<compile_context>
chip_gen: v6e
topology: v6e:2x2x1
jax: 0.10.0
libtpu: 0.0.40
codegen_flags: <defaults>
</compile_context>

<pallas_src>
import functools

import numpy as np
import jax
import jax.numpy as jnp
from jax.experimental import pallas as pl
from jax.experimental.pallas import tpu as pltpu

_VMEM_LIMIT = 48 * 1024 * 1024   # explicit scoped-VMEM cap; safe on v5e/v6e/v7x


def _round_up(a, b):
    return (a + b - 1) // b * b


def _pick_m_tile(M, cap=1024):
    """Largest row tile that is a multiple of 8, <= cap and divides M (no pad/slice)."""
    for tm in range(min(cap, M), 7, -1):
        if tm % 8 == 0 and M % tm == 0:
            return tm, M
    Mpad = _round_up(M, 8)
    if Mpad <= cap:
        return Mpad, Mpad
    tm = cap - cap % 8
    return tm, _round_up(Mpad, tm)


def _pick_row_tile(H, W, max_rows=1024):
    """Largest divisor TH < H with TH*W a multiple of 8 and <= max_rows.

    Preferring TH < H gives >= 2 row tiles per image so the spatial grid axis can feed
    both v7x TensorCores even at batch=1.  Falls back to TH = H if no divisor qualifies.
    """
    best = 0
    for th in range(1, H):
        if H % th == 0 and (th * W) % 8 == 0 and th * W <= max_rows:
            best = th
    return best if best > 0 else H


# ----------------------------------------------------------------------------
# Pallas kernels
# ----------------------------------------------------------------------------
def _silu(y):
    # y * sigmoid(y); the reciprocal goes to the EUP slot (nearly free).
    return y * pl.reciprocal(1.0 + jnp.exp(-y), approx=True)


def _mm_bias_silu_kernel(*refs, n_in):
    """Fused 1x1 conv: SiLU(sum_i x_i @ w_i + bias).  Multi-input -> folded concat."""
    xs = refs[:n_in]
    ws = refs[n_in:2 * n_in]
    b_ref = refs[2 * n_in]
    o_ref = refs[2 * n_in + 1]
    acc = jnp.dot(xs[0][...], ws[0][...], preferred_element_type=jnp.float32)
    for i in range(1, n_in):
        acc = acc + jnp.dot(xs[i][...], ws[i][...],
                            preferred_element_type=jnp.float32)
    o_ref[...] = _silu(acc + b_ref[...]).astype(o_ref.dtype)


def _conv3x3_rows_kernel(x_ref, w_ref, b_ref, o_ref, *, W, TH):
    """3x3 / stride-1 conv on one TH-row output tile.

    x_ref: (1, (H+2)*W, 3*Cin) bf16 -- kx taps packed along channels, zero-padded rows,
           whole image resident in VMEM (index_map constant over the row-tile axis).
    Per tile: 3 matmuls (one per ky) over contiguous row windows; compact output rows.
    """
    r0 = pl.program_id(1) * TH
    acc = None
    for ky in range(3):
        start = (r0 + ky) * W
        if W % 8 == 0:
            start = pl.multiple_of(start, 8)          # sublane-aligned free view
        slab = x_ref[0, pl.ds(start, TH * W), :]      # (TH*W, 3*Cin)
        t = jnp.dot(slab, w_ref[ky], preferred_element_type=jnp.float32)
        acc = t if acc is None else acc + t
    o_ref[0] = _silu(acc + b_ref[...]).astype(o_ref.dtype)


def _spp_cv5_rows_kernel(x_ref, w_ref, b_ref, o_ref, *, W, TH):
    """Fused SPPF (k=5,9,13 via cascaded 5x5 max) + channel concat + cv5 1x1, per row tile.

    x_ref: (1, H+12, W+12, C) bf16, padded with -1e30, whole image resident.
    Each pooled feature is compacted to the (TH, W) interior and matmul'd into the f32
    accumulator immediately (interleaved) -- pad values never reach the MXU.
    """
    C = x_ref.shape[-1]
    r0 = pl.program_id(1) * TH
    a = x_ref[0, pl.ds(r0, TH + 12), :, :]            # image rows [r0-6, r0+TH+6)

    def pool5(v, hh, ww):                             # separable 5-tap max
        cm = v[:, 0:ww, :]
        for dw in range(1, 5):
            cm = jnp.maximum(cm, v[:, dw:dw + ww, :])
        m = cm[0:hh, :, :]
        for dh in range(1, 5):
            m = jnp.maximum(m, cm[dh:dh + hh, :, :])
        return m

    def contract(f, i, acc):
        t = jnp.dot(f.reshape(TH * W, C), w_ref[i],
                    preferred_element_type=jnp.float32)
        return t if acc is None else acc + t

    acc = contract(a[6:6 + TH, 6:6 + W, :], 0, None)  # the un-pooled x1 itself
    m5 = pool5(a, TH + 8, W + 8)                      # pool k=5 (extended domain)
    acc = contract(m5[4:4 + TH, 4:4 + W, :], 1, acc)
    m9 = pool5(m5, TH + 4, W + 4)                     # = pool k=9
    acc = contract(m9[2:2 + TH, 2:2 + W, :], 2, acc)
    m13 = pool5(m9, TH, W)                            # = pool k=13
    acc = contract(m13, 3, acc)
    o_ref[0] = _silu(acc + b_ref[...]).astype(o_ref.dtype)


# ----------------------------------------------------------------------------
# Wrappers (tiling / BlockSpecs / glue)
# ----------------------------------------------------------------------------
def pointwise_conv_silu(xs, ws, bias, out_dtype=jnp.bfloat16):
    """Fused 1x1 Conv+BN+SiLU:  SiLU(sum_i xs[i] @ ws[i] + bias).

    Weights stay VMEM-resident (constant index_map, TN = Cout); activations stream in
    M-row tiles that divide M exactly (no pad / slice passes in the common case).
    """
    n = len(xs)
    M = xs[0].shape[0]
    Cout = ws[0].shape[1]
    TM, Mpad = _pick_m_tile(M)

    xs_p = []
    for x in xs:
        x = x.astype(jnp.bfloat16)
        if Mpad != M:
            x = jnp.pad(x, ((0, Mpad - M), (0, 0)))
        xs_p.append(x)
    ws_b = [w.astype(jnp.bfloat16) for w in ws]
    bias2 = bias.reshape(1, Cout).astype(jnp.float32)

    Ksum = sum(w.shape[0] for w in ws_b)
    cost = pl.CostEstimate(
        flops=int(2 * Mpad * Ksum * Cout),
        transcendentals=int(Mpad * Cout),
        bytes_accessed=int(2 * Mpad * Ksum + 2 * Ksum * Cout + 4 * Cout
                           + Mpad * Cout * jnp.dtype(out_dtype).itemsize))

    in_specs = ([pl.BlockSpec((TM, x.shape[1]), lambda i: (i, 0)) for x in xs_p]
                + [pl.BlockSpec(w.shape, lambda i: (0, 0)) for w in ws_b]   # resident
                + [pl.BlockSpec((1, Cout), lambda i: (0, 0))])

    out = pl.pallas_call(
        functools.partial(_mm_bias_silu_kernel, n_in=n),
        out_shape=jax.ShapeDtypeStruct((Mpad, Cout), out_dtype),
        grid=(Mpad // TM,),
        in_specs=in_specs,
        out_specs=pl.BlockSpec((TM, Cout), lambda i: (i, 0)),
        compiler_params=pltpu.CompilerParams(
            dimension_semantics=("parallel",),
            vmem_limit_bytes=_VMEM_LIMIT),
        cost_estimate=cost,
    )(*xs_p, *ws_b, bias2)
    return out[:M] if Mpad != M else out


def conv3x3_silu(x, wk, bias, out_dtype=jnp.bfloat16):
    """3x3 stride-1 Conv+BN+SiLU.  Returns compact (N, H*W, Cout) NHWC rows.

    x: (N,H,W,Cin);  wk: (3, 3*Cin, Cout) with kx packed along K;  bias: (Cout,).
    """
    N, H, W, Cin = x.shape
    KK = wk.shape[1]
    Cout = wk.shape[-1]
    # TODO(synk): for Cin >= 256 skip the kx packing (MXU K-depth already full) and use a
    # 9-tap variant to avoid the 3x input-byte expansion of the packed image.
    xp = jnp.pad(x.astype(jnp.bfloat16), ((0, 0), (1, 1), (1, 1), (0, 0)))
    xq = jnp.concatenate([xp[:, :, kx:kx + W, :] for kx in range(3)], axis=-1)
    xq = xq.reshape(N, (H + 2) * W, KK)
    b2 = bias.reshape(1, Cout).astype(jnp.float32)

    TH = _pick_row_tile(H, W)
    cost = pl.CostEstimate(
        flops=int(2 * N * H * W * 3 * KK * Cout),
        transcendentals=int(N * H * W * Cout),
        bytes_accessed=int(xq.size * 2 + wk.size * 2
                           + N * H * W * Cout * jnp.dtype(out_dtype).itemsize))

    return pl.pallas_call(
        functools.partial(_conv3x3_rows_kernel, W=W, TH=TH),
        out_shape=jax.ShapeDtypeStruct((N, H * W, Cout), out_dtype),
        grid=(N, H // TH),
        in_specs=[
            pl.BlockSpec((1, (H + 2) * W, KK), lambda n, t: (n, 0, 0)),   # resident/image
            pl.BlockSpec((3, KK, Cout), lambda n, t: (0, 0, 0)),          # resident
            pl.BlockSpec((1, Cout), lambda n, t: (0, 0)),
        ],
        out_specs=pl.BlockSpec((1, TH * W, Cout), lambda n, t: (n, t, 0)),
        compiler_params=pltpu.CompilerParams(
            dimension_semantics=("parallel", "parallel"),
            vmem_limit_bytes=_VMEM_LIMIT),
        cost_estimate=cost,
    )(xq, wk.astype(jnp.bfloat16), b2)


def spp_cv5_silu(x1, w5, bias, out_dtype=jnp.bfloat16):
    """Fused SPP(5,9,13) + concat + cv5 (1x1 Conv+BN+SiLU).  Compact (N, H*W, Cout) out.

    x1: (N,H,W,C);  w5: (4,C,Cout) cv5 weight split over [x1, m5, m9, m13];  bias: (Cout,).
    """
    N, H, W, C = x1.shape
    Cout = w5.shape[-1]
    P = 6                                          # max pad = 13 // 2
    NEG = -1.0e30                                  # -inf stand-in for max-pool padding
    # TODO(synk): the -inf pad could be done in-kernel (memset + interior DMA) to save one
    # wrapper-side HBM pass of the activation.
    xp = jnp.pad(x1.astype(jnp.bfloat16), ((0, 0), (P, P), (P, P), (0, 0)),
                 constant_values=NEG)
    b2 = bias.reshape(1, Cout).astype(jnp.float32)

    TH = _pick_row_tile(H, W)
    cost = pl.CostEstimate(
        flops=int(2 * N * H * W * 4 * C * Cout),
        transcendentals=int(N * H * W * Cout),
        bytes_accessed=int(xp.size * 2 + w5.size * 2
                           + N * H * W * Cout * jnp.dtype(out_dtype).itemsize))

    return pl.pallas_call(
        functools.partial(_spp_cv5_rows_kernel, W=W, TH=TH),
        out_shape=jax.ShapeDtypeStruct((N, H * W, Cout), out_dtype),
        grid=(N, H // TH),
        in_specs=[
            pl.BlockSpec((1, H + 2 * P, W + 2 * P, C), lambda n, t: (n, 0, 0, 0)),
            pl.BlockSpec((4, C, Cout), lambda n, t: (0, 0, 0)),           # resident
            pl.BlockSpec((1, Cout), lambda n, t: (0, 0)),
        ],
        out_specs=pl.BlockSpec((1, TH * W, Cout), lambda n, t: (n, t, 0)),
        compiler_params=pltpu.CompilerParams(
            dimension_semantics=("parallel", "parallel"),
            vmem_limit_bytes=_VMEM_LIMIT),
        cost_estimate=cost,
    )(xp, w5.astype(jnp.bfloat16), b2)


# ----------------------------------------------------------------------------
# Deterministic parameters (Conv2d no-bias + BatchNorm2d(eval, eps=1e-3) folded)
# ----------------------------------------------------------------------------
def make_conv_params(key, c1, c2, k=1):
    kw, kg, kb, km, kv = jax.random.split(key, 5)
    w = jax.random.normal(kw, (k, k, c1, c2), jnp.float32) / np.sqrt(k * k * c1)
    gamma = 1.0 + 0.1 * jax.random.normal(kg, (c2,), jnp.float32)
    beta = 0.1 * jax.random.normal(kb, (c2,), jnp.float32)
    mean = 0.1 * jax.random.normal(km, (c2,), jnp.float32)
    var = jnp.abs(jax.random.normal(kv, (c2,), jnp.float32)) + 1.0
    scale = gamma / jnp.sqrt(var + 1e-3)           # BatchNorm2d eps=0.001, eval mode
    return dict(w=w * scale, b=beta - mean * scale, k=k)   # BN scale folded into w


def make_sppcspc_params(key, c1, c2, e=0.5):
    c_ = int(2 * c2 * e)
    ks = jax.random.split(key, 7)
    raw = dict(
        cv1=make_conv_params(ks[0], c1, c_, 1),
        cv2=make_conv_params(ks[1], c1, c_, 1),
        cv3=make_conv_params(ks[2], c_, c_, 3),
        cv4=make_conv_params(ks[3], c_, c_, 1),
        cv5=make_conv_params(ks[4], 4 * c_, c_, 1),
        cv6=make_conv_params(ks[5], c_, c_, 3),
        cv7=make_conv_params(ks[6], 2 * c_, c2, 1),
    )
    bf = jnp.bfloat16
    w7 = raw["cv7"]["w"].reshape(2 * c_, c2)
    fused = dict(
        # cv1 + cv2 share their input -> one lane-denser matmul (Cout = 2*c_)
        w12=jnp.concatenate([raw["cv1"]["w"].reshape(c1, c_),
                             raw["cv2"]["w"].reshape(c1, c_)], axis=1).astype(bf),
        b12=jnp.concatenate([raw["cv1"]["b"], raw["cv2"]["b"]]),
        # 3x3 weights with kx packed along K: [ky, kx*Cin + cin, cout]
        w3=raw["cv3"]["w"].reshape(3, 3 * c_, c_).astype(bf), b3=raw["cv3"]["b"],
        w4=raw["cv4"]["w"].reshape(c_, c_).astype(bf),        b4=raw["cv4"]["b"],
        # cv5 weight split over the 4 concat groups [x1, m5, m9, m13]
        w5=raw["cv5"]["w"].reshape(4, c_, c_).astype(bf),     b5=raw["cv5"]["b"],
        w6=raw["cv6"]["w"].reshape(3, 3 * c_, c_).astype(bf), b6=raw["cv6"]["b"],
        # concat(y1, y2) + cv7 folded into a dual-K matmul
        w7a=w7[:c_].astype(bf), w7b=w7[c_:].astype(bf),       b7=raw["cv7"]["b"],
    )
    return raw, fused


# ----------------------------------------------------------------------------
# SppCspC forward
# ----------------------------------------------------------------------------
def sppcspc_forward_nhwc(p, x):
    N, H, W, c1 = x.shape
    M = N * H * W
    c_ = p["w4"].shape[-1]
    c2 = p["w7a"].shape[-1]

    x_flat = x.reshape(M, c1)
    o12 = pointwise_conv_silu([x_flat], [p["w12"]], p["b12"])          # cv1|cv2 fused
    x_cv1 = o12[:, :c_]
    y2 = o12[:, c_:]                                                   # (M, c_)

    x3 = conv3x3_silu(x_cv1.reshape(N, H, W, c_), p["w3"], p["b3"])    # cv3 -> (N,H*W,c_)
    x1 = pointwise_conv_silu([x3.reshape(M, c_)], [p["w4"]], p["b4"])  # cv4 -> (M, c_)

    y5 = spp_cv5_silu(x1.reshape(N, H, W, c_), p["w5"], p["b5"])       # SPP+concat+cv5
    y1 = conv3x3_silu(y5.reshape(N, H, W, c_), p["w6"], p["b6"])       # cv6 -> (N,H*W,c_)

    out = pointwise_conv_silu([y1.reshape(M, c_), y2],                 # concat+cv7
                              [p["w7a"], p["w7b"]], p["b7"],
                              out_dtype=jnp.float32)
    return out.reshape(N, H, W, c2)


@jax.jit
def sppcspc_forward_nchw(p, x_nchw):
    # TODO(synk): in a full NHWC network these transposes disappear; kept here only to
    # match the PyTorch NCHW interface.
    x = jnp.transpose(x_nchw, (0, 2, 3, 1))
    y = sppcspc_forward_nhwc(p, x)
    return jnp.transpose(y, (0, 3, 1, 2))


# ----------------------------------------------------------------------------
# Pure-JAX f32 reference (for a sanity check only)
# ----------------------------------------------------------------------------
def sppcspc_reference(raw, x):
    def conv(x, q):
        k = q["k"]
        y = jax.lax.conv_general_dilated(
            x, q["w"], (1, 1), [(k // 2, k // 2)] * 2,
            dimension_numbers=("NHWC", "HWIO", "NHWC"))
        y = y + q["b"]
        return y * jax.nn.sigmoid(y)

    def pool(x, k):
        return jax.lax.reduce_window(
            x, -jnp.inf, jax.lax.max, (1, k, k, 1), (1, 1, 1, 1),
            ((0, 0), (k // 2, k // 2), (k // 2, k // 2), (0, 0)))

    x1 = conv(conv(conv(x, raw["cv1"]), raw["cv3"]), raw["cv4"])
    cat = jnp.concatenate([x1] + [pool(x1, k) for k in (5, 9, 13)], axis=-1)
    y1 = conv(conv(cat, raw["cv5"]), raw["cv6"])
    y2 = conv(x, raw["cv2"])
    return conv(jnp.concatenate([y1, y2], axis=-1), raw["cv7"])


# ----------------------------------------------------------------------------
# Main
# ----------------------------------------------------------------------------
if __name__ == "__main__":
    key = jax.random.PRNGKey(0)
    kp, kx = jax.random.split(key)

    # Small config: SppCspC(c1=16, c2=32, e=0.5) -> c_ = 32; input (2, 16, 16, 16) NCHW.
    N, c1, H, W = 2, 16, 16, 16
    c2 = 32
    raw, fused = make_sppcspc_params(kp, c1, c2, e=0.5)
    x_nchw = jax.random.normal(kx, (N, c1, H, W), jnp.float32)

    out = sppcspc_forward_nchw(fused, x_nchw)
    out = jax.block_until_ready(out)

    assert out.shape == (N, c2, H, W)
    assert bool(jnp.all(jnp.isfinite(out)))

    # Sanity check against a pure-JAX f32 reference (bf16 MXU operands -> loose tol).
    ref = sppcspc_reference(raw, jnp.transpose(x_nchw, (0, 2, 3, 1)))
    ref = jnp.transpose(ref, (0, 3, 1, 2))
    rel = float(jnp.linalg.norm(out - ref) / (jnp.linalg.norm(ref) + 1e-6))
    assert rel < 0.05, f"relative error too high: {rel}"

    print("KERNEL_OK")
</pallas_src>

<mosaic_0001>
module attributes {stable_mosaic.version = 11 : i64} {
  func.func @_mm_bias_silu_kernel(%arg0: i32, %arg1: memref<512x16xbf16, #tpu.memory_space<vmem>>, %arg2: memref<16x64xbf16, #tpu.memory_space<vmem>>, %arg3: memref<1x64xf32, #tpu.memory_space<vmem>>, %arg4: memref<512x64xbf16, #tpu.memory_space<vmem>>) attributes {dimension_semantics = [#tpu.dimension_semantics<parallel>], iteration_bounds = array<i64: 1>, scalar_prefetch = 0 : i64, scratch_operands = 0 : i64, tpu.core_type = #tpu.core_type<tc>, window_params = [{transform_indices = @transform_0, window_bounds = array<i64: 512, 16>}, {pipeline_mode = #tpu.pipeline_mode<synchronous>, transform_indices = @transform_1, window_bounds = array<i64: 16, 64>}, {pipeline_mode = #tpu.pipeline_mode<synchronous>, transform_indices = @transform_2, window_bounds = array<i64: 1, 64>}, {transform_indices = @transform_3, window_bounds = array<i64: 512, 64>}]} {
    %c0 = arith.constant 0 : index
    %c0_0 = arith.constant 0 : index
    %0 = vector.load %arg1[%c0, %c0_0] : memref<512x16xbf16, #tpu.memory_space<vmem>>, vector<512x16xbf16>
    %c0_1 = arith.constant 0 : index
    %c0_2 = arith.constant 0 : index
    %1 = vector.load %arg2[%c0_1, %c0_2] : memref<16x64xbf16, #tpu.memory_space<vmem>>, vector<16x64xbf16>
    %cst = arith.constant dense<0.000000e+00> : vector<512x64xf32>
    %2 = tpu.matmul %0, %1, %cst {dimension_numbers = #tpu.dot_dimension_numbers<[1], [0], [0], [1], [0, 0, 1, 1], [], []>} : vector<512x16xbf16>, vector<16x64xbf16>, vector<512x64xf32> -> vector<512x64xf32>
    %c0_3 = arith.constant 0 : index
    %c0_4 = arith.constant 0 : index
    %3 = vector.load %arg3[%c0_3, %c0_4] : memref<1x64xf32, #tpu.memory_space<vmem>>, vector<1x64xf32>
    %4 = vector.broadcast %3 : vector<1x64xf32> to vector<512x64xf32>
    %5 = arith.addf %2, %4 : vector<512x64xf32>
    %cst_5 = arith.constant 0.000000e+00 : f32
    %6 = vector.broadcast %cst_5 : f32 to vector<512x64xf32>
    %7 = arith.subf %6, %5 : vector<512x64xf32>
    %8 = math.exp %7 : vector<512x64xf32>
    %cst_6 = arith.constant 1.000000e+00 : f32
    %9 = vector.broadcast %cst_6 : f32 to vector<512x64xf32>
    %10 = arith.addf %9, %8 : vector<512x64xf32>
    %11 = tpu.reciprocal %10 {approx = true} : vector<512x64xf32> -> vector<512x64xf32>
    %12 = arith.mulf %5, %11 : vector<512x64xf32>
    %13 = arith.truncf %12 : vector<512x64xf32> to vector<512x64xbf16>
    %c0_7 = arith.constant 0 : index
    %c0_8 = arith.constant 0 : index
    %14 = vector.load %arg4[%c0_7, %c0_8] : memref<512x64xbf16, #tpu.memory_space<vmem>>, vector<512x64xbf16>
    tpu.vector_store %arg4[%c0_7, %c0_8], %13 {strides = array<i32>} : memref<512x64xbf16, #tpu.memory_space<vmem>>, vector<512x64xbf16>,
    return
  }
  func.func @transform_0(%arg0: i32) -> (i32, i32) {
    %c0_i32 = arith.constant 0 : i32
    %c0_i32_0 = arith.constant 0 : i32
    return %arg0, %c0_i32 : i32, i32
  }
  func.func @transform_1(%arg0: i32) -> (i32, i32) {
    %c0_i32 = arith.constant 0 : i32
    %c0_i32_0 = arith.constant 0 : i32
    %c0_i32_1 = arith.constant 0 : i32
    return %c0_i32, %c0_i32_0 : i32, i32
  }
  func.func @transform_2(%arg0: i32) -> (i32, i32) {
    %c0_i32 = arith.constant 0 : i32
    %c0_i32_0 = arith.constant 0 : i32
    %c0_i32_1 = arith.constant 0 : i32
    return %c0_i32, %c0_i32_0 : i32, i32
  }
  func.func @transform_3(%arg0: i32) -> (i32, i32) {
    %c0_i32 = arith.constant 0 : i32
    %c0_i32_0 = arith.constant 0 : i32
    return %arg0, %c0_i32 : i32, i32
  }
}

module attributes {stable_mosaic.version = 11 : i64} {
  func.func @_conv3x3_rows_kernel(%arg0: i32, %arg1: i32, %arg2: memref<1x288x96xbf16, #tpu.memory_space<vmem>>, %arg3: memref<3x96x32xbf16, #tpu.memory_space<vmem>>, %arg4: memref<1x32xf32, #tpu.memory_space<vmem>>, %arg5: memref<1x128x32xbf16, #tpu.memory_space<vmem>>) attributes {dimension_semantics = [#tpu.dimension_semantics<parallel>, #tpu.dimension_semantics<parallel>], iteration_bounds = array<i64: 2, 2>, scalar_prefetch = 0 : i64, scratch_operands = 0 : i64, tpu.core_type = #tpu.core_type<tc>, window_params = [{transform_indices = @transform_0, window_bounds = array<i64: 1, 288, 96>}, {pipeline_mode = #tpu.pipeline_mode<synchronous>, transform_indices = @transform_1, window_bounds = array<i64: 3, 96, 32>}, {pipeline_mode = #tpu.pipeline_mode<synchronous>, transform_indices = @transform_2, window_bounds = array<i64: 1, 32>}, {transform_indices = @transform_3, window_bounds = array<i64: 1, 128, 32>}]} {
    %c8_i32 = arith.constant 8 : i32
    %0 = arith.muli %arg1, %c8_i32 : i32
    %c0_i32 = arith.constant 0 : i32
    %1 = arith.addi %0, %c0_i32 : i32
    %c16_i32 = arith.constant 16 : i32
    %2 = arith.muli %1, %c16_i32 : i32
    %3 = tpu.assume_multiple %2, 8 : i32
    %c0 = arith.constant 0 : index
    %4 = arith.index_cast %3 : i32 to index
    %c0_0 = arith.constant 0 : index
    %5 = vector.load %arg2[%c0, %4, %c0_0] : memref<1x288x96xbf16, #tpu.memory_space<vmem>>, vector<1x128x96xbf16>
    %6 = vector.shape_cast %5 : vector<1x128x96xbf16> to vector<128x96xbf16>
    %c0_1 = arith.constant 0 : index
    %c0_2 = arith.constant 0 : index
    %c0_3 = arith.constant 0 : index
    %7 = vector.load %arg3[%c0_1, %c0_2, %c0_3] : memref<3x96x32xbf16, #tpu.memory_space<vmem>>, vector<1x96x32xbf16>
    %8 = vector.shape_cast %7 : vector<1x96x32xbf16> to vector<96x32xbf16>
    %cst = arith.constant dense<0.000000e+00> : vector<128x32xf32>
    %9 = tpu.matmul %6, %8, %cst {dimension_numbers = #tpu.dot_dimension_numbers<[1], [0], [0], [1], [0, 0, 1, 1], [], []>} : vector<128x96xbf16>, vector<96x32xbf16>, vector<128x32xf32> -> vector<128x32xf32>
    %c1_i32 = arith.constant 1 : i32
    %10 = arith.addi %0, %c1_i32 : i32
    %c16_i32_4 = arith.constant 16 : i32
    %11 = arith.muli %10, %c16_i32_4 : i32
    %12 = tpu.assume_multiple %11, 8 : i32
    %c0_5 = arith.constant 0 : index
    %13 = arith.index_cast %12 : i32 to index
    %c0_6 = arith.constant 0 : index
    %14 = vector.load %arg2[%c0_5, %13, %c0_6] : memref<1x288x96xbf16, #tpu.memory_space<vmem>>, vector<1x128x96xbf16>
    %15 = vector.shape_cast %14 : vector<1x128x96xbf16> to vector<128x96xbf16>
    %c1 = arith.constant 1 : index
    %c0_7 = arith.constant 0 : index
    %c0_8 = arith.constant 0 : index
    %16 = vector.load %arg3[%c1, %c0_7, %c0_8] : memref<3x96x32xbf16, #tpu.memory_space<vmem>>, vector<1x96x32xbf16>
    %17 = vector.shape_cast %16 : vector<1x96x32xbf16> to vector<96x32xbf16>
    %cst_9 = arith.constant dense<0.000000e+00> : vector<128x32xf32>
    %18 = tpu.matmul %15, %17, %cst_9 {dimension_numbers = #tpu.dot_dimension_numbers<[1], [0], [0], [1], [0, 0, 1, 1], [], []>} : vector<128x96xbf16>, vector<96x32xbf16>, vector<128x32xf32> -> vector<128x32xf32>
    %19 = arith.addf %9, %18 : vector<128x32xf32>
    %c2_i32 = arith.constant 2 : i32
    %20 = arith.addi %0, %c2_i32 : i32
    %c16_i32_10 = arith.constant 16 : i32
    %21 = arith.muli %20, %c16_i32_10 : i32
    %22 = tpu.assume_multiple %21, 8 : i32
    %c0_11 = arith.constant 0 : index
    %23 = arith.index_cast %22 : i32 to index
    %c0_12 = arith.constant 0 : index
    %24 = vector.load %arg2[%c0_11, %23, %c0_12] : memref<1x288x96xbf16, #tpu.memory_space<vmem>>, vector<1x128x96xbf16>
    %25 = vector.shape_cast %24 : vector<1x128x96xbf16> to vector<128x96xbf16>
    %c2 = arith.constant 2 : index
    %c0_13 = arith.constant 0 : index
    %c0_14 = arith.constant 0 : index
    %26 = vector.load %arg3[%c2, %c0_13, %c0_14] : memref<3x96x32xbf16, #tpu.memory_space<vmem>>, vector<1x96x32xbf16>
    %27 = vector.shape_cast %26 : vector<1x96x32xbf16> to vector<96x32xbf16>
    %cst_15 = arith.constant dense<0.000000e+00> : vector<128x32xf32>
    %28 = tpu.matmul %25, %27, %cst_15 {dimension_numbers = #tpu.dot_dimension_numbers<[1], [0], [0], [1], [0, 0, 1, 1], [], []>} : vector<128x96xbf16>, vector<96x32xbf16>, vector<128x32xf32> -> vector<128x32xf32>
    %29 = arith.addf %19, %28 : vector<128x32xf32>
    %c0_16 = arith.constant 0 : index
    %c0_17 = arith.constant 0 : index
    %30 = vector.load %arg4[%c0_16, %c0_17] : memref<1x32xf32, #tpu.memory_space<vmem>>, vector<1x32xf32>
    %31 = vector.broadcast %30 : vector<1x32xf32> to vector<128x32xf32>
    %32 = arith.addf %29, %31 : vector<128x32xf32>
    %cst_18 = arith.constant 0.000000e+00 : f32
    %33 = vector.broadcast %cst_18 : f32 to vector<128x32xf32>
    %34 = arith.subf %33, %32 : vector<128x32xf32>
    %35 = math.exp %34 : vector<128x32xf32>
    %cst_19 = arith.constant 1.000000e+00 : f32
    %36 = vector.broadcast %cst_19 : f32 to vector<128x32xf32>
    %37 = arith.addf %36, %35 : vector<128x32xf32>
    %38 = tpu.reciprocal %37 {approx = true} : vector<128x32xf32> -> vector<128x32xf32>
    %39 = arith.mulf %32, %38 : vector<128x32xf32>
    %40 = arith.truncf %39 : vector<128x32xf32> to vector<128x32xbf16>
    %c0_20 = arith.constant 0 : index
    %c0_21 = arith.constant 0 : index
    %c0_22 = arith.constant 0 : index
    %41 = vector.load %arg5[%c0_20, %c0_21, %c0_22] : memref<1x128x32xbf16, #tpu.memory_space<vmem>>, vector<1x128x32xbf16>
    %42 = vector.shape_cast %41 : vector<1x128x32xbf16> to vector<128x32xbf16>
    %43 = vector.shape_cast %40 : vector<128x32xbf16> to vector<1x128x32xbf16>
    tpu.vector_store %arg5[%c0_20, %c0_21, %c0_22], %43 {strides = array<i32>} : memref<1x128x32xbf16, #tpu.memory_space<vmem>>, vector<1x128x32xbf16>,
    return
  }
  func.func @transform_0(%arg0: i32, %arg1: i32) -> (i32, i32, i32) {
    %c0_i32 = arith.constant 0 : i32
    %c0_i32_0 = arith.constant 0 : i32
    %c0_i32_1 = arith.constant 0 : i32
    return %arg0, %c0_i32, %c0_i32_0 : i32, i32, i32
  }
  func.func @transform_1(%arg0: i32, %arg1: i32) -> (i32, i32, i32) {
    %c0_i32 = arith.constant 0 : i32
    %c0_i32_0 = arith.constant 0 : i32
    %c0_i32_1 = arith.constant 0 : i32
    %c0_i32_2 = arith.constant 0 : i32
    return %c0_i32, %c0_i32_0, %c0_i32_1 : i32, i32, i32
  }
  func.func @transform_2(%arg0: i32, %arg1: i32) -> (i32, i32) {
    %c0_i32 = arith.constant 0 : i32
    %c0_i32_0 = arith.constant 0 : i32
    %c0_i32_1 = arith.constant 0 : i32
    return %c0_i32, %c0_i32_0 : i32, i32
  }
  func.func @transform_3(%arg0: i32, %arg1: i32) -> (i32, i32, i32) {
    %c0_i32 = arith.constant 0 : i32
    %c0_i32_0 = arith.constant 0 : i32
    return %arg0, %arg1, %c0_i32 : i32, i32, i32
  }
}

module attributes {stable_mosaic.version = 11 : i64} {
  func.func @_mm_bias_silu_kernel(%arg0: i32, %arg1: memref<512x32xbf16, #tpu.memory_space<vmem>>, %arg2: memref<32x32xbf16, #tpu.memory_space<vmem>>, %arg3: memref<1x32xf32, #tpu.memory_space<vmem>>, %arg4: memref<512x32xbf16, #tpu.memory_space<vmem>>) attributes {dimension_semantics = [#tpu.dimension_semantics<parallel>], iteration_bounds = array<i64: 1>, scalar_prefetch = 0 : i64, scratch_operands = 0 : i64, tpu.core_type = #tpu.core_type<tc>, window_params = [{transform_indices = @transform_0, window_bounds = array<i64: 512, 32>}, {pipeline_mode = #tpu.pipeline_mode<synchronous>, transform_indices = @transform_1, window_bounds = array<i64: 32, 32>}, {pipeline_mode = #tpu.pipeline_mode<synchronous>, transform_indices = @transform_2, window_bounds = array<i64: 1, 32>}, {transform_indices = @transform_3, window_bounds = array<i64: 512, 32>}]} {
    %c0 = arith.constant 0 : index
    %c0_0 = arith.constant 0 : index
    %0 = vector.load %arg1[%c0, %c0_0] : memref<512x32xbf16, #tpu.memory_space<vmem>>, vector<512x32xbf16>
    %c0_1 = arith.constant 0 : index
    %c0_2 = arith.constant 0 : index
    %1 = vector.load %arg2[%c0_1, %c0_2] : memref<32x32xbf16, #tpu.memory_space<vmem>>, vector<32x32xbf16>
    %cst = arith.constant dense<0.000000e+00> : vector<512x32xf32>
    %2 = tpu.matmul %0, %1, %cst {dimension_numbers = #tpu.dot_dimension_numbers<[1], [0], [0], [1], [0, 0, 1, 1], [], []>} : vector<512x32xbf16>, vector<32x32xbf16>, vector<512x32xf32> -> vector<512x32xf32>
    %c0_3 = arith.constant 0 : index
    %c0_4 = arith.constant 0 : index
    %3 = vector.load %arg3[%c0_3, %c0_4] : memref<1x32xf32, #tpu.memory_space<vmem>>, vector<1x32xf32>
    %4 = vector.broadcast %3 : vector<1x32xf32> to vector<512x32xf32>
    %5 = arith.addf %2, %4 : vector<512x32xf32>
    %cst_5 = arith.constant 0.000000e+00 : f32
    %6 = vector.broadcast %cst_5 : f32 to vector<512x32xf32>
    %7 = arith.subf %6, %5 : vector<512x32xf32>
    %8 = math.exp %7 : vector<512x32xf32>
    %cst_6 = arith.constant 1.000000e+00 : f32
    %9 = vector.broadcast %cst_6 : f32 to vector<512x32xf32>
    %10 = arith.addf %9, %8 : vector<512x32xf32>
    %11 = tpu.reciprocal %10 {approx = true} : vector<512x32xf32> -> vector<512x32xf32>
    %12 = arith.mulf %5, %11 : vector<512x32xf32>
    %13 = arith.truncf %12 : vector<512x32xf32> to vector<512x32xbf16>
    %c0_7 = arith.constant 0 : index
    %c0_8 = arith.constant 0 : index
    %14 = vector.load %arg4[%c0_7, %c0_8] : memref<512x32xbf16, #tpu.memory_space<vmem>>, vector<512x32xbf16>
    tpu.vector_store %arg4[%c0_7, %c0_8], %13 {strides = array<i32>} : memref<512x32xbf16, #tpu.memory_space<vmem>>, vector<512x32xbf16>,
    return
  }
  func.func @transform_0(%arg0: i32) -> (i32, i32) {
    %c0_i32 = arith.constant 0 : i32
    %c0_i32_0 = arith.constant 0 : i32
    return %arg0, %c0_i32 : i32, i32
  }
  func.func @transform_1(%arg0: i32) -> (i32, i32) {
    %c0_i32 = arith.constant 0 : i32
    %c0_i32_0 = arith.constant 0 : i32
    %c0_i32_1 = arith.constant 0 : i32
    return %c0_i32, %c0_i32_0 : i32, i32
  }
  func.func @transform_2(%arg0: i32) -> (i32, i32) {
    %c0_i32 = arith.constant 0 : i32
    %c0_i32_0 = arith.constant 0 : i32
    %c0_i32_1 = arith.constant 0 : i32
    return %c0_i32, %c0_i32_0 : i32, i32
  }
  func.func @transform_3(%arg0: i32) -> (i32, i32) {
    %c0_i32 = arith.constant 0 : i32
    %c0_i32_0 = arith.constant 0 : i32
    return %arg0, %c0_i32 : i32, i32
  }
}

module attributes {stable_mosaic.version = 11 : i64} {
  func.func @_spp_cv5_rows_kernel(%arg0: i32, %arg1: i32, %arg2: memref<1x28x28x32xbf16, #tpu.memory_space<vmem>>, %arg3: memref<4x32x32xbf16, #tpu.memory_space<vmem>>, %arg4: memref<1x32xf32, #tpu.memory_space<vmem>>, %arg5: memref<1x128x32xbf16, #tpu.memory_space<vmem>>) attributes {dimension_semantics = [#tpu.dimension_semantics<parallel>, #tpu.dimension_semantics<parallel>], iteration_bounds = array<i64: 2, 2>, scalar_prefetch = 0 : i64, scratch_operands = 0 : i64, tpu.core_type = #tpu.core_type<tc>, window_params = [{transform_indices = @transform_0, window_bounds = array<i64: 1, 28, 28, 32>}, {pipeline_mode = #tpu.pipeline_mode<synchronous>, transform_indices = @transform_1, window_bounds = array<i64: 4, 32, 32>}, {pipeline_mode = #tpu.pipeline_mode<synchronous>, transform_indices = @transform_2, window_bounds = array<i64: 1, 32>}, {transform_indices = @transform_3, window_bounds = array<i64: 1, 128, 32>}]} {
    %c8_i32 = arith.constant 8 : i32
    %0 = arith.muli %arg1, %c8_i32 : i32
    %c0 = arith.constant 0 : index
    %1 = arith.index_cast %0 : i32 to index
    %c0_0 = arith.constant 0 : index
    %c0_1 = arith.constant 0 : index
    %2 = vector.load %arg2[%c0, %1, %c0_0, %c0_1] : memref<1x28x28x32xbf16, #tpu.memory_space<vmem>>, vector<1x20x28x32xbf16>
    %3 = vector.shape_cast %2 : vector<1x20x28x32xbf16> to vector<20x28x32xbf16>
    %4 = vector.extract_strided_slice %3 {offsets = [6, 6, 0], sizes = [8, 16, 32], strides = [1, 1, 1]} : vector<20x28x32xbf16> to vector<8x16x32xbf16>
    %5 = vector.shape_cast %4 : vector<8x16x32xbf16> to vector<128x32xbf16>
    %c0_2 = arith.constant 0 : index
    %c0_3 = arith.constant 0 : index
    %c0_4 = arith.constant 0 : index
    %6 = vector.load %arg3[%c0_2, %c0_3, %c0_4] : memref<4x32x32xbf16, #tpu.memory_space<vmem>>, vector<1x32x32xbf16>
    %7 = vector.shape_cast %6 : vector<1x32x32xbf16> to vector<32x32xbf16>
    %cst = arith.constant dense<0.000000e+00> : vector<128x32xf32>
    %8 = tpu.matmul %5, %7, %cst {dimension_numbers = #tpu.dot_dimension_numbers<[1], [0], [0], [1], [0, 0, 1, 1], [], []>} : vector<128x32xbf16>, vector<32x32xbf16>, vector<128x32xf32> -> vector<128x32xf32>
    %9 = vector.extract_strided_slice %3 {offsets = [0, 0, 0], sizes = [20, 24, 32], strides = [1, 1, 1]} : vector<20x28x32xbf16> to vector<20x24x32xbf16>
    %10 = vector.extract_strided_slice %3 {offsets = [0, 1, 0], sizes = [20, 24, 32], strides = [1, 1, 1]} : vector<20x28x32xbf16> to vector<20x24x32xbf16>
    %11 = arith.maximumf %9, %10 : vector<20x24x32xbf16>
    %12 = vector.extract_strided_slice %3 {offsets = [0, 2, 0], sizes = [20, 24, 32], strides = [1, 1, 1]} : vector<20x28x32xbf16> to vector<20x24x32xbf16>
    %13 = arith.maximumf %11, %12 : vector<20x24x32xbf16>
    %14 = vector.extract_strided_slice %3 {offsets = [0, 3, 0], sizes = [20, 24, 32], strides = [1, 1, 1]} : vector<20x28x32xbf16> to vector<20x24x32xbf16>
    %15 = arith.maximumf %13, %14 : vector<20x24x32xbf16>
    %16 = vector.extract_strided_slice %3 {offsets = [0, 4, 0], sizes = [20, 24, 32], strides = [1, 1, 1]} : vector<20x28x32xbf16> to vector<20x24x32xbf16>
    %17 = arith.maximumf %15, %16 : vector<20x24x32xbf16>
    %18 = vector.extract_strided_slice %17 {offsets = [0, 0, 0], sizes = [16, 24, 32], strides = [1, 1, 1]} : vector<20x24x32xbf16> to vector<16x24x32xbf16>
    %19 = vector.extract_strided_slice %17 {offsets = [1, 0, 0], sizes = [16, 24, 32], strides = [1, 1, 1]} : vector<20x24x32xbf16> to vector<16x24x32xbf16>
    %20 = arith.maximumf %18, %19 : vector<16x24x32xbf16>
    %21 = vector.extract_strided_slice %17 {offsets = [2, 0, 0], sizes = [16, 24, 32], strides = [1, 1, 1]} : vector<20x24x32xbf16> to vector<16x24x32xbf16>
    %22 = arith.maximumf %20, %21 : vector<16x24x32xbf16>
    %23 = vector.extract_strided_slice %17 {offsets = [3, 0, 0], sizes = [16, 24, 32], strides = [1, 1, 1]} : vector<20x24x32xbf16> to vector<16x24x32xbf16>
    %24 = arith.maximumf %22, %23 : vector<16x24x32xbf16>
    %25 = vector.extract_strided_slice %17 {offsets = [4, 0, 0], sizes = [16, 24, 32], strides = [1, 1, 1]} : vector<20x24x32xbf16> to vector<16x24x32xbf16>
    %26 = arith.maximumf %24, %25 : vector<16x24x32xbf16>
    %27 = vector.extract_strided_slice %26 {offsets = [4, 4, 0], sizes = [8, 16, 32], strides = [1, 1, 1]} : vector<16x24x32xbf16> to vector<8x16x32xbf16>
    %28 = vector.shape_cast %27 : vector<8x16x32xbf16> to vector<128x32xbf16>
    %c1 = arith.constant 1 : index
    %c0_5 = arith.constant 0 : index
    %c0_6 = arith.constant 0 : index
    %29 = vector.load %arg3[%c1, %c0_5, %c0_6] : memref<4x32x32xbf16, #tpu.memory_space<vmem>>, vector<1x32x32xbf16>
    %30 = vector.shape_cast %29 : vector<1x32x32xbf16> to vector<32x32xbf16>
    %cst_7 = arith.constant dense<0.000000e+00> : vector<128x32xf32>
    %31 = tpu.matmul %28, %30, %cst_7 {dimension_numbers = #tpu.dot_dimension_numbers<[1], [0], [0], [1], [0, 0, 1, 1], [], []>} : vector<128x32xbf16>, vector<32x32xbf16>, vector<128x32xf32> -> vector<128x32xf32>
    %32 = arith.addf %8, %31 : vector<128x32xf32>
    %33 = vector.extract_strided_slice %26 {offsets = [0, 0, 0], sizes = [16, 20, 32], strides = [1, 1, 1]} : vector<16x24x32xbf16> to vector<16x20x32xbf16>
    %34 = vector.extract_strided_slice %26 {offsets = [0, 1, 0], sizes = [16, 20, 32], strides = [1, 1, 1]} : vector<16x24x32xbf16> to vector<16x20x32xbf16>
    %35 = arith.maximumf %33, %34 : vector<16x20x32xbf16>
    %36 = vector.extract_strided_slice %26 {offsets = [0, 2, 0], sizes = [16, 20, 32], strides = [1, 1, 1]} : vector<16x24x32xbf16> to vector<16x20x32xbf16>
    %37 = arith.maximumf %35, %36 : vector<16x20x32xbf16>
    %38 = vector.extract_strided_slice %26 {offsets = [0, 3, 0], sizes = [16, 20, 32], strides = [1, 1, 1]} : vector<16x24x32xbf16> to vector<16x20x32xbf16>
    %39 = arith.maximumf %37, %38 : vector<16x20x32xbf16>
    %40 = vector.extract_strided_slice %26 {offsets = [0, 4, 0], sizes = [16, 20, 32], strides = [1, 1, 1]} : vector<16x24x32xbf16> to vector<16x20x32xbf16>
    %41 = arith.maximumf %39, %40 : vector<16x20x32xbf16>
    %42 = vector.extract_strided_slice %41 {offsets = [0, 0, 0], sizes = [12, 20, 32], strides = [1, 1, 1]} : vector<16x20x32xbf16> to vector<12x20x32xbf16>
    %43 = vector.extract_strided_slice %41 {offsets = [1, 0, 0], sizes = [12, 20, 32], strides = [1, 1, 1]} : vector<16x20x32xbf16> to vector<12x20x32xbf16>
    %44 = arith.maximumf %42, %43 : vector<12x20x32xbf16>
    %45 = vector.extract_strided_slice %41 {offsets = [2, 0, 0], sizes = [12, 20, 32], strides = [1, 1, 1]} : vector<16x20x32xbf16> to vector<12x20x32xbf16>
    %46 = arith.maximumf %44, %45 : vector<12x20x32xbf16>
    %47 = vector.extract_strided_slice %41 {offsets = [3, 0, 0], sizes = [12, 20, 32], strides = [1, 1, 1]} : vector<16x20x32xbf16> to vector<12x20x32xbf16>
    %48 = arith.maximumf %46, %47 : vector<12x20x32xbf16>
    %49 = vector.extract_strided_slice %41 {offsets = [4, 0, 0], sizes = [12, 20, 32], strides = [1, 1, 1]} : vector<16x20x32xbf16> to vector<12x20x32xbf16>
    %50 = arith.maximumf %48, %49 : vector<12x20x32xbf16>
    %51 = vector.extract_strided_slice %50 {offsets = [2, 2, 0], sizes = [8, 16, 32], strides = [1, 1, 1]} : vector<12x20x32xbf16> to vector<8x16x32xbf16>
    %52 = vector.shape_cast %51 : vector<8x16x32xbf16> to vector<128x32xbf16>
    %c2 = arith.constant 2 : index
    %c0_8 = arith.constant 0 : index
    %c0_9 = arith.constant 0 : index
    %53 = vector.load %arg3[%c2, %c0_8, %c0_9] : memref<4x32x32xbf16, #tpu.memory_space<vmem>>, vector<1x32x32xbf16>
    %54 = vector.shape_cast %53 : vector<1x32x32xbf16> to vector<32x32xbf16>
    %cst_10 = arith.constant dense<0.000000e+00> : vector<128x32xf32>
    %55 = tpu.matmul %52, %54, %cst_10 {dimension_numbers = #tpu.dot_dimension_numbers<[1], [0], [0], [1], [0, 0, 1, 1], [], []>} : vector<128x32xbf16>, vector<32x32xbf16>, vector<128x32xf32> -> vector<128x32xf32>
    %56 = arith.addf %32, %55 : vector<128x32xf32>
    %57 = vector.extract_strided_slice %50 {offsets = [0, 0, 0], sizes = [12, 16, 32], strides = [1, 1, 1]} : vector<12x20x32xbf16> to vector<12x16x32xbf16>
    %58 = vector.extract_strided_slice %50 {offsets = [0, 1, 0], sizes = [12, 16, 32], strides = [1, 1, 1]} : vector<12x20x32xbf16> to vector<12x16x32xbf16>
    %59 = arith.maximumf %57, %58 : vector<12x16x32xbf16>
    %60 = vector.extract_strided_slice %50 {offsets = [0, 2, 0], sizes = [12, 16, 32], strides = [1, 1, 1]} : vector<12x20x32xbf16> to vector<12x16x32xbf16>
    %61 = arith.maximumf %59, %60 : vector<12x16x32xbf16>
    %62 = vector.extract_strided_slice %50 {offsets = [0, 3, 0], sizes = [12, 16, 32], strides = [1, 1, 1]} : vector<12x20x32xbf16> to vector<12x16x32xbf16>
    %63 = arith.maximumf %61, %62 : vector<12x16x32xbf16>
    %64 = vector.extract_strided_slice %50 {offsets = [0, 4, 0], sizes = [12, 16, 32], strides = [1, 1, 1]} : vector<12x20x32xbf16> to vector<12x16x32xbf16>
    %65 = arith.maximumf %63, %64 : vector<12x16x32xbf16>
    %66 = vector.extract_strided_slice %65 {offsets = [0, 0, 0], sizes = [8, 16, 32], strides = [1, 1, 1]} : vector<12x16x32xbf16> to vector<8x16x32xbf16>
    %67 = vector.extract_strided_slice %65 {offsets = [1, 0, 0], sizes = [8, 16, 32], strides = [1, 1, 1]} : vector<12x16x32xbf16> to vector<8x16x32xbf16>
    %68 = arith.maximumf %66, %67 : vector<8x16x32xbf16>
    %69 = vector.extract_strided_slice %65 {offsets = [2, 0, 0], sizes = [8, 16, 32], strides = [1, 1, 1]} : vector<12x16x32xbf16> to vector<8x16x32xbf16>
    %70 = arith.maximumf %68, %69 : vector<8x16x32xbf16>
    %71 = vector.extract_strided_slice %65 {offsets = [3, 0, 0], sizes = [8, 16, 32], strides = [1, 1, 1]} : vector<12x16x32xbf16> to vector<8x16x32xbf16>
    %72 = arith.maximumf %70, %71 : vector<8x16x32xbf16>
    %73 = vector.extract_strided_slice %65 {offsets = [4, 0, 0], sizes = [8, 16, 32], strides = [1, 1, 1]} : vector<12x16x32xbf16> to vector<8x16x32xbf16>
    %74 = arith.maximumf %72, %73 : vector<8x16x32xbf16>
    %75 = vector.shape_cast %74 : vector<8x16x32xbf16> to vector<128x32xbf16>
    %c3 = arith.constant 3 : index
    %c0_11 = arith.constant 0 : index
    %c0_12 = arith.constant 0 : index
    %76 = vector.load %arg3[%c3, %c0_11, %c0_12] : memref<4x32x32xbf16, #tpu.memory_space<vmem>>, vector<1x32x32xbf16>
    %77 = vector.shape_cast %76 : vector<1x32x32xbf16> to vector<32x32xbf16>
    %cst_13 = arith.constant dense<0.000000e+00> : vector<128x32xf32>
    %78 = tpu.matmul %75, %77, %cst_13 {dimension_numbers = #tpu.dot_dimension_numbers<[1], [0], [0], [1], [0, 0, 1, 1], [], []>} : vector<128x32xbf16>, vector<32x32xbf16>, vector<128x32xf32> -> vector<128x32xf32>
    %79 = arith.addf %56, %78 : vector<128x32xf32>
    %c0_14 = arith.constant 0 : index
    %c0_15 = arith.constant 0 : index
    %80 = vector.load %arg4[%c0_14, %c0_15] : memref<1x32xf32, #tpu.memory_space<vmem>>, vector<1x32xf32>
    %81 = vector.broadcast %80 : vector<1x32xf32> to vector<128x32xf32>
    %82 = arith.addf %79, %81 : vector<128x32xf32>
    %cst_16 = arith.constant 0.000000e+00 : f32
    %83 = vector.broadcast %cst_16 : f32 to vector<128x32xf32>
    %84 = arith.subf %83, %82 : vector<128x32xf32>
    %85 = math.exp %84 : vector<128x32xf32>
    %cst_17 = arith.constant 1.000000e+00 : f32
    %86 = vector.broadcast %cst_17 : f32 to vector<128x32xf32>
    %87 = arith.addf %86, %85 : vector<128x32xf32>
    %88 = tpu.reciprocal %87 {approx = true} : vector<128x32xf32> -> vector<128x32xf32>
    %89 = arith.mulf %82, %88 : vector<128x32xf32>
    %90 = arith.truncf %89 : vector<128x32xf32> to vector<128x32xbf16>
    %c0_18 = arith.constant 0 : index
    %c0_19 = arith.constant 0 : index
    %c0_20 = arith.constant 0 : index
    %91 = vector.load %arg5[%c0_18, %c0_19, %c0_20] : memref<1x128x32xbf16, #tpu.memory_space<vmem>>, vector<1x128x32xbf16>
    %92 = vector.shape_cast %91 : vector<1x128x32xbf16> to vector<128x32xbf16>
    %93 = vector.shape_cast %90 : vector<128x32xbf16> to vector<1x128x32xbf16>
    tpu.vector_store %arg5[%c0_18, %c0_19, %c0_20], %93 {strides = array<i32>} : memref<1x128x32xbf16, #tpu.memory_space<vmem>>, vector<1x128x32xbf16>,
    return
  }
  func.func @transform_0(%arg0: i32, %arg1: i32) -> (i32, i32, i32, i32) {
    %c0_i32 = arith.constant 0 : i32
    %c0_i32_0 = arith.constant 0 : i32
    %c0_i32_1 = arith.constant 0 : i32
    %c0_i32_2 = arith.constant 0 : i32
    return %arg0, %c0_i32, %c0_i32_0, %c0_i32_1 : i32, i32, i32, i32
  }
  func.func @transform_1(%arg0: i32, %arg1: i32) -> (i32, i32, i32) {
    %c0_i32 = arith.constant 0 : i32
    %c0_i32_0 = arith.constant 0 : i32
    %c0_i32_1 = arith.constant 0 : i32
    %c0_i32_2 = arith.constant 0 : i32
    return %c0_i32, %c0_i32_0, %c0_i32_1 : i32, i32, i32
  }
  func.func @transform_2(%arg0: i32, %arg1: i32) -> (i32, i32) {
    %c0_i32 = arith.constant 0 : i32
    %c0_i32_0 = arith.constant 0 : i32
    %c0_i32_1 = arith.constant 0 : i32
    return %c0_i32, %c0_i32_0 : i32, i32
  }
  func.func @transform_3(%arg0: i32, %arg1: i32) -> (i32, i32, i32) {
    %c0_i32 = arith.constant 0 : i32
    %c0_i32_0 = arith.constant 0 : i32
    return %arg0, %arg1, %c0_i32 : i32, i32, i32
  }
}

module attributes {stable_mosaic.version = 11 : i64} {
  func.func @_mm_bias_silu_kernel(%arg0: i32, %arg1: memref<512x32xbf16, #tpu.memory_space<vmem>>, %arg2: memref<512x32xbf16, #tpu.memory_space<vmem>>, %arg3: memref<32x32xbf16, #tpu.memory_space<vmem>>, %arg4: memref<32x32xbf16, #tpu.memory_space<vmem>>, %arg5: memref<1x32xf32, #tpu.memory_space<vmem>>, %arg6: memref<512x32xf32, #tpu.memory_space<vmem>>) attributes {dimension_semantics = [#tpu.dimension_semantics<parallel>], iteration_bounds = array<i64: 1>, scalar_prefetch = 0 : i64, scratch_operands = 0 : i64, tpu.core_type = #tpu.core_type<tc>, window_params = [{transform_indices = @transform_0, window_bounds = array<i64: 512, 32>}, {transform_indices = @transform_1, window_bounds = array<i64: 512, 32>}, {pipeline_mode = #tpu.pipeline_mode<synchronous>, transform_indices = @transform_2, window_bounds = array<i64: 32, 32>}, {pipeline_mode = #tpu.pipeline_mode<synchronous>, transform_indices = @transform_3, window_bounds = array<i64: 32, 32>}, {pipeline_mode = #tpu.pipeline_mode<synchronous>, transform_indices = @transform_4, window_bounds = array<i64: 1, 32>}, {transform_indices = @transform_5, window_bounds = array<i64: 512, 32>}]} {
    %c0 = arith.constant 0 : index
    %c0_0 = arith.constant 0 : index
    %0 = vector.load %arg1[%c0, %c0_0] : memref<512x32xbf16, #tpu.memory_space<vmem>>, vector<512x32xbf16>
    %c0_1 = arith.constant 0 : index
    %c0_2 = arith.constant 0 : index
    %1 = vector.load %arg3[%c0_1, %c0_2] : memref<32x32xbf16, #tpu.memory_space<vmem>>, vector<32x32xbf16>
    %cst = arith.constant dense<0.000000e+00> : vector<512x32xf32>
    %2 = tpu.matmul %0, %1, %cst {dimension_numbers = #tpu.dot_dimension_numbers<[1], [0], [0], [1], [0, 0, 1, 1], [], []>} : vector<512x32xbf16>, vector<32x32xbf16>, vector<512x32xf32> -> vector<512x32xf32>
    %c0_3 = arith.constant 0 : index
    %c0_4 = arith.constant 0 : index
    %3 = vector.load %arg2[%c0_3, %c0_4] : memref<512x32xbf16, #tpu.memory_space<vmem>>, vector<512x32xbf16>
    %c0_5 = arith.constant 0 : index
    %c0_6 = arith.constant 0 : index
    %4 = vector.load %arg4[%c0_5, %c0_6] : memref<32x32xbf16, #tpu.memory_space<vmem>>, vector<32x32xbf16>
    %cst_7 = arith.constant dense<0.000000e+00> : vector<512x32xf32>
    %5 = tpu.matmul %3, %4, %cst_7 {dimension_numbers = #tpu.dot_dimension_numbers<[1], [0], [0], [1], [0, 0, 1, 1], [], []>} : vector<512x32xbf16>, vector<32x32xbf16>, vector<512x32xf32> -> vector<512x32xf32>
    %6 = arith.addf %2, %5 : vector<512x32xf32>
    %c0_8 = arith.constant 0 : index
    %c0_9 = arith.constant 0 : index
    %7 = vector.load %arg5[%c0_8, %c0_9] : memref<1x32xf32, #tpu.memory_space<vmem>>, vector<1x32xf32>
    %8 = vector.broadcast %7 : vector<1x32xf32> to vector<512x32xf32>
    %9 = arith.addf %6, %8 : vector<512x32xf32>
    %cst_10 = arith.constant 0.000000e+00 : f32
    %10 = vector.broadcast %cst_10 : f32 to vector<512x32xf32>
    %11 = arith.subf %10, %9 : vector<512x32xf32>
    %12 = math.exp %11 : vector<512x32xf32>
    %cst_11 = arith.constant 1.000000e+00 : f32
    %13 = vector.broadcast %cst_11 : f32 to vector<512x32xf32>
    %14 = arith.addf %13, %12 : vector<512x32xf32>
    %15 = tpu.reciprocal %14 {approx = true} : vector<512x32xf32> -> vector<512x32xf32>
    %16 = arith.mulf %9, %15 : vector<512x32xf32>
    %c0_12 = arith.constant 0 : index
    %c0_13 = arith.constant 0 : index
    %17 = vector.load %arg6[%c0_12, %c0_13] : memref<512x32xf32, #tpu.memory_space<vmem>>, vector<512x32xf32>
    tpu.vector_store %arg6[%c0_12, %c0_13], %16 {strides = array<i32>} : memref<512x32xf32, #tpu.memory_space<vmem>>, vector<512x32xf32>,
    return
  }
  func.func @transform_0(%arg0: i32) -> (i32, i32) {
    %c0_i32 = arith.constant 0 : i32
    %c0_i32_0 = arith.constant 0 : i32
    return %arg0, %c0_i32 : i32, i32
  }
  func.func @transform_1(%arg0: i32) -> (i32, i32) {
    %c0_i32 = arith.constant 0 : i32
    %c0_i32_0 = arith.constant 0 : i32
    return %arg0, %c0_i32 : i32, i32
  }
  func.func @transform_2(%arg0: i32) -> (i32, i32) {
    %c0_i32 = arith.constant 0 : i32
    %c0_i32_0 = arith.constant 0 : i32
    %c0_i32_1 = arith.constant 0 : i32
    return %c0_i32, %c0_i32_0 : i32, i32
  }
  func.func @transform_3(%arg0: i32) -> (i32, i32) {
    %c0_i32 = arith.constant 0 : i32
    %c0_i32_0 = arith.constant 0 : i32
    %c0_i32_1 = arith.constant 0 : i32
    return %c0_i32, %c0_i32_0 : i32, i32
  }
  func.func @transform_4(%arg0: i32) -> (i32, i32) {
    %c0_i32 = arith.constant 0 : i32
    %c0_i32_0 = arith.constant 0 : i32
    %c0_i32_1 = arith.constant 0 : i32
    return %c0_i32, %c0_i32_0 : i32, i32
  }
  func.func @transform_5(%arg0: i32) -> (i32, i32) {
    %c0_i32 = arith.constant 0 : i32
    %c0_i32_0 = arith.constant 0 : i32
    return %arg0, %c0_i32 : i32, i32
  }
}

</mosaic_0001>

<bundles_post_ra>
// kernel: sppcspc_forward_nchw.6
= control target key start
LH: loop header
LB: loop body
LE: loop exit
PB: predicated region body
PF: predicated region fallthrough
CT: control target
= control target key end

     0   :  { %vm254_vm0 = vcmask 130048   ;;  %vm1280_vm1 = vcmask 519168   ;;  %s2749_s1 = inlined_call_operand.vmem [shape: bf16[16,64], index: 1, kind: input, shape index: {}]   ;;  %s2750_s0 = inlined_call_operand.vmem [shape: bf16[512,16], index: 0, kind: input, shape index: {}]   ;;  %s2751_s2 = inlined_call_operand.vmem [shape: f32[1,64], index: 2, kind: input, shape index: {}]   ;;  %s2752_s3 = inlined_call_operand.vmem [shape: bf16[512,64], index: 3, kind: output, shape index: {}]  }
   0x1   :  { %v1644_v0 = vld [vmem:[%s2749_s1] sm:$0xff]   ;;  %v1647_v3 = vld [vmem:[%s2750_s0 + $0x8] sm:$0xff]   ;;  %v1649_v5 = vld [vmem:[%s2750_s0 + $0x10] sm:$0xff]  }
   0x2   :  { %v1645_v1 = vld [vmem:[%s2750_s0] sm:$0xff]   ;;  %1576 = vmatprep.subr.bf16.mxu0 %v1644_v0  ;;  %1642 = vmatprep.subr.bf16.mxu1 %v1644_v0  ;;  %v1648_v4 = vld [vmem:[%s2750_s0 + $0x88] sm:$0xff]   ;;  %v1650_v6 = vld [vmem:[%s2750_s0 + $0x90] sm:$0xff]  }
   0x3   :  { %v1646_v2 = vld [vmem:[%s2750_s0 + $0x80] sm:$0xff]   ;;  %1577 = vmatpush3.bf16.msra.mxu0 %v1644_v0  ;;  %1643 = vmatpush3.bf16.msra.mxu1 %v1644_v0  ;;  %v1651_v7 = vld [vmem:[%s2750_s0 + $0x18] sm:$0xff]   ;;  %v1655_v11 = vld [vmem:[%s2750_s0 + $0x28] sm:$0xff]  }
   0x4   :  { %1578 = vmatprep.mubr.msk.bf16.mxu0 %vm254_vm0, %v1645_v1  ;;  %1610 = vmatprep.mubr.msk.bf16.mxu1 %vm254_vm0, %v1646_v2  ;;  %v1652_v8 = vld [vmem:[%s2750_s0 + $0x98] sm:$0xff]   ;;  %v1653_v9 = vld [vmem:[%s2750_s0 + $0x20] sm:$0xff]   ;;  %v1656_v12 = vld [vmem:[%s2750_s0 + $0xa8] sm:$0xff]  }
   0x5   :  { %v1654_v10 = vld [vmem:[%s2750_s0 + $0xa0] sm:$0xff]   ;;  %v1657_v13 = vld [vmem:[%s2750_s0 + $0x30] sm:$0xff]   ;;  %v1659_v15 = vld [vmem:[%s2750_s0 + $0x38] sm:$0xff]  }
   0x6   :  { %1579 = vmatmul.mubr.msk.bf16.vlgmr.msra.gmra.mxu0 %vm254_vm0, %v1647_v3  ;;  %1611 = vmatmul.mubr.msk.bf16.vlgmr.msra.gmra.mxu1 %vm254_vm0, %v1648_v4  ;;  %v1658_v14 = vld [vmem:[%s2750_s0 + $0xb0] sm:$0xff]   ;;  %v1660_v16 = vld [vmem:[%s2750_s0 + $0xb8] sm:$0xff]   ;;  %v1661_v17 = vld [vmem:[%s2750_s0 + $0x40] sm:$0xff]  }
   0x7   :  { %1582 = vmatprep.mubr.msk.bf16.mxu0 %vm254_vm0, %v1649_v5  ;;  %1614 = vmatprep.mubr.msk.bf16.mxu1 %vm254_vm0, %v1650_v6  ;;  %v1662_v18 = vld [vmem:[%s2750_s0 + $0xc0] sm:$0xff]   ;;  %v1663_v19 = vld [vmem:[%s2750_s0 + $0x48] sm:$0xff]   ;;  %v1665_v21 = vld [vmem:[%s2750_s0 + $0x50] sm:$0xff]  }
   0x8   :  { %v1664_v20 = vld [vmem:[%s2750_s0 + $0xc8] sm:$0xff]   ;;  %v1666_v22 = vld [vmem:[%s2750_s0 + $0xd0] sm:$0xff]   ;;  %v1667_v23 = vld [vmem:[%s2750_s0 + $0x58] sm:$0xff]  }
   0x9   :  { %v1668_v24 = vld [vmem:[%s2750_s0 + $0xd8] sm:$0xff]   ;;  %v1669_v25 = vld [vmem:[%s2750_s0 + $0x60] sm:$0xff]   ;;  %v1671_v27 = vld [vmem:[%s2750_s0 + $0x68] sm:$0xff]  }
   0xa   :  { %v1670_v26 = vld [vmem:[%s2750_s0 + $0xe0] sm:$0xff]   ;;  %v1672_v28 = vld [vmem:[%s2750_s0 + $0xe8] sm:$0xff]   ;;  %v1673_v29 = vld [vmem:[%s2750_s0 + $0x70] sm:$0xff]  }
   0xb   :  { %v1674_v30 = vld [vmem:[%s2750_s0 + $0xf0] sm:$0xff]   ;;  %v1675_v31 = vld [vmem:[%s2750_s0 + $0x78] sm:$0xff]   ;;  %v2088_v33 = vld [vmem:[%s2751_s2] ss:$0 sm:$0xff] }
   0xc   :  { %v1676_v32 = vld [vmem:[%s2750_s0 + $0xf8] sm:$0xff]  }
   0xe   :  { %1583 = vmatmul.mubr.msk.bf16.gmra.mxu0 %vm254_vm0, %v1651_v7  ;;  %1615 = vmatmul.mubr.msk.bf16.gmra.mxu1 %vm254_vm0, %v1652_v8 }
   0xf   :  { %1586 = vmatprep.mubr.msk.bf16.mxu0 %vm254_vm0, %v1653_v9  ;;  %1618 = vmatprep.mubr.msk.bf16.mxu1 %vm254_vm0, %v1654_v10 }
  0x16   :  { %1587 = vmatmul.mubr.msk.bf16.gmra.mxu0 %vm254_vm0, %v1655_v11  ;;  %1619 = vmatmul.mubr.msk.bf16.gmra.mxu1 %vm254_vm0, %v1656_v12 }
  0x17   :  { %1590 = vmatprep.mubr.msk.bf16.mxu0 %vm254_vm0, %v1657_v13  ;;  %1622 = vmatprep.mubr.msk.bf16.mxu1 %vm254_vm0, %v1658_v14 }
  0x1e   :  { %1591 = vmatmul.mubr.msk.bf16.gmra.mxu0 %vm254_vm0, %v1659_v15  ;;  %1623 = vmatmul.mubr.msk.bf16.gmra.mxu1 %vm254_vm0, %v1660_v16 }
  0x1f   :  { %1594 = vmatprep.mubr.msk.bf16.mxu0 %vm254_vm0, %v1661_v17  ;;  %1626 = vmatprep.mubr.msk.bf16.mxu1 %vm254_vm0, %v1662_v18 }
  0x26   :  { %1595 = vmatmul.mubr.msk.bf16.gmra.mxu0 %vm254_vm0, %v1663_v19  ;;  %1627 = vmatmul.mubr.msk.bf16.gmra.mxu1 %vm254_vm0, %v1664_v20 }
  0x27   :  { %1598 = vmatprep.mubr.msk.bf16.mxu0 %vm254_vm0, %v1665_v21  ;;  %1630 = vmatprep.mubr.msk.bf16.mxu1 %vm254_vm0, %v1666_v22 }
  0x2e   :  { %1599 = vmatmul.mubr.msk.bf16.gmra.mxu0 %vm254_vm0, %v1667_v23  ;;  %1631 = vmatmul.mubr.msk.bf16.gmra.mxu1 %vm254_vm0, %v1668_v24 }
  0x2f   :  { %1602 = vmatprep.mubr.msk.bf16.mxu0 %vm254_vm0, %v1669_v25  ;;  %1634 = vmatprep.mubr.msk.bf16.mxu1 %vm254_vm0, %v1670_v26 }
  0x36   :  { %1603 = vmatmul.mubr.msk.bf16.gmra.mxu0 %vm254_vm0, %v1671_v27  ;;  %1635 = vmatmul.mubr.msk.bf16.gmra.mxu1 %vm254_vm0, %v1672_v28 }
  0x37   :  { %1606 = vmatprep.mubr.msk.bf16.mxu0 %vm254_vm0, %v1673_v29  ;;  %1638 = vmatprep.mubr.msk.bf16.mxu1 %vm254_vm0, %v1674_v30 }
  0x3e   :  { %1607 = vmatmul.mubr.msk.bf16.gmra.mxu0 %vm254_vm0, %v1675_v31  ;;  %1639 = vmatmul.mubr.msk.bf16.gmra.mxu1 %vm254_vm0, %v1676_v32 }
  0xc6   :  { %v1580_v34 = vpop.f32.mrf.mxu0  ;;  %v1612_v35 = vpop.f32.mrf.mxu1 }
  0xc7   :  { %v2091_v36 = vadd.f32 %v1580_v34, %v2088_v33  ;;  %v2094_v37 = vadd.f32 %v1612_v35, %v2088_v33 }
  0xc8   :  { %v385_v38 = vpop.f32.mrf.mxu0  ;;  %v513_v39 = vpop.f32.mrf.mxu1 }
  0xc9   :  { %v642_v40 = vsub.f32 0.0, %v2091_v36  ;;  %v674_v41 = vsub.f32 0.0, %v2094_v37  ;;  %v2099_v42 = vadd.f32 %v2088_v33, %v385_v38  ;;  %v2102_v43 = vadd.f32 %v2088_v33, %v513_v39 }
  0xca   :  { %v1581_v44 = vpop.f32.mrf.mxu0  ;;  %v1613_v45 = vpop.f32.mrf.mxu1 }
  0xcb   :  { %v708_v46 = vmul.f32 1.442695, %v642_v40  ;;  %v772_v47 = vmul.f32 1.442695, %v674_v41  ;;  %v640_v48 = vsub.f32 0.0, %v2099_v42  ;;  %v672_v49 = vsub.f32 0.0, %v2102_v43 }
  0xcc   :  { %v2107_v50 = vadd.f32 %v1581_v44, %v2088_v33  ;;  %v2110_v51 = vadd.f32 %v1613_v45, %v2088_v33  ;;  %v388_v52 = vpop.f32.mrf.mxu0  ;;  %v516_v53 = vpop.f32.mrf.mxu1 }
  0xcd   :  { %1677 = vpow2.f32 %v708_v46  ;;  %v704_v54 = vmul.f32 1.442695, %v640_v48  ;;  %v768_v55 = vmul.f32 1.442695, %v672_v49  ;;  %v2113_v56 = vadd.f32 %v2088_v33, %v388_v52 }
  0xce   :  { %1679 = vpow2.f32 %v772_v47  ;;  %v643_v57 = vsub.f32 0.0, %v2107_v50  ;;  %v675_v58 = vsub.f32 0.0, %v2110_v51  ;;  %v2118_v59 = vadd.f32 %v2088_v33, %v516_v53  ;;  %v1584_v60 = vpop.f32.mrf.mxu0  ;;  %v1616_v61 = vpop.f32.mrf.mxu1 }
  0xcf   :  { %1681 = vpow2.f32 %v704_v54  ;;  %v641_v62 = vsub.f32 0.0, %v2113_v56  ;;  %v2122_v63 = vadd.f32 %v1584_v60, %v2088_v33  ;;  %v2125_v0 = vadd.f32 %v1616_v61, %v2088_v33 }
  0xd0   :  { %1683 = vpow2.f32 %v768_v55  ;;  %v710_v1 = vmul.f32 1.442695, %v643_v57  ;;  %v774_v2 = vmul.f32 1.442695, %v675_v58  ;;  %v673_v3 = vsub.f32 0.0, %v2118_v59  ;;  %v401_v4 = vpop.f32.mrf.mxu0  ;;  %v529_v5 = vpop.f32.mrf.mxu1 }
  0xd1   :  { %v706_v6 = vmul.f32 1.442695, %v641_v62  ;;  %v646_v7 = vsub.f32 0.0, %v2122_v63  ;;  %v678_v8 = vsub.f32 0.0, %v2125_v0  ;;  %v2131_v9 = vadd.f32 %v2088_v33, %v401_v4 }
  0xd2   :  { %1685 = vpow2.f32 %v710_v1  ;;  %v770_v10 = vmul.f32 1.442695, %v673_v3  ;;  %v2134_v11 = vadd.f32 %v2088_v33, %v529_v5  ;;  %v1585_v12 = vpop.f32.mrf.mxu0  ;;  %v1617_v13 = vpop.f32.mrf.mxu1 }
  0xd3   :  { %1687 = vpow2.f32 %v774_v2  ;;  %v716_v14 = vmul.f32 1.442695, %v646_v7  ;;  %v780_v15 = vmul.f32 1.442695, %v678_v8  ;;  %v644_v16 = vsub.f32 0.0, %v2131_v9 }
  0xd4   :  { %1689 = vpow2.f32 %v706_v6  ;;  %v676_v17 = vsub.f32 0.0, %v2134_v11  ;;  %v2139_v18 = vadd.f32 %v1585_v12, %v2088_v33  ;;  %v2142_v19 = vadd.f32 %v1617_v13, %v2088_v33  ;;  %v404_v20 = vpop.f32.mrf.mxu0  ;;  %v532_v21 = vpop.f32.mrf.mxu1 }
  0xd5   :  { %1691 = vpow2.f32 %v770_v10  ;;  %v712_v22 = vmul.f32 1.442695, %v644_v16  ;;  %v2145_v23 = vadd.f32 %v2088_v33, %v404_v20  ;;  %v2148_v24 = vadd.f32 %v2088_v33, %v532_v21 }
  0xd6   :  { %1693 = vpow2.f32 %v716_v14  ;;  %v776_v25 = vmul.f32 1.442695, %v676_v17  ;;  %v647_v26 = vsub.f32 0.0, %v2139_v18  ;;  %v679_v27 = vsub.f32 0.0, %v2142_v19  ;;  %v1588_v28 = vpop.f32.mrf.mxu0  ;;  %v1620_v29 = vpop.f32.mrf.mxu1 }
  0xd7   :  { %1695 = vpow2.f32 %v780_v15  ;;  %v645_v30 = vsub.f32 0.0, %v2145_v23  ;;  %v2154_v31 = vadd.f32 %v1588_v28, %v2088_v33  ;;  %v2157_v35 = vadd.f32 %v1620_v29, %v2088_v33 }
  0xd8   :  { %1697 = vpow2.f32 %v712_v22  ;;  %v718_v32 = vmul.f32 1.442695, %v647_v26  ;;  %v782_v34 = vmul.f32 1.442695, %v679_v27  ;;  %v417_v38 = vpop.f32.mrf.mxu0  ;;  %v545_v39 = vpop.f32.mrf.mxu1  ;;  %v677_v41 = vsub.f32 0.0, %v2148_v24 }
  0xd9   :  { %1699 = vpow2.f32 %v776_v25  ;;  %v714_v40 = vmul.f32 1.442695, %v645_v30  ;;  %v2161_v45 = vadd.f32 %v2088_v33, %v417_v38  ;;  %v650_v52 = vsub.f32 0.0, %v2154_v31 }
  0xda   :  { %v1678_v44 = vpop.eup %1677  ;;  %1701 = vpow2.f32 %v718_v32  ;;  %v1589_v46 = vpop.f32.mrf.mxu0  ;;  %v2165_v53 = vadd.f32 %v2088_v33, %v545_v39  ;;  %v682_v57 = vsub.f32 0.0, %v2157_v35  ;;  %v778_v1 = vmul.f32 1.442695, %v677_v41 }
  0xdb   :  { %v1621_v47 = vpop.f32.mrf.mxu1  ;;  %v1680_v48 = vpop.eup %1679  ;;  %v834_v49 = vadd.f32 1.0, %v1678_v44  ;;  %1703 = vpow2.f32 %v782_v34  ;;  %v2169_v2 = vadd.f32 %v1589_v46, %v2088_v33  ;;  %v648_v4 = vsub.f32 0.0, %v2161_v45 }
  0xdc   :  { %v1682_v54 = vpop.eup %1681  ;;  %v866_v55 = vadd.f32 1.0, %v1680_v48  ;;  %1705 = vpow2.f32 %v714_v40  ;;  %v420_v58 = vpop.f32.mrf.mxu0  ;;  %v2172_v7 = vmul.f32 1.442695, %v650_v52  ;;  %v680_v8 = vsub.f32 0.0, %v2165_v53 }
  0xdd   :  { %v548_v60 = vpop.f32.mrf.mxu1  ;;  %v1684_v61 = vpop.eup %1683  ;;  %1707 = vrcp.f32 %v834_v49  ;;  %v832_v62 = vadd.f32 1.0, %v1682_v54  ;;  %v2176_v10 = vadd.f32 %v1621_v47, %v2088_v33  ;;  %v2178_v14 = vmul.f32 1.442695, %v682_v57 }
  0xde   :  { %1709 = vrcp.f32 %v866_v55  ;;  %v864_v3 = vadd.f32 1.0, %v1684_v61  ;;  %v1592_v5 = vpop.f32.mrf.mxu0  ;;  %v2181_v15 = vadd.f32 %v2088_v33, %v420_v58  ;;  %v651_v21 = vsub.f32 0.0, %v2169_v2 }
  0xdf   :  { %v1686_v6 = vpop.eup %1685  ;;  %1711 = vrcp.f32 %v832_v62  ;;  %v1624_v16 = vpop.f32.mrf.mxu1  ;;  %v2185_v22 = vadd.f32 %v2088_v33, %v548_v60  ;;  %v2187_v28 = vmul.f32 1.442695, %v648_v4  ;;  %v2190_v29 = vadd.f32 %v1592_v5, %v2088_v33 }
  0xe0   :  { %v1688_v12 = vpop.eup %1687  ;;  %1713 = vrcp.f32 %v864_v3  ;;  %v835_v13 = vadd.f32 1.0, %v1686_v6  ;;  %v433_v25 = vpop.f32.mrf.mxu0  ;;  %v2192_v34 = vmul.f32 1.442695, %v680_v8  ;;  %v683_v38 = vsub.f32 0.0, %v2176_v10 }
  0xe1   :  { %v1690_v17 = vpop.eup %1689  ;;  %v867_v20 = vadd.f32 1.0, %v1688_v12  ;;  %1715 = vpow2.f32 %v778_v1  ;;  %v649_v41 = vsub.f32 0.0, %v2181_v15  ;;  %v2197_v44 = vadd.f32 %v1624_v16, %v2088_v33  ;;  %v561_v46 = vpop.f32.mrf.mxu1 }
  0xe2   :  { %v1692_v26 = vpop.eup %1691  ;;  %1717 = vrcp.f32 %v835_v13  ;;  %v833_v27 = vadd.f32 1.0, %v1690_v17  ;;  %v2199_v49 = vmul.f32 1.442695, %v651_v21  ;;  %v681_v52 = vsub.f32 0.0, %v2185_v22  ;;  %v1593_v54 = vpop.f32.mrf.mxu0 }
  0xe3   :  { %v1694_v30 = vpop.eup %1693  ;;  %1719 = vrcp.f32 %v867_v20  ;;  %v865_v32 = vadd.f32 1.0, %v1692_v26  ;;  %v654_v58 = vsub.f32 0.0, %v2190_v29  ;;  %v2204_v60 = vadd.f32 %v2088_v33, %v433_v25  ;;  %v1625_v12 = vpop.f32.mrf.mxu1 }
  0xe4   :  { %v1696_v39 = vpop.eup %1695  ;;  %1721 = vrcp.f32 %v833_v27  ;;  %v838_v40 = vadd.f32 1.0, %v1694_v30  ;;  %v2206_v1 = vmul.f32 1.442695, %v683_v38  ;;  %v686_v3 = vsub.f32 0.0, %v2197_v44  ;;  %v436_v21 = vpop.f32.mrf.mxu0 }
  0xe5   :  { %v1698_v47 = vpop.eup %1697  ;;  %1723 = vrcp.f32 %v865_v32  ;;  %v870_v48 = vadd.f32 1.0, %v1696_v39  ;;  %v2209_v6 = vmul.f32 1.442695, %v649_v41  ;;  %v2212_v8 = vadd.f32 %v2088_v33, %v561_v46 }
  0xe6   :  { %v1700_v55 = vpop.eup %1699  ;;  %1725 = vrcp.f32 %v838_v40  ;;  %v836_v57 = vadd.f32 1.0, %v1698_v47  ;;  %v2214_v17 = vmul.f32 1.442695, %v681_v52  ;;  %v2217_v20 = vadd.f32 %v1593_v54, %v2088_v33  ;;  %v564_v52 = vpop.f32.mrf.mxu1 }
  0xe7   :  { %v1702_v61 = vpop.eup %1701  ;;  %1727 = vrcp.f32 %v870_v48  ;;  %v868_v62 = vadd.f32 1.0, %v1700_v55  ;;  %v2219_v27 = vmul.f32 1.442695, %v654_v58  ;;  %v652_v30 = vsub.f32 0.0, %v2204_v60 }
  0xe8   :  { %v1704_v4 = vpop.eup %1703  ;;  %1729 = vrcp.f32 %v836_v57  ;;  %v839_v5 = vadd.f32 1.0, %v1702_v61  ;;  %v2223_v39 = vmul.f32 1.442695, %v686_v3  ;;  %v2226_v40 = vadd.f32 %v1625_v12, %v2088_v33  ;;  %v1596_v3 = vpop.f32.mrf.mxu0 }
  0xe9   :  { %v1706_v13 = vpop.eup %1705  ;;  %1731 = vrcp.f32 %v868_v62  ;;  %v871_v16 = vadd.f32 1.0, %v1704_v4  ;;  %v684_v47 = vsub.f32 0.0, %v2212_v8  ;;  %v2231_v48 = vadd.f32 %v2088_v33, %v436_v21 }
  0xea   :  { %v1708_v25 = vpop.eup %1707  ;;  %1733 = vrcp.f32 %v839_v5  ;;  %v837_v26 = vadd.f32 1.0, %v1706_v13  ;;  %v655_v57 = vsub.f32 0.0, %v2217_v20 }
  0xeb   :  { %v1710_v32 = vpop.eup %1709  ;;  %v962_v38 = vmul.f32 %v1708_v25, %v2091_v36  ;;  %1735 = vrcp.f32 %v871_v16  ;;  %v653_v13 = vsub.f32 0.0, %v2231_v48  ;;  %v1628_v16 = vpop.f32.mrf.mxu1  ;;  %v792_v25 = vmul.f32 1.442695, %v684_v47 }
  0xec   :  { %v1712_v41 = vpop.eup %1711  ;;  %v994_v46 = vmul.f32 %v1710_v32, %v2094_v37  ;;  %1737 = vrcp.f32 %v837_v26  ;;  %v2238_v37 = vmul.f32 1.442695, %v652_v30  ;;  %v734_v26 = vmul.f32 1.442695, %v655_v57 }
  0xed   :  { %v1714_v54 = vpop.eup %1713  ;;  %v1481_v55 = vpack.c.bf16 %v962_v38, %v962_v38  ;;  %v960_v36 = vmul.f32 %v1712_v41, %v2099_v42  ;;  %1739 = vpow2.f32 %v2172_v7  ;;  %v687_v7 = vsub.f32 0.0, %v2226_v40  ;;  %v449_v38 = vpop.f32.mrf.mxu0 }
  0xee   :  { %v1716_v58 = vpop.eup %1715  ;;  %v1513_v61 = vpack.c.bf16 %v994_v46, %v994_v46  ;;  %v992_v62 = vmul.f32 %v1714_v54, %v2102_v43  ;;  %1741 = vpow2.f32 %v2178_v14  ;;  %v2265_v32 = vadd.f32 %v2088_v33, %v564_v52 }
  0xef   :  { %v1718_v4 = vpop.eup %1717  ;;  %1283 = vst.msk [vmem:[%s2752_s3 + $0x8] sm:$0xf] %vm1280_vm1, %v1481_v55  ;;  %v1479_v42 = vpack.c.bf16 %v960_v36, %v960_v36  ;;  %v869_v5 = vadd.f32 1.0, %v1716_v58  ;;  %1743 = vpow2.f32 %v2187_v28  ;;  %v798_v47 = vmul.f32 1.442695, %v687_v7  ;;  %v577_v55 = vpop.f32.mrf.mxu1 }
  0xf0   :  { %v1720_v12 = vpop.eup %1719  ;;  %1315 = vst.msk [vmem:[%s2752_s3 + $0x88] sm:$0xf] %vm1280_vm1, %v1513_v61  ;;  %v1511_v43 = vpack.c.bf16 %v992_v62, %v992_v62  ;;  %v963_v14 = vmul.f32 %v1718_v4, %v2107_v50  ;;  %1745 = vpow2.f32 %v2192_v34  ;;  %v730_v52 = vmul.f32 1.442695, %v653_v13  ;;  %v1597_v62 = vpop.f32.mrf.mxu0 }
  0xf1   :  { %v1722_v21 = vpop.eup %1721  ;;  %1281 = vst.msk [vmem:[%s2752_s3] sm:$0xf] %vm1280_vm1, %v1479_v42  ;;  %v995_v28 = vmul.f32 %v1720_v12, %v2110_v51  ;;  %1747 = vrcp.f32 %v869_v5  ;;  %v2282_v57 = vadd.f32 %v1596_v3, %v2088_v33  ;;  %v685_v61 = vsub.f32 0.0, %v2265_v32 }
  0xf2   :  { %v1724_v30 = vpop.eup %1723  ;;  %1313 = vst.msk [vmem:[%s2752_s3 + $0x80] sm:$0xf] %vm1280_vm1, %v1511_v43  ;;  %v1482_v50 = vpack.c.bf16 %v963_v14, %v963_v14  ;;  %v961_v34 = vmul.f32 %v1722_v21, %v2113_v56  ;;  %1749 = vpow2.f32 %v2199_v49  ;;  %v2298_v4 = vadd.f32 %v1628_v16, %v2088_v33  ;;  %v452_v16 = vpop.f32.mrf.mxu0 }
  0xf3   :  { %v1726_v41 = vpop.eup %1725  ;;  %v1514_v51 = vpack.c.bf16 %v995_v28, %v995_v28  ;;  %v993_v46 = vmul.f32 %v1724_v30, %v2118_v59  ;;  %1751 = vpow2.f32 %v2206_v1  ;;  %v2307_v5 = vadd.f32 %v2088_v33, %v449_v38 }
  0xf4   :  { %v1728_v54 = vpop.eup %1727  ;;  %1284 = vst.msk [vmem:[%s2752_s3 + $0xc] sm:$0xf] %vm1280_vm1, %v1482_v50  ;;  %v1480_v56 = vpack.c.bf16 %v961_v34, %v961_v34  ;;  %v966_v49 = vmul.f32 %v1726_v41, %v2122_v63  ;;  %1753 = vpow2.f32 %v2209_v6  ;;  %v658_v43 = vsub.f32 0.0, %v2282_v57 }
  0xf5   :  { %v1730_v36 = vpop.eup %1729  ;;  %1316 = vst.msk [vmem:[%s2752_s3 + $0x8c] sm:$0xf] %vm1280_vm1, %v1514_v51  ;;  %v1512_v59 = vpack.c.bf16 %v993_v46, %v993_v46  ;;  %v998_v1 = vmul.f32 %v1728_v54, %v2125_v0  ;;  %1755 = vpow2.f32 %v2214_v17  ;;  %v2321_v13 = vadd.f32 %v2088_v33, %v577_v55 }
  0xf6   :  { %v1732_v58 = vpop.eup %1731  ;;  %1282 = vst.msk [vmem:[%s2752_s3 + $0x4] sm:$0xf] %vm1280_vm1, %v1480_v56  ;;  %v1485_v63 = vpack.c.bf16 %v966_v49, %v966_v49  ;;  %v964_v6 = vmul.f32 %v1730_v36, %v2131_v9  ;;  %1757 = vpow2.f32 %v2219_v27  ;;  %v656_v50 = vsub.f32 0.0, %v2307_v5  ;;  %v1600_v49 = vpop.f32.mrf.mxu0 }
  0xf7   :  { %v1734_v0 = vpop.eup %1733  ;;  %1314 = vst.msk [vmem:[%s2752_s3 + $0x84] sm:$0xf] %vm1280_vm1, %v1512_v59  ;;  %v1517_v17 = vpack.c.bf16 %v998_v1, %v998_v1  ;;  %v996_v3 = vmul.f32 %v1732_v58, %v2134_v11  ;;  %1759 = vpow2.f32 %v2223_v39  ;;  %v1629_v11 = vpop.f32.mrf.mxu1  ;;  %v794_v51 = vmul.f32 1.442695, %v685_v61 }
  0xf8   :  { %v1736_v9 = vpop.eup %1735  ;;  %1287 = vst.msk [vmem:[%s2752_s3 + $0x18] sm:$0xf] %vm1280_vm1, %v1485_v63  ;;  %v1483_v27 = vpack.c.bf16 %v964_v6, %v964_v6  ;;  %v967_v42 = vmul.f32 %v1734_v0, %v2139_v18  ;;  %1761 = vpow2.f32 %v2238_v37  ;;  %v2341_v54 = vmul.f32 1.442695, %v658_v43 }
  0xf9   :  { %v1738_v7 = vpop.eup %1737  ;;  %1319 = vst.msk [vmem:[%s2752_s3 + $0x98] sm:$0xf] %vm1280_vm1, %v1517_v17  ;;  %v1515_v39 = vpack.c.bf16 %v996_v3, %v996_v3  ;;  %v999_v12 = vmul.f32 %v1736_v9, %v2142_v19  ;;  %1763 = vpow2.f32 %v792_v25  ;;  %v690_v25 = vsub.f32 0.0, %v2298_v4  ;;  %v580_v34 = vpop.f32.mrf.mxu1 }
  0xfa   :  { %v1740_v14 = vpop.eup %1739  ;;  %1285 = vst.msk [vmem:[%s2752_s3 + $0x10] sm:$0xf] %vm1280_vm1, %v1483_v27  ;;  %v1486_v18 = vpack.c.bf16 %v967_v42, %v967_v42  ;;  %v965_v37 = vmul.f32 %v1738_v7, %v2145_v23  ;;  %1765 = vpow2.f32 %v734_v26  ;;  %v688_v56 = vsub.f32 0.0, %v2321_v13  ;;  %v465_v7 = vpop.f32.mrf.mxu0 }
  0xfb   :  { %v1742_v21 = vpop.eup %1741  ;;  %1317 = vst.msk [vmem:[%s2752_s3 + $0x90] sm:$0xf] %vm1280_vm1, %v1515_v39  ;;  %v1518_v19 = vpack.c.bf16 %v999_v12, %v999_v12  ;;  %v842_v28 = vadd.f32 1.0, %v1740_v14  ;;  %1767 = vpow2.f32 %v798_v47  ;;  %v2345_v36 = vmul.f32 1.442695, %v690_v25  ;;  %v1632_v61 = vpop.f32.mrf.mxu1 }
  0xfc   :  { %v1744_v30 = vpop.eup %1743  ;;  %1288 = vst.msk [vmem:[%s2752_s3 + $0x1c] sm:$0xf] %vm1280_vm1, %v1486_v18  ;;  %v1484_v23 = vpack.c.bf16 %v965_v37, %v965_v37  ;;  %v874_v26 = vadd.f32 1.0, %v1742_v21  ;;  %1769 = vpow2.f32 %v730_v52  ;;  %v2348_v59 = vadd.f32 %v1597_v62, %v2088_v33 }
  0xfd   :  { %v1746_v38 = vpop.eup %1745  ;;  %1320 = vst.msk [vmem:[%s2752_s3 + $0x9c] sm:$0xf] %vm1280_vm1, %v1518_v19  ;;  %1771 = vrcp.f32 %v842_v28  ;;  %v840_v41 = vadd.f32 1.0, %v1744_v30  ;;  %v2350_v63 = vmul.f32 1.442695, %v656_v50  ;;  %v2353_v6 = vadd.f32 %v1629_v11, %v2088_v33  ;;  %v593_v21 = vpop.f32.mrf.mxu1 }
  0xfe   :  { %v1748_v46 = vpop.eup %1747  ;;  %1286 = vst.msk [vmem:[%s2752_s3 + $0x14] sm:$0xf] %vm1280_vm1, %v1484_v23  ;;  %1773 = vrcp.f32 %v874_v26  ;;  %v872_v47 = vadd.f32 1.0, %v1746_v38  ;;  %v2358_v27 = vmul.f32 1.442695, %v688_v56  ;;  %v2361_v42 = vadd.f32 %v2088_v33, %v580_v34 }
  0xff   :  { %v1750_v52 = vpop.eup %1749  ;;  %v997_v55 = vmul.f32 %v1748_v46, %v2148_v24  ;;  %1775 = vrcp.f32 %v840_v41  ;;  %v2356_v24 = vadd.f32 %v2088_v33, %v452_v16  ;;  %v659_v12 = vsub.f32 0.0, %v2348_v59 }
 0x100   :  { %v1752_v1 = vpop.eup %1751  ;;  %1777 = vrcp.f32 %v872_v47  ;;  %v843_v58 = vadd.f32 1.0, %v1750_v52  ;;  %v2369_v43 = vadd.f32 %v1600_v49, %v2088_v33  ;;  %v691_v37 = vsub.f32 0.0, %v2353_v6  ;;  %v1601_v47 = vpop.f32.mrf.mxu0 }
 0x101   :  { %v1754_v0 = vpop.eup %1753  ;;  %v1516_v17 = vpack.c.bf16 %v997_v55, %v997_v55  ;;  %v875_v3 = vadd.f32 1.0, %v1752_v1  ;;  %1779 = vpow2.f32 %v794_v51  ;;  %v2373_v16 = vadd.f32 %v1632_v61, %v2088_v33 }
 0x102   :  { %v1756_v9 = vpop.eup %1755  ;;  %1781 = vrcp.f32 %v843_v58  ;;  %v841_v62 = vadd.f32 1.0, %v1754_v0  ;;  %v657_v25 = vsub.f32 0.0, %v2356_v24  ;;  %v2377_v30 = vadd.f32 %v2088_v33, %v465_v7 }
 0x103   :  { %v1758_v39 = vpop.eup %1757  ;;  %1318 = vst.msk [vmem:[%s2752_s3 + $0x94] sm:$0xf] %vm1280_vm1, %v1516_v17  ;;  %1783 = vrcp.f32 %v875_v3  ;;  %v873_v11 = vadd.f32 1.0, %v1756_v9  ;;  %v689_v50 = vsub.f32 0.0, %v2361_v42  ;;  %v662_v34 = vsub.f32 0.0, %v2369_v43  ;;  %v1633_v17 = vpop.f32.mrf.mxu1 }
 0x104   :  { %v1760_v14 = vpop.eup %1759  ;;  %1785 = vrcp.f32 %v841_v62  ;;  %v846_v18 = vadd.f32 1.0, %v1758_v39  ;;  %v2381_v51 = vmul.f32 1.442695, %v659_v12  ;;  %v2384_v46 = vadd.f32 %v2088_v33, %v593_v21 }
 0x105   :  { %v1762_v19 = vpop.eup %1761  ;;  %1787 = vrcp.f32 %v873_v11  ;;  %v878_v28 = vadd.f32 1.0, %v1760_v14  ;;  %v2386_v52 = vmul.f32 1.442695, %v691_v37  ;;  %v694_v55 = vsub.f32 0.0, %v2373_v16 }
 0x106   :  { %v1764_v23 = vpop.eup %1763  ;;  %1789 = vrcp.f32 %v846_v18  ;;  %v844_v26 = vadd.f32 1.0, %v1762_v19  ;;  %v2389_v61 = vmul.f32 1.442695, %v657_v25  ;;  %v660_v0 = vsub.f32 0.0, %v2377_v30  ;;  %v468_v18 = vpop.f32.mrf.mxu0 }
 0x107   :  { %v1766_v38 = vpop.eup %1765  ;;  %1791 = vrcp.f32 %v878_v28  ;;  %v876_v41 = vadd.f32 1.0, %v1764_v23  ;;  %v2392_v62 = vmul.f32 1.442695, %v689_v50  ;;  %v2394_v7 = vmul.f32 1.442695, %v662_v34  ;;  %v596_v50 = vpop.f32.mrf.mxu1 }
 0x108   :  { %v1768_v56 = vpop.eup %1767  ;;  %1793 = vrcp.f32 %v844_v26  ;;  %v847_v49 = vadd.f32 1.0, %v1766_v38  ;;  %v692_v12 = vsub.f32 0.0, %v2384_v46  ;;  %v2399_v14 = vadd.f32 %v1601_v47, %v2088_v33 }
 0x109   :  { %v1770_v1 = vpop.eup %1769  ;;  %1795 = vrcp.f32 %v876_v41  ;;  %v879_v58 = vadd.f32 1.0, %v1768_v56  ;;  %v2402_v19 = vmul.f32 1.442695, %v694_v55  ;;  %v2405_v28 = vadd.f32 %v1633_v17, %v2088_v33 }
 0x10a   :  { %v1772_v3 = vpop.eup %1771  ;;  %1797 = vrcp.f32 %v847_v49  ;;  %v845_v9 = vadd.f32 1.0, %v1770_v1  ;;  %v2409_v26 = vmul.f32 1.442695, %v660_v0  ;;  %v663_v56 = vsub.f32 0.0, %v2399_v14  ;;  %v1604_v1 = vpop.f32.mrf.mxu0 }
 0x10b   :  { %v1774_v39 = vpop.eup %1773  ;;  %v970_v11 = vmul.f32 %v1772_v3, %v2154_v31  ;;  %1799 = vrcp.f32 %v879_v58  ;;  %v695_v55 = vsub.f32 0.0, %v2405_v28  ;;  %v808_v0 = vmul.f32 1.442695, %v692_v12  ;;  %v1636_v3 = vpop.f32.mrf.mxu1 }
 0x10c   :  { %v1776_v37 = vpop.eup %1775  ;;  %v1002_v21 = vmul.f32 %v1774_v39, %v2157_v35  ;;  %1801 = vrcp.f32 %v845_v9  ;;  %v2414_v35 = vadd.f32 %v2088_v33, %v468_v18  ;;  %v2435_v17 = vadd.f32 %v2088_v33, %v596_v50 }
 0x10d   :  { %v1778_v25 = vpop.eup %1777  ;;  %v1489_v23 = vpack.c.bf16 %v970_v11, %v970_v11  ;;  %v968_v31 = vmul.f32 %v1776_v37, %v2161_v45  ;;  %1803 = vpow2.f32 %v2341_v54  ;;  %v750_v18 = vmul.f32 1.442695, %v663_v56  ;;  %v609_v50 = vpop.f32.mrf.mxu1 }
 0x10e   :  { %v1780_v34 = vpop.eup %1779  ;;  %v1521_v38 = vpack.c.bf16 %v1002_v21, %v1002_v21  ;;  %v1000_v41 = vmul.f32 %v1778_v25, %v2165_v53  ;;  %1805 = vpow2.f32 %v2345_v36  ;;  %v661_v39 = vsub.f32 0.0, %v2414_v35  ;;  %v481_v25 = vpop.f32.mrf.mxu0 }
 0x10f   :  { %v1782_v47 = vpop.eup %1781  ;;  %1291 = vst.msk [vmem:[%s2752_s3 + $0x28] sm:$0xf] %vm1280_vm1, %v1489_v23  ;;  %v1487_v45 = vpack.c.bf16 %v968_v31, %v968_v31  ;;  %v877_v54 = vadd.f32 1.0, %v1780_v34  ;;  %1807 = vpow2.f32 %v2350_v63  ;;  %v2459_v31 = vadd.f32 %v1604_v1, %v2088_v33 }
 0x110   :  { %v1784_v49 = vpop.eup %1783  ;;  %1323 = vst.msk [vmem:[%s2752_s3 + $0xa8] sm:$0xf] %vm1280_vm1, %v1521_v38  ;;  %v1519_v53 = vpack.c.bf16 %v1000_v41, %v1000_v41  ;;  %v971_v36 = vmul.f32 %v1782_v47, %v2169_v2  ;;  %1809 = vpow2.f32 %v2358_v27  ;;  %v2468_v38 = vadd.f32 %v1636_v3, %v2088_v33  ;;  %v1605_v56 = vpop.f32.mrf.mxu0 }
 0x111   :  { %v1786_v58 = vpop.eup %1785  ;;  %1289 = vst.msk [vmem:[%s2752_s3 + $0x20] sm:$0xf] %vm1280_vm1, %v1487_v45  ;;  %v1003_v63 = vmul.f32 %v1784_v49, %v2176_v10  ;;  %1811 = vrcp.f32 %v877_v54  ;;  %v746_v47 = vmul.f32 1.442695, %v661_v39  ;;  %v693_v54 = vsub.f32 0.0, %v2435_v17 }
 0x112   :  { %v1788_v2 = vpop.eup %1787  ;;  %1321 = vst.msk [vmem:[%s2752_s3 + $0xa0] sm:$0xf] %vm1280_vm1, %v1519_v53  ;;  %v1490_v27 = vpack.c.bf16 %v971_v36, %v971_v36  ;;  %v969_v9 = vmul.f32 %v1786_v58, %v2181_v15  ;;  %1813 = vpow2.f32 %v2381_v51  ;;  %v814_v51 = vmul.f32 1.442695, %v695_v55  ;;  %v1637_v36 = vpop.f32.mrf.mxu1 }
 0x113   :  { %v1790_v10 = vpop.eup %1789  ;;  %v1522_v11 = vpack.c.bf16 %v1003_v63, %v1003_v63  ;;  %v1001_v12 = vmul.f32 %v1788_v2, %v2185_v22  ;;  %1815 = vpow2.f32 %v2386_v52  ;;  %v666_v53 = vsub.f32 0.0, %v2459_v31 }
 0x114   :  { %v1792_v37 = vpop.eup %1791  ;;  %1292 = vst.msk [vmem:[%s2752_s3 + $0x2c] sm:$0xf] %vm1280_vm1, %v1490_v27  ;;  %v1488_v21 = vpack.c.bf16 %v969_v9, %v969_v9  ;;  %v974_v15 = vmul.f32 %v1790_v10, %v2190_v29  ;;  %1817 = vpow2.f32 %v2389_v61  ;;  %v698_v1 = vsub.f32 0.0, %v2468_v38  ;;  %v484_v9 = vpop.f32.mrf.mxu0 }
 0x115   :  { %v1794_v23 = vpop.eup %1793  ;;  %1324 = vst.msk [vmem:[%s2752_s3 + $0xac] sm:$0xf] %vm1280_vm1, %v1522_v11  ;;  %v1520_v22 = vpack.c.bf16 %v1001_v12, %v1001_v12  ;;  %v1006_v52 = vmul.f32 %v1792_v37, %v2197_v44  ;;  %1819 = vpow2.f32 %v2392_v62  ;;  %v2507_v27 = vadd.f32 %v2088_v33, %v609_v50  ;;  %v612_v12 = vpop.f32.mrf.mxu1 }
 0x116   :  { %v1796_v29 = vpop.eup %1795  ;;  %1290 = vst.msk [vmem:[%s2752_s3 + $0x24] sm:$0xf] %vm1280_vm1, %v1488_v21  ;;  %v1493_v61 = vpack.c.bf16 %v974_v15, %v974_v15  ;;  %v972_v34 = vmul.f32 %v1794_v23, %v2204_v60  ;;  %1821 = vpow2.f32 %v2394_v7  ;;  %v810_v11 = vmul.f32 1.442695, %v693_v54 }
 0x117   :  { %v1798_v44 = vpop.eup %1797  ;;  %1322 = vst.msk [vmem:[%s2752_s3 + $0xa4] sm:$0xf] %vm1280_vm1, %v1520_v22  ;;  %v1525_v62 = vpack.c.bf16 %v1006_v52, %v1006_v52  ;;  %v1004_v41 = vmul.f32 %v1796_v29, %v2212_v8  ;;  %1823 = vpow2.f32 %v2402_v19  ;;  %v2521_v52 = vmul.f32 1.442695, %v698_v1  ;;  %v1608_v29 = vpop.f32.mrf.mxu0 }
 0x118   :  { %v1800_v45 = vpop.eup %1799  ;;  %1295 = vst.msk [vmem:[%s2752_s3 + $0x38] sm:$0xf] %vm1280_vm1, %v1493_v61  ;;  %v1491_v60 = vpack.c.bf16 %v972_v34, %v972_v34  ;;  %v975_v7 = vmul.f32 %v1798_v44, %v2217_v20  ;;  %1825 = vpow2.f32 %v2409_v26  ;;  %v696_v50 = vsub.f32 0.0, %v2507_v27 }
 0x119   :  { %v1802_v49 = vpop.eup %1801  ;;  %1327 = vst.msk [vmem:[%s2752_s3 + $0xb8] sm:$0xf] %vm1280_vm1, %v1525_v62  ;;  %v1523_v8 = vpack.c.bf16 %v1004_v41, %v1004_v41  ;;  %v1007_v19 = vmul.f32 %v1800_v45, %v2226_v40  ;;  %1827 = vpow2.f32 %v808_v0  ;;  %v2500_v0 = vadd.f32 %v2088_v33, %v481_v25 }
 0x11a   :  { %v1804_v55 = vpop.eup %1803  ;;  %1293 = vst.msk [vmem:[%s2752_s3 + $0x30] sm:$0xf] %vm1280_vm1, %v1491_v60  ;;  %v1494_v20 = vpack.c.bf16 %v975_v7, %v975_v7  ;;  %v973_v26 = vmul.f32 %v1802_v49, %v2231_v48  ;;  %1829 = vpow2.f32 %v750_v18  ;;  %v2525_v62 = vadd.f32 %v1605_v56, %v2088_v33  ;;  %v2542_v49 = vld [vmem:[%s2751_s2] ss:$0 sm:$0xff] }
 0x11b   :  { %v1806_v58 = vpop.eup %1805  ;;  %1325 = vst.msk [vmem:[%s2752_s3 + $0xb0] sm:$0xf] %vm1280_vm1, %v1523_v8  ;;  %v1526_v40 = vpack.c.bf16 %v1007_v19, %v1007_v19  ;;  %v850_v63 = vadd.f32 1.0, %v1804_v55  ;;  %1831 = vpow2.f32 %v814_v51  ;;  %v2518_v51 = vmul.f32 1.442695, %v666_v53  ;;  %v497_v55 = vpop.f32.mrf.mxu0 }
 0x11c   :  { %v1808_v3 = vpop.eup %1807  ;;  %1296 = vst.msk [vmem:[%s2752_s3 + $0x3c] sm:$0xf] %vm1280_vm1, %v1494_v20  ;;  %v1492_v48 = vpack.c.bf16 %v973_v26, %v973_v26  ;;  %v882_v2 = vadd.f32 1.0, %v1806_v58  ;;  %1833 = vpow2.f32 %v746_v47  ;;  %v664_v25 = vsub.f32 0.0, %v2500_v0 }
 0x11d   :  { %v1810_v39 = vpop.eup %1809  ;;  %1328 = vst.msk [vmem:[%s2752_s3 + $0xbc] sm:$0xf] %vm1280_vm1, %v1526_v40  ;;  %1835 = vrcp.f32 %v850_v63  ;;  %v848_v10 = vadd.f32 1.0, %v1808_v3  ;;  %v2528_v45 = vadd.f32 %v1637_v36, %v2088_v33  ;;  %v2531_v60 = vadd.f32 %v2088_v33, %v484_v9 }
 0x11e   :  { %v1812_v18 = vpop.eup %1811  ;;  %1294 = vst.msk [vmem:[%s2752_s3 + $0x34] sm:$0xf] %vm1280_vm1, %v1492_v48  ;;  %1837 = vrcp.f32 %v882_v2  ;;  %v880_v37 = vadd.f32 1.0, %v1810_v39  ;;  %v2537_v56 = vmul.f32 1.442695, %v664_v25  ;;  %v2545_v8 = vadd.f32 %v2542_v49, %v612_v12 }
 0x11f   :  { %v1814_v21 = vpop.eup %1813  ;;  %v1005_v15 = vmul.f32 %v1812_v18, %v2265_v32  ;;  %1839 = vrcp.f32 %v848_v10  ;;  %v1640_v32 = vpop.f32.mrf.mxu1  ;;  %v2547_v53 = vmul.f32 1.442695, %v696_v50  ;;  %v2550_v36 = vadd.f32 %v2542_v49, %v1608_v29 }
 0x120   :  { %v1816_v23 = vpop.eup %1815  ;;  %1841 = vrcp.f32 %v880_v37  ;;  %v851_v22 = vadd.f32 1.0, %v1814_v21  ;;  %v667_v1 = vsub.f32 0.0, %v2525_v62  ;;  %v2554_v58 = vadd.f32 %v2542_v49, %v1640_v32  ;;  %v1609_v50 = vpop.f32.mrf.mxu0 }
 0x121   :  { %v1818_v61 = vpop.eup %1817  ;;  %v1524_v34 = vpack.c.bf16 %v1005_v15, %v1005_v15  ;;  %v883_v44 = vadd.f32 1.0, %v1816_v23  ;;  %1843 = vpow2.f32 %v810_v11  ;;  %v625_v40 = vpop.f32.mrf.mxu1  ;;  %v699_v48 = vsub.f32 0.0, %v2528_v45 }
 0x122   :  { %v1820_v41 = vpop.eup %1819  ;;  %1845 = vrcp.f32 %v851_v22  ;;  %v849_v47 = vadd.f32 1.0, %v1818_v61  ;;  %v665_v2 = vsub.f32 0.0, %v2531_v60  ;;  %v697_v10 = vsub.f32 0.0, %v2545_v8 }
 0x123   :  { %v1822_v7 = vpop.eup %1821  ;;  %1326 = vst.msk [vmem:[%s2752_s3 + $0xb4] sm:$0xf] %vm1280_vm1, %v1524_v34  ;;  %1847 = vrcp.f32 %v883_v44  ;;  %v881_v54 = vadd.f32 1.0, %v1820_v41  ;;  %v2560_v11 = vadd.f32 %v2542_v49, %v497_v55  ;;  %v670_v37 = vsub.f32 0.0, %v2550_v36 }
 0x124   :  { %v1824_v33 = vpop.eup %1823  ;;  %1849 = vrcp.f32 %v849_v47  ;;  %v854_v19 = vadd.f32 1.0, %v1822_v7  ;;  %v2564_v21 = vadd.f32 %v2542_v49, %v625_v40  ;;  %v758_v23 = vmul.f32 1.442695, %v667_v1 }
 0x125   :  { %v1826_v20 = vpop.eup %1825  ;;  %1851 = vrcp.f32 %v881_v54  ;;  %v886_v26 = vadd.f32 1.0, %v1824_v33  ;;  %v702_v22 = vsub.f32 0.0, %v2554_v58  ;;  %v822_v34 = vmul.f32 1.442695, %v699_v48 }
 0x126   :  { %v1828_v63 = vpop.eup %1827  ;;  %1853 = vrcp.f32 %v854_v19  ;;  %v852_v3 = vadd.f32 1.0, %v1826_v20  ;;  %v754_v44 = vmul.f32 1.442695, %v665_v2  ;;  %v818_v47 = vmul.f32 1.442695, %v697_v10  ;;  %v1641_v20 = vpop.f32.mrf.mxu1 }
 0x127   :  { %v1830_v9 = vpop.eup %1829  ;;  %1855 = vrcp.f32 %v886_v26  ;;  %v884_v39 = vadd.f32 1.0, %v1828_v63  ;;  %v668_v7 = vsub.f32 0.0, %v2560_v11  ;;  %v764_v19 = vmul.f32 1.442695, %v670_v37 }
 0x128   :  { %v1832_v12 = vpop.eup %1831  ;;  %1857 = vrcp.f32 %v852_v3  ;;  %v855_v18 = vadd.f32 1.0, %v1830_v9  ;;  %v700_v55 = vsub.f32 0.0, %v2564_v21  ;;  %v828_v63 = vmul.f32 1.442695, %v702_v22 }
 0x129   :  { %v1834_v15 = vpop.eup %1833  ;;  %1859 = vrcp.f32 %v884_v39  ;;  %v887_v25 = vadd.f32 1.0, %v1832_v12  ;;  %v760_v37 = vmul.f32 1.442695, %v668_v7 }
 0x12a   :  { %v1836_v29 = vpop.eup %1835  ;;  %1861 = vrcp.f32 %v855_v18  ;;  %v853_v61 = vadd.f32 1.0, %v1834_v15  ;;  %v824_v15 = vmul.f32 1.442695, %v700_v55 }
 0x12b   :  { %v1838_v32 = vpop.eup %1837  ;;  %v978_v41 = vmul.f32 %v1836_v29, %v2282_v57  ;;  %1863 = vrcp.f32 %v887_v25  ;;  %v500_v57 = vpop.f32.mrf.mxu0 }
 0x12c   :  { %v1840_v54 = vpop.eup %1839  ;;  %v1010_v33 = vmul.f32 %v1838_v32, %v2298_v4  ;;  %1865 = vrcp.f32 %v853_v61  ;;  %v2576_v4 = vadd.f32 %v2542_v49, %v1609_v50  ;;  %v2593_v12 = vadd.f32 %v2542_v49, %v500_v57  ;;  %v628_v50 = vpop.f32.mrf.mxu1 }
 0x12d   :  { %v1842_v26 = vpop.eup %1841  ;;  %v1497_v1 = vpack.c.bf16 %v978_v41, %v978_v41  ;;  %v976_v40 = vmul.f32 %v1840_v54, %v2307_v5  ;;  %1867 = vpow2.f32 %v2518_v51  ;;  %v2584_v51 = vadd.f32 %v2542_v49, %v1641_v20 }
 0x12e   :  { %v1844_v3 = vpop.eup %1843  ;;  %v1529_v48 = vpack.c.bf16 %v1010_v33, %v1010_v33  ;;  %v1008_v2 = vmul.f32 %v1842_v26, %v2321_v13  ;;  %1869 = vpow2.f32 %v2521_v52  ;;  %v671_v22 = vsub.f32 0.0, %v2576_v4 }
 0x12f   :  { %v1846_v9 = vpop.eup %1845  ;;  %1299 = vst.msk [vmem:[%s2752_s3 + $0x48] sm:$0xf] %vm1280_vm1, %v1497_v1  ;;  %v1495_v5 = vpack.c.bf16 %v976_v40, %v976_v40  ;;  %v885_v39 = vadd.f32 1.0, %v1844_v3  ;;  %1871 = vpow2.f32 %v2537_v56  ;;  %v703_v32 = vsub.f32 0.0, %v2584_v51 }
 0x130   :  { %v1848_v10 = vpop.eup %1847  ;;  %1331 = vst.msk [vmem:[%s2752_s3 + $0xc8] sm:$0xf] %vm1280_vm1, %v1529_v48  ;;  %v1527_v13 = vpack.c.bf16 %v1008_v2, %v1008_v2  ;;  %v979_v52 = vmul.f32 %v1846_v9, %v2348_v59  ;;  %1873 = vpow2.f32 %v2547_v53  ;;  %v2620_v33 = vadd.f32 %v2542_v49, %v628_v50 }
 0x131   :  { %v1850_v18 = vpop.eup %1849  ;;  %1297 = vst.msk [vmem:[%s2752_s3 + $0x40] sm:$0xf] %vm1280_vm1, %v1495_v5  ;;  %v1011_v56 = vmul.f32 %v1848_v10, %v2353_v6  ;;  %1875 = vrcp.f32 %v885_v39  ;;  %v766_v20 = vmul.f32 1.442695, %v671_v22 }
 0x132   :  { %v1852_v25 = vpop.eup %1851  ;;  %1329 = vst.msk [vmem:[%s2752_s3 + $0xc0] sm:$0xf] %vm1280_vm1, %v1527_v13  ;;  %v1498_v59 = vpack.c.bf16 %v979_v52, %v979_v52  ;;  %v977_v53 = vmul.f32 %v1850_v18, %v2356_v24  ;;  %1877 = vpow2.f32 %v758_v23  ;;  %v669_v23 = vsub.f32 0.0, %v2593_v12 }
 0x133   :  { %v1854_v29 = vpop.eup %1853  ;;  %v1530_v61 = vpack.c.bf16 %v1011_v56, %v1011_v56  ;;  %v1009_v6 = vmul.f32 %v1852_v25, %v2361_v42  ;;  %1879 = vpow2.f32 %v822_v34  ;;  %v701_v3 = vsub.f32 0.0, %v2620_v33 }
 0x134   :  { %v1856_v41 = vpop.eup %1855  ;;  %1300 = vst.msk [vmem:[%s2752_s3 + $0x4c] sm:$0xf] %vm1280_vm1, %v1498_v59  ;;  %v1496_v7 = vpack.c.bf16 %v977_v53, %v977_v53  ;;  %v982_v24 = vmul.f32 %v1854_v29, %v2369_v43  ;;  %1881 = vpow2.f32 %v754_v44  ;;  %v762_v40 = vmul.f32 1.442695, %v669_v23 }
 0x135   :  { %v1858_v54 = vpop.eup %1857  ;;  %1332 = vst.msk [vmem:[%s2752_s3 + $0xcc] sm:$0xf] %vm1280_vm1, %v1530_v61  ;;  %v1528_v42 = vpack.c.bf16 %v1009_v6, %v1009_v6  ;;  %v1014_v34 = vmul.f32 %v1856_v41, %v2373_v16  ;;  %1883 = vpow2.f32 %v818_v47  ;;  %v830_v47 = vmul.f32 1.442695, %v703_v32 }
 0x136   :  { %v1860_v55 = vpop.eup %1859  ;;  %1298 = vst.msk [vmem:[%s2752_s3 + $0x44] sm:$0xf] %vm1280_vm1, %v1496_v7  ;;  %v1501_v43 = vpack.c.bf16 %v982_v24, %v982_v24  ;;  %v980_v44 = vmul.f32 %v1858_v54, %v2377_v30  ;;  %1885 = vpow2.f32 %v764_v19  ;;  %v826_v18 = vmul.f32 1.442695, %v701_v3 }
 0x137   :  { %v1862_v26 = vpop.eup %1861  ;;  %1330 = vst.msk [vmem:[%s2752_s3 + $0xc4] sm:$0xf] %vm1280_vm1, %v1528_v42  ;;  %v1533_v16 = vpack.c.bf16 %v1014_v34, %v1014_v34  ;;  %v1012_v49 = vmul.f32 %v1860_v55, %v2384_v46  ;;  %1887 = vpow2.f32 %v828_v63 }
 0x138   :  { %v1864_v1 = vpop.eup %1863  ;;  %1303 = vst.msk [vmem:[%s2752_s3 + $0x58] sm:$0xf] %vm1280_vm1, %v1501_v43  ;;  %v1499_v30 = vpack.c.bf16 %v980_v44, %v980_v44  ;;  %v983_v19 = vmul.f32 %v1862_v26, %v2399_v14  ;;  %1889 = vpow2.f32 %v760_v37 }
 0x139   :  { %v1866_v57 = vpop.eup %1865  ;;  %1335 = vst.msk [vmem:[%s2752_s3 + $0xd8] sm:$0xf] %vm1280_vm1, %v1533_v16  ;;  %v1531_v46 = vpack.c.bf16 %v1012_v49, %v1012_v49  ;;  %v1015_v63 = vmul.f32 %v1864_v1, %v2405_v28  ;;  %1891 = vpow2.f32 %v824_v15 }
 0x13a   :  { %v1868_v48 = vpop.eup %1867  ;;  %1301 = vst.msk [vmem:[%s2752_s3 + $0x50] sm:$0xf] %vm1280_vm1, %v1499_v30  ;;  %v1502_v14 = vpack.c.bf16 %v983_v19, %v983_v19  ;;  %v981_v2 = vmul.f32 %v1866_v57, %v2414_v35  ;;  %1893 = vpow2.f32 %v766_v20 }
 0x13b   :  { %v1870_v9 = vpop.eup %1869  ;;  %1333 = vst.msk [vmem:[%s2752_s3 + $0xd0] sm:$0xf] %vm1280_vm1, %v1531_v46  ;;  %v1534_v28 = vpack.c.bf16 %v1015_v63, %v1015_v63  ;;  %v858_v5 = vadd.f32 1.0, %v1868_v48  ;;  %1895 = vpow2.f32 %v830_v47 }
 0x13c   :  { %v1872_v39 = vpop.eup %1871  ;;  %1304 = vst.msk [vmem:[%s2752_s3 + $0x5c] sm:$0xf] %vm1280_vm1, %v1502_v14  ;;  %v1500_v10 = vpack.c.bf16 %v981_v2, %v981_v2  ;;  %v890_v13 = vadd.f32 1.0, %v1870_v9  ;;  %1897 = vpow2.f32 %v762_v40 }
 0x13d   :  { %v1874_v35 = vpop.eup %1873  ;;  %1336 = vst.msk [vmem:[%s2752_s3 + $0xdc] sm:$0xf] %vm1280_vm1, %v1534_v28  ;;  %1899 = vrcp.f32 %v858_v5  ;;  %v856_v52 = vadd.f32 1.0, %v1872_v39 }
 0x13e   :  { %v1876_v56 = vpop.eup %1875  ;;  %1302 = vst.msk [vmem:[%s2752_s3 + $0x54] sm:$0xf] %vm1280_vm1, %v1500_v10  ;;  %1901 = vrcp.f32 %v890_v13  ;;  %v888_v37 = vadd.f32 1.0, %v1874_v35 }
 0x13f   :  { %v1878_v15 = vpop.eup %1877  ;;  %v1013_v25 = vmul.f32 %v1876_v56, %v2435_v17  ;;  %1903 = vrcp.f32 %v856_v52 }
 0x140   :  { %v1880_v59 = vpop.eup %1879  ;;  %1905 = vrcp.f32 %v888_v37  ;;  %v859_v53 = vadd.f32 1.0, %v1878_v15 }
 0x141   :  { %v1882_v22 = vpop.eup %1881  ;;  %v1532_v50 = vpack.c.bf16 %v1013_v25, %v1013_v25  ;;  %v891_v29 = vadd.f32 1.0, %v1880_v59  ;;  %1907 = vpow2.f32 %v826_v18 }
 0x142   :  { %v1884_v61 = vpop.eup %1883  ;;  %1909 = vrcp.f32 %v859_v53  ;;  %v857_v6 = vadd.f32 1.0, %v1882_v22 }
 0x143   :  { %v1886_v32 = vpop.eup %1885  ;;  %1334 = vst.msk [vmem:[%s2752_s3 + $0xd4] sm:$0xf] %vm1280_vm1, %v1532_v50  ;;  %1911 = vrcp.f32 %v891_v29  ;;  %v889_v41 = vadd.f32 1.0, %v1884_v61 }
 0x144   :  { %v1888_v17 = vpop.eup %1887  ;;  %1913 = vrcp.f32 %v857_v6  ;;  %v862_v7 = vadd.f32 1.0, %v1886_v32 }
 0x145   :  { %v1890_v24 = vpop.eup %1889  ;;  %1915 = vrcp.f32 %v889_v41  ;;  %v894_v23 = vadd.f32 1.0, %v1888_v17 }
 0x146   :  { %v1892_v54 = vpop.eup %1891  ;;  %1917 = vrcp.f32 %v862_v7  ;;  %v860_v42 = vadd.f32 1.0, %v1890_v24 }
 0x147   :  { %v1894_v34 = vpop.eup %1893  ;;  %1919 = vrcp.f32 %v894_v23  ;;  %v892_v55 = vadd.f32 1.0, %v1892_v54 }
 0x148   :  { %v1896_v43 = vpop.eup %1895  ;;  %1921 = vrcp.f32 %v860_v42  ;;  %v863_v44 = vadd.f32 1.0, %v1894_v34 }
 0x149   :  { %v1898_v20 = vpop.eup %1897  ;;  %1923 = vrcp.f32 %v892_v55  ;;  %v895_v26 = vadd.f32 1.0, %v1896_v43 }
 0x14a   :  { %v1900_v16 = vpop.eup %1899  ;;  %1925 = vrcp.f32 %v863_v44  ;;  %v861_v49 = vadd.f32 1.0, %v1898_v20 }
 0x14b   :  { %v1902_v47 = vpop.eup %1901  ;;  %v986_v1 = vmul.f32 %v1900_v16, %v2459_v31  ;;  %1927 = vrcp.f32 %v895_v26 }
 0x14c   :  { %v1904_v30 = vpop.eup %1903  ;;  %v1018_v19 = vmul.f32 %v1902_v47, %v2468_v38  ;;  %1929 = vrcp.f32 %v861_v49 }
 0x14d   :  { %v1906_v40 = vpop.eup %1905  ;;  %v1505_v57 = vpack.c.bf16 %v986_v1, %v986_v1  ;;  %v984_v46 = vmul.f32 %v1904_v30, %v2500_v0 }
 0x14e   :  { %v1908_v63 = vpop.eup %1907  ;;  %v1537_v3 = vpack.c.bf16 %v1018_v19, %v1018_v19  ;;  %v1016_v48 = vmul.f32 %v1906_v40, %v2507_v27 }
 0x14f   :  { %v1910_v14 = vpop.eup %1909  ;;  %1307 = vst.msk [vmem:[%s2752_s3 + $0x68] sm:$0xf] %vm1280_vm1, %v1505_v57  ;;  %v1503_v31 = vpack.c.bf16 %v984_v46, %v984_v46  ;;  %v893_v2 = vadd.f32 1.0, %v1908_v63 }
 0x150   :  { %v1912_v9 = vpop.eup %1911  ;;  %1339 = vst.msk [vmem:[%s2752_s3 + $0xe8] sm:$0xf] %vm1280_vm1, %v1537_v3  ;;  %v1535_v38 = vpack.c.bf16 %v1016_v48, %v1016_v48  ;;  %v987_v0 = vmul.f32 %v1910_v14, %v2525_v62 }
 0x151   :  { %v1914_v28 = vpop.eup %1913  ;;  %1305 = vst.msk [vmem:[%s2752_s3 + $0x60] sm:$0xf] %vm1280_vm1, %v1503_v31  ;;  %v1019_v27 = vmul.f32 %v1912_v9, %v2528_v45  ;;  %1931 = vrcp.f32 %v893_v2 }
 0x152   :  { %v1916_v5 = vpop.eup %1915  ;;  %1337 = vst.msk [vmem:[%s2752_s3 + $0xe0] sm:$0xf] %vm1280_vm1, %v1535_v38  ;;  %v1506_v39 = vpack.c.bf16 %v987_v0, %v987_v0  ;;  %v985_v10 = vmul.f32 %v1914_v28, %v2531_v60 }
 0x153   :  { %v1918_v13 = vpop.eup %1917  ;;  %v1538_v62 = vpack.c.bf16 %v1019_v27, %v1019_v27  ;;  %v1017_v35 = vmul.f32 %v1916_v5, %v2545_v8 }
 0x154   :  { %v1920_v52 = vpop.eup %1919  ;;  %1308 = vst.msk [vmem:[%s2752_s3 + $0x6c] sm:$0xf] %vm1280_vm1, %v1506_v39  ;;  %v1504_v45 = vpack.c.bf16 %v985_v10, %v985_v10  ;;  %v990_v18 = vmul.f32 %v1918_v13, %v2550_v36 }
 0x155   :  { %v1922_v56 = vpop.eup %1921  ;;  %1340 = vst.msk [vmem:[%s2752_s3 + $0xec] sm:$0xf] %vm1280_vm1, %v1538_v62  ;;  %v1536_v60 = vpack.c.bf16 %v1017_v35, %v1017_v35  ;;  %v1022_v37 = vmul.f32 %v1920_v52, %v2554_v58 }
 0x156   :  { %v1924_v15 = vpop.eup %1923  ;;  %1306 = vst.msk [vmem:[%s2752_s3 + $0x64] sm:$0xf] %vm1280_vm1, %v1504_v45  ;;  %v1509_v8 = vpack.c.bf16 %v990_v18, %v990_v18  ;;  %v988_v25 = vmul.f32 %v1922_v56, %v2560_v11 }
 0x157   :  { %v1926_v59 = vpop.eup %1925  ;;  %1338 = vst.msk [vmem:[%s2752_s3 + $0xe4] sm:$0xf] %vm1280_vm1, %v1536_v60  ;;  %v1541_v36 = vpack.c.bf16 %v1022_v37, %v1022_v37  ;;  %v1020_v53 = vmul.f32 %v1924_v15, %v2564_v21 }
 0x158   :  { %v1928_v22 = vpop.eup %1927  ;;  %1311 = vst.msk [vmem:[%s2752_s3 + $0x78] sm:$0xf] %vm1280_vm1, %v1509_v8  ;;  %v1507_v58 = vpack.c.bf16 %v988_v25, %v988_v25  ;;  %v991_v50 = vmul.f32 %v1926_v59, %v2576_v4 }
 0x159   :  { %v1930_v29 = vpop.eup %1929  ;;  %1343 = vst.msk [vmem:[%s2752_s3 + $0xf8] sm:$0xf] %vm1280_vm1, %v1541_v36  ;;  %v1539_v11 = vpack.c.bf16 %v1020_v53, %v1020_v53  ;;  %v1023_v61 = vmul.f32 %v1928_v22, %v2584_v51 }
 0x15a   :  { %1309 = vst.msk [vmem:[%s2752_s3 + $0x70] sm:$0xf] %vm1280_vm1, %v1507_v58  ;;  %v1510_v21 = vpack.c.bf16 %v991_v50, %v991_v50  ;;  %v989_v6 = vmul.f32 %v1930_v29, %v2593_v12 }
 0x15b   :  { %1341 = vst.msk [vmem:[%s2752_s3 + $0xf0] sm:$0xf] %vm1280_vm1, %v1539_v11  ;;  %v1542_v4 = vpack.c.bf16 %v1023_v61, %v1023_v61 }
 0x15c   :  { %1312 = vst.msk [vmem:[%s2752_s3 + $0x7c] sm:$0xf] %vm1280_vm1, %v1510_v21  ;;  %v1508_v51 = vpack.c.bf16 %v989_v6, %v989_v6 }
 0x15d   :  { %1344 = vst.msk [vmem:[%s2752_s3 + $0xfc] sm:$0xf] %vm1280_vm1, %v1542_v4 }
 0x15e   :  { %v1932_v32 = vpop.eup %1931  ;;  %1310 = vst.msk [vmem:[%s2752_s3 + $0x74] sm:$0xf] %vm1280_vm1, %v1508_v51 }
 0x15f   :  { %v1021_v12 = vmul.f32 %v1932_v32, %v2620_v33 }
 0x161   :  { %v1540_v41 = vpack.c.bf16 %v1021_v12, %v1021_v12 }
 0x163   :  { %1342 = vst.msk [vmem:[%s2752_s3 + $0xf4] sm:$0xf] %vm1280_vm1, %v1540_v41 }

// kernel: sppcspc_forward_nchw.7
= control target key start
LH: loop header
LB: loop body
LE: loop exit
PB: predicated region body
PF: predicated region fallthrough
CT: control target
= control target key end

     0   :  { %s1689_s12 = smov 0   ;;  %s1691_s13 = smov 0   ;;  %s1997_s0 = inlined_call_operand.vmem [shape: bf16[2,288,96], index: 0, kind: input, shape index: {}]   ;;  %s1998_s1 = inlined_call_operand.vmem [shape: bf16[3,96,32], index: 1, kind: input, shape index: {}]   ;;  %s1999_s2 = inlined_call_operand.vmem [shape: f32[1,32], index: 2, kind: input, shape index: {}]   ;;  %s2000_s3 = inlined_call_operand.vmem [shape: bf16[2,256,32], index: 3, kind: output, shape index: {}]  }
   0x1   :  { %s1693_s14 = smov 0   ;;  %s1695_s15 = smov 0  }
   0x2   :  { %s1697_s16 = smov 0  }
   0x3 LB: > { %s22_s17 = sadd.s32 1, %s1659_s14  ;;  %s25_s18 = sadd.s32 1, %s1663_s15  ;;  %s1667_s16 = sphi %s1697_s16, %s13_s16   ;;  %s1663_s15 = sphi %s1695_s15, %s2005_s15   ;;  %s1659_s14 = sphi %s1693_s14, %s2004_s14   ;;  %s1655_s13 = sphi %s1691_s13, %s2003_s13   ;;  %s1651_s12 = sphi %s1689_s12, %s2002_s12  }
   0x4   : > { %p23_p0 = scmp.ge.s32.totalorder %s22_s17, 2  ;;  %p1201_p1 = scmp.ge.s32.totalorder %s1667_s16, 1 }
   0x5   : > { %p151_p2 = scmp.lt.s32.totalorder %s1667_s16, 5 }
   0x6   : > { %s2007_s17 = smov (%p23_p0, %s22_s17), 0  ;;  %s2009_s18 = smov (!%p23_p0, %s25_s18), %s1663_s15 }
   0x7   : > { %p152_p3 = pnand %p1201_p1, %p151_p2  ;;  %p27_p4 = scmp.ge.s32.totalorder %s2009_s18, 2 }
   0x8   : > { %p179_p5 = scmp.lt.s32.totalorder (!%p152_p3), %s1655_s13, 1  ;;  %s1728_s23 = sshll.u32 (!%p152_p3), %s1651_s12, 7 }
   0x9   : > { %s2011_s18 = smov (%p27_p4, %s2009_s18), 0  ;;  %155 = sbr.rel (%p152_p3) target bundleno = 332 (0x14c), region = 32 }
   0xa   : > { %s1323_s28 = sadd.s32 (!%p152_p3), 16, %s1728_s23  ;;  %s197_s27 = sshra.s32 (!%p152_p3), %s1728_s23, 3 }
   0xb   : > { %s231_s10 = sshra.s32 (!%p152_p3), %s1323_s28, 3  ;;  %s1208_s30 = sshll.u32 (!%p152_p3), %s197_s27, 2 }
   0xc   : > { %s1210_s11 = sshll.u32 (!%p152_p3), %s231_s10, 2  ;;  %s1325_s19 = sadd.s32 (!%p152_p3), 32, %s1728_s23 }
   0xd   : > { %s661_s22 = sshra.s32 (!%p152_p3), %s1325_s19, 3  ;;  %s1203_s7 = sshll.u32 (!%p152_p3), %s1651_s12, 4 }
   0xe   : > { %v1523_v0 = vld [vmem:[%s1998_s1 + $0x58] sm:$0xff]   ;;  %v1524_v1 = vld [vmem:[%s1998_s1 + $0x28] sm:$0xff]   ;;  %v1525_v2 = vld [vmem:[%s1998_s1 + $0x50] sm:$0xff]   ;;  %s2013_s13 = smov (!%p179_p5, %s1655_s13), 1  ;;  %vm340_vm0 = vcmask 785408   ;;  %s1268_s26 = sshll.u32 %s661_s22, 2 }
   0xf   : > { %1386 = vmatprep.subr.bf16.mxu0 %v1523_v0  ;;  %1414 = vmatprep.subr.bf16.mxu1 %v1524_v1  ;;  %v1526_v3 = vld [vmem:[%s1998_s1 + $0x20] sm:$0xff]   ;;  %v1527_v4 = vld [vmem:[%s1998_s1 + $0x48] sm:$0xff]   ;;  %s1482_s4 = smul.u32 144, %s2013_s13  ;;  %v1528_v5 = vld [vmem:[%s1998_s1 + $0x18] sm:$0xff]   ;;  %p1921_p6 = scmp.lt.s32.totalorder %s1203_s7, 31  ;;  %vm1090_vm1 = vcmask 257024  }
  0x10   : > { %1387 = vmatpush3.bf16.msra.mxu0 %v1523_v0  ;;  %1415 = vmatpush3.bf16.msra.mxu1 %v1524_v1  ;;  %v1529_v6 = vld [vmem:[%s1998_s1 + $0x40] sm:$0xff]   ;;  %v1530_v7 = vld [vmem:[%s1998_s1 + $0x10] sm:$0xff]   ;;  %v1531_v8 = vld [vmem:[%s1998_s1 + $0x38] sm:$0xff]   ;;  %s1204_s12 = sshll.u32 %s2013_s13, 5 }
  0x11   : > { %1388 = vmatprep.subr.bf16.mxu0 %v1525_v2  ;;  %1416 = vmatprep.subr.bf16.mxu1 %v1526_v3  ;;  %s1749_s9 = scalar_lea.vmem %s1997_s0, %s1482_s4  ;;  %v1532_v10 = vld [vmem:[%s1998_s1 + $0x8] sm:$0xff]   ;;  %v1533_v12 = vld [vmem:[%s1998_s1 + $0x30] sm:$0xff]   ;;  %v1534_v13 = vld [vmem:[%s1998_s1] sm:$0xff]   ;;  %s2015_s7 = smov (!%p1921_p6, %s1203_s7), 31 }
  0x12   : > { %s1758_s24 = scalar_lea.vmem %s1749_s9, %s1210_s11  ;;  %s1770_s4 = scalar_lea.vmem %s1749_s9, %s1208_s30  ;;  %v1539_v14 = vld [vmem:[%s1998_s1 + $0x88] sm:$0xff]   ;;  %v1540_v17 = vld [vmem:[%s1998_s1 + $0x80] sm:$0xff]   ;;  %v1545_v20 = vld [vmem:[%s1998_s1 + $0x78] sm:$0xff]  }
  0x13   : > { %v1535_v9 = vld [vmem:[%s1758_s24] sm:$0xff]   ;;  %v1537_v15 = vld [vmem:[%s1758_s24 + $0x8] sm:$0xff]   ;;  %v1541_v18 = vld [vmem:[%s1758_s24 + $0x10] sm:$0xff]   ;;  %s1803_s27 = scalar_lea.vmem %s1749_s9, %s1268_s26  ;;  %s190_s10 = sadd.s32 %s1204_s12, %s2015_s7 }
  0x14   : > { %1389 = vmatpush3.bf16.msra.mxu0 %v1525_v2  ;;  %1417 = vmatpush3.bf16.msra.mxu1 %v1526_v3  ;;  %v1536_v11 = vld [vmem:[%s1770_s4] sm:$0xff]   ;;  %v1538_v16 = vld [vmem:[%s1770_s4 + $0x8] sm:$0xff]   ;;  %v1542_v19 = vld [vmem:[%s1770_s4 + $0x10] sm:$0xff]   ;;  %s1205_s11 = sshll.u32 %s190_s10, 2 }
  0x15   : > { %1390 = vmatprep.subr.bf16.mxu0 %v1527_v4  ;;  %1418 = vmatprep.subr.bf16.mxu1 %v1528_v5  ;;  %v1543_v21 = vld [vmem:[%s1758_s24 + $0x18] sm:$0xff]   ;;  %v1546_v23 = vld [vmem:[%s1758_s24 + $0x20] sm:$0xff]   ;;  %v1550_v25 = vld [vmem:[%s1998_s1 + $0x70] sm:$0xff]   ;;  %s1933_s20 = scalar_lea.vmem %s2000_s3, %s1205_s11 }
  0x16   : > { %1398 = vmatprep.mubr.msk.bf16.mxu0 %vm340_vm0, %v1535_v9  ;;  %1426 = vmatprep.mubr.msk.bf16.mxu1 %vm340_vm0, %v1536_v11  ;;  %v1544_v22 = vld [vmem:[%s1770_s4 + $0x18] sm:$0xff]   ;;  %v1547_v24 = vld [vmem:[%s1770_s4 + $0x20] sm:$0xff]   ;;  %v1551_v26 = vld [vmem:[%s1998_s1 + $0x68] sm:$0xff]  }
  0x17   : > { %v1548_v27 = vld [vmem:[%s1758_s24 + $0x28] sm:$0xff]   ;;  %v1552_v29 = vld [vmem:[%s1758_s24 + $0x30] sm:$0xff]   ;;  %v1556_v31 = vld [vmem:[%s1998_s1 + $0x60] sm:$0xff]  }
  0x18   : > { %1391 = vmatpush3.bf16.msra.mxu0 %v1527_v4  ;;  %1419 = vmatpush3.bf16.msra.mxu1 %v1528_v5  ;;  %v1549_v28 = vld [vmem:[%s1770_s4 + $0x28] sm:$0xff]   ;;  %v1553_v30 = vld [vmem:[%s1770_s4 + $0x30] sm:$0xff]   ;;  %v1554_v32 = vld [vmem:[%s1758_s24 + $0x38] sm:$0xff]  }
  0x19   : > { %1392 = vmatprep.subr.bf16.mxu0 %v1529_v6  ;;  %1420 = vmatprep.subr.bf16.mxu1 %v1530_v7  ;;  %v1555_v33 = vld [vmem:[%s1770_s4 + $0x38] sm:$0xff]   ;;  %v1557_v34 = vld [vmem:[%s1803_s27] sm:$0xff]   ;;  %v1559_v36 = vld [vmem:[%s1803_s27 + $0x8] sm:$0xff]  }
  0x1a   : > { %v1558_v35 = vld [vmem:[%s1803_s27 + $0x20] sm:$0xff]   ;;  %v1560_v37 = vld [vmem:[%s1803_s27 + $0x28] sm:$0xff]   ;;  %v1561_v38 = vld [vmem:[%s1803_s27 + $0x10] sm:$0xff]  }
  0x1b   : > { %v1562_v39 = vld [vmem:[%s1803_s27 + $0x30] sm:$0xff]   ;;  %v1563_v40 = vld [vmem:[%s1803_s27 + $0x18] sm:$0xff]  }
  0x1c   : > { %1393 = vmatpush3.bf16.msra.mxu0 %v1529_v6  ;;  %1421 = vmatpush3.bf16.msra.mxu1 %v1530_v7  ;;  %v1564_v41 = vld [vmem:[%s1803_s27 + $0x38] sm:$0xff]  }
  0x1d   : > { %1394 = vmatprep.subr.bf16.mxu0 %v1531_v8  ;;  %1422 = vmatprep.subr.bf16.mxu1 %v1532_v10 }
  0x20   : > { %1395 = vmatpush3.bf16.msra.mxu0 %v1531_v8  ;;  %1423 = vmatpush3.bf16.msra.mxu1 %v1532_v10 }
  0x21   : > { %1396 = vmatprep.subr.bf16.mxu0 %v1533_v12  ;;  %1424 = vmatprep.subr.bf16.mxu1 %v1534_v13 }
  0x24   : > { %1397 = vmatpush3.bf16.msra.mxu0 %v1533_v12  ;;  %1425 = vmatpush3.bf16.msra.mxu1 %v1534_v13 }
  0x25   : > { %1442 = vmatprep.subr.bf16.mxu0 %v1539_v14  ;;  %1470 = vmatprep.subr.bf16.mxu1 %v1539_v14 }
  0x27   : > { %1399 = vmatmul.mubr.msk.bf16.vlgmr.msra.gmra.mxu0 %vm340_vm0, %v1537_v15  ;;  %1427 = vmatmul.mubr.msk.bf16.vlgmr.msra.gmra.mxu1 %vm340_vm0, %v1538_v16  ;;  %v1849_v15 = vld [vmem:[%s1999_s2] ss:$0 sm:$0xff] }
  0x28   : > { %1443 = vmatpush3.bf16.msra.mxu0 %v1539_v14  ;;  %1476 = vmatpush3.bf16.msra.mxu1 %v1539_v14 }
  0x29   : > { %1444 = vmatprep.subr.bf16.mxu0 %v1540_v17  ;;  %1471 = vmatprep.subr.bf16.mxu1 %v1540_v17 }
  0x2a   : > { %1402 = vmatprep.mubr.msk.bf16.mxu0 %vm340_vm0, %v1541_v18  ;;  %1430 = vmatprep.mubr.msk.bf16.mxu1 %vm340_vm0, %v1542_v19 }
  0x2c   : > { %1445 = vmatpush3.bf16.msra.mxu0 %v1540_v17  ;;  %1477 = vmatpush3.bf16.msra.mxu1 %v1540_v17 }
  0x2d   : > { %1446 = vmatprep.subr.bf16.mxu0 %v1545_v20  ;;  %1472 = vmatprep.subr.bf16.mxu1 %v1545_v20 }
  0x2f   : > { %1403 = vmatmul.mubr.msk.bf16.gmra.mxu0 %vm340_vm0, %v1543_v21  ;;  %1431 = vmatmul.mubr.msk.bf16.gmra.mxu1 %vm340_vm0, %v1544_v22 }
  0x30   : > { %1447 = vmatpush3.bf16.msra.mxu0 %v1545_v20  ;;  %1478 = vmatpush3.bf16.msra.mxu1 %v1545_v20 }
  0x31   : > { %1406 = vmatprep.mubr.msk.bf16.mxu0 %vm340_vm0, %v1546_v23  ;;  %1434 = vmatprep.mubr.msk.bf16.mxu1 %vm340_vm0, %v1547_v24 }
  0x32   : > { %1448 = vmatprep.subr.bf16.mxu0 %v1550_v25  ;;  %1473 = vmatprep.subr.bf16.mxu1 %v1550_v25 }
  0x34   : > { %1449 = vmatpush3.bf16.msra.mxu0 %v1550_v25  ;;  %1479 = vmatpush3.bf16.msra.mxu1 %v1550_v25 }
  0x35   : > { %1450 = vmatprep.subr.bf16.mxu0 %v1551_v26  ;;  %1474 = vmatprep.subr.bf16.mxu1 %v1551_v26 }
  0x37   : > { %1407 = vmatmul.mubr.msk.bf16.gmra.mxu0 %vm340_vm0, %v1548_v27  ;;  %1435 = vmatmul.mubr.msk.bf16.gmra.mxu1 %vm340_vm0, %v1549_v28 }
  0x38   : > { %1410 = vmatprep.mubr.msk.bf16.mxu0 %vm340_vm0, %v1552_v29  ;;  %1438 = vmatprep.mubr.msk.bf16.mxu1 %vm340_vm0, %v1553_v30 }
  0x39   : > { %1451 = vmatpush3.bf16.msra.mxu0 %v1551_v26  ;;  %1480 = vmatpush3.bf16.msra.mxu1 %v1551_v26 }
  0x3a   : > { %1452 = vmatprep.subr.bf16.mxu0 %v1556_v31  ;;  %1475 = vmatprep.subr.bf16.mxu1 %v1556_v31 }
  0x3d   : > { %1453 = vmatpush3.bf16.msra.mxu0 %v1556_v31  ;;  %1481 = vmatpush3.bf16.msra.mxu1 %v1556_v31 }
  0x3f   : > { %1411 = vmatmul.mubr.msk.bf16.gmra.mxu0 %vm340_vm0, %v1554_v32  ;;  %1439 = vmatmul.mubr.msk.bf16.gmra.mxu1 %vm340_vm0, %v1555_v33 }
  0x40   : > { %1454 = vmatprep.mubr.msk.bf16.mxu0 %vm340_vm0, %v1557_v34  ;;  %1462 = vmatprep.mubr.msk.bf16.mxu1 %vm340_vm0, %v1558_v35 }
  0x47   : > { %1455 = vmatmul.mubr.msk.bf16.vlgmr.msra.gmra.mxu0 %vm340_vm0, %v1559_v36  ;;  %1463 = vmatmul.mubr.msk.bf16.vlgmr.msra.gmra.mxu1 %vm340_vm0, %v1560_v37 }
  0x48   : > { %1458 = vmatprep.mubr.msk.bf16.mxu0 %vm340_vm0, %v1561_v38  ;;  %1466 = vmatprep.mubr.msk.bf16.mxu1 %vm340_vm0, %v1562_v39 }
  0x4f   : > { %1459 = vmatmul.mubr.msk.bf16.gmra.mxu0 %vm340_vm0, %v1563_v40  ;;  %1467 = vmatmul.mubr.msk.bf16.gmra.mxu1 %vm340_vm0, %v1564_v41 }
  0xe7   : > { %v1400_v42 = vpop.f32.mrf.mxu0  ;;  %v1428_v43 = vpop.f32.mrf.mxu1 }
  0xe8   : > { %v605_v9 = vadd.f32 %v1428_v43, %v1400_v42 }
  0xe9   : > { %v399_v44 = vpop.f32.mrf.mxu0  ;;  %v596_v45 = vpop.f32.mrf.mxu1 }
  0xea   : > { %v597_v11 = vadd.f32 %v596_v45, %v399_v44 }
  0xeb   : > { %v1401_v46 = vpop.f32.mrf.mxu0  ;;  %v1429_v47 = vpop.f32.mrf.mxu1 }
  0xec   : > { %v608_v12 = vadd.f32 %v1429_v47, %v1401_v46 }
  0xed   : > { %v402_v48 = vpop.f32.mrf.mxu0  ;;  %v599_v49 = vpop.f32.mrf.mxu1 }
  0xee   : > { %v600_v16 = vadd.f32 %v599_v49, %v402_v48 }
  0xef   : > { %v1404_v50 = vpop.f32.mrf.mxu0  ;;  %v1432_v51 = vpop.f32.mrf.mxu1 }
  0xf0   : > { %v621_v17 = vadd.f32 %v1432_v51, %v1404_v50 }
  0xf1   : > { %v415_v52 = vpop.f32.mrf.mxu0  ;;  %v612_v53 = vpop.f32.mrf.mxu1 }
  0xf2   : > { %v613_v18 = vadd.f32 %v612_v53, %v415_v52 }
  0xf3   : > { %v1405_v54 = vpop.f32.mrf.mxu0  ;;  %v1433_v55 = vpop.f32.mrf.mxu1 }
  0xf4   : > { %v1851_v21 = vadd.f32 %v1433_v55, %v1405_v54 }
  0xf5   : > { %v418_v56 = vpop.f32.mrf.mxu0  ;;  %v615_v57 = vpop.f32.mrf.mxu1 }
  0xf6   : > { %v1853_v22 = vadd.f32 %v615_v57, %v418_v56 }
  0xf7   : > { %v1408_v58 = vpop.f32.mrf.mxu0  ;;  %v1436_v59 = vpop.f32.mrf.mxu1 }
  0xf8   : > { %v637_v13 = vadd.f32 %v1436_v59, %v1408_v58 }
  0xf9   : > { %v431_v60 = vpop.f32.mrf.mxu0  ;;  %v628_v61 = vpop.f32.mrf.mxu1 }
  0xfa   : > { %v629_v23 = vadd.f32 %v628_v61, %v431_v60 }
  0xfb   : > { %v1409_v62 = vpop.f32.mrf.mxu0  ;;  %v1437_v63 = vpop.f32.mrf.mxu1 }
  0xfc   : > { %v640_v26 = vadd.f32 %v1437_v63, %v1409_v62 }
  0xfd   : > { %v434_v0 = vpop.f32.mrf.mxu0  ;;  %v631_v1 = vpop.f32.mrf.mxu1 }
  0xfe   : > { %v632_v27 = vadd.f32 %v631_v1, %v434_v0 }
  0xff   : > { %v1412_v2 = vpop.f32.mrf.mxu0  ;;  %v1440_v3 = vpop.f32.mrf.mxu1 }
 0x100   : > { %v653_v31 = vadd.f32 %v1440_v3, %v1412_v2 }
 0x101   : > { %v447_v4 = vpop.f32.mrf.mxu0  ;;  %v644_v5 = vpop.f32.mrf.mxu1 }
 0x102   : > { %v645_v32 = vadd.f32 %v644_v5, %v447_v4 }
 0x103   : > { %v1413_v6 = vpop.f32.mrf.mxu0  ;;  %v1441_v7 = vpop.f32.mrf.mxu1 }
 0x104   : > { %v656_v36 = vadd.f32 %v1441_v7, %v1413_v6 }
 0x105   : > { %v450_v8 = vpop.f32.mrf.mxu0  ;;  %v647_v10 = vpop.f32.mrf.mxu1 }
 0x106   : > { %v648_v41 = vadd.f32 %v647_v10, %v450_v8 }
 0x107   : > { %v1456_v14 = vpop.f32.mrf.mxu0  ;;  %v1464_v20 = vpop.f32.mrf.mxu1 }
 0x108   : > { %v893_v19 = vadd.f32 %v1456_v14, %v605_v9  ;;  %v901_v24 = vadd.f32 %v1464_v20, %v637_v13 }
 0x109   : > { %v828_v25 = vpop.f32.mrf.mxu0  ;;  %v860_v30 = vpop.f32.mrf.mxu1 }
 0x10a   : > { %v1856_v28 = vadd.f32 %v1849_v15, %v893_v19  ;;  %v891_v29 = vadd.f32 %v828_v25, %v597_v11  ;;  %v1859_v33 = vadd.f32 %v1849_v15, %v901_v24  ;;  %v899_v34 = vadd.f32 %v860_v30, %v629_v23 }
 0x10b   : > { %v1457_v35 = vpop.f32.mrf.mxu0  ;;  %v1465_v40 = vpop.f32.mrf.mxu1 }
 0x10c   : > { %v932_v37 = vsub.f32 0.0, %v1856_v28  ;;  %v1863_v38 = vadd.f32 %v1849_v15, %v891_v29  ;;  %v894_v39 = vadd.f32 %v1457_v35, %v608_v12  ;;  %v940_v42 = vsub.f32 0.0, %v1859_v33 }
 0x10d   : > { %v1867_v43 = vadd.f32 %v1849_v15, %v899_v34  ;;  %v902_v44 = vadd.f32 %v1465_v40, %v640_v26  ;;  %v831_v45 = vpop.f32.mrf.mxu0  ;;  %v863_v50 = vpop.f32.mrf.mxu1 }
 0x10e   : > { %v950_v46 = vmul.f32 1.442695, %v932_v37  ;;  %v930_v47 = vsub.f32 0.0, %v1863_v38  ;;  %v1871_v48 = vadd.f32 %v1849_v15, %v894_v39  ;;  %v892_v49 = vadd.f32 %v831_v45, %v600_v16 }
 0x10f   : > { %v966_v51 = vmul.f32 1.442695, %v940_v42  ;;  %v938_v52 = vsub.f32 0.0, %v1867_v43  ;;  %v1875_v53 = vadd.f32 %v1849_v15, %v902_v44  ;;  %v900_v54 = vadd.f32 %v863_v50, %v632_v27  ;;  %v1460_v55 = vpop.f32.mrf.mxu0  ;;  %v1468_v59 = vpop.f32.mrf.mxu1 }
 0x110   : > { %1565 = vpow2.f32 %v950_v46  ;;  %v946_v56 = vmul.f32 1.442695, %v930_v47  ;;  %v933_v57 = vsub.f32 0.0, %v1871_v48  ;;  %v1879_v58 = vadd.f32 %v1849_v15, %v892_v49 }
 0x111   : > { %1567 = vpow2.f32 %v966_v51  ;;  %v962_v60 = vmul.f32 1.442695, %v938_v52  ;;  %v941_v61 = vsub.f32 0.0, %v1875_v53  ;;  %v1883_v62 = vadd.f32 %v1849_v15, %v900_v54  ;;  %v844_v63 = vpop.f32.mrf.mxu0  ;;  %v876_v3 = vpop.f32.mrf.mxu1 }
 0x112   : > { %1569 = vpow2.f32 %v946_v56  ;;  %v952_v0 = vmul.f32 1.442695, %v933_v57  ;;  %v931_v1 = vsub.f32 0.0, %v1879_v58  ;;  %v897_v2 = vadd.f32 %v1460_v55, %v621_v17 }
 0x113   : > { %1571 = vpow2.f32 %v962_v60  ;;  %v968_v4 = vmul.f32 1.442695, %v941_v61  ;;  %v939_v5 = vsub.f32 0.0, %v1883_v62  ;;  %v905_v6 = vadd.f32 %v1468_v59, %v653_v31  ;;  %v1461_v7 = vpop.f32.mrf.mxu0  ;;  %v1469_v11 = vpop.f32.mrf.mxu1 }
 0x114   : > { %1573 = vpow2.f32 %v952_v0  ;;  %v948_v8 = vmul.f32 1.442695, %v931_v1  ;;  %v1888_v9 = vadd.f32 %v1849_v15, %v897_v2  ;;  %v895_v10 = vadd.f32 %v844_v63, %v613_v18 }
 0x115   : > { %1575 = vpow2.f32 %v968_v4  ;;  %v964_v12 = vmul.f32 1.442695, %v939_v5  ;;  %v1891_v13 = vadd.f32 %v1849_v15, %v905_v6  ;;  %v903_v14 = vadd.f32 %v876_v3, %v645_v32  ;;  %v847_v16 = vpop.f32.mrf.mxu0  ;;  %v879_v23 = vpop.f32.mrf.mxu1 }
 0x116   : > { %1577 = vpow2.f32 %v948_v8  ;;  %v936_v17 = vsub.f32 0.0, %v1888_v9  ;;  %v1895_v19 = vadd.f32 %v1849_v15, %v895_v10  ;;  %v898_v20 = vadd.f32 %v1461_v7, %v1851_v21 }
 0x117   : > { %1579 = vpow2.f32 %v964_v12  ;;  %v944_v18 = vsub.f32 0.0, %v1891_v13  ;;  %v1900_v24 = vadd.f32 %v1849_v15, %v903_v14  ;;  %v906_v25 = vadd.f32 %v1469_v11, %v656_v36 }
 0x118   : > { %v958_v26 = vmul.f32 1.442695, %v936_v17  ;;  %v934_v27 = vsub.f32 0.0, %v1895_v19  ;;  %v1904_v29 = vadd.f32 %v1849_v15, %v898_v20  ;;  %v896_v30 = vadd.f32 %v847_v16, %v1853_v22 }
 0x119   : > { %v974_v31 = vmul.f32 1.442695, %v944_v18  ;;  %v942_v32 = vsub.f32 0.0, %v1900_v24  ;;  %v1909_v21 = vadd.f32 %v1849_v15, %v906_v25  ;;  %v904_v34 = vadd.f32 %v879_v23, %v648_v41 }
 0x11a   : > { %1581 = vpow2.f32 %v958_v26  ;;  %v954_v35 = vmul.f32 1.442695, %v934_v27  ;;  %v937_v36 = vsub.f32 0.0, %v1904_v29  ;;  %v1914_v22 = vadd.f32 %v1849_v15, %v896_v30 }
 0x11b   : > { %1583 = vpow2.f32 %v974_v31  ;;  %v970_v37 = vmul.f32 1.442695, %v942_v32  ;;  %v945_v39 = vsub.f32 0.0, %v1909_v21  ;;  %v1917_v45 = vadd.f32 %v1849_v15, %v904_v34 }
 0x11c   : > { %1585 = vpow2.f32 %v954_v35  ;;  %v960_v40 = vmul.f32 1.442695, %v937_v36  ;;  %v935_v52 = vsub.f32 0.0, %v1914_v22 }
 0x11d   : > { %v1566_v42 = vpop.eup %1565  ;;  %1587 = vpow2.f32 %v970_v37  ;;  %v976_v44 = vmul.f32 1.442695, %v945_v39  ;;  %v943_v55 = vsub.f32 0.0, %v1917_v45 }
 0x11e   : > { %v1568_v41 = vpop.eup %1567  ;;  %v980_v46 = vadd.f32 1.0, %v1566_v42  ;;  %1589 = vpow2.f32 %v960_v40  ;;  %v956_v0 = vmul.f32 1.442695, %v935_v52 }
 0x11f   : > { %v1570_v47 = vpop.eup %1569  ;;  %v988_v49 = vadd.f32 1.0, %v1568_v41  ;;  %1591 = vpow2.f32 %v976_v44  ;;  %v972_v2 = vmul.f32 1.442695, %v943_v55 }
 0x120   : > { %v1572_v50 = vpop.eup %1571  ;;  %1593 = vrcp.f32 %v980_v46  ;;  %v978_v51 = vadd.f32 1.0, %v1570_v47 }
 0x121   : > { %v1574_v54 = vpop.eup %1573  ;;  %1595 = vrcp.f32 %v988_v49  ;;  %v986_v15 = vadd.f32 1.0, %v1572_v50 }
 0x122   : > { %v1576_v56 = vpop.eup %1575  ;;  %1597 = vrcp.f32 %v978_v51  ;;  %v981_v57 = vadd.f32 1.0, %v1574_v54 }
 0x123   : > { %v1578_v59 = vpop.eup %1577  ;;  %1599 = vrcp.f32 %v986_v15  ;;  %v989_v60 = vadd.f32 1.0, %v1576_v56 }
 0x124   : > { %v1580_v61 = vpop.eup %1579  ;;  %1601 = vrcp.f32 %v981_v57  ;;  %v979_v63 = vadd.f32 1.0, %v1578_v59 }
 0x125   : > { %1603 = vrcp.f32 %v989_v60  ;;  %v987_v1 = vadd.f32 1.0, %v1580_v61 }
 0x126   : > { %1605 = vrcp.f32 %v979_v63 }
 0x127   : > { %v1582_v3 = vpop.eup %1581  ;;  %1607 = vrcp.f32 %v987_v1 }
 0x128   : > { %v1584_v4 = vpop.eup %1583  ;;  %v984_v5 = vadd.f32 1.0, %v1582_v3  ;;  %1609 = vpow2.f32 %v956_v0 }
 0x129   : > { %v1586_v6 = vpop.eup %1585  ;;  %v992_v7 = vadd.f32 1.0, %v1584_v4  ;;  %1611 = vpow2.f32 %v972_v2 }
 0x12a   : > { %v1588_v8 = vpop.eup %1587  ;;  %1613 = vrcp.f32 %v984_v5  ;;  %v982_v10 = vadd.f32 1.0, %v1586_v6 }
 0x12b   : > { %v1590_v11 = vpop.eup %1589  ;;  %1615 = vrcp.f32 %v992_v7  ;;  %v990_v12 = vadd.f32 1.0, %v1588_v8 }
 0x12c   : > { %v1592_v14 = vpop.eup %1591  ;;  %1617 = vrcp.f32 %v982_v10  ;;  %v985_v16 = vadd.f32 1.0, %v1590_v11 }
 0x12d   : > { %v1594_v17 = vpop.eup %1593  ;;  %1619 = vrcp.f32 %v990_v12  ;;  %v993_v20 = vadd.f32 1.0, %v1592_v14 }
 0x12e   : > { %v1596_v23 = vpop.eup %1595  ;;  %v1012_v18 = vmul.f32 %v1594_v17, %v1856_v28  ;;  %1621 = vrcp.f32 %v985_v16 }
 0x12f   : > { %v1598_v25 = vpop.eup %1597  ;;  %v1020_v26 = vmul.f32 %v1596_v23, %v1859_v33  ;;  %1623 = vrcp.f32 %v993_v20 }
 0x130   : > { %v1600_v27 = vpop.eup %1599  ;;  %v1328_v30 = vpack.c.bf16 %v1012_v18, %v1012_v18  ;;  %v1010_v31 = vmul.f32 %v1598_v25, %v1863_v38 }
 0x131   : > { %v1602_v32 = vpop.eup %1601  ;;  %v1336_v28 = vpack.c.bf16 %v1020_v26, %v1020_v26  ;;  %v1018_v34 = vmul.f32 %v1600_v27, %v1867_v43 }
 0x132   : > { %v1604_v35 = vpop.eup %1603  ;;  %1093 = vst.msk [vmem:[%s1933_s20 + $0x8] sm:$0xf] %vm1090_vm1, %v1328_v30  ;;  %v1326_v36 = vpack.c.bf16 %v1010_v31, %v1010_v31  ;;  %v1013_v37 = vmul.f32 %v1602_v32, %v1871_v48 }
 0x133   : > { %v1606_v39 = vpop.eup %1605  ;;  %1101 = vst.msk [vmem:[%s1933_s20 + $0x28] sm:$0xf] %vm1090_vm1, %v1336_v28  ;;  %v1334_v33 = vpack.c.bf16 %v1018_v34, %v1018_v34  ;;  %v1021_v40 = vmul.f32 %v1604_v35, %v1875_v53 }
 0x134   : > { %v1608_v38 = vpop.eup %1607  ;;  %1091 = vst.msk [vmem:[%s1933_s20] sm:$0xf] %vm1090_vm1, %v1326_v36  ;;  %v1329_v42 = vpack.c.bf16 %v1013_v37, %v1013_v37  ;;  %v1011_v43 = vmul.f32 %v1606_v39, %v1879_v58 }
 0x135   : > { %v1610_v44 = vpop.eup %1609  ;;  %1099 = vst.msk [vmem:[%s1933_s20 + $0x20] sm:$0xf] %vm1090_vm1, %v1334_v33  ;;  %v1337_v41 = vpack.c.bf16 %v1021_v40, %v1021_v40  ;;  %v1019_v48 = vmul.f32 %v1608_v38, %v1883_v62 }
 0x136   : > { %v1612_v46 = vpop.eup %1611  ;;  %1094 = vst.msk [vmem:[%s1933_s20 + $0xc] sm:$0xf] %vm1090_vm1, %v1329_v42  ;;  %v1327_v47 = vpack.c.bf16 %v1011_v43, %v1011_v43  ;;  %v983_v49 = vadd.f32 1.0, %v1610_v44 }
 0x137   : > { %v1614_v53 = vpop.eup %1613  ;;  %1102 = vst.msk [vmem:[%s1933_s20 + $0x2c] sm:$0xf] %vm1090_vm1, %v1337_v41  ;;  %v1335_v50 = vpack.c.bf16 %v1019_v48, %v1019_v48  ;;  %v991_v51 = vadd.f32 1.0, %v1612_v46 }
 0x138   : > { %v1616_v52 = vpop.eup %1615  ;;  %1092 = vst.msk [vmem:[%s1933_s20 + $0x4] sm:$0xf] %vm1090_vm1, %v1327_v47  ;;  %v1016_v58 = vmul.f32 %v1614_v53, %v1888_v9  ;;  %1625 = vrcp.f32 %v983_v49 }
 0x139   : > { %v1618_v54 = vpop.eup %1617  ;;  %1100 = vst.msk [vmem:[%s1933_s20 + $0x24] sm:$0xf] %vm1090_vm1, %v1335_v50  ;;  %v1024_v62 = vmul.f32 %v1616_v52, %v1891_v13  ;;  %1627 = vrcp.f32 %v991_v51 }
 0x13a   : > { %v1620_v15 = vpop.eup %1619  ;;  %v1332_v55 = vpack.c.bf16 %v1016_v58, %v1016_v58  ;;  %v1014_v56 = vmul.f32 %v1618_v54, %v1895_v19 }
 0x13b   : > { %v1622_v57 = vpop.eup %1621  ;;  %v1340_v59 = vpack.c.bf16 %v1024_v62, %v1024_v62  ;;  %v1022_v9 = vmul.f32 %v1620_v15, %v1900_v24 }
 0x13c   : > { %v1624_v60 = vpop.eup %1623  ;;  %1097 = vst.msk [vmem:[%s1933_s20 + $0x18] sm:$0xf] %vm1090_vm1, %v1332_v55  ;;  %v1330_v61 = vpack.c.bf16 %v1014_v56, %v1014_v56  ;;  %v1017_v63 = vmul.f32 %v1622_v57, %v1904_v29 }
 0x13d   : > { %1105 = vst.msk [vmem:[%s1933_s20 + $0x38] sm:$0xf] %vm1090_vm1, %v1340_v59  ;;  %v1338_v13 = vpack.c.bf16 %v1022_v9, %v1022_v9  ;;  %v1025_v0 = vmul.f32 %v1624_v60, %v1909_v21 }
 0x13e   : > { %1095 = vst.msk [vmem:[%s1933_s20 + $0x10] sm:$0xf] %vm1090_vm1, %v1330_v61  ;;  %v1333_v19 = vpack.c.bf16 %v1017_v63, %v1017_v63 }
 0x13f   : > { %1103 = vst.msk [vmem:[%s1933_s20 + $0x30] sm:$0xf] %vm1090_vm1, %v1338_v13  ;;  %v1341_v1 = vpack.c.bf16 %v1025_v0, %v1025_v0 }
 0x140   : > { %1098 = vst.msk [vmem:[%s1933_s20 + $0x1c] sm:$0xf] %vm1090_vm1, %v1333_v19 }
 0x141   : > { %1106 = vst.msk [vmem:[%s1933_s20 + $0x3c] sm:$0xf] %vm1090_vm1, %v1341_v1 }
 0x145   : > { %v1626_v24 = vpop.eup %1625 }
 0x146   : > { %v1628_v2 = vpop.eup %1627  ;;  %v1015_v29 = vmul.f32 %v1626_v24, %v1914_v22 }
 0x147   : > { %v1023_v3 = vmul.f32 %v1628_v2, %v1917_v45 }
 0x148   : > { %v1331_v4 = vpack.c.bf16 %v1015_v29, %v1015_v29 }
 0x149   : > { %v1339_v5 = vpack.c.bf16 %v1023_v3, %v1023_v3 }
 0x14a   : > { %1096 = vst.msk [vmem:[%s1933_s20 + $0x14] sm:$0xf] %vm1090_vm1, %v1331_v4 }
 0x14b   : > { %1104 = vst.msk [vmem:[%s1933_s20 + $0x34] sm:$0xf] %vm1090_vm1, %v1339_v5 }
 0x14c PF: > { %s13_s16 = sadd.s32 1, %s1667_s16   ;;  %s2002_s12 = smov %s1659_s14 }
 0x14d   : > { %p10_p7 = scmp.ge.s32.totalorder %s13_s16, 6   ;;  %s2003_s13 = smov %s1663_s15 }
 0x14e   : > { %s2004_s14 = smov %s2007_s17  ;;  %s2005_s15 = smov %s2011_s18 }
 0x14f   :  { %12 = sbr.rel (!%p10_p7) target bundleno = 3 (0x3), region = 67 }

// kernel: sppcspc_forward_nchw.8
= control target key start
LH: loop header
LB: loop body
LE: loop exit
PB: predicated region body
PF: predicated region fallthrough
CT: control target
= control target key end

     0   :  { %vm262_vm0 = vcmask 261120   ;;  %vm1288_vm1 = vcmask 257024   ;;  %s2767_s1 = inlined_call_operand.vmem [shape: bf16[32,32], index: 1, kind: input, shape index: {}]   ;;  %s2768_s0 = inlined_call_operand.vmem [shape: bf16[512,32], index: 0, kind: input, shape index: {}]   ;;  %s2769_s2 = inlined_call_operand.vmem [shape: f32[1,32], index: 2, kind: input, shape index: {}]   ;;  %s2770_s3 = inlined_call_operand.vmem [shape: bf16[512,32], index: 3, kind: output, shape index: {}]  }
   0x1   :  { %v1658_v0 = vld [vmem:[%s2767_s1 + $0x8] sm:$0xff]   ;;  %v1659_v1 = vld [vmem:[%s2767_s1] sm:$0xff]   ;;  %v1664_v6 = vld [vmem:[%s2768_s0 + $0x10] sm:$0xff]  }
   0x2   :  { %1586 = vmatprep.subr.bf16.mxu0 %v1658_v0  ;;  %1654 = vmatprep.subr.bf16.mxu1 %v1658_v0  ;;  %v1660_v2 = vld [vmem:[%s2768_s0] sm:$0xff]   ;;  %v1662_v4 = vld [vmem:[%s2768_s0 + $0x8] sm:$0xff]   ;;  %v1665_v7 = vld [vmem:[%s2768_s0 + $0x90] sm:$0xff]  }
   0x3   :  { %1587 = vmatpush3.bf16.msra.mxu0 %v1658_v0  ;;  %1656 = vmatpush3.bf16.msra.mxu1 %v1658_v0  ;;  %v1661_v3 = vld [vmem:[%s2768_s0 + $0x80] sm:$0xff]   ;;  %v1663_v5 = vld [vmem:[%s2768_s0 + $0x88] sm:$0xff]   ;;  %v1666_v8 = vld [vmem:[%s2768_s0 + $0x18] sm:$0xff]  }
   0x4   :  { %1588 = vmatprep.subr.bf16.mxu0 %v1659_v1  ;;  %1655 = vmatprep.subr.bf16.mxu1 %v1659_v1  ;;  %v1667_v9 = vld [vmem:[%s2768_s0 + $0x98] sm:$0xff]   ;;  %v1668_v10 = vld [vmem:[%s2768_s0 + $0x20] sm:$0xff]   ;;  %v1670_v12 = vld [vmem:[%s2768_s0 + $0x28] sm:$0xff]  }
   0x5   :  { %1590 = vmatprep.mubr.msk.bf16.mxu0 %vm262_vm0, %v1660_v2  ;;  %1622 = vmatprep.mubr.msk.bf16.mxu1 %vm262_vm0, %v1661_v3  ;;  %v1669_v11 = vld [vmem:[%s2768_s0 + $0xa0] sm:$0xff]   ;;  %v1671_v13 = vld [vmem:[%s2768_s0 + $0xa8] sm:$0xff]   ;;  %v1672_v14 = vld [vmem:[%s2768_s0 + $0x30] sm:$0xff]  }
   0x6   :  { %v1673_v15 = vld [vmem:[%s2768_s0 + $0xb0] sm:$0xff]   ;;  %v1674_v16 = vld [vmem:[%s2768_s0 + $0x38] sm:$0xff]   ;;  %v1676_v18 = vld [vmem:[%s2768_s0 + $0x40] sm:$0xff]  }
   0x7   :  { %1589 = vmatpush3.bf16.msra.mxu0 %v1659_v1  ;;  %1657 = vmatpush3.bf16.msra.mxu1 %v1659_v1  ;;  %v1675_v17 = vld [vmem:[%s2768_s0 + $0xb8] sm:$0xff]   ;;  %v1677_v19 = vld [vmem:[%s2768_s0 + $0xc0] sm:$0xff]   ;;  %v1678_v20 = vld [vmem:[%s2768_s0 + $0x48] sm:$0xff]  }
   0x8   :  { %v1679_v21 = vld [vmem:[%s2768_s0 + $0xc8] sm:$0xff]   ;;  %v1680_v22 = vld [vmem:[%s2768_s0 + $0x50] sm:$0xff]   ;;  %v1682_v24 = vld [vmem:[%s2768_s0 + $0x58] sm:$0xff]  }
   0x9   :  { %v1681_v23 = vld [vmem:[%s2768_s0 + $0xd0] sm:$0xff]   ;;  %v1683_v25 = vld [vmem:[%s2768_s0 + $0xd8] sm:$0xff]   ;;  %v1684_v26 = vld [vmem:[%s2768_s0 + $0x60] sm:$0xff]  }
   0xa   :  { %1591 = vmatmul.mubr.msk.bf16.vlgmr.msra.gmra.mxu0 %vm262_vm0, %v1662_v4  ;;  %1623 = vmatmul.mubr.msk.bf16.vlgmr.msra.gmra.mxu1 %vm262_vm0, %v1663_v5  ;;  %v1685_v27 = vld [vmem:[%s2768_s0 + $0xe0] sm:$0xff]   ;;  %v1686_v28 = vld [vmem:[%s2768_s0 + $0x68] sm:$0xff]   ;;  %v1688_v30 = vld [vmem:[%s2768_s0 + $0x70] sm:$0xff]  }
   0xb   :  { %1594 = vmatprep.mubr.msk.bf16.mxu0 %vm262_vm0, %v1664_v6  ;;  %1626 = vmatprep.mubr.msk.bf16.mxu1 %vm262_vm0, %v1665_v7  ;;  %v1687_v29 = vld [vmem:[%s2768_s0 + $0xe8] sm:$0xff]   ;;  %v1689_v31 = vld [vmem:[%s2768_s0 + $0xf0] sm:$0xff]   ;;  %v1690_v32 = vld [vmem:[%s2768_s0 + $0x78] sm:$0xff]  }
   0xc   :  { %v1691_v33 = vld [vmem:[%s2768_s0 + $0xf8] sm:$0xff]   ;;  %v2106_v34 = vld [vmem:[%s2769_s2] ss:$0 sm:$0xff] }
  0x12   :  { %1595 = vmatmul.mubr.msk.bf16.gmra.mxu0 %vm262_vm0, %v1666_v8  ;;  %1627 = vmatmul.mubr.msk.bf16.gmra.mxu1 %vm262_vm0, %v1667_v9 }
  0x13   :  { %1598 = vmatprep.mubr.msk.bf16.mxu0 %vm262_vm0, %v1668_v10  ;;  %1630 = vmatprep.mubr.msk.bf16.mxu1 %vm262_vm0, %v1669_v11 }
  0x1a   :  { %1599 = vmatmul.mubr.msk.bf16.gmra.mxu0 %vm262_vm0, %v1670_v12  ;;  %1631 = vmatmul.mubr.msk.bf16.gmra.mxu1 %vm262_vm0, %v1671_v13 }
  0x1b   :  { %1602 = vmatprep.mubr.msk.bf16.mxu0 %vm262_vm0, %v1672_v14  ;;  %1634 = vmatprep.mubr.msk.bf16.mxu1 %vm262_vm0, %v1673_v15 }
  0x22   :  { %1603 = vmatmul.mubr.msk.bf16.gmra.mxu0 %vm262_vm0, %v1674_v16  ;;  %1635 = vmatmul.mubr.msk.bf16.gmra.mxu1 %vm262_vm0, %v1675_v17 }
  0x23   :  { %1606 = vmatprep.mubr.msk.bf16.mxu0 %vm262_vm0, %v1676_v18  ;;  %1638 = vmatprep.mubr.msk.bf16.mxu1 %vm262_vm0, %v1677_v19 }
  0x2a   :  { %1607 = vmatmul.mubr.msk.bf16.gmra.mxu0 %vm262_vm0, %v1678_v20  ;;  %1639 = vmatmul.mubr.msk.bf16.gmra.mxu1 %vm262_vm0, %v1679_v21 }
  0x2b   :  { %1610 = vmatprep.mubr.msk.bf16.mxu0 %vm262_vm0, %v1680_v22  ;;  %1642 = vmatprep.mubr.msk.bf16.mxu1 %vm262_vm0, %v1681_v23 }
  0x32   :  { %1611 = vmatmul.mubr.msk.bf16.gmra.mxu0 %vm262_vm0, %v1682_v24  ;;  %1643 = vmatmul.mubr.msk.bf16.gmra.mxu1 %vm262_vm0, %v1683_v25 }
  0x33   :  { %1614 = vmatprep.mubr.msk.bf16.mxu0 %vm262_vm0, %v1684_v26  ;;  %1646 = vmatprep.mubr.msk.bf16.mxu1 %vm262_vm0, %v1685_v27 }
  0x3a   :  { %1615 = vmatmul.mubr.msk.bf16.gmra.mxu0 %vm262_vm0, %v1686_v28  ;;  %1647 = vmatmul.mubr.msk.bf16.gmra.mxu1 %vm262_vm0, %v1687_v29 }
  0x3b   :  { %1618 = vmatprep.mubr.msk.bf16.mxu0 %vm262_vm0, %v1688_v30  ;;  %1650 = vmatprep.mubr.msk.bf16.mxu1 %vm262_vm0, %v1689_v31 }
  0x42   :  { %1619 = vmatmul.mubr.msk.bf16.gmra.mxu0 %vm262_vm0, %v1690_v32  ;;  %1651 = vmatmul.mubr.msk.bf16.gmra.mxu1 %vm262_vm0, %v1691_v33 }
  0xca   :  { %v1592_v35 = vpop.f32.mrf.mxu0  ;;  %v1624_v36 = vpop.f32.mrf.mxu1 }
  0xcb   :  { %v2109_v37 = vadd.f32 %v1592_v35, %v2106_v34  ;;  %v2112_v38 = vadd.f32 %v1624_v36, %v2106_v34 }
  0xcc   :  { %v393_v39 = vpop.f32.mrf.mxu0  ;;  %v521_v40 = vpop.f32.mrf.mxu1 }
  0xcd   :  { %v650_v41 = vsub.f32 0.0, %v2109_v37  ;;  %v682_v42 = vsub.f32 0.0, %v2112_v38  ;;  %v2117_v43 = vadd.f32 %v2106_v34, %v393_v39  ;;  %v2120_v44 = vadd.f32 %v2106_v34, %v521_v40 }
  0xce   :  { %v1593_v45 = vpop.f32.mrf.mxu0  ;;  %v1625_v46 = vpop.f32.mrf.mxu1 }
  0xcf   :  { %v716_v47 = vmul.f32 1.442695, %v650_v41  ;;  %v780_v48 = vmul.f32 1.442695, %v682_v42  ;;  %v648_v49 = vsub.f32 0.0, %v2117_v43  ;;  %v680_v50 = vsub.f32 0.0, %v2120_v44 }
  0xd0   :  { %v2125_v51 = vadd.f32 %v1593_v45, %v2106_v34  ;;  %v2128_v52 = vadd.f32 %v1625_v46, %v2106_v34  ;;  %v396_v53 = vpop.f32.mrf.mxu0  ;;  %v524_v54 = vpop.f32.mrf.mxu1 }
  0xd1   :  { %1692 = vpow2.f32 %v716_v47  ;;  %v712_v55 = vmul.f32 1.442695, %v648_v49  ;;  %v776_v56 = vmul.f32 1.442695, %v680_v50  ;;  %v2131_v57 = vadd.f32 %v2106_v34, %v396_v53 }
  0xd2   :  { %1694 = vpow2.f32 %v780_v48  ;;  %v651_v58 = vsub.f32 0.0, %v2125_v51  ;;  %v683_v59 = vsub.f32 0.0, %v2128_v52  ;;  %v2136_v60 = vadd.f32 %v2106_v34, %v524_v54  ;;  %v1596_v61 = vpop.f32.mrf.mxu0  ;;  %v1628_v62 = vpop.f32.mrf.mxu1 }
  0xd3   :  { %1696 = vpow2.f32 %v712_v55  ;;  %v649_v63 = vsub.f32 0.0, %v2131_v57  ;;  %v2140_v0 = vadd.f32 %v1596_v61, %v2106_v34  ;;  %v2143_v1 = vadd.f32 %v1628_v62, %v2106_v34 }
  0xd4   :  { %1698 = vpow2.f32 %v776_v56  ;;  %v718_v2 = vmul.f32 1.442695, %v651_v58  ;;  %v782_v3 = vmul.f32 1.442695, %v683_v59  ;;  %v681_v4 = vsub.f32 0.0, %v2136_v60  ;;  %v409_v5 = vpop.f32.mrf.mxu0  ;;  %v537_v6 = vpop.f32.mrf.mxu1 }
  0xd5   :  { %v714_v7 = vmul.f32 1.442695, %v649_v63  ;;  %v654_v8 = vsub.f32 0.0, %v2140_v0  ;;  %v686_v9 = vsub.f32 0.0, %v2143_v1  ;;  %v2149_v10 = vadd.f32 %v2106_v34, %v409_v5 }
  0xd6   :  { %1700 = vpow2.f32 %v718_v2  ;;  %v778_v11 = vmul.f32 1.442695, %v681_v4  ;;  %v2152_v12 = vadd.f32 %v2106_v34, %v537_v6  ;;  %v1597_v13 = vpop.f32.mrf.mxu0  ;;  %v1629_v14 = vpop.f32.mrf.mxu1 }
  0xd7   :  { %1702 = vpow2.f32 %v782_v3  ;;  %v724_v15 = vmul.f32 1.442695, %v654_v8  ;;  %v788_v16 = vmul.f32 1.442695, %v686_v9  ;;  %v652_v17 = vsub.f32 0.0, %v2149_v10 }
  0xd8   :  { %1704 = vpow2.f32 %v714_v7  ;;  %v684_v18 = vsub.f32 0.0, %v2152_v12  ;;  %v2157_v19 = vadd.f32 %v1597_v13, %v2106_v34  ;;  %v2160_v20 = vadd.f32 %v1629_v14, %v2106_v34  ;;  %v412_v21 = vpop.f32.mrf.mxu0  ;;  %v540_v22 = vpop.f32.mrf.mxu1 }
  0xd9   :  { %1706 = vpow2.f32 %v778_v11  ;;  %v720_v23 = vmul.f32 1.442695, %v652_v17  ;;  %v2163_v24 = vadd.f32 %v2106_v34, %v412_v21  ;;  %v2166_v25 = vadd.f32 %v2106_v34, %v540_v22 }
  0xda   :  { %1708 = vpow2.f32 %v724_v15  ;;  %v784_v26 = vmul.f32 1.442695, %v684_v18  ;;  %v655_v27 = vsub.f32 0.0, %v2157_v19  ;;  %v687_v28 = vsub.f32 0.0, %v2160_v20  ;;  %v1600_v29 = vpop.f32.mrf.mxu0  ;;  %v1632_v30 = vpop.f32.mrf.mxu1 }
  0xdb   :  { %1710 = vpow2.f32 %v788_v16  ;;  %v653_v31 = vsub.f32 0.0, %v2163_v24  ;;  %v2172_v32 = vadd.f32 %v1600_v29, %v2106_v34  ;;  %v2175_v36 = vadd.f32 %v1632_v30, %v2106_v34 }
  0xdc   :  { %1712 = vpow2.f32 %v720_v23  ;;  %v726_v33 = vmul.f32 1.442695, %v655_v27  ;;  %v790_v35 = vmul.f32 1.442695, %v687_v28  ;;  %v425_v39 = vpop.f32.mrf.mxu0  ;;  %v553_v40 = vpop.f32.mrf.mxu1  ;;  %v685_v42 = vsub.f32 0.0, %v2166_v25 }
  0xdd   :  { %1714 = vpow2.f32 %v784_v26  ;;  %v722_v41 = vmul.f32 1.442695, %v653_v31  ;;  %v2179_v46 = vadd.f32 %v2106_v34, %v425_v39  ;;  %v658_v53 = vsub.f32 0.0, %v2172_v32 }
  0xde   :  { %v1693_v45 = vpop.eup %1692  ;;  %1716 = vpow2.f32 %v726_v33  ;;  %v1601_v47 = vpop.f32.mrf.mxu0  ;;  %v2183_v54 = vadd.f32 %v2106_v34, %v553_v40  ;;  %v690_v58 = vsub.f32 0.0, %v2175_v36  ;;  %v786_v2 = vmul.f32 1.442695, %v685_v42 }
  0xdf   :  { %v1633_v48 = vpop.f32.mrf.mxu1  ;;  %v1695_v49 = vpop.eup %1694  ;;  %v842_v50 = vadd.f32 1.0, %v1693_v45  ;;  %1718 = vpow2.f32 %v790_v35  ;;  %v2187_v3 = vadd.f32 %v1601_v47, %v2106_v34  ;;  %v656_v5 = vsub.f32 0.0, %v2179_v46 }
  0xe0   :  { %v1697_v55 = vpop.eup %1696  ;;  %v874_v56 = vadd.f32 1.0, %v1695_v49  ;;  %1720 = vpow2.f32 %v722_v41  ;;  %v428_v59 = vpop.f32.mrf.mxu0  ;;  %v2190_v8 = vmul.f32 1.442695, %v658_v53  ;;  %v688_v9 = vsub.f32 0.0, %v2183_v54 }
  0xe1   :  { %v556_v61 = vpop.f32.mrf.mxu1  ;;  %v1699_v62 = vpop.eup %1698  ;;  %1722 = vrcp.f32 %v842_v50  ;;  %v840_v63 = vadd.f32 1.0, %v1697_v55  ;;  %v2194_v11 = vadd.f32 %v1633_v48, %v2106_v34  ;;  %v2196_v15 = vmul.f32 1.442695, %v690_v58 }
  0xe2   :  { %1724 = vrcp.f32 %v874_v56  ;;  %v872_v4 = vadd.f32 1.0, %v1699_v62  ;;  %v1604_v6 = vpop.f32.mrf.mxu0  ;;  %v2199_v16 = vadd.f32 %v2106_v34, %v428_v59  ;;  %v659_v22 = vsub.f32 0.0, %v2187_v3 }
  0xe3   :  { %v1701_v7 = vpop.eup %1700  ;;  %1726 = vrcp.f32 %v840_v63  ;;  %v1636_v17 = vpop.f32.mrf.mxu1  ;;  %v2203_v23 = vadd.f32 %v2106_v34, %v556_v61  ;;  %v2205_v29 = vmul.f32 1.442695, %v656_v5  ;;  %v2208_v30 = vadd.f32 %v1604_v6, %v2106_v34 }
  0xe4   :  { %v1703_v13 = vpop.eup %1702  ;;  %1728 = vrcp.f32 %v872_v4  ;;  %v843_v14 = vadd.f32 1.0, %v1701_v7  ;;  %v441_v26 = vpop.f32.mrf.mxu0  ;;  %v2210_v35 = vmul.f32 1.442695, %v688_v9  ;;  %v691_v39 = vsub.f32 0.0, %v2194_v11 }
  0xe5   :  { %v1705_v18 = vpop.eup %1704  ;;  %v875_v21 = vadd.f32 1.0, %v1703_v13  ;;  %1730 = vpow2.f32 %v786_v2  ;;  %v657_v42 = vsub.f32 0.0, %v2199_v16  ;;  %v2215_v45 = vadd.f32 %v1636_v17, %v2106_v34  ;;  %v569_v47 = vpop.f32.mrf.mxu1 }
  0xe6   :  { %v1707_v27 = vpop.eup %1706  ;;  %1732 = vrcp.f32 %v843_v14  ;;  %v841_v28 = vadd.f32 1.0, %v1705_v18  ;;  %v2217_v50 = vmul.f32 1.442695, %v659_v22  ;;  %v689_v53 = vsub.f32 0.0, %v2203_v23  ;;  %v1605_v55 = vpop.f32.mrf.mxu0 }
  0xe7   :  { %v1709_v31 = vpop.eup %1708  ;;  %1734 = vrcp.f32 %v875_v21  ;;  %v873_v33 = vadd.f32 1.0, %v1707_v27  ;;  %v662_v59 = vsub.f32 0.0, %v2208_v30  ;;  %v2222_v61 = vadd.f32 %v2106_v34, %v441_v26  ;;  %v1637_v13 = vpop.f32.mrf.mxu1 }
  0xe8   :  { %v1711_v40 = vpop.eup %1710  ;;  %1736 = vrcp.f32 %v841_v28  ;;  %v846_v41 = vadd.f32 1.0, %v1709_v31  ;;  %v2224_v2 = vmul.f32 1.442695, %v691_v39  ;;  %v694_v4 = vsub.f32 0.0, %v2215_v45  ;;  %v444_v22 = vpop.f32.mrf.mxu0 }
  0xe9   :  { %v1713_v48 = vpop.eup %1712  ;;  %1738 = vrcp.f32 %v873_v33  ;;  %v878_v49 = vadd.f32 1.0, %v1711_v40  ;;  %v2227_v7 = vmul.f32 1.442695, %v657_v42  ;;  %v2230_v9 = vadd.f32 %v2106_v34, %v569_v47 }
  0xea   :  { %v1715_v56 = vpop.eup %1714  ;;  %1740 = vrcp.f32 %v846_v41  ;;  %v844_v58 = vadd.f32 1.0, %v1713_v48  ;;  %v2232_v18 = vmul.f32 1.442695, %v689_v53  ;;  %v2235_v21 = vadd.f32 %v1605_v55, %v2106_v34  ;;  %v572_v53 = vpop.f32.mrf.mxu1 }
  0xeb   :  { %v1717_v62 = vpop.eup %1716  ;;  %1742 = vrcp.f32 %v878_v49  ;;  %v876_v63 = vadd.f32 1.0, %v1715_v56  ;;  %v2237_v28 = vmul.f32 1.442695, %v662_v59  ;;  %v660_v31 = vsub.f32 0.0, %v2222_v61 }
  0xec   :  { %v1719_v5 = vpop.eup %1718  ;;  %1744 = vrcp.f32 %v844_v58  ;;  %v847_v6 = vadd.f32 1.0, %v1717_v62  ;;  %v2241_v40 = vmul.f32 1.442695, %v694_v4  ;;  %v2244_v41 = vadd.f32 %v1637_v13, %v2106_v34  ;;  %v1608_v4 = vpop.f32.mrf.mxu0 }
  0xed   :  { %v1721_v14 = vpop.eup %1720  ;;  %1746 = vrcp.f32 %v876_v63  ;;  %v879_v17 = vadd.f32 1.0, %v1719_v5  ;;  %v692_v48 = vsub.f32 0.0, %v2230_v9  ;;  %v2249_v49 = vadd.f32 %v2106_v34, %v444_v22 }
  0xee   :  { %v1723_v26 = vpop.eup %1722  ;;  %1748 = vrcp.f32 %v847_v6  ;;  %v845_v27 = vadd.f32 1.0, %v1721_v14  ;;  %v663_v58 = vsub.f32 0.0, %v2235_v21 }
  0xef   :  { %v1725_v33 = vpop.eup %1724  ;;  %v970_v39 = vmul.f32 %v1723_v26, %v2109_v37  ;;  %1750 = vrcp.f32 %v879_v17  ;;  %v661_v14 = vsub.f32 0.0, %v2249_v49  ;;  %v1640_v17 = vpop.f32.mrf.mxu1  ;;  %v800_v26 = vmul.f32 1.442695, %v692_v48 }
  0xf0   :  { %v1727_v42 = vpop.eup %1726  ;;  %v1002_v47 = vmul.f32 %v1725_v33, %v2112_v38  ;;  %1752 = vrcp.f32 %v845_v27  ;;  %v2256_v38 = vmul.f32 1.442695, %v660_v31  ;;  %v742_v27 = vmul.f32 1.442695, %v663_v58 }
  0xf1   :  { %v1729_v55 = vpop.eup %1728  ;;  %v1490_v56 = vpack.c.bf16 %v970_v39, %v970_v39  ;;  %v968_v37 = vmul.f32 %v1727_v42, %v2117_v43  ;;  %1754 = vpow2.f32 %v2190_v8  ;;  %v695_v8 = vsub.f32 0.0, %v2244_v41  ;;  %v457_v39 = vpop.f32.mrf.mxu0 }
  0xf2   :  { %v1731_v59 = vpop.eup %1730  ;;  %v1522_v62 = vpack.c.bf16 %v1002_v47, %v1002_v47  ;;  %v1000_v63 = vmul.f32 %v1729_v55, %v2120_v44  ;;  %1756 = vpow2.f32 %v2196_v15  ;;  %v2283_v33 = vadd.f32 %v2106_v34, %v572_v53 }
  0xf3   :  { %v1733_v5 = vpop.eup %1732  ;;  %1291 = vst.msk [vmem:[%s2770_s3 + $0x8] sm:$0xf] %vm1288_vm1, %v1490_v56  ;;  %v1488_v43 = vpack.c.bf16 %v968_v37, %v968_v37  ;;  %v877_v6 = vadd.f32 1.0, %v1731_v59  ;;  %1758 = vpow2.f32 %v2205_v29  ;;  %v806_v48 = vmul.f32 1.442695, %v695_v8  ;;  %v585_v56 = vpop.f32.mrf.mxu1 }
  0xf4   :  { %v1735_v13 = vpop.eup %1734  ;;  %1323 = vst.msk [vmem:[%s2770_s3 + $0x88] sm:$0xf] %vm1288_vm1, %v1522_v62  ;;  %v1520_v44 = vpack.c.bf16 %v1000_v63, %v1000_v63  ;;  %v971_v15 = vmul.f32 %v1733_v5, %v2125_v51  ;;  %1760 = vpow2.f32 %v2210_v35  ;;  %v738_v53 = vmul.f32 1.442695, %v661_v14  ;;  %v1609_v63 = vpop.f32.mrf.mxu0 }
  0xf5   :  { %v1737_v22 = vpop.eup %1736  ;;  %1289 = vst.msk [vmem:[%s2770_s3] sm:$0xf] %vm1288_vm1, %v1488_v43  ;;  %v1003_v29 = vmul.f32 %v1735_v13, %v2128_v52  ;;  %1762 = vrcp.f32 %v877_v6  ;;  %v2300_v58 = vadd.f32 %v1608_v4, %v2106_v34  ;;  %v693_v62 = vsub.f32 0.0, %v2283_v33 }
  0xf6   :  { %v1739_v31 = vpop.eup %1738  ;;  %1321 = vst.msk [vmem:[%s2770_s3 + $0x80] sm:$0xf] %vm1288_vm1, %v1520_v44  ;;  %v1491_v51 = vpack.c.bf16 %v971_v15, %v971_v15  ;;  %v969_v35 = vmul.f32 %v1737_v22, %v2131_v57  ;;  %1764 = vpow2.f32 %v2217_v50  ;;  %v2316_v5 = vadd.f32 %v1640_v17, %v2106_v34  ;;  %v460_v17 = vpop.f32.mrf.mxu0 }
  0xf7   :  { %v1741_v42 = vpop.eup %1740  ;;  %v1523_v52 = vpack.c.bf16 %v1003_v29, %v1003_v29  ;;  %v1001_v47 = vmul.f32 %v1739_v31, %v2136_v60  ;;  %1766 = vpow2.f32 %v2224_v2  ;;  %v2325_v6 = vadd.f32 %v2106_v34, %v457_v39 }
  0xf8   :  { %v1743_v55 = vpop.eup %1742  ;;  %1292 = vst.msk [vmem:[%s2770_s3 + $0xc] sm:$0xf] %vm1288_vm1, %v1491_v51  ;;  %v1489_v57 = vpack.c.bf16 %v969_v35, %v969_v35  ;;  %v974_v50 = vmul.f32 %v1741_v42, %v2140_v0  ;;  %1768 = vpow2.f32 %v2227_v7  ;;  %v666_v44 = vsub.f32 0.0, %v2300_v58 }
  0xf9   :  { %v1745_v37 = vpop.eup %1744  ;;  %1324 = vst.msk [vmem:[%s2770_s3 + $0x8c] sm:$0xf] %vm1288_vm1, %v1523_v52  ;;  %v1521_v60 = vpack.c.bf16 %v1001_v47, %v1001_v47  ;;  %v1006_v2 = vmul.f32 %v1743_v55, %v2143_v1  ;;  %1770 = vpow2.f32 %v2232_v18  ;;  %v2339_v14 = vadd.f32 %v2106_v34, %v585_v56 }
  0xfa   :  { %v1747_v59 = vpop.eup %1746  ;;  %1290 = vst.msk [vmem:[%s2770_s3 + $0x4] sm:$0xf] %vm1288_vm1, %v1489_v57  ;;  %v1494_v0 = vpack.c.bf16 %v974_v50, %v974_v50  ;;  %v972_v7 = vmul.f32 %v1745_v37, %v2149_v10  ;;  %1772 = vpow2.f32 %v2237_v28  ;;  %v664_v51 = vsub.f32 0.0, %v2325_v6  ;;  %v1612_v50 = vpop.f32.mrf.mxu0 }
  0xfb   :  { %v1749_v1 = vpop.eup %1748  ;;  %1322 = vst.msk [vmem:[%s2770_s3 + $0x84] sm:$0xf] %vm1288_vm1, %v1521_v60  ;;  %v1526_v18 = vpack.c.bf16 %v1006_v2, %v1006_v2  ;;  %v1004_v4 = vmul.f32 %v1747_v59, %v2152_v12  ;;  %1774 = vpow2.f32 %v2241_v40  ;;  %v1641_v12 = vpop.f32.mrf.mxu1  ;;  %v802_v52 = vmul.f32 1.442695, %v693_v62 }
  0xfc   :  { %v1751_v10 = vpop.eup %1750  ;;  %1295 = vst.msk [vmem:[%s2770_s3 + $0x18] sm:$0xf] %vm1288_vm1, %v1494_v0  ;;  %v1492_v28 = vpack.c.bf16 %v972_v7, %v972_v7  ;;  %v975_v43 = vmul.f32 %v1749_v1, %v2157_v19  ;;  %1776 = vpow2.f32 %v2256_v38  ;;  %v2359_v55 = vmul.f32 1.442695, %v666_v44 }
  0xfd   :  { %v1753_v8 = vpop.eup %1752  ;;  %1327 = vst.msk [vmem:[%s2770_s3 + $0x98] sm:$0xf] %vm1288_vm1, %v1526_v18  ;;  %v1524_v40 = vpack.c.bf16 %v1004_v4, %v1004_v4  ;;  %v1007_v13 = vmul.f32 %v1751_v10, %v2160_v20  ;;  %1778 = vpow2.f32 %v800_v26  ;;  %v698_v26 = vsub.f32 0.0, %v2316_v5  ;;  %v588_v35 = vpop.f32.mrf.mxu1 }
  0xfe   :  { %v1755_v15 = vpop.eup %1754  ;;  %1293 = vst.msk [vmem:[%s2770_s3 + $0x10] sm:$0xf] %vm1288_vm1, %v1492_v28  ;;  %v1495_v19 = vpack.c.bf16 %v975_v43, %v975_v43  ;;  %v973_v38 = vmul.f32 %v1753_v8, %v2163_v24  ;;  %1780 = vpow2.f32 %v742_v27  ;;  %v696_v57 = vsub.f32 0.0, %v2339_v14  ;;  %v473_v8 = vpop.f32.mrf.mxu0 }
  0xff   :  { %v1757_v22 = vpop.eup %1756  ;;  %1325 = vst.msk [vmem:[%s2770_s3 + $0x90] sm:$0xf] %vm1288_vm1, %v1524_v40  ;;  %v1527_v20 = vpack.c.bf16 %v1007_v13, %v1007_v13  ;;  %v850_v29 = vadd.f32 1.0, %v1755_v15  ;;  %1782 = vpow2.f32 %v806_v48  ;;  %v2363_v37 = vmul.f32 1.442695, %v698_v26  ;;  %v1644_v62 = vpop.f32.mrf.mxu1 }
 0x100   :  { %v1759_v31 = vpop.eup %1758  ;;  %1296 = vst.msk [vmem:[%s2770_s3 + $0x1c] sm:$0xf] %vm1288_vm1, %v1495_v19  ;;  %v1493_v24 = vpack.c.bf16 %v973_v38, %v973_v38  ;;  %v882_v27 = vadd.f32 1.0, %v1757_v22  ;;  %1784 = vpow2.f32 %v738_v53  ;;  %v2366_v60 = vadd.f32 %v1609_v63, %v2106_v34 }
 0x101   :  { %v1761_v39 = vpop.eup %1760  ;;  %1328 = vst.msk [vmem:[%s2770_s3 + $0x9c] sm:$0xf] %vm1288_vm1, %v1527_v20  ;;  %1786 = vrcp.f32 %v850_v29  ;;  %v848_v42 = vadd.f32 1.0, %v1759_v31  ;;  %v2368_v0 = vmul.f32 1.442695, %v664_v51  ;;  %v2371_v7 = vadd.f32 %v1641_v12, %v2106_v34  ;;  %v601_v22 = vpop.f32.mrf.mxu1 }
 0x102   :  { %v1763_v47 = vpop.eup %1762  ;;  %1294 = vst.msk [vmem:[%s2770_s3 + $0x14] sm:$0xf] %vm1288_vm1, %v1493_v24  ;;  %1788 = vrcp.f32 %v882_v27  ;;  %v880_v48 = vadd.f32 1.0, %v1761_v39  ;;  %v2376_v28 = vmul.f32 1.442695, %v696_v57  ;;  %v2379_v43 = vadd.f32 %v2106_v34, %v588_v35 }
 0x103   :  { %v1765_v53 = vpop.eup %1764  ;;  %v1005_v56 = vmul.f32 %v1763_v47, %v2166_v25  ;;  %1790 = vrcp.f32 %v848_v42  ;;  %v2374_v25 = vadd.f32 %v2106_v34, %v460_v17  ;;  %v667_v13 = vsub.f32 0.0, %v2366_v60 }
 0x104   :  { %v1767_v2 = vpop.eup %1766  ;;  %1792 = vrcp.f32 %v880_v48  ;;  %v851_v59 = vadd.f32 1.0, %v1765_v53  ;;  %v2387_v44 = vadd.f32 %v1612_v50, %v2106_v34  ;;  %v699_v38 = vsub.f32 0.0, %v2371_v7  ;;  %v1613_v48 = vpop.f32.mrf.mxu0 }
 0x105   :  { %v1769_v1 = vpop.eup %1768  ;;  %v1525_v18 = vpack.c.bf16 %v1005_v56, %v1005_v56  ;;  %v883_v4 = vadd.f32 1.0, %v1767_v2  ;;  %1794 = vpow2.f32 %v802_v52  ;;  %v2391_v17 = vadd.f32 %v1644_v62, %v2106_v34 }
 0x106   :  { %v1771_v10 = vpop.eup %1770  ;;  %1796 = vrcp.f32 %v851_v59  ;;  %v849_v63 = vadd.f32 1.0, %v1769_v1  ;;  %v665_v26 = vsub.f32 0.0, %v2374_v25  ;;  %v2395_v31 = vadd.f32 %v2106_v34, %v473_v8 }
 0x107   :  { %v1773_v40 = vpop.eup %1772  ;;  %1326 = vst.msk [vmem:[%s2770_s3 + $0x94] sm:$0xf] %vm1288_vm1, %v1525_v18  ;;  %1798 = vrcp.f32 %v883_v4  ;;  %v881_v12 = vadd.f32 1.0, %v1771_v10  ;;  %v697_v51 = vsub.f32 0.0, %v2379_v43  ;;  %v670_v35 = vsub.f32 0.0, %v2387_v44  ;;  %v1645_v18 = vpop.f32.mrf.mxu1 }
 0x108   :  { %v1775_v15 = vpop.eup %1774  ;;  %1800 = vrcp.f32 %v849_v63  ;;  %v854_v19 = vadd.f32 1.0, %v1773_v40  ;;  %v2399_v52 = vmul.f32 1.442695, %v667_v13  ;;  %v2402_v47 = vadd.f32 %v2106_v34, %v601_v22 }
 0x109   :  { %v1777_v20 = vpop.eup %1776  ;;  %1802 = vrcp.f32 %v881_v12  ;;  %v886_v29 = vadd.f32 1.0, %v1775_v15  ;;  %v2404_v53 = vmul.f32 1.442695, %v699_v38  ;;  %v702_v56 = vsub.f32 0.0, %v2391_v17 }
 0x10a   :  { %v1779_v24 = vpop.eup %1778  ;;  %1804 = vrcp.f32 %v854_v19  ;;  %v852_v27 = vadd.f32 1.0, %v1777_v20  ;;  %v2407_v62 = vmul.f32 1.442695, %v665_v26  ;;  %v668_v1 = vsub.f32 0.0, %v2395_v31  ;;  %v476_v19 = vpop.f32.mrf.mxu0 }
 0x10b   :  { %v1781_v39 = vpop.eup %1780  ;;  %1806 = vrcp.f32 %v886_v29  ;;  %v884_v42 = vadd.f32 1.0, %v1779_v24  ;;  %v2410_v63 = vmul.f32 1.442695, %v697_v51  ;;  %v2412_v8 = vmul.f32 1.442695, %v670_v35  ;;  %v604_v51 = vpop.f32.mrf.mxu1 }
 0x10c   :  { %v1783_v57 = vpop.eup %1782  ;;  %1808 = vrcp.f32 %v852_v27  ;;  %v855_v50 = vadd.f32 1.0, %v1781_v39  ;;  %v700_v13 = vsub.f32 0.0, %v2402_v47  ;;  %v2417_v15 = vadd.f32 %v1613_v48, %v2106_v34 }
 0x10d   :  { %v1785_v2 = vpop.eup %1784  ;;  %1810 = vrcp.f32 %v884_v42  ;;  %v887_v59 = vadd.f32 1.0, %v1783_v57  ;;  %v2420_v20 = vmul.f32 1.442695, %v702_v56  ;;  %v2423_v29 = vadd.f32 %v1645_v18, %v2106_v34 }
 0x10e   :  { %v1787_v4 = vpop.eup %1786  ;;  %1812 = vrcp.f32 %v855_v50  ;;  %v853_v10 = vadd.f32 1.0, %v1785_v2  ;;  %v2427_v27 = vmul.f32 1.442695, %v668_v1  ;;  %v671_v57 = vsub.f32 0.0, %v2417_v15  ;;  %v1616_v2 = vpop.f32.mrf.mxu0 }
 0x10f   :  { %v1789_v40 = vpop.eup %1788  ;;  %v978_v12 = vmul.f32 %v1787_v4, %v2172_v32  ;;  %1814 = vrcp.f32 %v887_v59  ;;  %v703_v56 = vsub.f32 0.0, %v2423_v29  ;;  %v816_v1 = vmul.f32 1.442695, %v700_v13  ;;  %v1648_v4 = vpop.f32.mrf.mxu1 }
 0x110   :  { %v1791_v38 = vpop.eup %1790  ;;  %v1010_v22 = vmul.f32 %v1789_v40, %v2175_v36  ;;  %1816 = vrcp.f32 %v853_v10  ;;  %v2432_v36 = vadd.f32 %v2106_v34, %v476_v19  ;;  %v2453_v18 = vadd.f32 %v2106_v34, %v604_v51 }
 0x111   :  { %v1793_v26 = vpop.eup %1792  ;;  %v1498_v24 = vpack.c.bf16 %v978_v12, %v978_v12  ;;  %v976_v32 = vmul.f32 %v1791_v38, %v2179_v46  ;;  %1818 = vpow2.f32 %v2359_v55  ;;  %v758_v19 = vmul.f32 1.442695, %v671_v57  ;;  %v617_v51 = vpop.f32.mrf.mxu1 }
 0x112   :  { %v1795_v35 = vpop.eup %1794  ;;  %v1530_v39 = vpack.c.bf16 %v1010_v22, %v1010_v22  ;;  %v1008_v42 = vmul.f32 %v1793_v26, %v2183_v54  ;;  %1820 = vpow2.f32 %v2363_v37  ;;  %v669_v40 = vsub.f32 0.0, %v2432_v36  ;;  %v489_v26 = vpop.f32.mrf.mxu0 }
 0x113   :  { %v1797_v48 = vpop.eup %1796  ;;  %1299 = vst.msk [vmem:[%s2770_s3 + $0x28] sm:$0xf] %vm1288_vm1, %v1498_v24  ;;  %v1496_v46 = vpack.c.bf16 %v976_v32, %v976_v32  ;;  %v885_v55 = vadd.f32 1.0, %v1795_v35  ;;  %1822 = vpow2.f32 %v2368_v0  ;;  %v2477_v32 = vadd.f32 %v1616_v2, %v2106_v34 }
 0x114   :  { %v1799_v50 = vpop.eup %1798  ;;  %1331 = vst.msk [vmem:[%s2770_s3 + $0xa8] sm:$0xf] %vm1288_vm1, %v1530_v39  ;;  %v1528_v54 = vpack.c.bf16 %v1008_v42, %v1008_v42  ;;  %v979_v37 = vmul.f32 %v1797_v48, %v2187_v3  ;;  %1824 = vpow2.f32 %v2376_v28  ;;  %v2486_v39 = vadd.f32 %v1648_v4, %v2106_v34  ;;  %v1617_v57 = vpop.f32.mrf.mxu0 }
 0x115   :  { %v1801_v59 = vpop.eup %1800  ;;  %1297 = vst.msk [vmem:[%s2770_s3 + $0x20] sm:$0xf] %vm1288_vm1, %v1496_v46  ;;  %v1011_v0 = vmul.f32 %v1799_v50, %v2194_v11  ;;  %1826 = vrcp.f32 %v885_v55  ;;  %v754_v48 = vmul.f32 1.442695, %v669_v40  ;;  %v701_v55 = vsub.f32 0.0, %v2453_v18 }
 0x116   :  { %v1803_v3 = vpop.eup %1802  ;;  %1329 = vst.msk [vmem:[%s2770_s3 + $0xa0] sm:$0xf] %vm1288_vm1, %v1528_v54  ;;  %v1499_v28 = vpack.c.bf16 %v979_v37, %v979_v37  ;;  %v977_v10 = vmul.f32 %v1801_v59, %v2199_v16  ;;  %1828 = vpow2.f32 %v2399_v52  ;;  %v822_v52 = vmul.f32 1.442695, %v703_v56  ;;  %v1649_v37 = vpop.f32.mrf.mxu1 }
 0x117   :  { %v1805_v11 = vpop.eup %1804  ;;  %v1531_v12 = vpack.c.bf16 %v1011_v0, %v1011_v0  ;;  %v1009_v13 = vmul.f32 %v1803_v3, %v2203_v23  ;;  %1830 = vpow2.f32 %v2404_v53  ;;  %v674_v54 = vsub.f32 0.0, %v2477_v32 }
 0x118   :  { %v1807_v38 = vpop.eup %1806  ;;  %1300 = vst.msk [vmem:[%s2770_s3 + $0x2c] sm:$0xf] %vm1288_vm1, %v1499_v28  ;;  %v1497_v22 = vpack.c.bf16 %v977_v10, %v977_v10  ;;  %v982_v16 = vmul.f32 %v1805_v11, %v2208_v30  ;;  %1832 = vpow2.f32 %v2407_v62  ;;  %v706_v2 = vsub.f32 0.0, %v2486_v39  ;;  %v492_v10 = vpop.f32.mrf.mxu0 }
 0x119   :  { %v1809_v24 = vpop.eup %1808  ;;  %1332 = vst.msk [vmem:[%s2770_s3 + $0xac] sm:$0xf] %vm1288_vm1, %v1531_v12  ;;  %v1529_v23 = vpack.c.bf16 %v1009_v13, %v1009_v13  ;;  %v1014_v53 = vmul.f32 %v1807_v38, %v2215_v45  ;;  %1834 = vpow2.f32 %v2410_v63  ;;  %v2525_v28 = vadd.f32 %v2106_v34, %v617_v51  ;;  %v620_v13 = vpop.f32.mrf.mxu1 }
 0x11a   :  { %v1811_v30 = vpop.eup %1810  ;;  %1298 = vst.msk [vmem:[%s2770_s3 + $0x24] sm:$0xf] %vm1288_vm1, %v1497_v22  ;;  %v1502_v62 = vpack.c.bf16 %v982_v16, %v982_v16  ;;  %v980_v35 = vmul.f32 %v1809_v24, %v2222_v61  ;;  %1836 = vpow2.f32 %v2412_v8  ;;  %v818_v12 = vmul.f32 1.442695, %v701_v55 }
 0x11b   :  { %v1813_v45 = vpop.eup %1812  ;;  %1330 = vst.msk [vmem:[%s2770_s3 + $0xa4] sm:$0xf] %vm1288_vm1, %v1529_v23  ;;  %v1534_v63 = vpack.c.bf16 %v1014_v53, %v1014_v53  ;;  %v1012_v42 = vmul.f32 %v1811_v30, %v2230_v9  ;;  %1838 = vpow2.f32 %v2420_v20  ;;  %v2539_v53 = vmul.f32 1.442695, %v706_v2  ;;  %v1620_v30 = vpop.f32.mrf.mxu0 }
 0x11c   :  { %v1815_v46 = vpop.eup %1814  ;;  %1303 = vst.msk [vmem:[%s2770_s3 + $0x38] sm:$0xf] %vm1288_vm1, %v1502_v62  ;;  %v1500_v61 = vpack.c.bf16 %v980_v35, %v980_v35  ;;  %v983_v8 = vmul.f32 %v1813_v45, %v2235_v21  ;;  %1840 = vpow2.f32 %v2427_v27  ;;  %v704_v51 = vsub.f32 0.0, %v2525_v28 }
 0x11d   :  { %v1817_v50 = vpop.eup %1816  ;;  %1335 = vst.msk [vmem:[%s2770_s3 + $0xb8] sm:$0xf] %vm1288_vm1, %v1534_v63  ;;  %v1532_v9 = vpack.c.bf16 %v1012_v42, %v1012_v42  ;;  %v1015_v20 = vmul.f32 %v1815_v46, %v2244_v41  ;;  %1842 = vpow2.f32 %v816_v1  ;;  %v2518_v1 = vadd.f32 %v2106_v34, %v489_v26 }
 0x11e   :  { %v1819_v56 = vpop.eup %1818  ;;  %1301 = vst.msk [vmem:[%s2770_s3 + $0x30] sm:$0xf] %vm1288_vm1, %v1500_v61  ;;  %v1503_v21 = vpack.c.bf16 %v983_v8, %v983_v8  ;;  %v981_v27 = vmul.f32 %v1817_v50, %v2249_v49  ;;  %1844 = vpow2.f32 %v758_v19  ;;  %v2543_v63 = vadd.f32 %v1617_v57, %v2106_v34  ;;  %v2560_v50 = vld [vmem:[%s2769_s2] ss:$0 sm:$0xff] }
 0x11f   :  { %v1821_v59 = vpop.eup %1820  ;;  %1333 = vst.msk [vmem:[%s2770_s3 + $0xb0] sm:$0xf] %vm1288_vm1, %v1532_v9  ;;  %v1535_v41 = vpack.c.bf16 %v1015_v20, %v1015_v20  ;;  %v858_v0 = vadd.f32 1.0, %v1819_v56  ;;  %1846 = vpow2.f32 %v822_v52  ;;  %v2536_v52 = vmul.f32 1.442695, %v674_v54  ;;  %v505_v56 = vpop.f32.mrf.mxu0 }
 0x120   :  { %v1823_v4 = vpop.eup %1822  ;;  %1304 = vst.msk [vmem:[%s2770_s3 + $0x3c] sm:$0xf] %vm1288_vm1, %v1503_v21  ;;  %v1501_v49 = vpack.c.bf16 %v981_v27, %v981_v27  ;;  %v890_v3 = vadd.f32 1.0, %v1821_v59  ;;  %1848 = vpow2.f32 %v754_v48  ;;  %v672_v26 = vsub.f32 0.0, %v2518_v1 }
 0x121   :  { %v1825_v40 = vpop.eup %1824  ;;  %1336 = vst.msk [vmem:[%s2770_s3 + $0xbc] sm:$0xf] %vm1288_vm1, %v1535_v41  ;;  %1850 = vrcp.f32 %v858_v0  ;;  %v856_v11 = vadd.f32 1.0, %v1823_v4  ;;  %v2546_v46 = vadd.f32 %v1649_v37, %v2106_v34  ;;  %v2549_v61 = vadd.f32 %v2106_v34, %v492_v10 }
 0x122   :  { %v1827_v19 = vpop.eup %1826  ;;  %1302 = vst.msk [vmem:[%s2770_s3 + $0x34] sm:$0xf] %vm1288_vm1, %v1501_v49  ;;  %1852 = vrcp.f32 %v890_v3  ;;  %v888_v38 = vadd.f32 1.0, %v1825_v40  ;;  %v2555_v57 = vmul.f32 1.442695, %v672_v26  ;;  %v2563_v9 = vadd.f32 %v2560_v50, %v620_v13 }
 0x123   :  { %v1829_v22 = vpop.eup %1828  ;;  %v1013_v16 = vmul.f32 %v1827_v19, %v2283_v33  ;;  %1854 = vrcp.f32 %v856_v11  ;;  %v1652_v33 = vpop.f32.mrf.mxu1  ;;  %v2565_v54 = vmul.f32 1.442695, %v704_v51  ;;  %v2568_v37 = vadd.f32 %v2560_v50, %v1620_v30 }
 0x124   :  { %v1831_v24 = vpop.eup %1830  ;;  %1856 = vrcp.f32 %v888_v38  ;;  %v859_v23 = vadd.f32 1.0, %v1829_v22  ;;  %v675_v2 = vsub.f32 0.0, %v2543_v63  ;;  %v2572_v59 = vadd.f32 %v2560_v50, %v1652_v33  ;;  %v1621_v51 = vpop.f32.mrf.mxu0 }
 0x125   :  { %v1833_v62 = vpop.eup %1832  ;;  %v1533_v35 = vpack.c.bf16 %v1013_v16, %v1013_v16  ;;  %v891_v45 = vadd.f32 1.0, %v1831_v24  ;;  %1858 = vpow2.f32 %v818_v12  ;;  %v633_v41 = vpop.f32.mrf.mxu1  ;;  %v707_v49 = vsub.f32 0.0, %v2546_v46 }
 0x126   :  { %v1835_v42 = vpop.eup %1834  ;;  %1860 = vrcp.f32 %v859_v23  ;;  %v857_v48 = vadd.f32 1.0, %v1833_v62  ;;  %v673_v3 = vsub.f32 0.0, %v2549_v61  ;;  %v705_v11 = vsub.f32 0.0, %v2563_v9 }
 0x127   :  { %v1837_v8 = vpop.eup %1836  ;;  %1334 = vst.msk [vmem:[%s2770_s3 + $0xb4] sm:$0xf] %vm1288_vm1, %v1533_v35  ;;  %1862 = vrcp.f32 %v891_v45  ;;  %v889_v55 = vadd.f32 1.0, %v1835_v42  ;;  %v2578_v12 = vadd.f32 %v2560_v50, %v505_v56  ;;  %v678_v38 = vsub.f32 0.0, %v2568_v37 }
 0x128   :  { %v1839_v34 = vpop.eup %1838  ;;  %1864 = vrcp.f32 %v857_v48  ;;  %v862_v20 = vadd.f32 1.0, %v1837_v8  ;;  %v2582_v22 = vadd.f32 %v2560_v50, %v633_v41  ;;  %v766_v24 = vmul.f32 1.442695, %v675_v2 }
 0x129   :  { %v1841_v21 = vpop.eup %1840  ;;  %1866 = vrcp.f32 %v889_v55  ;;  %v894_v27 = vadd.f32 1.0, %v1839_v34  ;;  %v710_v23 = vsub.f32 0.0, %v2572_v59  ;;  %v830_v35 = vmul.f32 1.442695, %v707_v49 }
 0x12a   :  { %v1843_v0 = vpop.eup %1842  ;;  %1868 = vrcp.f32 %v862_v20  ;;  %v860_v4 = vadd.f32 1.0, %v1841_v21  ;;  %v762_v45 = vmul.f32 1.442695, %v673_v3  ;;  %v826_v48 = vmul.f32 1.442695, %v705_v11  ;;  %v1653_v21 = vpop.f32.mrf.mxu1 }
 0x12b   :  { %v1845_v10 = vpop.eup %1844  ;;  %1870 = vrcp.f32 %v894_v27  ;;  %v892_v40 = vadd.f32 1.0, %v1843_v0  ;;  %v676_v8 = vsub.f32 0.0, %v2578_v12  ;;  %v772_v20 = vmul.f32 1.442695, %v678_v38 }
 0x12c   :  { %v1847_v13 = vpop.eup %1846  ;;  %1872 = vrcp.f32 %v860_v4  ;;  %v863_v19 = vadd.f32 1.0, %v1845_v10  ;;  %v708_v56 = vsub.f32 0.0, %v2582_v22  ;;  %v836_v0 = vmul.f32 1.442695, %v710_v23 }
 0x12d   :  { %v1849_v16 = vpop.eup %1848  ;;  %1874 = vrcp.f32 %v892_v40  ;;  %v895_v26 = vadd.f32 1.0, %v1847_v13  ;;  %v768_v38 = vmul.f32 1.442695, %v676_v8 }
 0x12e   :  { %v1851_v30 = vpop.eup %1850  ;;  %1876 = vrcp.f32 %v863_v19  ;;  %v861_v62 = vadd.f32 1.0, %v1849_v16  ;;  %v832_v16 = vmul.f32 1.442695, %v708_v56 }
 0x12f   :  { %v1853_v33 = vpop.eup %1852  ;;  %v986_v42 = vmul.f32 %v1851_v30, %v2300_v58  ;;  %1878 = vrcp.f32 %v895_v26  ;;  %v508_v58 = vpop.f32.mrf.mxu0 }
 0x130   :  { %v1855_v55 = vpop.eup %1854  ;;  %v1018_v34 = vmul.f32 %v1853_v33, %v2316_v5  ;;  %1880 = vrcp.f32 %v861_v62  ;;  %v2594_v5 = vadd.f32 %v2560_v50, %v1621_v51  ;;  %v2611_v13 = vadd.f32 %v2560_v50, %v508_v58  ;;  %v636_v51 = vpop.f32.mrf.mxu1 }
 0x131   :  { %v1857_v27 = vpop.eup %1856  ;;  %v1506_v2 = vpack.c.bf16 %v986_v42, %v986_v42  ;;  %v984_v41 = vmul.f32 %v1855_v55, %v2325_v6  ;;  %1882 = vpow2.f32 %v2536_v52  ;;  %v2602_v52 = vadd.f32 %v2560_v50, %v1653_v21 }
 0x132   :  { %v1859_v4 = vpop.eup %1858  ;;  %v1538_v49 = vpack.c.bf16 %v1018_v34, %v1018_v34  ;;  %v1016_v3 = vmul.f32 %v1857_v27, %v2339_v14  ;;  %1884 = vpow2.f32 %v2539_v53  ;;  %v679_v23 = vsub.f32 0.0, %v2594_v5 }
 0x133   :  { %v1861_v10 = vpop.eup %1860  ;;  %1307 = vst.msk [vmem:[%s2770_s3 + $0x48] sm:$0xf] %vm1288_vm1, %v1506_v2  ;;  %v1504_v6 = vpack.c.bf16 %v984_v41, %v984_v41  ;;  %v893_v40 = vadd.f32 1.0, %v1859_v4  ;;  %1886 = vpow2.f32 %v2555_v57  ;;  %v711_v33 = vsub.f32 0.0, %v2602_v52 }
 0x134   :  { %v1863_v11 = vpop.eup %1862  ;;  %1339 = vst.msk [vmem:[%s2770_s3 + $0xc8] sm:$0xf] %vm1288_vm1, %v1538_v49  ;;  %v1536_v14 = vpack.c.bf16 %v1016_v3, %v1016_v3  ;;  %v987_v53 = vmul.f32 %v1861_v10, %v2366_v60  ;;  %1888 = vpow2.f32 %v2565_v54  ;;  %v2638_v34 = vadd.f32 %v2560_v50, %v636_v51 }
 0x135   :  { %v1865_v19 = vpop.eup %1864  ;;  %1305 = vst.msk [vmem:[%s2770_s3 + $0x40] sm:$0xf] %vm1288_vm1, %v1504_v6  ;;  %v1019_v57 = vmul.f32 %v1863_v11, %v2371_v7  ;;  %1890 = vrcp.f32 %v893_v40  ;;  %v774_v21 = vmul.f32 1.442695, %v679_v23 }
 0x136   :  { %v1867_v26 = vpop.eup %1866  ;;  %1337 = vst.msk [vmem:[%s2770_s3 + $0xc0] sm:$0xf] %vm1288_vm1, %v1536_v14  ;;  %v1507_v60 = vpack.c.bf16 %v987_v53, %v987_v53  ;;  %v985_v54 = vmul.f32 %v1865_v19, %v2374_v25  ;;  %1892 = vpow2.f32 %v766_v24  ;;  %v677_v24 = vsub.f32 0.0, %v2611_v13 }
 0x137   :  { %v1869_v30 = vpop.eup %1868  ;;  %v1539_v62 = vpack.c.bf16 %v1019_v57, %v1019_v57  ;;  %v1017_v7 = vmul.f32 %v1867_v26, %v2379_v43  ;;  %1894 = vpow2.f32 %v830_v35  ;;  %v709_v4 = vsub.f32 0.0, %v2638_v34 }
 0x138   :  { %v1871_v42 = vpop.eup %1870  ;;  %1308 = vst.msk [vmem:[%s2770_s3 + $0x4c] sm:$0xf] %vm1288_vm1, %v1507_v60  ;;  %v1505_v8 = vpack.c.bf16 %v985_v54, %v985_v54  ;;  %v990_v25 = vmul.f32 %v1869_v30, %v2387_v44  ;;  %1896 = vpow2.f32 %v762_v45  ;;  %v770_v41 = vmul.f32 1.442695, %v677_v24 }
 0x139   :  { %v1873_v55 = vpop.eup %1872  ;;  %1340 = vst.msk [vmem:[%s2770_s3 + $0xcc] sm:$0xf] %vm1288_vm1, %v1539_v62  ;;  %v1537_v43 = vpack.c.bf16 %v1017_v7, %v1017_v7  ;;  %v1022_v35 = vmul.f32 %v1871_v42, %v2391_v17  ;;  %1898 = vpow2.f32 %v826_v48  ;;  %v838_v48 = vmul.f32 1.442695, %v711_v33 }
 0x13a   :  { %v1875_v56 = vpop.eup %1874  ;;  %1306 = vst.msk [vmem:[%s2770_s3 + $0x44] sm:$0xf] %vm1288_vm1, %v1505_v8  ;;  %v1510_v44 = vpack.c.bf16 %v990_v25, %v990_v25  ;;  %v988_v45 = vmul.f32 %v1873_v55, %v2395_v31  ;;  %1900 = vpow2.f32 %v772_v20  ;;  %v834_v19 = vmul.f32 1.442695, %v709_v4 }
 0x13b   :  { %v1877_v27 = vpop.eup %1876  ;;  %1338 = vst.msk [vmem:[%s2770_s3 + $0xc4] sm:$0xf] %vm1288_vm1, %v1537_v43  ;;  %v1542_v17 = vpack.c.bf16 %v1022_v35, %v1022_v35  ;;  %v1020_v50 = vmul.f32 %v1875_v56, %v2402_v47  ;;  %1902 = vpow2.f32 %v836_v0 }
 0x13c   :  { %v1879_v2 = vpop.eup %1878  ;;  %1311 = vst.msk [vmem:[%s2770_s3 + $0x58] sm:$0xf] %vm1288_vm1, %v1510_v44  ;;  %v1508_v31 = vpack.c.bf16 %v988_v45, %v988_v45  ;;  %v991_v20 = vmul.f32 %v1877_v27, %v2417_v15  ;;  %1904 = vpow2.f32 %v768_v38 }
 0x13d   :  { %v1881_v58 = vpop.eup %1880  ;;  %1343 = vst.msk [vmem:[%s2770_s3 + $0xd8] sm:$0xf] %vm1288_vm1, %v1542_v17  ;;  %v1540_v47 = vpack.c.bf16 %v1020_v50, %v1020_v50  ;;  %v1023_v0 = vmul.f32 %v1879_v2, %v2423_v29  ;;  %1906 = vpow2.f32 %v832_v16 }
 0x13e   :  { %v1883_v49 = vpop.eup %1882  ;;  %1309 = vst.msk [vmem:[%s2770_s3 + $0x50] sm:$0xf] %vm1288_vm1, %v1508_v31  ;;  %v1511_v15 = vpack.c.bf16 %v991_v20, %v991_v20  ;;  %v989_v3 = vmul.f32 %v1881_v58, %v2432_v36  ;;  %1908 = vpow2.f32 %v774_v21 }
 0x13f   :  { %v1885_v10 = vpop.eup %1884  ;;  %1341 = vst.msk [vmem:[%s2770_s3 + $0xd0] sm:$0xf] %vm1288_vm1, %v1540_v47  ;;  %v1543_v29 = vpack.c.bf16 %v1023_v0, %v1023_v0  ;;  %v866_v6 = vadd.f32 1.0, %v1883_v49  ;;  %1910 = vpow2.f32 %v838_v48 }
 0x140   :  { %v1887_v40 = vpop.eup %1886  ;;  %1312 = vst.msk [vmem:[%s2770_s3 + $0x5c] sm:$0xf] %vm1288_vm1, %v1511_v15  ;;  %v1509_v11 = vpack.c.bf16 %v989_v3, %v989_v3  ;;  %v898_v14 = vadd.f32 1.0, %v1885_v10  ;;  %1912 = vpow2.f32 %v770_v41 }
 0x141   :  { %v1889_v36 = vpop.eup %1888  ;;  %1344 = vst.msk [vmem:[%s2770_s3 + $0xdc] sm:$0xf] %vm1288_vm1, %v1543_v29  ;;  %1914 = vrcp.f32 %v866_v6  ;;  %v864_v53 = vadd.f32 1.0, %v1887_v40 }
 0x142   :  { %v1891_v57 = vpop.eup %1890  ;;  %1310 = vst.msk [vmem:[%s2770_s3 + $0x54] sm:$0xf] %vm1288_vm1, %v1509_v11  ;;  %1916 = vrcp.f32 %v898_v14  ;;  %v896_v38 = vadd.f32 1.0, %v1889_v36 }
 0x143   :  { %v1893_v16 = vpop.eup %1892  ;;  %v1021_v26 = vmul.f32 %v1891_v57, %v2453_v18  ;;  %1918 = vrcp.f32 %v864_v53 }
 0x144   :  { %v1895_v60 = vpop.eup %1894  ;;  %1920 = vrcp.f32 %v896_v38  ;;  %v867_v54 = vadd.f32 1.0, %v1893_v16 }
 0x145   :  { %v1897_v23 = vpop.eup %1896  ;;  %v1541_v51 = vpack.c.bf16 %v1021_v26, %v1021_v26  ;;  %v899_v30 = vadd.f32 1.0, %v1895_v60  ;;  %1922 = vpow2.f32 %v834_v19 }
 0x146   :  { %v1899_v62 = vpop.eup %1898  ;;  %1924 = vrcp.f32 %v867_v54  ;;  %v865_v7 = vadd.f32 1.0, %v1897_v23 }
 0x147   :  { %v1901_v33 = vpop.eup %1900  ;;  %1342 = vst.msk [vmem:[%s2770_s3 + $0xd4] sm:$0xf] %vm1288_vm1, %v1541_v51  ;;  %1926 = vrcp.f32 %v899_v30  ;;  %v897_v42 = vadd.f32 1.0, %v1899_v62 }
 0x148   :  { %v1903_v18 = vpop.eup %1902  ;;  %1928 = vrcp.f32 %v865_v7  ;;  %v870_v8 = vadd.f32 1.0, %v1901_v33 }
 0x149   :  { %v1905_v25 = vpop.eup %1904  ;;  %1930 = vrcp.f32 %v897_v42  ;;  %v902_v24 = vadd.f32 1.0, %v1903_v18 }
 0x14a   :  { %v1907_v55 = vpop.eup %1906  ;;  %1932 = vrcp.f32 %v870_v8  ;;  %v868_v43 = vadd.f32 1.0, %v1905_v25 }
 0x14b   :  { %v1909_v35 = vpop.eup %1908  ;;  %1934 = vrcp.f32 %v902_v24  ;;  %v900_v56 = vadd.f32 1.0, %v1907_v55 }
 0x14c   :  { %v1911_v44 = vpop.eup %1910  ;;  %1936 = vrcp.f32 %v868_v43  ;;  %v871_v45 = vadd.f32 1.0, %v1909_v35 }
 0x14d   :  { %v1913_v21 = vpop.eup %1912  ;;  %1938 = vrcp.f32 %v900_v56  ;;  %v903_v27 = vadd.f32 1.0, %v1911_v44 }
 0x14e   :  { %v1915_v17 = vpop.eup %1914  ;;  %1940 = vrcp.f32 %v871_v45  ;;  %v869_v50 = vadd.f32 1.0, %v1913_v21 }
 0x14f   :  { %v1917_v48 = vpop.eup %1916  ;;  %v994_v2 = vmul.f32 %v1915_v17, %v2477_v32  ;;  %1942 = vrcp.f32 %v903_v27 }
 0x150   :  { %v1919_v31 = vpop.eup %1918  ;;  %v1026_v20 = vmul.f32 %v1917_v48, %v2486_v39  ;;  %1944 = vrcp.f32 %v869_v50 }
 0x151   :  { %v1921_v41 = vpop.eup %1920  ;;  %v1514_v58 = vpack.c.bf16 %v994_v2, %v994_v2  ;;  %v992_v47 = vmul.f32 %v1919_v31, %v2518_v1 }
 0x152   :  { %v1923_v0 = vpop.eup %1922  ;;  %v1546_v4 = vpack.c.bf16 %v1026_v20, %v1026_v20  ;;  %v1024_v49 = vmul.f32 %v1921_v41, %v2525_v28 }
 0x153   :  { %v1925_v15 = vpop.eup %1924  ;;  %1315 = vst.msk [vmem:[%s2770_s3 + $0x68] sm:$0xf] %vm1288_vm1, %v1514_v58  ;;  %v1512_v32 = vpack.c.bf16 %v992_v47, %v992_v47  ;;  %v901_v3 = vadd.f32 1.0, %v1923_v0 }
 0x154   :  { %v1927_v10 = vpop.eup %1926  ;;  %1347 = vst.msk [vmem:[%s2770_s3 + $0xe8] sm:$0xf] %vm1288_vm1, %v1546_v4  ;;  %v1544_v39 = vpack.c.bf16 %v1024_v49, %v1024_v49  ;;  %v995_v1 = vmul.f32 %v1925_v15, %v2543_v63 }
 0x155   :  { %v1929_v29 = vpop.eup %1928  ;;  %1313 = vst.msk [vmem:[%s2770_s3 + $0x60] sm:$0xf] %vm1288_vm1, %v1512_v32  ;;  %v1027_v28 = vmul.f32 %v1927_v10, %v2546_v46  ;;  %1946 = vrcp.f32 %v901_v3 }
 0x156   :  { %v1931_v6 = vpop.eup %1930  ;;  %1345 = vst.msk [vmem:[%s2770_s3 + $0xe0] sm:$0xf] %vm1288_vm1, %v1544_v39  ;;  %v1515_v40 = vpack.c.bf16 %v995_v1, %v995_v1  ;;  %v993_v11 = vmul.f32 %v1929_v29, %v2549_v61 }
 0x157   :  { %v1933_v14 = vpop.eup %1932  ;;  %v1547_v63 = vpack.c.bf16 %v1027_v28, %v1027_v28  ;;  %v1025_v36 = vmul.f32 %v1931_v6, %v2563_v9 }
 0x158   :  { %v1935_v53 = vpop.eup %1934  ;;  %1316 = vst.msk [vmem:[%s2770_s3 + $0x6c] sm:$0xf] %vm1288_vm1, %v1515_v40  ;;  %v1513_v46 = vpack.c.bf16 %v993_v11, %v993_v11  ;;  %v998_v19 = vmul.f32 %v1933_v14, %v2568_v37 }
 0x159   :  { %v1937_v57 = vpop.eup %1936  ;;  %1348 = vst.msk [vmem:[%s2770_s3 + $0xec] sm:$0xf] %vm1288_vm1, %v1547_v63  ;;  %v1545_v61 = vpack.c.bf16 %v1025_v36, %v1025_v36  ;;  %v1030_v38 = vmul.f32 %v1935_v53, %v2572_v59 }
 0x15a   :  { %v1939_v16 = vpop.eup %1938  ;;  %1314 = vst.msk [vmem:[%s2770_s3 + $0x64] sm:$0xf] %vm1288_vm1, %v1513_v46  ;;  %v1518_v9 = vpack.c.bf16 %v998_v19, %v998_v19  ;;  %v996_v26 = vmul.f32 %v1937_v57, %v2578_v12 }
 0x15b   :  { %v1941_v60 = vpop.eup %1940  ;;  %1346 = vst.msk [vmem:[%s2770_s3 + $0xe4] sm:$0xf] %vm1288_vm1, %v1545_v61  ;;  %v1550_v37 = vpack.c.bf16 %v1030_v38, %v1030_v38  ;;  %v1028_v54 = vmul.f32 %v1939_v16, %v2582_v22 }
 0x15c   :  { %v1943_v23 = vpop.eup %1942  ;;  %1319 = vst.msk [vmem:[%s2770_s3 + $0x78] sm:$0xf] %vm1288_vm1, %v1518_v9  ;;  %v1516_v59 = vpack.c.bf16 %v996_v26, %v996_v26  ;;  %v999_v51 = vmul.f32 %v1941_v60, %v2594_v5 }
 0x15d   :  { %v1945_v30 = vpop.eup %1944  ;;  %1351 = vst.msk [vmem:[%s2770_s3 + $0xf8] sm:$0xf] %vm1288_vm1, %v1550_v37  ;;  %v1548_v12 = vpack.c.bf16 %v1028_v54, %v1028_v54  ;;  %v1031_v62 = vmul.f32 %v1943_v23, %v2602_v52 }
 0x15e   :  { %1317 = vst.msk [vmem:[%s2770_s3 + $0x70] sm:$0xf] %vm1288_vm1, %v1516_v59  ;;  %v1519_v22 = vpack.c.bf16 %v999_v51, %v999_v51  ;;  %v997_v7 = vmul.f32 %v1945_v30, %v2611_v13 }
 0x15f   :  { %1349 = vst.msk [vmem:[%s2770_s3 + $0xf0] sm:$0xf] %vm1288_vm1, %v1548_v12  ;;  %v1551_v5 = vpack.c.bf16 %v1031_v62, %v1031_v62 }
 0x160   :  { %1320 = vst.msk [vmem:[%s2770_s3 + $0x7c] sm:$0xf] %vm1288_vm1, %v1519_v22  ;;  %v1517_v52 = vpack.c.bf16 %v997_v7, %v997_v7 }
 0x161   :  { %1352 = vst.msk [vmem:[%s2770_s3 + $0xfc] sm:$0xf] %vm1288_vm1, %v1551_v5 }
 0x162   :  { %v1947_v33 = vpop.eup %1946  ;;  %1318 = vst.msk [vmem:[%s2770_s3 + $0x74] sm:$0xf] %vm1288_vm1, %v1517_v52 }
 0x163   :  { %v1029_v13 = vmul.f32 %v1947_v33, %v2638_v34 }
 0x165   :  { %v1549_v42 = vpack.c.bf16 %v1029_v13, %v1029_v13 }
 0x167   :  { %1350 = vst.msk [vmem:[%s2770_s3 + $0xf4] sm:$0xf] %vm1288_vm1, %v1549_v42 }

// kernel: sppcspc_forward_nchw.11
= control target key start
LH: loop header
LB: loop body
LE: loop exit
PB: predicated region body
PF: predicated region fallthrough
CT: control target
= control target key end

     0   :  { %vm330_vm0 = vcmask 261120   ;;  %s3193_s0 = inlined_call_operand.vmem [shape: bf16[512,32], index: 0, kind: input, shape index: {}]   ;;  %s3194_s1 = inlined_call_operand.vmem [shape: bf16[512,32], index: 1, kind: input, shape index: {}]   ;;  %s3195_s2 = inlined_call_operand.vmem [shape: bf16[32,32], index: 2, kind: input, shape index: {}]   ;;  %s3196_s3 = inlined_call_operand.vmem [shape: bf16[32,32], index: 3, kind: input, shape index: {}]   ;;  %s3197_s4 = inlined_call_operand.vmem [shape: f32[1,32], index: 4, kind: input, shape index: {}]   ;;  %s3198_s5 = inlined_call_operand.hbm [shape: f32[512,32], index: 5, kind: output, shape index: {}]  }
   0x1   :  { %v2148_v0 = vld [vmem:[%s3196_s3 + $0x8] sm:$0xff]   ;;  %v2150_v2 = vld [vmem:[%s3196_s3] sm:$0xff]   ;;  %v2156_v8 = vld [vmem:[%s3194_s1 + $0x10] sm:$0xff]  }
   0x2   :  { %v2149_v1 = vld [vmem:[%s3195_s2 + $0x8] sm:$0xff]   ;;  %2009 = vmatprep.subr.bf16.mxu0 %v2148_v0  ;;  %v2151_v3 = vld [vmem:[%s3195_s2] sm:$0xff]   ;;  %v2157_v9 = vld [vmem:[%s3193_s0 + $0x10] sm:$0xff]  }
   0x3   :  { %2077 = vmatprep.subr.bf16.mxu1 %v2149_v1  ;;  %2010 = vmatpush3.bf16.msra.mxu0 %v2148_v0  ;;  %v2152_v4 = vld [vmem:[%s3194_s1] sm:$0xff]   ;;  %v2154_v6 = vld [vmem:[%s3194_s1 + $0x8] sm:$0xff]   ;;  %v2158_v10 = vld [vmem:[%s3194_s1 + $0x18] sm:$0xff]  }
   0x4   :  { %2078 = vmatpush3.bf16.msra.mxu1 %v2149_v1  ;;  %2011 = vmatprep.subr.bf16.mxu0 %v2150_v2  ;;  %v2153_v5 = vld [vmem:[%s3193_s0] sm:$0xff]   ;;  %v2155_v7 = vld [vmem:[%s3193_s0 + $0x8] sm:$0xff]   ;;  %v2159_v11 = vld [vmem:[%s3193_s0 + $0x18] sm:$0xff]  }
   0x5   :  { %2079 = vmatprep.subr.bf16.mxu1 %v2151_v3  ;;  %2013 = vmatprep.mubr.msk.bf16.mxu0 %vm330_vm0, %v2152_v4  ;;  %v2160_v12 = vld [vmem:[%s3194_s1 + $0x20] sm:$0xff]   ;;  %v2162_v14 = vld [vmem:[%s3194_s1 + $0x28] sm:$0xff]   ;;  %v2164_v16 = vld [vmem:[%s3194_s1 + $0x30] sm:$0xff]  }
   0x6   :  { %2081 = vmatprep.mubr.msk.bf16.mxu1 %vm330_vm0, %v2153_v5  ;;  %v2161_v13 = vld [vmem:[%s3193_s0 + $0x20] sm:$0xff]   ;;  %v2163_v15 = vld [vmem:[%s3193_s0 + $0x28] sm:$0xff]   ;;  %v2165_v17 = vld [vmem:[%s3193_s0 + $0x30] sm:$0xff]  }
   0x7   :  { %2012 = vmatpush3.bf16.msra.mxu0 %v2150_v2  ;;  %v2166_v18 = vld [vmem:[%s3194_s1 + $0x38] sm:$0xff]   ;;  %v2168_v20 = vld [vmem:[%s3194_s1 + $0x40] sm:$0xff]   ;;  %v2170_v22 = vld [vmem:[%s3194_s1 + $0x48] sm:$0xff]  }
   0x8   :  { %2080 = vmatpush3.bf16.msra.mxu1 %v2151_v3  ;;  %v2167_v19 = vld [vmem:[%s3193_s0 + $0x38] sm:$0xff]   ;;  %v2169_v21 = vld [vmem:[%s3193_s0 + $0x40] sm:$0xff]   ;;  %v2171_v23 = vld [vmem:[%s3193_s0 + $0x48] sm:$0xff]  }
   0x9   :  { %v2172_v24 = vld [vmem:[%s3194_s1 + $0x50] sm:$0xff]   ;;  %v2174_v26 = vld [vmem:[%s3194_s1 + $0x58] sm:$0xff]   ;;  %v2176_v28 = vld [vmem:[%s3194_s1 + $0x60] sm:$0xff]  }
   0xa   :  { %2014 = vmatmul.mubr.msk.bf16.vlgmr.msra.gmra.mxu0 %vm330_vm0, %v2154_v6  ;;  %v2173_v25 = vld [vmem:[%s3193_s0 + $0x50] sm:$0xff]   ;;  %v2175_v27 = vld [vmem:[%s3193_s0 + $0x58] sm:$0xff]   ;;  %v2177_v29 = vld [vmem:[%s3193_s0 + $0x60] sm:$0xff]  }
   0xb   :  { %2082 = vmatmul.mubr.msk.bf16.vlgmr.msra.gmra.mxu1 %vm330_vm0, %v2155_v7  ;;  %2017 = vmatprep.mubr.msk.bf16.mxu0 %vm330_vm0, %v2156_v8  ;;  %v2178_v30 = vld [vmem:[%s3194_s1 + $0x68] sm:$0xff]   ;;  %v2180_v32 = vld [vmem:[%s3194_s1 + $0x70] sm:$0xff]   ;;  %v2182_v34 = vld [vmem:[%s3194_s1 + $0x78] sm:$0xff]  }
   0xc   :  { %2085 = vmatprep.mubr.msk.bf16.mxu1 %vm330_vm0, %v2157_v9  ;;  %v2179_v31 = vld [vmem:[%s3193_s0 + $0x68] sm:$0xff]   ;;  %v2181_v33 = vld [vmem:[%s3193_s0 + $0x70] sm:$0xff]   ;;  %v2183_v35 = vld [vmem:[%s3193_s0 + $0x78] sm:$0xff]  }
   0xd   :  { %v2184_v36 = vld [vmem:[%s3194_s1 + $0x80] sm:$0xff]  }
   0xe   :  { %v2185_v37 = vld [vmem:[%s3193_s0 + $0x80] sm:$0xff]  }
  0x12   :  { %2018 = vmatmul.mubr.msk.bf16.gmra.mxu0 %vm330_vm0, %v2158_v10 }
  0x13   :  { %2086 = vmatmul.mubr.msk.bf16.gmra.mxu1 %vm330_vm0, %v2159_v11  ;;  %2021 = vmatprep.mubr.msk.bf16.mxu0 %vm330_vm0, %v2160_v12 }
  0x14   :  { %2089 = vmatprep.mubr.msk.bf16.mxu1 %vm330_vm0, %v2161_v13 }
  0x1a   :  { %2022 = vmatmul.mubr.msk.bf16.gmra.mxu0 %vm330_vm0, %v2162_v14 }
  0x1b   :  { %2090 = vmatmul.mubr.msk.bf16.gmra.mxu1 %vm330_vm0, %v2163_v15  ;;  %2025 = vmatprep.mubr.msk.bf16.mxu0 %vm330_vm0, %v2164_v16 }
  0x1c   :  { %2093 = vmatprep.mubr.msk.bf16.mxu1 %vm330_vm0, %v2165_v17 }
  0x22   :  { %2026 = vmatmul.mubr.msk.bf16.gmra.mxu0 %vm330_vm0, %v2166_v18 }
  0x23   :  { %2094 = vmatmul.mubr.msk.bf16.gmra.mxu1 %vm330_vm0, %v2167_v19  ;;  %2029 = vmatprep.mubr.msk.bf16.mxu0 %vm330_vm0, %v2168_v20 }
  0x24   :  { %2097 = vmatprep.mubr.msk.bf16.mxu1 %vm330_vm0, %v2169_v21 }
  0x2a   :  { %2030 = vmatmul.mubr.msk.bf16.gmra.mxu0 %vm330_vm0, %v2170_v22 }
  0x2b   :  { %2098 = vmatmul.mubr.msk.bf16.gmra.mxu1 %vm330_vm0, %v2171_v23  ;;  %2033 = vmatprep.mubr.msk.bf16.mxu0 %vm330_vm0, %v2172_v24 }
  0x2c   :  { %2101 = vmatprep.mubr.msk.bf16.mxu1 %vm330_vm0, %v2173_v25 }
  0x32   :  { %2034 = vmatmul.mubr.msk.bf16.gmra.mxu0 %vm330_vm0, %v2174_v26 }
  0x33   :  { %2102 = vmatmul.mubr.msk.bf16.gmra.mxu1 %vm330_vm0, %v2175_v27  ;;  %2037 = vmatprep.mubr.msk.bf16.mxu0 %vm330_vm0, %v2176_v28 }
  0x34   :  { %2105 = vmatprep.mubr.msk.bf16.mxu1 %vm330_vm0, %v2177_v29 }
  0x3a   :  { %2038 = vmatmul.mubr.msk.bf16.gmra.mxu0 %vm330_vm0, %v2178_v30 }
  0x3b   :  { %2106 = vmatmul.mubr.msk.bf16.gmra.mxu1 %vm330_vm0, %v2179_v31  ;;  %2041 = vmatprep.mubr.msk.bf16.mxu0 %vm330_vm0, %v2180_v32 }
  0x3c   :  { %2109 = vmatprep.mubr.msk.bf16.mxu1 %vm330_vm0, %v2181_v33 }
  0x42   :  { %2042 = vmatmul.mubr.msk.bf16.gmra.mxu0 %vm330_vm0, %v2182_v34 }
  0x43   :  { %2110 = vmatmul.mubr.msk.bf16.gmra.mxu1 %vm330_vm0, %v2183_v35  ;;  %2045 = vmatprep.mubr.msk.bf16.mxu0 %vm330_vm0, %v2184_v36 }
  0x44   :  { %2113 = vmatprep.mubr.msk.bf16.mxu1 %vm330_vm0, %v2185_v37 }
  0x45   :  { %10 = vsyncpa [#allocation3], 0  ;;  %v2186_v38 = vld [vmem:[%s3194_s1 + $0x88] sm:$0xff]   ;;  %v2188_v40 = vld [vmem:[%s3194_s1 + $0x90] sm:$0xff]  }
  0x46   :  { %v2187_v39 = vld [vmem:[%s3193_s0 + $0x88] sm:$0xff]   ;;  %v2189_v41 = vld [vmem:[%s3193_s0 + $0x90] sm:$0xff]   ;;  %v2190_v42 = vld [vmem:[%s3194_s1 + $0x98] sm:$0xff]  }
  0x47   :  { %v2191_v43 = vld [vmem:[%s3193_s0 + $0x98] sm:$0xff]   ;;  %v2192_v44 = vld [vmem:[%s3194_s1 + $0xa0] sm:$0xff]   ;;  %v2194_v46 = vld [vmem:[%s3194_s1 + $0xa8] sm:$0xff]  }
  0x48   :  { %v2193_v45 = vld [vmem:[%s3193_s0 + $0xa0] sm:$0xff]   ;;  %v2195_v47 = vld [vmem:[%s3193_s0 + $0xa8] sm:$0xff]   ;;  %v2196_v48 = vld [vmem:[%s3194_s1 + $0xb0] sm:$0xff]  }
  0x49   :  { %v2197_v49 = vld [vmem:[%s3193_s0 + $0xb0] sm:$0xff]   ;;  %v2198_v50 = vld [vmem:[%s3194_s1 + $0xb8] sm:$0xff]   ;;  %v2200_v52 = vld [vmem:[%s3194_s1 + $0xc0] sm:$0xff]  }
  0x4a   :  { %2046 = vmatmul.mubr.msk.bf16.gmra.mxu0 %vm330_vm0, %v2186_v38  ;;  %v2199_v51 = vld [vmem:[%s3193_s0 + $0xb8] sm:$0xff]   ;;  %v2201_v53 = vld [vmem:[%s3193_s0 + $0xc0] sm:$0xff]   ;;  %v2202_v54 = vld [vmem:[%s3194_s1 + $0xc8] sm:$0xff]  }
  0x4b   :  { %2114 = vmatmul.mubr.msk.bf16.gmra.mxu1 %vm330_vm0, %v2187_v39  ;;  %2049 = vmatprep.mubr.msk.bf16.mxu0 %vm330_vm0, %v2188_v40  ;;  %v2203_v55 = vld [vmem:[%s3193_s0 + $0xc8] sm:$0xff]   ;;  %v2204_v56 = vld [vmem:[%s3194_s1 + $0xd0] sm:$0xff]   ;;  %v2206_v58 = vld [vmem:[%s3194_s1 + $0xd8] sm:$0xff]  }
  0x4c   :  { %2117 = vmatprep.mubr.msk.bf16.mxu1 %vm330_vm0, %v2189_v41  ;;  %v2205_v57 = vld [vmem:[%s3193_s0 + $0xd0] sm:$0xff]   ;;  %v2207_v59 = vld [vmem:[%s3193_s0 + $0xd8] sm:$0xff]   ;;  %v2208_v60 = vld [vmem:[%s3194_s1 + $0xe0] sm:$0xff]  }
  0x4d   :  { %v2209_v61 = vld [vmem:[%s3193_s0 + $0xe0] sm:$0xff]   ;;  %v2210_v62 = vld [vmem:[%s3194_s1 + $0xe8] sm:$0xff]   ;;  %v2212_v0 = vld [vmem:[%s3194_s1 + $0xf0] sm:$0xff]  }
  0x4e   :  { %v2211_v63 = vld [vmem:[%s3193_s0 + $0xe8] sm:$0xff]   ;;  %v2213_v1 = vld [vmem:[%s3193_s0 + $0xf0] sm:$0xff]   ;;  %v2214_v2 = vld [vmem:[%s3194_s1 + $0xf8] sm:$0xff]  }
  0x4f   :  { %v2215_v3 = vld [vmem:[%s3193_s0 + $0xf8] sm:$0xff]   ;;  %v2799_v6 = vld [vmem:[%s3197_s4] ss:$0 sm:$0xff] }
  0x52   :  { %2050 = vmatmul.mubr.msk.bf16.gmra.mxu0 %vm330_vm0, %v2190_v42 }
  0x53   :  { %2118 = vmatmul.mubr.msk.bf16.gmra.mxu1 %vm330_vm0, %v2191_v43  ;;  %2053 = vmatprep.mubr.msk.bf16.mxu0 %vm330_vm0, %v2192_v44 }
  0x54   :  { %2121 = vmatprep.mubr.msk.bf16.mxu1 %vm330_vm0, %v2193_v45 }
  0x5a   :  { %2054 = vmatmul.mubr.msk.bf16.gmra.mxu0 %vm330_vm0, %v2194_v46 }
  0x5b   :  { %2122 = vmatmul.mubr.msk.bf16.gmra.mxu1 %vm330_vm0, %v2195_v47  ;;  %2057 = vmatprep.mubr.msk.bf16.mxu0 %vm330_vm0, %v2196_v48 }
  0x5c   :  { %2125 = vmatprep.mubr.msk.bf16.mxu1 %vm330_vm0, %v2197_v49 }
  0x62   :  { %2058 = vmatmul.mubr.msk.bf16.gmra.mxu0 %vm330_vm0, %v2198_v50 }
  0x63   :  { %2126 = vmatmul.mubr.msk.bf16.gmra.mxu1 %vm330_vm0, %v2199_v51  ;;  %2061 = vmatprep.mubr.msk.bf16.mxu0 %vm330_vm0, %v2200_v52 }
  0x64   :  { %2129 = vmatprep.mubr.msk.bf16.mxu1 %vm330_vm0, %v2201_v53 }
  0x6a   :  { %2062 = vmatmul.mubr.msk.bf16.gmra.mxu0 %vm330_vm0, %v2202_v54 }
  0x6b   :  { %2130 = vmatmul.mubr.msk.bf16.gmra.mxu1 %vm330_vm0, %v2203_v55  ;;  %2065 = vmatprep.mubr.msk.bf16.mxu0 %vm330_vm0, %v2204_v56 }
  0x6c   :  { %2133 = vmatprep.mubr.msk.bf16.mxu1 %vm330_vm0, %v2205_v57 }
  0x72   :  { %2066 = vmatmul.mubr.msk.bf16.gmra.mxu0 %vm330_vm0, %v2206_v58 }
  0x73   :  { %2134 = vmatmul.mubr.msk.bf16.gmra.mxu1 %vm330_vm0, %v2207_v59  ;;  %2069 = vmatprep.mubr.msk.bf16.mxu0 %vm330_vm0, %v2208_v60 }
  0x74   :  { %2137 = vmatprep.mubr.msk.bf16.mxu1 %vm330_vm0, %v2209_v61 }
  0x7a   :  { %2070 = vmatmul.mubr.msk.bf16.gmra.mxu0 %vm330_vm0, %v2210_v62 }
  0x7b   :  { %2138 = vmatmul.mubr.msk.bf16.gmra.mxu1 %vm330_vm0, %v2211_v63  ;;  %2073 = vmatprep.mubr.msk.bf16.mxu0 %vm330_vm0, %v2212_v0 }
  0x7c   :  { %2141 = vmatprep.mubr.msk.bf16.mxu1 %vm330_vm0, %v2213_v1 }
  0x82   :  { %2074 = vmatmul.mubr.msk.bf16.gmra.mxu0 %vm330_vm0, %v2214_v2 }
  0x83   :  { %2142 = vmatmul.mubr.msk.bf16.gmra.mxu1 %vm330_vm0, %v2215_v3 }
  0xca   :  { %v2015_v4 = vpop.f32.mrf.mxu0 }
  0xcb   :  { %v2083_v5 = vpop.f32.mrf.mxu1 }
  0xcc   :  { %v1027_v7 = vadd.f32 %v2083_v5, %v2015_v4  ;;  %v461_v8 = vpop.f32.mrf.mxu0 }
  0xcd   :  { %v1018_v9 = vpop.f32.mrf.mxu1 }
  0xce   :  { %v2802_v10 = vadd.f32 %v2799_v6, %v1027_v7  ;;  %v1019_v11 = vadd.f32 %v1018_v9, %v461_v8  ;;  %v2016_v12 = vpop.f32.mrf.mxu0 }
  0xcf   :  { %v2084_v13 = vpop.f32.mrf.mxu1 }
  0xd0   :  { %v1346_v14 = vsub.f32 0.0, %v2802_v10  ;;  %v2806_v15 = vadd.f32 %v2799_v6, %v1019_v11  ;;  %v1030_v16 = vadd.f32 %v2084_v13, %v2016_v12  ;;  %v464_v17 = vpop.f32.mrf.mxu0 }
  0xd1   :  { %v1021_v18 = vpop.f32.mrf.mxu1 }
  0xd2   :  { %v1412_v19 = vmul.f32 1.442695, %v1346_v14  ;;  %v1344_v20 = vsub.f32 0.0, %v2806_v15  ;;  %v2810_v21 = vadd.f32 %v2799_v6, %v1030_v16  ;;  %v1022_v22 = vadd.f32 %v1021_v18, %v464_v17  ;;  %v2019_v23 = vpop.f32.mrf.mxu0 }
  0xd3   :  { %v2087_v24 = vpop.f32.mrf.mxu1 }
  0xd4   :  { %2216 = vpow2.f32 %v1412_v19  ;;  %v1408_v25 = vmul.f32 1.442695, %v1344_v20  ;;  %v1347_v26 = vsub.f32 0.0, %v2810_v21  ;;  %v2814_v27 = vadd.f32 %v2799_v6, %v1022_v22  ;;  %v477_v28 = vpop.f32.mrf.mxu0 }
  0xd5   :  { %v1043_v29 = vadd.f32 %v2087_v24, %v2019_v23  ;;  %v1034_v30 = vpop.f32.mrf.mxu1 }
  0xd6   :  { %2218 = vpow2.f32 %v1408_v25  ;;  %v1414_v31 = vmul.f32 1.442695, %v1347_v26  ;;  %v1345_v32 = vsub.f32 0.0, %v2814_v27  ;;  %v1035_v33 = vadd.f32 %v1034_v30, %v477_v28  ;;  %v2020_v34 = vpop.f32.mrf.mxu0 }
  0xd7   :  { %v2818_v35 = vadd.f32 %v2799_v6, %v1043_v29  ;;  %v2088_v36 = vpop.f32.mrf.mxu1 }
  0xd8   :  { %2220 = vpow2.f32 %v1414_v31  ;;  %v1410_v37 = vmul.f32 1.442695, %v1345_v32  ;;  %v2821_v38 = vadd.f32 %v2799_v6, %v1035_v33  ;;  %v1046_v39 = vadd.f32 %v2088_v36, %v2020_v34  ;;  %v480_v40 = vpop.f32.mrf.mxu0 }
  0xd9   :  { %v1350_v41 = vsub.f32 0.0, %v2818_v35  ;;  %v1037_v42 = vpop.f32.mrf.mxu1 }
  0xda   :  { %2222 = vpow2.f32 %v1410_v37  ;;  %v1348_v43 = vsub.f32 0.0, %v2821_v38  ;;  %v2826_v44 = vadd.f32 %v2799_v6, %v1046_v39  ;;  %v1038_v45 = vadd.f32 %v1037_v42, %v480_v40  ;;  %v2023_v46 = vpop.f32.mrf.mxu0 }
  0xdb   :  { %v1420_v47 = vmul.f32 1.442695, %v1350_v41  ;;  %v2091_v48 = vpop.f32.mrf.mxu1 }
  0xdc   :  { %v1416_v49 = vmul.f32 1.442695, %v1348_v43  ;;  %v1351_v50 = vsub.f32 0.0, %v2826_v44  ;;  %v2830_v51 = vadd.f32 %v2799_v6, %v1038_v45  ;;  %v1059_v52 = vadd.f32 %v2091_v48, %v2023_v46  ;;  %v493_v53 = vpop.f32.mrf.mxu0 }
  0xdd   :  { %2224 = vpow2.f32 %v1420_v47  ;;  %v1050_v54 = vpop.f32.mrf.mxu1 }
  0xde   :  { %2226 = vpow2.f32 %v1416_v49  ;;  %v1422_v55 = vmul.f32 1.442695, %v1351_v50  ;;  %v1349_v56 = vsub.f32 0.0, %v2830_v51  ;;  %v2834_v57 = vadd.f32 %v2799_v6, %v1059_v52  ;;  %v2024_v58 = vpop.f32.mrf.mxu0 }
  0xdf   :  { %v1051_v59 = vadd.f32 %v1050_v54, %v493_v53  ;;  %v2092_v60 = vpop.f32.mrf.mxu1 }
  0xe0   :  { %2228 = vpow2.f32 %v1422_v55  ;;  %v1418_v61 = vmul.f32 1.442695, %v1349_v56  ;;  %v1354_v62 = vsub.f32 0.0, %v2834_v57  ;;  %v1062_v63 = vadd.f32 %v2092_v60, %v2024_v58  ;;  %v496_v0 = vpop.f32.mrf.mxu0 }
  0xe1   :  { %v2217_v1 = vpop.eup %2216  ;;  %v2838_v2 = vadd.f32 %v2799_v6, %v1051_v59  ;;  %v1053_v3 = vpop.f32.mrf.mxu1 }
  0xe2   :  { %v1538_v4 = vadd.f32 1.0, %v2217_v1  ;;  %2230 = vpow2.f32 %v1418_v61  ;;  %v1428_v5 = vmul.f32 1.442695, %v1354_v62  ;;  %v2841_v7 = vadd.f32 %v2799_v6, %v1062_v63  ;;  %v2027_v8 = vpop.f32.mrf.mxu0 }
  0xe3   :  { %v2219_v9 = vpop.eup %2218  ;;  %v1352_v11 = vsub.f32 0.0, %v2838_v2  ;;  %v1054_v12 = vadd.f32 %v1053_v3, %v496_v0  ;;  %v2095_v13 = vpop.f32.mrf.mxu1 }
  0xe4   :  { %2232 = vrcp.f32 %v1538_v4  ;;  %v1536_v14 = vadd.f32 1.0, %v2219_v9  ;;  %v1355_v16 = vsub.f32 0.0, %v2841_v7  ;;  %v1075_v17 = vadd.f32 %v2095_v13, %v2027_v8  ;;  %v509_v18 = vpop.f32.mrf.mxu0 }
  0xe5   :  { %v2221_v19 = vpop.eup %2220  ;;  %2234 = vpow2.f32 %v1428_v5  ;;  %v1424_v20 = vmul.f32 1.442695, %v1352_v11  ;;  %v2846_v22 = vadd.f32 %v2799_v6, %v1054_v12  ;;  %v1066_v23 = vpop.f32.mrf.mxu1 }
  0xe6   :  { %2236 = vrcp.f32 %v1536_v14  ;;  %v1539_v24 = vadd.f32 1.0, %v2221_v19  ;;  %v1430_v25 = vmul.f32 1.442695, %v1355_v16  ;;  %v2849_v26 = vadd.f32 %v2799_v6, %v1075_v17  ;;  %v2028_v28 = vpop.f32.mrf.mxu0 }
  0xe7   :  { %v2223_v29 = vpop.eup %2222  ;;  %2238 = vpow2.f32 %v1424_v20  ;;  %v1353_v30 = vsub.f32 0.0, %v2846_v22  ;;  %v1067_v31 = vadd.f32 %v1066_v23, %v509_v18  ;;  %v2096_v32 = vpop.f32.mrf.mxu1 }
  0xe8   :  { %2240 = vrcp.f32 %v1539_v24  ;;  %v1537_v33 = vadd.f32 1.0, %v2223_v29  ;;  %v1358_v34 = vsub.f32 0.0, %v2849_v26  ;;  %v1078_v36 = vadd.f32 %v2096_v32, %v2028_v28  ;;  %v512_v37 = vpop.f32.mrf.mxu0 }
  0xe9   :  { %2242 = vpow2.f32 %v1430_v25  ;;  %v1426_v39 = vmul.f32 1.442695, %v1353_v30  ;;  %v2854_v40 = vadd.f32 %v2799_v6, %v1067_v31  ;;  %v1069_v41 = vpop.f32.mrf.mxu1 }
  0xea   :  { %v2225_v42 = vpop.eup %2224  ;;  %2244 = vrcp.f32 %v1537_v33  ;;  %v1436_v43 = vmul.f32 1.442695, %v1358_v34  ;;  %v2857_v45 = vadd.f32 %v2799_v6, %v1078_v36  ;;  %v1070_v46 = vadd.f32 %v1069_v41, %v512_v37  ;;  %v2031_v47 = vpop.f32.mrf.mxu0 }
  0xeb   :  { %v2227_v48 = vpop.eup %2226  ;;  %v1542_v49 = vadd.f32 1.0, %v2225_v42  ;;  %2246 = vpow2.f32 %v1426_v39  ;;  %v1356_v50 = vsub.f32 0.0, %v2854_v40  ;;  %v2099_v52 = vpop.f32.mrf.mxu1 }
  0xec   :  { %v1540_v53 = vadd.f32 1.0, %v2227_v48  ;;  %2248 = vpow2.f32 %v1436_v43  ;;  %v1359_v54 = vsub.f32 0.0, %v2857_v45  ;;  %v2862_v55 = vadd.f32 %v2799_v6, %v1070_v46  ;;  %v525_v56 = vpop.f32.mrf.mxu0 }
  0xed   :  { %v2229_v58 = vpop.eup %2228  ;;  %2250 = vrcp.f32 %v1542_v49  ;;  %v1432_v59 = vmul.f32 1.442695, %v1356_v50  ;;  %v1091_v60 = vadd.f32 %v2099_v52, %v2031_v47  ;;  %v1082_v61 = vpop.f32.mrf.mxu1 }
  0xee   :  { %2252 = vrcp.f32 %v1540_v53  ;;  %v1543_v62 = vadd.f32 1.0, %v2229_v58  ;;  %v1438_v63 = vmul.f32 1.442695, %v1359_v54  ;;  %v1357_v0 = vsub.f32 0.0, %v2862_v55  ;;  %v2032_v1 = vpop.f32.mrf.mxu0 }
  0xef   :  { %v2231_v3 = vpop.eup %2230  ;;  %2254 = vpow2.f32 %v1432_v59  ;;  %v2866_v4 = vadd.f32 %v2799_v6, %v1091_v60  ;;  %v1083_v5 = vadd.f32 %v1082_v61, %v525_v56  ;;  %v2100_v8 = vpop.f32.mrf.mxu1 }
  0xf0   :  { %2256 = vrcp.f32 %v1543_v62  ;;  %v1541_v9 = vadd.f32 1.0, %v2231_v3  ;;  %v1434_v11 = vmul.f32 1.442695, %v1357_v0  ;;  %v1094_v12 = vadd.f32 %v2100_v8, %v2032_v1  ;;  %v528_v13 = vpop.f32.mrf.mxu0 }
  0xf1   :  { %v2233_v14 = vpop.eup %2232  ;;  %2258 = vpow2.f32 %v1438_v63  ;;  %v1362_v16 = vsub.f32 0.0, %v2866_v4  ;;  %v2870_v17 = vadd.f32 %v2799_v6, %v1083_v5  ;;  %v1085_v18 = vpop.f32.mrf.mxu1 }
  0xf2   :  { %v2235_v19 = vpop.eup %2234  ;;  %v1666_v20 = vmul.f32 %v2233_v14, %v2802_v10  ;;  %2260 = vrcp.f32 %v1541_v9  ;;  %v2874_v23 = vadd.f32 %v2799_v6, %v1094_v12  ;;  %v1086_v24 = vadd.f32 %v1085_v18, %v528_v13  ;;  %v2035_v25 = vpop.f32.mrf.mxu0 }
  0xf3   :  { %v2237_v28 = vpop.eup %2236  ;;  %v1546_v29 = vadd.f32 1.0, %v2235_v19  ;;  %2262 = vpow2.f32 %v1434_v11  ;;  %v1444_v30 = vmul.f32 1.442695, %v1362_v16  ;;  %v1360_v31 = vsub.f32 0.0, %v2870_v17  ;;  %v2103_v32 = vpop.f32.mrf.mxu1 }
  0xf4   :  { %v2239_v33 = vpop.eup %2238  ;;  %1730 = vst.msk [vmem:[#allocation2 + $0x10] sm:$0xff] %vm330_vm0, %v1666_v20  ;;  %v1664_v34 = vmul.f32 %v2237_v28, %v2806_v15  ;;  %v1363_v10 = vsub.f32 0.0, %v2874_v23  ;;  %v2881_v36 = vadd.f32 %v2799_v6, %v1086_v24  ;;  %v1107_v37 = vadd.f32 %v2103_v32, %v2035_v25  ;;  %v541_v39 = vpop.f32.mrf.mxu0 }
  0xf5   :  { %v2241_v41 = vpop.eup %2240  ;;  %2264 = vrcp.f32 %v1546_v29  ;;  %v1544_v42 = vadd.f32 1.0, %v2239_v33  ;;  %v1440_v43 = vmul.f32 1.442695, %v1360_v31  ;;  %v1098_v46 = vpop.f32.mrf.mxu1 }
  0xf6   :  { %v2243_v47 = vpop.eup %2242  ;;  %1728 = vst.msk [vmem:[#allocation2] sm:$0xff] %vm330_vm0, %v1664_v34  ;;  %v1667_v48 = vmul.f32 %v2241_v41, %v2810_v21  ;;  %2266 = vpow2.f32 %v1444_v30  ;;  %v1446_v49 = vmul.f32 1.442695, %v1363_v10  ;;  %v1361_v15 = vsub.f32 0.0, %v2881_v36  ;;  %v2036_v50 = vpop.f32.mrf.mxu0 }
  0xf7   :  { %v2245_v52 = vpop.eup %2244  ;;  %2268 = vrcp.f32 %v1544_v42  ;;  %v1547_v53 = vadd.f32 1.0, %v2243_v47  ;;  %v2887_v54 = vadd.f32 %v2799_v6, %v1107_v37  ;;  %v1099_v56 = vadd.f32 %v1098_v46, %v541_v39  ;;  %v2104_v58 = vpop.f32.mrf.mxu1 }
  0xf8   :  { %v2247_v59 = vpop.eup %2246  ;;  %1731 = vst.msk [vmem:[#allocation2 + $0x18] sm:$0xff] %vm330_vm0, %v1667_v48  ;;  %v1665_v60 = vmul.f32 %v2245_v52, %v2814_v27  ;;  %2270 = vpow2.f32 %v1440_v43  ;;  %v1442_v21 = vmul.f32 1.442695, %v1361_v15  ;;  %v1110_v61 = vadd.f32 %v2104_v58, %v2036_v50  ;;  %v544_v62 = vpop.f32.mrf.mxu0 }
  0xf9   :  { %v2249_v63 = vpop.eup %2248  ;;  %2272 = vrcp.f32 %v1547_v53  ;;  %v1545_v0 = vadd.f32 1.0, %v2247_v59  ;;  %v1366_v1 = vsub.f32 0.0, %v2887_v54  ;;  %v2893_v3 = vadd.f32 %v2799_v6, %v1099_v56  ;;  %v1101_v5 = vpop.f32.mrf.mxu1 }
  0xfa   :  { %v2251_v8 = vpop.eup %2250  ;;  %1729 = vst.msk [vmem:[#allocation2 + $0x8] sm:$0xff] %vm330_vm0, %v1665_v60  ;;  %v1550_v9 = vadd.f32 1.0, %v2249_v63  ;;  %2274 = vpow2.f32 %v1446_v49  ;;  %v2897_v27 = vadd.f32 %v2799_v6, %v1110_v61  ;;  %v1102_v11 = vadd.f32 %v1101_v5, %v544_v62  ;;  %v2039_v12 = vpop.f32.mrf.mxu0 }
  0xfb   :  { %v2253_v13 = vpop.eup %2252  ;;  %v1670_v14 = vmul.f32 %v2251_v8, %v2818_v35  ;;  %2276 = vrcp.f32 %v1545_v0  ;;  %v1452_v16 = vmul.f32 1.442695, %v1366_v1  ;;  %v1364_v18 = vsub.f32 0.0, %v2893_v3  ;;  %v2107_v19 = vpop.f32.mrf.mxu1 }
  0xfc   :  { %v2255_v20 = vpop.eup %2254  ;;  %v1668_v24 = vmul.f32 %v2253_v13, %v2821_v38  ;;  %2278 = vrcp.f32 %v1550_v9  ;;  %v1367_v25 = vsub.f32 0.0, %v2897_v27  ;;  %v2904_v28 = vadd.f32 %v2799_v6, %v1102_v11  ;;  %v557_v29 = vpop.f32.mrf.mxu0 }
  0xfd   :  { %v2257_v30 = vpop.eup %2256  ;;  %1734 = vst.msk [vmem:[#allocation2 + $0x30] sm:$0xff] %vm330_vm0, %v1670_v14  ;;  %v1548_v31 = vadd.f32 1.0, %v2255_v20  ;;  %2280 = vpow2.f32 %v1442_v21  ;;  %v1448_v35 = vmul.f32 1.442695, %v1364_v18  ;;  %v1123_v32 = vadd.f32 %v2107_v19, %v2039_v12  ;;  %v1114_v33 = vpop.f32.mrf.mxu1 }
  0xfe   :  { %v2259_v34 = vpop.eup %2258  ;;  %1732 = vst.msk [vmem:[#allocation2 + $0x20] sm:$0xff] %vm330_vm0, %v1668_v24  ;;  %v1671_v38 = vmul.f32 %v2257_v30, %v2826_v44  ;;  %2282 = vpow2.f32 %v1452_v16  ;;  %v1454_v10 = vmul.f32 1.442695, %v1367_v25  ;;  %v1365_v37 = vsub.f32 0.0, %v2904_v28  ;;  %v2040_v39 = vpop.f32.mrf.mxu0 }
  0xff   :  { %v2261_v41 = vpop.eup %2260  ;;  %2284 = vrcp.f32 %v1548_v31  ;;  %v1551_v42 = vadd.f32 1.0, %v2259_v34  ;;  %v2911_v43 = vadd.f32 %v2799_v6, %v1123_v32  ;;  %v1115_v46 = vadd.f32 %v1114_v33, %v557_v29  ;;  %v2108_v47 = vpop.f32.mrf.mxu1 }
 0x100   :  { %v2263_v48 = vpop.eup %2262  ;;  %1735 = vst.msk [vmem:[#allocation2 + $0x38] sm:$0xff] %vm330_vm0, %v1671_v38  ;;  %v1669_v49 = vmul.f32 %v2261_v41, %v2830_v51  ;;  %2286 = vpow2.f32 %v1448_v35  ;;  %v1450_v44 = vmul.f32 1.442695, %v1365_v37  ;;  %v1126_v15 = vadd.f32 %v2108_v47, %v2040_v39  ;;  %v560_v50 = vpop.f32.mrf.mxu0 }
 0x101   :  { %2288 = vrcp.f32 %v1551_v42  ;;  %v1549_v52 = vadd.f32 1.0, %v2263_v48  ;;  %v1370_v53 = vsub.f32 0.0, %v2911_v43  ;;  %v2917_v56 = vadd.f32 %v2799_v6, %v1115_v46  ;;  %v1117_v58 = vpop.f32.mrf.mxu1 }
 0x102   :  { %v2265_v59 = vpop.eup %2264  ;;  %1733 = vst.msk [vmem:[#allocation2 + $0x28] sm:$0xff] %vm330_vm0, %v1669_v49  ;;  %2290 = vpow2.f32 %v1454_v10  ;;  %v2921_v60 = vadd.f32 %v2799_v6, %v1126_v15  ;;  %v1118_v51 = vadd.f32 %v1117_v58, %v560_v50  ;;  %v2043_v21 = vpop.f32.mrf.mxu0 }
 0x103   :  { %v2267_v61 = vpop.eup %2266  ;;  %v1674_v62 = vmul.f32 %v2265_v59, %v2834_v57  ;;  %2292 = vrcp.f32 %v1549_v52  ;;  %v1460_v63 = vmul.f32 1.442695, %v1370_v53  ;;  %v1368_v0 = vsub.f32 0.0, %v2917_v56  ;;  %v2111_v1 = vpop.f32.mrf.mxu1 }
 0x104   :  { %v2269_v5 = vpop.eup %2268  ;;  %v1554_v8 = vadd.f32 1.0, %v2267_v61  ;;  %2294 = vpow2.f32 %v1450_v44  ;;  %v1371_v9 = vsub.f32 0.0, %v2921_v60  ;;  %v2927_v11 = vadd.f32 %v2799_v6, %v1118_v51  ;;  %v573_v12 = vpop.f32.mrf.mxu0 }
 0x105   :  { %v2271_v13 = vpop.eup %2270  ;;  %1738 = vst.msk [vmem:[#allocation2 + $0x50] sm:$0xff] %vm330_vm0, %v1674_v62  ;;  %v1672_v14 = vmul.f32 %v2269_v5, %v2838_v2  ;;  %2296 = vpow2.f32 %v1460_v63  ;;  %v1456_v57 = vmul.f32 1.442695, %v1368_v0  ;;  %v1139_v16 = vadd.f32 %v2111_v1, %v2043_v21  ;;  %v1130_v18 = vpop.f32.mrf.mxu1 }
 0x106   :  { %v2273_v19 = vpop.eup %2272  ;;  %2298 = vrcp.f32 %v1554_v8  ;;  %v1552_v20 = vadd.f32 1.0, %v2271_v13  ;;  %v1462_v24 = vmul.f32 1.442695, %v1371_v9  ;;  %v1369_v25 = vsub.f32 0.0, %v2927_v11  ;;  %v2044_v29 = vpop.f32.mrf.mxu0 }
 0x107   :  { %v2275_v30 = vpop.eup %2274  ;;  %1736 = vst.msk [vmem:[#allocation2 + $0x40] sm:$0xff] %vm330_vm0, %v1672_v14  ;;  %v1675_v31 = vmul.f32 %v2273_v19, %v2841_v7  ;;  %2300 = vpow2.f32 %v1456_v57  ;;  %v2935_v35 = vadd.f32 %v2799_v6, %v1139_v16  ;;  %v1131_v2 = vadd.f32 %v1130_v18, %v573_v12  ;;  %v2112_v32 = vpop.f32.mrf.mxu1 }
 0x108   :  { %v2277_v33 = vpop.eup %2276  ;;  %2302 = vrcp.f32 %v1552_v20  ;;  %v1555_v34 = vadd.f32 1.0, %v2275_v30  ;;  %v1458_v38 = vmul.f32 1.442695, %v1369_v25  ;;  %v1142_v10 = vadd.f32 %v2112_v32, %v2044_v29  ;;  %v576_v37 = vpop.f32.mrf.mxu0 }
 0x109   :  { %v2279_v39 = vpop.eup %2278  ;;  %1739 = vst.msk [vmem:[#allocation2 + $0x58] sm:$0xff] %vm330_vm0, %v1675_v31  ;;  %v1673_v41 = vmul.f32 %v2277_v33, %v2846_v22  ;;  %2304 = vpow2.f32 %v1462_v24  ;;  %v1374_v7 = vsub.f32 0.0, %v2935_v35  ;;  %v2941_v42 = vadd.f32 %v2799_v6, %v1131_v2  ;;  %v1133_v46 = vpop.f32.mrf.mxu1 }
 0x10a   :  { %v2281_v47 = vpop.eup %2280  ;;  %v1678_v48 = vmul.f32 %v2279_v39, %v2849_v26  ;;  %2306 = vrcp.f32 %v1555_v34  ;;  %v2945_v49 = vadd.f32 %v2799_v6, %v1142_v10  ;;  %v1134_v44 = vadd.f32 %v1133_v46, %v576_v37  ;;  %v2047_v15 = vpop.f32.mrf.mxu0 }
 0x10b   :  { %v2283_v50 = vpop.eup %2282  ;;  %1737 = vst.msk [vmem:[#allocation2 + $0x48] sm:$0xff] %vm330_vm0, %v1673_v41  ;;  %v1553_v22 = vadd.f32 1.0, %v2281_v47  ;;  %2308 = vpow2.f32 %v1458_v38  ;;  %v1468_v52 = vmul.f32 1.442695, %v1374_v7  ;;  %v1372_v53 = vsub.f32 0.0, %v2941_v42  ;;  %v2115_v58 = vpop.f32.mrf.mxu1 }
 0x10c   :  { %v2285_v59 = vpop.eup %2284  ;;  %1742 = vst.msk [vmem:[#allocation2 + $0x70] sm:$0xff] %vm330_vm0, %v1678_v48  ;;  %v1558_v51 = vadd.f32 1.0, %v2283_v50  ;;  %v1375_v26 = vsub.f32 0.0, %v2945_v49  ;;  %v2952_v21 = vadd.f32 %v2799_v6, %v1134_v44  ;;  %v1155_v61 = vadd.f32 %v2115_v58, %v2047_v15  ;;  %v589_v62 = vpop.f32.mrf.mxu0 }
 0x10d   :  { %v2287_v63 = vpop.eup %2286  ;;  %v1676_v0 = vmul.f32 %v2285_v59, %v2854_v40  ;;  %2310 = vrcp.f32 %v1553_v22  ;;  %v1464_v1 = vmul.f32 1.442695, %v1372_v53  ;;  %v1146_v5 = vpop.f32.mrf.mxu1 }
 0x10e   :  { %v2289_v8 = vpop.eup %2288  ;;  %2312 = vrcp.f32 %v1558_v51  ;;  %v1556_v9 = vadd.f32 1.0, %v2287_v63  ;;  %v1470_v12 = vmul.f32 1.442695, %v1375_v26  ;;  %v1373_v13 = vsub.f32 0.0, %v2952_v21  ;;  %v2048_v14 = vpop.f32.mrf.mxu0 }
 0x10f   :  { %v2291_v57 = vpop.eup %2290  ;;  %1740 = vst.msk [vmem:[#allocation2 + $0x60] sm:$0xff] %vm330_vm0, %v1676_v0  ;;  %v1679_v16 = vmul.f32 %v2289_v8, %v2857_v45  ;;  %2314 = vpow2.f32 %v1468_v52  ;;  %v2959_v18 = vadd.f32 %v2799_v6, %v1155_v61  ;;  %v1147_v40 = vadd.f32 %v1146_v5, %v589_v62  ;;  %v2116_v19 = vpop.f32.mrf.mxu1 }
 0x110   :  { %v2293_v20 = vpop.eup %2292  ;;  %2316 = vrcp.f32 %v1556_v9  ;;  %v1559_v24 = vadd.f32 1.0, %v2291_v57  ;;  %v1466_v25 = vmul.f32 1.442695, %v1373_v13  ;;  %v1158_v29 = vadd.f32 %v2116_v19, %v2048_v14  ;;  %v592_v30 = vpop.f32.mrf.mxu0 }
 0x111   :  { %v2295_v31 = vpop.eup %2294  ;;  %1743 = vst.msk [vmem:[#allocation2 + $0x78] sm:$0xff] %vm330_vm0, %v1679_v16  ;;  %v1677_v2 = vmul.f32 %v2293_v20, %v2862_v55  ;;  %2318 = vpow2.f32 %v1464_v1  ;;  %v1378_v45 = vsub.f32 0.0, %v2959_v18  ;;  %v2965_v32 = vadd.f32 %v2799_v6, %v1147_v40  ;;  %v1149_v33 = vpop.f32.mrf.mxu1 }
 0x112   :  { %v2297_v34 = vpop.eup %2296  ;;  %2320 = vrcp.f32 %v1559_v24  ;;  %v1557_v38 = vadd.f32 1.0, %v2295_v31  ;;  %v2968_v10 = vadd.f32 %v2799_v6, %v1158_v29  ;;  %v1150_v37 = vadd.f32 %v1149_v33, %v592_v30  ;;  %v2051_v39 = vpop.f32.mrf.mxu0 }
 0x113   :  { %v2299_v41 = vpop.eup %2298  ;;  %1741 = vst.msk [vmem:[#allocation2 + $0x68] sm:$0xff] %vm330_vm0, %v1677_v2  ;;  %v1562_v7 = vadd.f32 1.0, %v2297_v34  ;;  %2322 = vpow2.f32 %v1470_v12  ;;  %v1476_v55 = vmul.f32 1.442695, %v1378_v45  ;;  %v1376_v46 = vsub.f32 0.0, %v2965_v32  ;;  %v2119_v47 = vpop.f32.mrf.mxu1 }
 0x114   :  { %v2301_v48 = vpop.eup %2300  ;;  %v1682_v44 = vmul.f32 %v2299_v41, %v2866_v4  ;;  %2324 = vrcp.f32 %v1557_v38  ;;  %v1379_v15 = vsub.f32 0.0, %v2968_v10  ;;  %v2975_v50 = vadd.f32 %v2799_v6, %v1150_v37  ;;  %v605_v22 = vpop.f32.mrf.mxu0 }
 0x115   :  { %v2303_v52 = vpop.eup %2302  ;;  %2326 = vrcp.f32 %v1562_v7  ;;  %v1560_v53 = vadd.f32 1.0, %v2301_v48  ;;  %v1472_v58 = vmul.f32 1.442695, %v1376_v46  ;;  %v1171_v59 = vadd.f32 %v2119_v47, %v2051_v39  ;;  %v1162_v51 = vpop.f32.mrf.mxu1 }
 0x116   :  { %v2305_v26 = vpop.eup %2304  ;;  %1746 = vst.msk [vmem:[#allocation2 + $0x90] sm:$0xff] %vm330_vm0, %v1682_v44  ;;  %v1680_v61 = vmul.f32 %v2303_v52, %v2870_v17  ;;  %2328 = vpow2.f32 %v1466_v25  ;;  %v1478_v4 = vmul.f32 1.442695, %v1379_v15  ;;  %v1377_v62 = vsub.f32 0.0, %v2975_v50  ;;  %v2052_v63 = vpop.f32.mrf.mxu0 }
 0x117   :  { %v2307_v0 = vpop.eup %2306  ;;  %2330 = vrcp.f32 %v1560_v53  ;;  %v1563_v1 = vadd.f32 1.0, %v2305_v26  ;;  %v2981_v5 = vadd.f32 %v2799_v6, %v1171_v59  ;;  %v1163_v8 = vadd.f32 %v1162_v51, %v605_v22  ;;  %v2120_v9 = vpop.f32.mrf.mxu1 }
 0x118   :  { %v2309_v12 = vpop.eup %2308  ;;  %1744 = vst.msk [vmem:[#allocation2 + $0x80] sm:$0xff] %vm330_vm0, %v1680_v61  ;;  %v1683_v13 = vmul.f32 %v2307_v0, %v2874_v23  ;;  %2332 = vpow2.f32 %v1476_v55  ;;  %v1474_v17 = vmul.f32 1.442695, %v1377_v62  ;;  %v1174_v14 = vadd.f32 %v2120_v9, %v2052_v63  ;;  %v608_v57 = vpop.f32.mrf.mxu0 }
 0x119   :  { %2334 = vrcp.f32 %v1563_v1  ;;  %v1561_v16 = vadd.f32 1.0, %v2309_v12  ;;  %v1382_v40 = vsub.f32 0.0, %v2981_v5  ;;  %v2987_v19 = vadd.f32 %v2799_v6, %v1163_v8  ;;  %v1165_v20 = vpop.f32.mrf.mxu1 }
 0x11a   :  { %v2311_v24 = vpop.eup %2310  ;;  %1747 = vst.msk [vmem:[#allocation2 + $0x98] sm:$0xff] %vm330_vm0, %v1683_v13  ;;  %2336 = vpow2.f32 %v1472_v58  ;;  %v2991_v25 = vadd.f32 %v2799_v6, %v1174_v14  ;;  %v1166_v23 = vadd.f32 %v1165_v20, %v608_v57  ;;  %v2055_v29 = vpop.f32.mrf.mxu0 }
 0x11b   :  { %v2313_v30 = vpop.eup %2312  ;;  %v1681_v31 = vmul.f32 %v2311_v24, %v2881_v36  ;;  %2338 = vrcp.f32 %v1561_v16  ;;  %v1484_v2 = vmul.f32 1.442695, %v1382_v40  ;;  %v1380_v45 = vsub.f32 0.0, %v2987_v19  ;;  %v2123_v33 = vpop.f32.mrf.mxu1 }
 0x11c   :  { %v2315_v34 = vpop.eup %2314  ;;  %v1686_v38 = vmul.f32 %v2313_v30, %v2887_v54  ;;  %2340 = vpow2.f32 %v1478_v4  ;;  %v1383_v37 = vsub.f32 0.0, %v2991_v25  ;;  %v2998_v39 = vadd.f32 %v2799_v6, %v1166_v23  ;;  %v621_v41 = vpop.f32.mrf.mxu0 }
 0x11d   :  { %v2317_v7 = vpop.eup %2316  ;;  %1745 = vst.msk [vmem:[#allocation2 + $0x88] sm:$0xff] %vm330_vm0, %v1681_v31  ;;  %v1566_v55 = vadd.f32 1.0, %v2315_v34  ;;  %2342 = vpow2.f32 %v1474_v17  ;;  %v1480_v36 = vmul.f32 1.442695, %v1380_v45  ;;  %v1187_v46 = vadd.f32 %v2123_v33, %v2055_v29  ;;  %v1178_v47 = vpop.f32.mrf.mxu1 }
 0x11e   :  { %v2319_v48 = vpop.eup %2318  ;;  %1750 = vst.msk [vmem:[#allocation2 + $0xb0] sm:$0xff] %vm330_vm0, %v1686_v38  ;;  %v1684_v54 = vmul.f32 %v2317_v7, %v2893_v3  ;;  %2344 = vpow2.f32 %v1484_v2  ;;  %v1486_v44 = vmul.f32 1.442695, %v1383_v37  ;;  %v1381_v15 = vsub.f32 0.0, %v2998_v39  ;;  %v2056_v22 = vpop.f32.mrf.mxu0 }
 0x11f   :  { %v2321_v52 = vpop.eup %2320  ;;  %2346 = vrcp.f32 %v1566_v55  ;;  %v1564_v53 = vadd.f32 1.0, %v2319_v48  ;;  %v3005_v58 = vadd.f32 %v2799_v6, %v1187_v46  ;;  %v1179_v59 = vadd.f32 %v1178_v47, %v621_v41  ;;  %v2124_v51 = vpop.f32.mrf.mxu1 }
 0x120   :  { %v2323_v26 = vpop.eup %2322  ;;  %1748 = vst.msk [vmem:[#allocation2 + $0xa0] sm:$0xff] %vm330_vm0, %v1684_v54  ;;  %v1687_v61 = vmul.f32 %v2321_v52, %v2897_v27  ;;  %2348 = vpow2.f32 %v1480_v36  ;;  %v1482_v3 = vmul.f32 1.442695, %v1381_v15  ;;  %v1190_v4 = vadd.f32 %v2124_v51, %v2056_v22  ;;  %v624_v62 = vpop.f32.mrf.mxu0 }
 0x121   :  { %v2325_v63 = vpop.eup %2324  ;;  %2350 = vrcp.f32 %v1564_v53  ;;  %v1567_v0 = vadd.f32 1.0, %v2323_v26  ;;  %v1386_v1 = vsub.f32 0.0, %v3005_v58  ;;  %v3011_v8 = vadd.f32 %v2799_v6, %v1179_v59  ;;  %v1181_v9 = vpop.f32.mrf.mxu1 }
 0x122   :  { %v2327_v12 = vpop.eup %2326  ;;  %1751 = vst.msk [vmem:[#allocation2 + $0xb8] sm:$0xff] %vm330_vm0, %v1687_v61  ;;  %v1685_v13 = vmul.f32 %v2325_v63, %v2904_v28  ;;  %2352 = vpow2.f32 %v1486_v44  ;;  %v3016_v27 = vadd.f32 %v2799_v6, %v1190_v4  ;;  %v1182_v17 = vadd.f32 %v1181_v9, %v624_v62  ;;  %v2059_v14 = vpop.f32.mrf.mxu0 }
 0x123   :  { %v2329_v57 = vpop.eup %2328  ;;  %v1690_v16 = vmul.f32 %v2327_v12, %v2911_v43  ;;  %2354 = vrcp.f32 %v1567_v0  ;;  %v1492_v40 = vmul.f32 1.442695, %v1386_v1  ;;  %v1384_v20 = vsub.f32 0.0, %v3011_v8  ;;  %v2127_v24 = vpop.f32.mrf.mxu1 }
 0x124   :  { %v2331_v23 = vpop.eup %2330  ;;  %1749 = vst.msk [vmem:[#allocation2 + $0xa8] sm:$0xff] %vm330_vm0, %v1685_v13  ;;  %v1565_v29 = vadd.f32 1.0, %v2329_v57  ;;  %2356 = vpow2.f32 %v1482_v3  ;;  %v1387_v28 = vsub.f32 0.0, %v3016_v27  ;;  %v3023_v30 = vadd.f32 %v2799_v6, %v1182_v17  ;;  %v637_v31 = vpop.f32.mrf.mxu0 }
 0x125   :  { %v2333_v2 = vpop.eup %2332  ;;  %1754 = vst.msk [vmem:[#allocation2 + $0xd0] sm:$0xff] %vm330_vm0, %v1690_v16  ;;  %v1688_v43 = vmul.f32 %v2331_v23, %v2917_v56  ;;  %2358 = vpow2.f32 %v1492_v40  ;;  %v1488_v45 = vmul.f32 1.442695, %v1384_v20  ;;  %v1203_v33 = vadd.f32 %v2127_v24, %v2059_v14  ;;  %v1194_v34 = vpop.f32.mrf.mxu1 }
 0x126   :  { %v2335_v38 = vpop.eup %2334  ;;  %2360 = vrcp.f32 %v1565_v29  ;;  %v1570_v37 = vadd.f32 1.0, %v2333_v2  ;;  %v1494_v41 = vmul.f32 1.442695, %v1387_v28  ;;  %v1385_v7 = vsub.f32 0.0, %v3023_v30  ;;  %v2060_v55 = vpop.f32.mrf.mxu0 }
 0x127   :  { %v2337_v36 = vpop.eup %2336  ;;  %1752 = vst.msk [vmem:[#allocation2 + $0xc0] sm:$0xff] %vm330_vm0, %v1688_v43  ;;  %v1691_v46 = vmul.f32 %v2335_v38, %v2921_v60  ;;  %2362 = vpow2.f32 %v1488_v45  ;;  %v3031_v47 = vadd.f32 %v2799_v6, %v1203_v33  ;;  %v1195_v56 = vadd.f32 %v1194_v34, %v637_v31  ;;  %v2128_v48 = vpop.f32.mrf.mxu1 }
 0x128   :  { %v2339_v54 = vpop.eup %2338  ;;  %2364 = vrcp.f32 %v1570_v37  ;;  %v1568_v44 = vadd.f32 1.0, %v2337_v36  ;;  %v1490_v15 = vmul.f32 1.442695, %v1385_v7  ;;  %v1206_v22 = vadd.f32 %v2128_v48, %v2060_v55  ;;  %v640_v52 = vpop.f32.mrf.mxu0 }
 0x129   :  { %v2341_v53 = vpop.eup %2340  ;;  %1755 = vst.msk [vmem:[#allocation2 + $0xd8] sm:$0xff] %vm330_vm0, %v1691_v46  ;;  %v1689_v59 = vmul.f32 %v2339_v54, %v2927_v11  ;;  %2366 = vpow2.f32 %v1494_v41  ;;  %v1390_v60 = vsub.f32 0.0, %v3031_v47  ;;  %v3037_v51 = vadd.f32 %v2799_v6, %v1195_v56  ;;  %v1197_v26 = vpop.f32.mrf.mxu1 }
 0x12a   :  { %v2343_v61 = vpop.eup %2342  ;;  %2368 = vrcp.f32 %v1568_v44  ;;  %v1571_v3 = vadd.f32 1.0, %v2341_v53  ;;  %v3040_v4 = vadd.f32 %v2799_v6, %v1206_v22  ;;  %v1198_v62 = vadd.f32 %v1197_v26, %v640_v52  ;;  %v2063_v63 = vpop.f32.mrf.mxu0  ;;  %v3048_v6 = vld [vmem:[%s3197_s4] ss:$0 sm:$0xff]  ;;  %s2495_s4 = smov [#allocation2]  }
 0x12b   :  { %v2345_v0 = vpop.eup %2344  ;;  %1753 = vst.msk [vmem:[#allocation2 + $0xc8] sm:$0xff] %vm330_vm0, %v1689_v59  ;;  %v1569_v1 = vadd.f32 1.0, %v2343_v61  ;;  %2370 = vpow2.f32 %v1490_v15  ;;  %v1500_v11 = vmul.f32 1.442695, %v1390_v60  ;;  %v1388_v9 = vsub.f32 0.0, %v3037_v51  ;;  %v2131_v12 = vpop.f32.mrf.mxu1  ;;  %s1797_s21 = sshll.u32 %s2495_s4, 4  ;;  %s1798_s21 = int_to_ptr.vmem [resolvable:$true] %s1797_s21 }
 0x12c   :  { %v2347_v13 = vpop.eup %2346  ;;  %2372 = vrcp.f32 %v1571_v3  ;;  %v1574_v17 = vadd.f32 1.0, %v2345_v0  ;;  %v1391_v14 = vsub.f32 0.0, %v3040_v4  ;;  %v3051_v57 = vadd.f32 %v3048_v6, %v1198_v62  ;;  %v653_v16 = vpop.f32.mrf.mxu0  ;;  %s2473_s22 = scalar_lea.vmem %s1798_s21, 8192  ;;  %p2478_p1 = scmp.lt.s32.totalorder %s1798_s21, %s1798_s21 }
 0x12d   :  { %v2349_v40 = vpop.eup %2348  ;;  %v1694_v20 = vmul.f32 %v2347_v13, %v2935_v35  ;;  %2374 = vrcp.f32 %v1569_v1  ;;  %v1496_v24 = vmul.f32 1.442695, %v1388_v9  ;;  %v1219_v23 = vadd.f32 %v2131_v12, %v2063_v63  ;;  %v1210_v29 = vpop.f32.mrf.mxu1  ;;  %p2474_p0 = scmp.ne.s32.totalorder %s1798_s21, %s2473_s22  ;;  %p2479_p2 = scmp.lt.s32.totalorder %s2473_s22, %s2473_s22 }
 0x12e   :  { %v2351_v28 = vpop.eup %2350  ;;  %2376 = vrcp.f32 %v1574_v17  ;;  %v1572_v31 = vadd.f32 1.0, %v2349_v40  ;;  %v1502_v2 = vmul.f32 1.442695, %v1391_v14  ;;  %v1389_v43 = vsub.f32 0.0, %v3051_v57  ;;  %v2064_v45 = vpop.f32.mrf.mxu0 }
 0x12f   :  { %v2353_v33 = vpop.eup %2352  ;;  %1758 = vst.msk [vmem:[#allocation2 + $0xf0] sm:$0xff] %vm330_vm0, %v1694_v20  ;;  %v1692_v34 = vmul.f32 %v2351_v28, %v2941_v42  ;;  %2378 = vpow2.f32 %v1500_v11  ;;  %v3058_v38 = vadd.f32 %v3048_v6, %v1219_v23  ;;  %v1211_v35 = vadd.f32 %v1210_v29, %v653_v16  ;;  %v2132_v37 = vpop.f32.mrf.mxu1  ;;  %p2480_p3 = por %p2479_p2, %p2478_p1 }
 0x130   :  { %v2355_v41 = vpop.eup %2354  ;;  %2380 = vrcp.f32 %v1572_v31  ;;  %v1575_v7 = vadd.f32 1.0, %v2353_v33  ;;  %v1498_v55 = vmul.f32 1.442695, %v1389_v43  ;;  %v1222_v36 = vadd.f32 %v2132_v37, %v2064_v45  ;;  %v656_v46 = vpop.f32.mrf.mxu0 }
 0x131   :  { %v2357_v56 = vpop.eup %2356  ;;  %1756 = vst.msk [vmem:[#allocation2 + $0xe0] sm:$0xff] %vm330_vm0, %v1692_v34  ;;  %v1695_v48 = vmul.f32 %v2355_v41, %v2945_v49  ;;  %2382 = vpow2.f32 %v1496_v24  ;;  %v1394_v42 = vsub.f32 0.0, %v3058_v38  ;;  %v3064_v54 = vadd.f32 %v3048_v6, %v1211_v35  ;;  %v1213_v44 = vpop.f32.mrf.mxu1  ;;  %p2481_p4 = pnand %p2480_p3, %p2474_p0 }
 0x132   :  { %v2359_v15 = vpop.eup %2358  ;;  %2384 = vrcp.f32 %v1575_v7  ;;  %v1573_v22 = vadd.f32 1.0, %v2357_v56  ;;  %v3067_v52 = vadd.f32 %v3048_v6, %v1222_v36  ;;  %v1214_v53 = vadd.f32 %v1213_v44, %v656_v46  ;;  %v2067_v59 = vpop.f32.mrf.mxu0 }
 0x133   :  { %v2361_v60 = vpop.eup %2360  ;;  %1759 = vst.msk [vmem:[#allocation2 + $0xf8] sm:$0xff] %vm330_vm0, %v1695_v48  ;;  %v1578_v26 = vadd.f32 1.0, %v2359_v15  ;;  %2386 = vpow2.f32 %v1502_v2  ;;  %v1508_v49 = vmul.f32 1.442695, %v1394_v42  ;;  %v1392_v61 = vsub.f32 0.0, %v3064_v54  ;;  %v2135_v3 = vpop.f32.mrf.mxu1 }
 0x134   :  { %v2363_v62 = vpop.eup %2362  ;;  %v1693_v63 = vmul.f32 %v2361_v60, %v2952_v21  ;;  %2388 = vrcp.f32 %v1573_v22  ;;  %v1395_v0 = vsub.f32 0.0, %v3067_v52  ;;  %v3074_v1 = vadd.f32 %v3048_v6, %v1214_v53  ;;  %v669_v11 = vpop.f32.mrf.mxu0 }
 0x135   :  { %v2365_v9 = vpop.eup %2364  ;;  %2390 = vrcp.f32 %v1578_v26  ;;  %v1576_v12 = vadd.f32 1.0, %v2363_v62  ;;  %v1504_v13 = vmul.f32 1.442695, %v1392_v61  ;;  %v1235_v17 = vadd.f32 %v2135_v3, %v2067_v59  ;;  %v1226_v14 = vpop.f32.mrf.mxu1 }
 0x136   :  { %v2367_v16 = vpop.eup %2366  ;;  %1757 = vst.msk [vmem:[#allocation2 + $0xe8] sm:$0xff] %vm330_vm0, %v1693_v63  ;;  %v1698_v40 = vmul.f32 %v2365_v9, %v2959_v18  ;;  %2392 = vpow2.f32 %v1498_v55  ;;  %v1510_v21 = vmul.f32 1.442695, %v1395_v0  ;;  %v1393_v20 = vsub.f32 0.0, %v3074_v1  ;;  %v2068_v24 = vpop.f32.mrf.mxu0 }
 0x137   :  { %v2369_v23 = vpop.eup %2368  ;;  %2394 = vrcp.f32 %v1576_v12  ;;  %v1579_v29 = vadd.f32 1.0, %v2367_v16  ;;  %v3080_v28 = vadd.f32 %v3048_v6, %v1235_v17  ;;  %v1227_v31 = vadd.f32 %v1226_v14, %v669_v11  ;;  %v2136_v2 = vpop.f32.mrf.mxu1 }
 0x138   :  { %v2371_v43 = vpop.eup %2370  ;;  %1762 = vst.msk [vmem:[#allocation2 + $0x110] sm:$0xff] %vm330_vm0, %v1698_v40  ;;  %v1696_v45 = vmul.f32 %v2369_v23, %v2965_v32  ;;  %2396 = vpow2.f32 %v1508_v49  ;;  %v1506_v18 = vmul.f32 1.442695, %v1393_v20  ;;  %v1238_v33 = vadd.f32 %v2136_v2, %v2068_v24  ;;  %v672_v34 = vpop.f32.mrf.mxu0 }
 0x139   :  { %v2373_v35 = vpop.eup %2372  ;;  %2398 = vrcp.f32 %v1579_v29  ;;  %v1577_v37 = vadd.f32 1.0, %v2371_v43  ;;  %v1398_v41 = vsub.f32 0.0, %v3080_v28  ;;  %v3086_v7 = vadd.f32 %v3048_v6, %v1227_v31  ;;  %v1229_v55 = vpop.f32.mrf.mxu1 }
 0x13a   :  { %v2375_v36 = vpop.eup %2374  ;;  %1760 = vst.msk [vmem:[#allocation2 + $0x100] sm:$0xff] %vm330_vm0, %v1696_v45  ;;  %v1699_v46 = vmul.f32 %v2373_v35, %v2968_v10  ;;  %2400 = vpow2.f32 %v1504_v13  ;;  %v3091_v32 = vadd.f32 %v3048_v6, %v1238_v33  ;;  %v1230_v56 = vadd.f32 %v1229_v55, %v672_v34  ;;  %v2071_v48 = vpop.f32.mrf.mxu0 }
 0x13b   :  { %v2377_v42 = vpop.eup %2376  ;;  %v1697_v44 = vmul.f32 %v2375_v36, %v2975_v50  ;;  %2402 = vrcp.f32 %v1577_v37  ;;  %v1516_v15 = vmul.f32 1.442695, %v1398_v41  ;;  %v1396_v22 = vsub.f32 0.0, %v3086_v7  ;;  %v2139_v53 = vpop.f32.mrf.mxu1 }
 0x13c   :  { %v2379_v59 = vpop.eup %2378  ;;  %1763 = vst.msk [vmem:[#allocation2 + $0x118] sm:$0xff] %vm330_vm0, %v1699_v46  ;;  %v1702_v60 = vmul.f32 %v2377_v42, %v2981_v5  ;;  %2404 = vpow2.f32 %v1510_v21  ;;  %v1399_v10 = vsub.f32 0.0, %v3091_v32  ;;  %v3099_v26 = vadd.f32 %v3048_v6, %v1230_v56  ;;  %v685_v49 = vpop.f32.mrf.mxu0 }
 0x13d   :  { %v2381_v61 = vpop.eup %2380  ;;  %1761 = vst.msk [vmem:[#allocation2 + $0x108] sm:$0xff] %vm330_vm0, %v1697_v44  ;;  %v1582_v50 = vadd.f32 1.0, %v2379_v59  ;;  %2406 = vpow2.f32 %v1506_v18  ;;  %v1512_v3 = vmul.f32 1.442695, %v1396_v22  ;;  %v1251_v62 = vadd.f32 %v2139_v53, %v2071_v48  ;;  %v1242_v63 = vpop.f32.mrf.mxu1 }
 0x13e   :  { %v2383_v0 = vpop.eup %2382  ;;  %1766 = vst.msk [vmem:[#allocation2 + $0x130] sm:$0xff] %vm330_vm0, %v1702_v60  ;;  %v1700_v5 = vmul.f32 %v2381_v61, %v2987_v19  ;;  %2408 = vpow2.f32 %v1516_v15  ;;  %v1518_v11 = vmul.f32 1.442695, %v1399_v10  ;;  %v1397_v9 = vsub.f32 0.0, %v3099_v26  ;;  %v2072_v12 = vpop.f32.mrf.mxu0 }
 0x13f   :  { %v2385_v13 = vpop.eup %2384  ;;  %2410 = vrcp.f32 %v1582_v50  ;;  %v1580_v17 = vadd.f32 1.0, %v2383_v0  ;;  %v3106_v14 = vadd.f32 %v3048_v6, %v1251_v62  ;;  %v1243_v16 = vadd.f32 %v1242_v63, %v685_v49  ;;  %v2140_v40 = vpop.f32.mrf.mxu1 }
 0x140   :  { %v2387_v21 = vpop.eup %2386  ;;  %1764 = vst.msk [vmem:[#allocation2 + $0x120] sm:$0xff] %vm330_vm0, %v1700_v5  ;;  %v1703_v20 = vmul.f32 %v2385_v13, %v2991_v25  ;;  %2412 = vpow2.f32 %v1512_v3  ;;  %v1514_v19 = vmul.f32 1.442695, %v1397_v9  ;;  %v1254_v24 = vadd.f32 %v2140_v40, %v2072_v12  ;;  %v688_v23 = vpop.f32.mrf.mxu0 }
 0x141   :  { %v2389_v29 = vpop.eup %2388  ;;  %2414 = vrcp.f32 %v1580_v17  ;;  %v1583_v31 = vadd.f32 1.0, %v2387_v21  ;;  %v1402_v2 = vsub.f32 0.0, %v3106_v14  ;;  %v3112_v43 = vadd.f32 %v3048_v6, %v1243_v16  ;;  %v1245_v45 = vpop.f32.mrf.mxu1 }
 0x142   :  { %v2391_v18 = vpop.eup %2390  ;;  %1767 = vst.msk [vmem:[#allocation2 + $0x138] sm:$0xff] %vm330_vm0, %v1703_v20  ;;  %v1701_v33 = vmul.f32 %v2389_v29, %v2998_v39  ;;  %2416 = vpow2.f32 %v1518_v11  ;;  %v3117_v25 = vadd.f32 %v3048_v6, %v1254_v24  ;;  %v1246_v34 = vadd.f32 %v1245_v45, %v688_v23  ;;  %v2075_v35 = vpop.f32.mrf.mxu0 }
 0x143   :  { %v2393_v37 = vpop.eup %2392  ;;  %v1706_v41 = vmul.f32 %v2391_v18, %v3005_v58  ;;  %2418 = vrcp.f32 %v1583_v31  ;;  %v1524_v55 = vmul.f32 1.442695, %v1402_v2  ;;  %v1400_v36 = vsub.f32 0.0, %v3112_v43  ;;  %v2143_v46 = vpop.f32.mrf.mxu1 }
 0x144   :  { %v2395_v56 = vpop.eup %2394  ;;  %1765 = vst.msk [vmem:[#allocation2 + $0x128] sm:$0xff] %vm330_vm0, %v1701_v33  ;;  %v1581_v48 = vadd.f32 1.0, %v2393_v37  ;;  %2420 = vpow2.f32 %v1514_v19  ;;  %v1403_v39 = vsub.f32 0.0, %v3117_v25  ;;  %v3124_v42 = vadd.f32 %v3048_v6, %v1246_v34  ;;  %v701_v44 = vpop.f32.mrf.mxu0 }
 0x145   :  { %v2397_v15 = vpop.eup %2396  ;;  %1770 = vst.msk [vmem:[#allocation2 + $0x150] sm:$0xff] %vm330_vm0, %v1706_v41  ;;  %v1704_v58 = vmul.f32 %v2395_v56, %v3011_v8  ;;  %2422 = vpow2.f32 %v1524_v55  ;;  %v1520_v22 = vmul.f32 1.442695, %v1400_v36  ;;  %v1267_v53 = vadd.f32 %v2143_v46, %v2075_v35  ;;  %v1258_v59 = vpop.f32.mrf.mxu1 }
 0x146   :  { %v2399_v60 = vpop.eup %2398  ;;  %2424 = vrcp.f32 %v1581_v48  ;;  %v1586_v10 = vadd.f32 1.0, %v2397_v15  ;;  %v1526_v49 = vmul.f32 1.442695, %v1403_v39  ;;  %v1401_v61 = vsub.f32 0.0, %v3124_v42  ;;  %v2076_v50 = vpop.f32.mrf.mxu0 }
 0x147   :  { %v2401_v3 = vpop.eup %2400  ;;  %1768 = vst.msk [vmem:[#allocation2 + $0x140] sm:$0xff] %vm330_vm0, %v1704_v58  ;;  %v1707_v62 = vmul.f32 %v2399_v60, %v3016_v27  ;;  %2426 = vpow2.f32 %v1520_v22  ;;  %v3132_v63 = vadd.f32 %v3048_v6, %v1267_v53  ;;  %v1259_v8 = vadd.f32 %v1258_v59, %v701_v44  ;;  %v2144_v0 = vpop.f32.mrf.mxu1 }
 0x148   :  { %v2403_v5 = vpop.eup %2402  ;;  %2428 = vrcp.f32 %v1586_v10  ;;  %v1584_v11 = vadd.f32 1.0, %v2401_v3  ;;  %v1522_v9 = vmul.f32 1.442695, %v1401_v61  ;;  %v1270_v12 = vadd.f32 %v2144_v0, %v2076_v50  ;;  %v704_v13 = vpop.f32.mrf.mxu0 }
 0x149   :  { %v2405_v17 = vpop.eup %2404  ;;  %1771 = vst.msk [vmem:[#allocation2 + $0x158] sm:$0xff] %vm330_vm0, %v1707_v62  ;;  %v1705_v16 = vmul.f32 %v2403_v5, %v3023_v30  ;;  %2430 = vpow2.f32 %v1526_v49  ;;  %v1406_v27 = vsub.f32 0.0, %v3132_v63  ;;  %v3138_v40 = vadd.f32 %v3048_v6, %v1259_v8  ;;  %v1261_v21 = vpop.f32.mrf.mxu1 }
 0x14a   :  { %v2407_v20 = vpop.eup %2406  ;;  %2432 = vrcp.f32 %v1584_v11  ;;  %v1587_v19 = vadd.f32 1.0, %v2405_v17  ;;  %v3141_v24 = vadd.f32 %v3048_v6, %v1270_v12  ;;  %v1262_v23 = vadd.f32 %v1261_v21, %v704_v13 }
 0x14b   :  { %v2409_v29 = vpop.eup %2408  ;;  %1769 = vst.msk [vmem:[#allocation2 + $0x148] sm:$0xff] %vm330_vm0, %v1705_v16  ;;  %v1585_v31 = vadd.f32 1.0, %v2407_v20  ;;  %2434 = vpow2.f32 %v1522_v9  ;;  %v1532_v30 = vmul.f32 1.442695, %v1406_v27  ;;  %v1404_v2 = vsub.f32 0.0, %v3138_v40 }
 0x14c   :  { %v2411_v45 = vpop.eup %2410  ;;  %2436 = vrcp.f32 %v1587_v19  ;;  %v1590_v18 = vadd.f32 1.0, %v2409_v29  ;;  %v1407_v33 = vsub.f32 0.0, %v3141_v24  ;;  %v3147_v34 = vadd.f32 %v3048_v6, %v1262_v23 }
 0x14d   :  { %v2413_v35 = vpop.eup %2412  ;;  %v1710_v37 = vmul.f32 %v2411_v45, %v3031_v47  ;;  %2438 = vrcp.f32 %v1585_v31  ;;  %v1528_v41 = vmul.f32 1.442695, %v1404_v2 }
 0x14e   :  { %v2415_v55 = vpop.eup %2414  ;;  %2440 = vrcp.f32 %v1590_v18  ;;  %v1588_v36 = vadd.f32 1.0, %v2413_v35  ;;  %v1405_v46 = vsub.f32 0.0, %v3147_v34  ;;  %v1534_v39 = vmul.f32 1.442695, %v1407_v33 }
 0x14f   :  { %v2417_v56 = vpop.eup %2416  ;;  %1774 = vst.msk [vmem:[#allocation2 + $0x170] sm:$0xff] %vm330_vm0, %v1710_v37  ;;  %v1708_v48 = vmul.f32 %v2415_v55, %v3037_v51  ;;  %2442 = vpow2.f32 %v1532_v30 }
 0x150   :  { %v2419_v44 = vpop.eup %2418  ;;  %2444 = vrcp.f32 %v1588_v36  ;;  %v1591_v6 = vadd.f32 1.0, %v2417_v56  ;;  %v1530_v53 = vmul.f32 1.442695, %v1405_v46 }
 0x151   :  { %v2421_v15 = vpop.eup %2420  ;;  %1772 = vst.msk [vmem:[#allocation2 + $0x160] sm:$0xff] %vm330_vm0, %v1708_v48  ;;  %v1711_v47 = vmul.f32 %v2419_v44, %v3040_v4  ;;  %2446 = vpow2.f32 %v1528_v41 }
 0x152   :  { %v2423_v58 = vpop.eup %2422  ;;  %2448 = vrcp.f32 %v1591_v6  ;;  %v1589_v22 = vadd.f32 1.0, %v2421_v15 }
 0x153   :  { %v2425_v59 = vpop.eup %2424  ;;  %1775 = vst.msk [vmem:[#allocation2 + $0x178] sm:$0xff] %vm330_vm0, %v1711_v47  ;;  %v1594_v60 = vadd.f32 1.0, %v2423_v58  ;;  %2450 = vpow2.f32 %v1534_v39 }
 0x154   :  { %v2427_v51 = vpop.eup %2426  ;;  %v1709_v10 = vmul.f32 %v2425_v59, %v3051_v57  ;;  %2452 = vrcp.f32 %v1589_v22 }
 0x155   :  { %v2429_v49 = vpop.eup %2428  ;;  %2454 = vrcp.f32 %v1594_v60  ;;  %v1592_v61 = vadd.f32 1.0, %v2427_v51 }
 0x156   :  { %v2431_v50 = vpop.eup %2430  ;;  %1773 = vst.msk [vmem:[#allocation2 + $0x168] sm:$0xff] %vm330_vm0, %v1709_v10  ;;  %v1714_v4 = vmul.f32 %v2429_v49, %v3058_v38  ;;  %2456 = vpow2.f32 %v1530_v53 }
 0x157   :  { %v2433_v3 = vpop.eup %2432  ;;  %2458 = vrcp.f32 %v1592_v61  ;;  %v1595_v62 = vadd.f32 1.0, %v2431_v50 }
 0x158   :  { %v2435_v8 = vpop.eup %2434  ;;  %1778 = vst.msk [vmem:[#allocation2 + $0x190] sm:$0xff] %vm330_vm0, %v1714_v4  ;;  %v1712_v0 = vmul.f32 %v2433_v3, %v3064_v54 }
 0x159   :  { %v2437_v5 = vpop.eup %2436  ;;  %2460 = vrcp.f32 %v1595_v62  ;;  %v1593_v57 = vadd.f32 1.0, %v2435_v8 }
 0x15a   :  { %v2439_v11 = vpop.eup %2438  ;;  %1776 = vst.msk [vmem:[#allocation2 + $0x180] sm:$0xff] %vm330_vm0, %v1712_v0  ;;  %v1715_v9 = vmul.f32 %v2437_v5, %v3067_v52 }
 0x15b   :  { %v2441_v12 = vpop.eup %2440  ;;  %v1713_v38 = vmul.f32 %v2439_v11, %v3074_v1  ;;  %2462 = vrcp.f32 %v1593_v57 }
 0x15c   :  { %v2443_v13 = vpop.eup %2442  ;;  %1779 = vst.msk [vmem:[#allocation2 + $0x198] sm:$0xff] %vm330_vm0, %v1715_v9  ;;  %v1718_v17 = vmul.f32 %v2441_v12, %v3080_v28 }
 0x15d   :  { %v2445_v16 = vpop.eup %2444  ;;  %1777 = vst.msk [vmem:[#allocation2 + $0x188] sm:$0xff] %vm330_vm0, %v1713_v38  ;;  %v1598_v54 = vadd.f32 1.0, %v2443_v13 }
 0x15e   :  { %v2447_v27 = vpop.eup %2446  ;;  %1782 = vst.msk [vmem:[#allocation2 + $0x1b0] sm:$0xff] %vm330_vm0, %v1718_v17  ;;  %v1716_v21 = vmul.f32 %v2445_v16, %v3086_v7 }
 0x15f   :  { %v2449_v20 = vpop.eup %2448  ;;  %2464 = vrcp.f32 %v1598_v54  ;;  %v1596_v52 = vadd.f32 1.0, %v2447_v27 }
 0x160   :  { %v2451_v19 = vpop.eup %2450  ;;  %1780 = vst.msk [vmem:[#allocation2 + $0x1a0] sm:$0xff] %vm330_vm0, %v1716_v21  ;;  %v1719_v1 = vmul.f32 %v2449_v20, %v3091_v32 }
 0x161   :  { %v2453_v23 = vpop.eup %2452  ;;  %2466 = vrcp.f32 %v1596_v52  ;;  %v1599_v28 = vadd.f32 1.0, %v2451_v19 }
 0x162   :  { %v2455_v29 = vpop.eup %2454  ;;  %1783 = vst.msk [vmem:[#allocation2 + $0x1b8] sm:$0xff] %vm330_vm0, %v1719_v1  ;;  %v1717_v31 = vmul.f32 %v2453_v23, %v3099_v26 }
 0x163   :  { %v2457_v30 = vpop.eup %2456  ;;  %v1722_v2 = vmul.f32 %v2455_v29, %v3106_v14  ;;  %2468 = vrcp.f32 %v1599_v28 }
 0x164   :  { %v2459_v7 = vpop.eup %2458  ;;  %1781 = vst.msk [vmem:[#allocation2 + $0x1a8] sm:$0xff] %vm330_vm0, %v1717_v31  ;;  %v1597_v45 = vadd.f32 1.0, %v2457_v30 }
 0x165   :  { %1786 = vst.msk [vmem:[#allocation2 + $0x1d0] sm:$0xff] %vm330_vm0, %v1722_v2  ;;  %v1720_v32 = vmul.f32 %v2459_v7, %v3112_v43 }
 0x166   :  { %v2461_v18 = vpop.eup %2460  ;;  %2470 = vrcp.f32 %v1597_v45 }
 0x167   :  { %1784 = vst.msk [vmem:[#allocation2 + $0x1c0] sm:$0xff] %vm330_vm0, %v1720_v32  ;;  %v1723_v33 = vmul.f32 %v2461_v18, %v3117_v25 }
 0x168   :  { %v2463_v35 = vpop.eup %2462 }
 0x169   :  { %1787 = vst.msk [vmem:[#allocation2 + $0x1d8] sm:$0xff] %vm330_vm0, %v1723_v33  ;;  %v1721_v26 = vmul.f32 %v2463_v35, %v3124_v42 }
 0x16b   :  { %1785 = vst.msk [vmem:[#allocation2 + $0x1c8] sm:$0xff] %vm330_vm0, %v1721_v26 }
 0x16c   :  { %v2465_v14 = vpop.eup %2464 }
 0x16d   :  { %v1726_v37 = vmul.f32 %v2465_v14, %v3132_v63 }
 0x16e   :  { %v2467_v41 = vpop.eup %2466 }
 0x16f   :  { %1790 = vst.msk [vmem:[#allocation2 + $0x1f0] sm:$0xff] %vm330_vm0, %v1726_v37  ;;  %v1724_v43 = vmul.f32 %v2467_v41, %v3138_v40 }
 0x170   :  { %v2469_v55 = vpop.eup %2468 }
 0x171   :  { %1788 = vst.msk [vmem:[#allocation2 + $0x1e0] sm:$0xff] %vm330_vm0, %v1724_v43  ;;  %v1727_v25 = vmul.f32 %v2469_v55, %v3141_v24 }
 0x173   :  { %v2471_v36 = vpop.eup %2470  ;;  %1791 = vst.msk [vmem:[#allocation2 + $0x1f8] sm:$0xff] %vm330_vm0, %v1727_v25 }
 0x174   :  { %v1725_v42 = vmul.f32 %v2471_v36, %v3147_v34 }
 0x176   :  { %1789 = vst.msk [vmem:[#allocation2 + $0x1e8] sm:$0xff] %vm330_vm0, %v1725_v42 }
 0x177   :  { %2484 = shalt.err (!%p2481_p4)
}
 0x178   :  { %s2496_s23 = smov 128   ;;  %s2497_s24 = smov 8  }
 0x179   :  { %1803 = dma.vmem_to_hbm [thread:$0]  %s1798_s21, 8192, %s3198_s5, [#allocation3], %s2496_s23, %s2496_s23, %s2497_s24  }
 0x17a   :  { %2493 = dma.done.wait [#allocation3], 8192  }
 0x17b   :  { %2494 = vsyncadd [#allocation3], 4294959104 }
 0x17c   :  { %1807 = vsyncpa [#allocation3], 1 }

// kernel: sppcspc_forward_nchw.9
= control target key start
LH: loop header
LB: loop body
LE: loop exit
PB: predicated region body
PF: predicated region fallthrough
CT: control target
= control target key end

     0   :  { %s6585_s12 = smov 0   ;;  %s6587_s13 = smov 0   ;;  %s11815_s0 = inlined_call_operand.vmem [shape: bf16[2,28,28,32], index: 0, kind: input, shape index: {}]   ;;  %s11816_s1 = inlined_call_operand.vmem [shape: bf16[4,32,32], index: 1, kind: input, shape index: {}]   ;;  %s11817_s2 = inlined_call_operand.vmem [shape: f32[1,32], index: 2, kind: input, shape index: {}]   ;;  %s11818_s3 = inlined_call_operand.vmem [shape: bf16[2,256,32], index: 3, kind: output, shape index: {}]  }
   0x1   :  { %s6589_s14 = smov 0   ;;  %s6591_s15 = smov 0  }
   0x2   :  { %s6593_s16 = smov 0  }
   0x3 LB: > { %s22_s17 = sadd.s32 1, %s6555_s14  ;;  %s25_s18 = sadd.s32 1, %s6559_s15  ;;  %s6563_s16 = sphi %s6593_s16, %s13_s16   ;;  %s6559_s15 = sphi %s6591_s15, %s13182_s15   ;;  %s6555_s14 = sphi %s6589_s14, %s13181_s14   ;;  %s6551_s13 = sphi %s6587_s13, %s13180_s13   ;;  %s6547_s12 = sphi %s6585_s12, %s13179_s12  }
   0x4   : > { %p23_p0 = scmp.ge.s32.totalorder %s22_s17, 2  ;;  %p6016_p1 = scmp.ge.s32.totalorder %s6563_s16, 1 }
   0x5   : > { %p151_p2 = scmp.lt.s32.totalorder %s6563_s16, 5 }
   0x6   : > { %s13184_s17 = smov (%p23_p0, %s22_s17), 0  ;;  %s13186_s18 = smov (!%p23_p0, %s25_s18), %s6559_s15 }
   0x7   : > { %p152_p3 = pnand %p6016_p1, %p151_p2  ;;  %p27_p4 = scmp.ge.s32.totalorder %s13186_s18, 2 }
   0x9   : > { %s13188_s18 = smov (%p27_p4, %s13186_s18), 0  ;;  %155 = sbr.rel (%p152_p3) target bundleno = 1206 (0x4b6), region = 32 }
   0xe   : > { %v6410_v0 = vld [vmem:[%s11816_s1 + $0x18] sm:$0xff]   ;;  %p179_p5 = scmp.lt.s32.totalorder %s6551_s13, 1  ;;  %v6411_v1 = vld [vmem:[%s11816_s1 + $0x10] sm:$0xff]   ;;  %v6412_v2 = vld [vmem:[%s11816_s1 + $0x8] sm:$0xff]   ;;  %s6232_s29 = sshll.u32 %s6547_s12, 7  ;;  %v12313_v31 = vmov 0 }
   0xf   : > { %6289 = vmatprep.subr.bf16.mxu0 %v6410_v0  ;;  %6309 = vmatprep.subr.bf16.mxu1 %v6412_v2  ;;  %vm366_vm0 = vsmask.f32 3328  ;;  %vm367_vm1 = vsmask.f32 7440  ;;  %vm1225_vm3 = vcmask 1042432   ;;  %vm1226_vm4 = vcmask 1046532  }
  0x10   : > { %s13190_s13 = smov (!%p179_p5, %s6551_s13), 1  ;;  %6290 = vmatpush3.bf16.msra.mxu0 %v6410_v0  ;;  %6310 = vmatpush3.bf16.msra.mxu1 %v6412_v2  ;;  %vm6694_vm2 = vmor %vm366_vm0, %vm367_vm1  ;;  %vm1548_vm6 = vsmask.f32 2304  ;;  %vm1549_vm7 = vsmask.f32 6416  ;;  %vm2071_vm9 = vcmask 1041408  }
  0x11   : > { %6291 = vmatprep.subr.bf16.mxu0 %v6411_v1  ;;  %s6369_s25 = smul.u32 448, %s13190_s13  ;;  %v12314_v31 = vsel %vm6694_vm2, 4294967295, %v12313_v31  ;;  %vm7312_vm5 = vmor %vm1225_vm3, %vm1226_vm4  ;;  %vm2072_vm10 = vcmask 1045508   ;;  %vm2707_vm12 = vcmask 261120   ;;  %vm303_vm13 = vcmask 1040384   ;;  %s6018_s23 = sshll.u32 %s6547_s12, 4 }
  0x12   : > { %12315 = vst [vmem:[#allocation10_spill] sm:$0xff] %v12314_v31  ;;  %vm7539_vm8 = vmor %vm1548_vm6, %vm1549_vm7  ;;  %vm304_vm14 = vcmask 1044484   ;;  %p187_p6 = scmp.lt.s32.totalorder %s6018_s23, 31  ;;  %s6019_s12 = sshll.u32 %s13190_s13, 5  ;;  %vm5909_vm0 = vcmask 257024  }
  0x13   : > { %s183_s28 = scalar_lea.vmem %s11815_s0, %s6369_s25  ;;  %vm7964_vm11 = vmor %vm2071_vm9, %vm2072_vm10 }
  0x14   : > { %6292 = vmatpush3.bf16.msra.mxu0 %v6411_v1  ;;  %s6633_s30 = scalar_lea.vmem %s183_s28, %s6232_s29  ;;  %vm8821_vm15 = vmor %vm303_vm13, %vm304_vm14  ;;  %s13192_s23 = smov (!%p187_p6, %s6018_s23), 31 }
  0x15   : > { %v6636_v3 = vld [vmem:[%s6633_s30] sm:$0xf]  ;;  %v6639_v4 = vld [vmem:[%s6633_s30 + $0x4] sm:$0xf]  ;;  %v6642_v5 = vld [vmem:[%s6633_s30 + $0x8] sm:$0xf]  ;;  %s190_s24 = sadd.s32 %s6019_s12, %s13192_s23 }
  0x16   : > { %12305 = vst [vmem:[#allocation2_spill] sm:$0xff] %v6636_v3  ;;  %12306 = vst [vmem:[#allocation3_spill] sm:$0xff] %v6639_v4  ;;  %v6645_v6 = vld [vmem:[%s6633_s30 + $0xc] sm:$0x3]  ;;  %v6648_v7 = vld [vmem:[%s6633_s30 + $0x10] sm:$0xf] }
  0x17   : > { %12307 = vst [vmem:[#allocation4_spill] sm:$0xff] %v6642_v5  ;;  %12308 = vst [vmem:[#allocation5_spill] sm:$0xff] %v6645_v6  ;;  %v6651_v8 = vld [vmem:[%s6633_s30 + $0x14] sm:$0xf]  ;;  %v6654_v9 = vld [vmem:[%s6633_s30 + $0x18] sm:$0xf] }
  0x18   : > { %12309 = vst [vmem:[#allocation6_spill] sm:$0xff] %v6648_v7  ;;  %12310 = vst [vmem:[#allocation7_spill] sm:$0xff] %v6651_v8  ;;  %v11846_v10 = vshrl.u32 %v6636_v3, 16  ;;  %v11845_v11 = vshll.u32 %v6636_v3, 16  ;;  %v11842_v12 = vshll.u32 %v6639_v4, 16  ;;  %v11843_v13 = vshrl.u32 %v6639_v4, 16 }
  0x19   : > { %12311 = vst [vmem:[#allocation8_spill] sm:$0xff] %v6654_v9  ;;  %v11838_v14 = vshll.u32 %v6642_v5, 16  ;;  %v11840_v15 = vshrl.u32 %v6642_v5, 16  ;;  %v11837_v16 = vshll.u32 %v6645_v6, 16  ;;  %v11836_v17 = vshrl.u32 %v6648_v7, 16  ;;  %s6020_s13 = sshll.u32 %s190_s24, 2 }
  0x1a   : > { %v372_v18 = vrot.slane %v11846_v10, 4  ;;  %v375_v19 = vrot.slane %v11845_v11, 5  ;;  %v6670_v20 = vrot.slane %v11842_v12, 5  ;;  %v385_v21 = vrot.slane %v11843_v13, 4  ;;  %v6690_v30 = vld [vmem:[%s6633_s30 + $0x1c] sm:$0x3]  ;;  %s11733_s27 = scalar_lea.vmem %s11818_s3, %s6020_s13 }
  0x1b   : > { %v6676_v22 = vrot.slane %v11838_v14, 5  ;;  %v395_v23 = vrot.slane %v11840_v15, 4  ;;  %v6682_v24 = vrot.slane %v11837_v16, 5  ;;  %v406_v25 = vrot.slane %v11836_v17, 4  ;;  %12312 = vst [vmem:[#allocation9_spill] sm:$0xff] %v6690_v30 }
  0x1c   : > { %v376_v26 = vor.u32 %v375_v19, %v372_v18  ;;  %v386_v27 = vor.u32 %v385_v21, %v6670_v20  ;;  %v11834_v28 = vshll.u32 %v6648_v7, 16  ;;  %v11832_v29 = vshll.u32 %v6651_v8, 16  ;;  %v6703_v36 = vld [vmem:[%s6633_s30 + $0x20] sm:$0xf]  ;;  %v6716_v41 = vld [vmem:[%s6633_s30 + $0x24] sm:$0xf] }
  0x1d   : > { %v396_v32 = vor.u32 %v395_v23, %v6676_v22  ;;  %v11833_v33 = vshrl.u32 %v6651_v8, 16  ;;  %v11826_v34 = vshll.u32 %v6654_v9, 16  ;;  %v11829_v35 = vshrl.u32 %v6654_v9, 16  ;;  %12316 = vst [vmem:[#allocation11_spill] sm:$0xff] %v6703_v36  ;;  %12317 = vst [vmem:[#allocation12_spill] sm:$0xff] %v6716_v41 }
  0x1e   : > { %v6705_v37 = vrot.slane %v376_v26, 4  ;;  %v6707_v38 = vrot.slane %v386_v27, 4  ;;  %v409_v39 = vrot.slane %v11834_v28, 5  ;;  %v6713_v40 = vrot.slane %v11832_v29, 5  ;;  %v6738_v50 = vld [vmem:[%s6633_s30 + $0x28] sm:$0xf] }
  0x1f   : > { %v6718_v42 = vrot.slane %v396_v32, 4  ;;  %v419_v43 = vrot.slane %v11833_v33, 4  ;;  %v6724_v44 = vrot.slane %v11826_v34, 5  ;;  %v429_v45 = vrot.slane %v11829_v35, 4  ;;  %12318 = vst [vmem:[#allocation13_spill] sm:$0xff] %v6738_v50 }
  0x20   : > { %v410_v48 = vor.u32 %v409_v39, %v406_v25  ;;  %v11825_v49 = vshll.u32 %v6690_v30, 16  ;;  %v11824_v54 = vshrl.u32 %v6703_v36, 16  ;;  %v6748_v55 = vld [vmem:[%s6633_s30 + $0x2c] sm:$0x3]  ;;  %v11822_v58 = vshll.u32 %v6703_v36, 16 }
  0x21   : > { %v420_v52 = vor.u32 %v419_v43, %v6713_v40  ;;  %v430_v53 = vor.u32 %v429_v45, %v6724_v44  ;;  %12319 = vst [vmem:[#allocation14_spill] sm:$0xff] %v6748_v55  ;;  %v11819_v59 = vshll.u32 %v6716_v41, 16  ;;  %v6759_v60 = vld [vmem:[%s6633_s30 + $0x30] sm:$0xf]  ;;  %v11821_v0 = vshrl.u32 %v6716_v41, 16 }
  0x22   : > { %v6750_v56 = vrot.slane %v410_v48, 4  ;;  %v6754_v57 = vrot.slane %v11825_v49, 5  ;;  %12320 = vst [vmem:[#allocation15_spill] sm:$0xff] %v6759_v60  ;;  %v440_v63 = vrot.slane %v11824_v54, 4  ;;  %v6769_v1 = vld [vmem:[%s6633_s30 + $0x34] sm:$0xf] }
  0x23   : > { %v6761_v61 = vrot.slane %v420_v52, 4  ;;  %v6763_v62 = vrot.slane %v430_v53, 4  ;;  %12321 = vst [vmem:[#allocation16_spill] sm:$0xff] %v6769_v1  ;;  %v443_v18 = vrot.slane %v11822_v58, 5  ;;  %v6779_v19 = vrot.slane %v11819_v59, 5 }
  0x24   : > { %v11820_v21 = vshll.u32 %v6738_v50, 16  ;;  %v453_v26 = vrot.slane %v11821_v0, 4  ;;  %v11823_v27 = vshrl.u32 %v6738_v50, 16  ;;  %v11828_v43 = vshll.u32 %v6748_v55, 16  ;;  %v6800_v48 = vld [vmem:[%s6633_s30 + $0x38] sm:$0xf] }
  0x25   : > { %v444_v32 = vor.u32 %v443_v18, %v440_v63  ;;  %v11827_v45 = vshrl.u32 %v6759_v60, 16  ;;  %12322 = vst [vmem:[#allocation17_spill] sm:$0xff] %v6800_v48  ;;  %v11831_v59 = vshll.u32 %v6759_v60, 16  ;;  %v11830_v63 = vshll.u32 %v6769_v1, 16  ;;  %v6808_v18 = vld [vmem:[%s6633_s30 + $0x3c] sm:$0x3] }
  0x26   : > { %v6795_v39 = vrot.slane %v11820_v21, 5  ;;  %v454_v52 = vor.u32 %v453_v26, %v6779_v19  ;;  %v463_v53 = vrot.slane %v11823_v27, 4  ;;  %12323 = vst [vmem:[#allocation18_spill] sm:$0xff] %v6808_v18  ;;  %v6814_v0 = vrot.slane %v11828_v43, 5  ;;  %v6820_v27 = vld [vmem:[%s6633_s30 + $0x40] sm:$0xf] }
  0x27   : > { %v6810_v21 = vrot.slane %v444_v32, 4  ;;  %v474_v58 = vrot.slane %v11827_v45, 4  ;;  %v11835_v26 = vshrl.u32 %v6769_v1, 16  ;;  %12324 = vst [vmem:[#allocation19_spill] sm:$0xff] %v6820_v27  ;;  %v477_v32 = vrot.slane %v11831_v59, 5 }
  0x28   : > { %v6822_v54 = vrot.slane %v454_v52, 4  ;;  %v464_v49 = vor.u32 %v463_v53, %v6795_v39  ;;  %v6829_v34 = vrot.slane %v11830_v63, 5  ;;  %v11839_v52 = vshll.u32 %v6800_v48, 16  ;;  %v6840_v35 = vld [vmem:[%s6633_s30 + $0x44] sm:$0xf] }
  0x29   : > { %v487_v43 = vrot.slane %v11835_v26, 4  ;;  %v11841_v53 = vshrl.u32 %v6800_v48, 16  ;;  %12325 = vst [vmem:[#allocation20_spill] sm:$0xff] %v6840_v35  ;;  %v478_v29 = vor.u32 %v477_v32, %v474_v58  ;;  %v11844_v33 = vshll.u32 %v6808_v18, 16  ;;  %v6850_v28 = vld [vmem:[%s6633_s30 + $0x48] sm:$0xf] }
  0x2a   : > { %v6846_v59 = vrot.slane %v464_v49, 4  ;;  %12326 = vst [vmem:[#allocation21_spill] sm:$0xff] %v6850_v28  ;;  %v6855_v17 = vrot.slane %v11839_v52, 5  ;;  %v11847_v14 = vshrl.u32 %v6820_v27, 16  ;;  %v11848_v32 = vshll.u32 %v6820_v27, 16 }
  0x2b   : > { %v488_v26 = vor.u32 %v487_v43, %v6829_v34  ;;  %v497_v16 = vrot.slane %v11841_v53, 4  ;;  %v6864_v58 = vrot.slane %v478_v29, 4  ;;  %v6868_v43 = vrot.slane %v11844_v33, 5  ;;  %v6872_v52 = vld [vmem:[%s6633_s30 + $0x4c] sm:$0x3] }
  0x2c   : > { %12327 = vst [vmem:[#allocation22_spill] sm:$0xff] %v6872_v52  ;;  %v508_v12 = vrot.slane %v11847_v14, 4  ;;  %v11849_v13 = vshll.u32 %v6840_v35, 16  ;;  %v6881_v29 = vld [vmem:[%s6633_s30 + $0x50] sm:$0xf]  ;;  %v511_v11 = vrot.slane %v11848_v32, 5 }
  0x2d   : > { %v6874_v15 = vrot.slane %v488_v26, 4  ;;  %v498_v53 = vor.u32 %v497_v16, %v6855_v17  ;;  %12328 = vst [vmem:[#allocation23_spill] sm:$0xff] %v6881_v29  ;;  %v11850_v26 = vshrl.u32 %v6840_v35, 16  ;;  %v11851_v16 = vshll.u32 %v6850_v28, 16  ;;  %v6892_v10 = vld [vmem:[%s6633_s30 + $0x54] sm:$0xf] }
  0x2e   : > { %12329 = vst [vmem:[#allocation24_spill] sm:$0xff] %v6892_v10  ;;  %v6902_v33 = vrot.slane %v11849_v13, 5  ;;  %v11852_v32 = vshrl.u32 %v6850_v28, 16  ;;  %v512_v63 = vor.u32 %v511_v11, %v508_v12  ;;  %v11855_v23 = vshll.u32 %v6872_v52, 16  ;;  %v6913_v14 = vld [vmem:[%s6633_s30 + $0x58] sm:$0xf] }
  0x2f   : > { %v6898_v49 = vrot.slane %v498_v53, 4  ;;  %v521_v45 = vrot.slane %v11850_v26, 4  ;;  %v6909_v25 = vrot.slane %v11851_v16, 5  ;;  %12331 = vst [vmem:[#allocation26_spill] sm:$0xff] %v6913_v14  ;;  %v11858_v11 = vshrl.u32 %v6881_v29, 16 }
  0x30   : > { %v531_v13 = vrot.slane %v11852_v32, 4  ;;  %v11861_v12 = vshll.u32 %v6881_v29, 16  ;;  %v6924_v26 = vld [vmem:[%s6633_s30 + $0x5c] sm:$0x3]  ;;  %v6926_v16 = vrot.slane %v512_v63, 4  ;;  %v6931_v51 = vrot.slane %v11855_v23, 5 }
  0x31   : > { %12330 = vst [vmem:[#allocation25_spill] sm:$0xff] %v6909_v25  ;;  %12332 = vst [vmem:[#allocation27_spill] sm:$0xff] %v6924_v26  ;;  %v522_v2 = vor.u32 %v521_v45, %v6902_v33  ;;  %v11864_v53 = vshll.u32 %v6892_v10, 16  ;;  %v6935_v47 = vld [vmem:[%s6633_s30 + $0x60] sm:$0xf]  ;;  %v542_v46 = vrot.slane %v11858_v11, 4 }
  0x32   : > { %12333 = vst [vmem:[#allocation28_spill] sm:$0xff] %v6931_v51  ;;  %12334 = vst [vmem:[#allocation29_spill] sm:$0xff] %v6935_v47  ;;  %v532_v32 = vor.u32 %v531_v13, %v6909_v25  ;;  %v545_v63 = vrot.slane %v11861_v12, 5  ;;  %v11867_v18 = vshrl.u32 %v6892_v10, 16  ;;  %v11868_v13 = vshll.u32 %v6913_v14, 16 }
  0x33   : > { %v6947_v23 = vrot.slane %v522_v2, 4  ;;  %v6951_v52 = vrot.slane %v11864_v53, 5  ;;  %v6955_v11 = vld [vmem:[%s6633_s30 + $0x64] sm:$0xf]  ;;  %v11876_v6 = vshll.u32 %v6924_v26, 16  ;;  %v12342_v2 = vshrl.u32 %v6913_v14, 16 }
  0x34   : > { %12337 = vst [vmem:[#allocation32_spill] sm:$0xff] %v6955_v11  ;;  %v6957_v55 = vrot.slane %v532_v32, 4  ;;  %v546_v12 = vor.u32 %v545_v63, %v542_v46  ;;  %v555_v30 = vrot.slane %v11867_v18, 4  ;;  %v6968_v53 = vrot.slane %v11868_v13, 5  ;;  %v6973_v46 = vld [vmem:[%s6633_s30 + $0x68] sm:$0xf] }
  0x35   : > { %12335 = vst [vmem:[#allocation30_spill] sm:$0xff] %v6947_v23  ;;  %12336 = vst [vmem:[#allocation31_spill] sm:$0xff] %v6951_v52  ;;  %v565_v13 = vrot.slane %v12342_v2, 4  ;;  %v6985_v10 = vld [vmem:[%s6633_s30 + $0x6c] sm:$0x3]  ;;  %v6989_v32 = vrot.slane %v11876_v6, 5 }
  0x36   : > { %12338 = vst [vmem:[#allocation33_spill] sm:$0xff] %v6957_v55  ;;  %12339 = vst [vmem:[#allocation34_spill] sm:$0xff] %v6968_v53  ;;  %v6979_v18 = vrot.slane %v546_v12, 4  ;;  %v556_v45 = vor.u32 %v555_v30, %v6951_v52  ;;  %v12345_v29 = vshrl.u32 %v6935_v47, 16  ;;  %v11884_v25 = vshll.u32 %v6935_v47, 16 }
  0x37   : > { %12340 = vst [vmem:[#allocation35_spill] sm:$0xff] %v6973_v46  ;;  %12343 = vst [vmem:[#allocation37_spill] sm:$0xff] %v6985_v10  ;;  %v11885_v12 = vshll.u32 %v6955_v11, 16  ;;  %v6996_v63 = vld [vmem:[%s6633_s30 + $0x70] sm:$0xf]  ;;  %v566_v6 = vor.u32 %v565_v13, %v6968_v53  ;;  %v11890_v26 = vshrl.u32 %v6955_v11, 16 }
  0x38   : > { %12341 = vst [vmem:[#allocation36_spill] sm:$0xff] %v6979_v18  ;;  %12344 = vst [vmem:[#allocation38_spill] sm:$0xff] %v6989_v32  ;;  %v576_v28 = vrot.slane %v12345_v29, 4  ;;  %v7002_v2 = vrot.slane %v556_v45, 4  ;;  %v579_v29 = vrot.slane %v11884_v25, 5  ;;  %v12352_v55 = vshll.u32 %v6973_v46, 16 }
  0x39   : > { %12346 = vst [vmem:[#allocation39_spill] sm:$0xff] %v6996_v63  ;;  %v7010_v14 = vrot.slane %v11885_v12, 5  ;;  %v7015_v23 = vld [vmem:[%s6633_s30 + $0x74] sm:$0xf]  ;;  %v7021_v13 = vrot.slane %v566_v6, 4  ;;  %v589_v25 = vrot.slane %v11890_v26, 4 }
  0x3a   : > { %12347 = vst [vmem:[#allocation40_spill] sm:$0xff] %v7002_v2  ;;  %12349 = vst [vmem:[#allocation42_spill] sm:$0xff] %v7015_v23  ;;  %v11896_v12 = vshll.u32 %v6985_v10, 16  ;;  %v7027_v30 = vld [vmem:[%s6633_s30 + $0x78] sm:$0xf]  ;;  %v580_v51 = vor.u32 %v579_v29, %v576_v28  ;;  %v7031_v47 = vrot.slane %v12352_v55, 5 }
  0x3b   : > { %12348 = vst [vmem:[#allocation41_spill] sm:$0xff] %v7010_v14  ;;  %12350 = vst [vmem:[#allocation43_spill] sm:$0xff] %v7021_v13  ;;  %v12353_v52 = vshrl.u32 %v6973_v46, 16  ;;  %v11900_v6 = vshrl.u32 %v6996_v63, 16  ;;  %v590_v45 = vor.u32 %v589_v25, %v7010_v14  ;;  %v11901_v55 = vshll.u32 %v6996_v63, 16 }
  0x3c   : > { %12351 = vst [vmem:[#allocation44_spill] sm:$0xff] %v7027_v30  ;;  %v7043_v28 = vrot.slane %v11896_v12, 5  ;;  %v7047_v29 = vld [vmem:[%s6633_s30 + $0x7c] sm:$0x3]  ;;  %v7049_v46 = vrot.slane %v580_v51, 4  ;;  %v11905_v53 = vshll.u32 %v7015_v23, 16 }
  0x3d   : > { %v599_v18 = vrot.slane %v12353_v52, 4  ;;  %12354 = vst [vmem:[#allocation45_spill] sm:$0xff] %v7047_v29  ;;  %v610_v11 = vrot.slane %v11900_v6, 4  ;;  %v7056_v26 = vld [vmem:[%s6633_s30 + $0x80] sm:$0xf]  ;;  %v7058_v25 = vrot.slane %v590_v45, 4 }
  0x3e   : > { %12355 = vst [vmem:[#allocation46_spill] sm:$0xff] %v7049_v46  ;;  %12356 = vst [vmem:[#allocation47_spill] sm:$0xff] %v7056_v26  ;;  %v613_v12 = vrot.slane %v11901_v55, 5  ;;  %v7065_v32 = vld [vmem:[%s6633_s30 + $0x84] sm:$0xf]  ;;  %v7075_v45 = vrot.slane %v11905_v53, 5 }
  0x3f   : > { %v600_v52 = vor.u32 %v599_v18, %v7031_v47  ;;  %12357 = vst [vmem:[#allocation48_spill] sm:$0xff] %v7065_v32  ;;  %v11910_v55 = vshrl.u32 %v7027_v30, 16  ;;  %v596_v51 = vsel %vm6694_vm2, %v7058_v25, %v7031_v47  ;;  %v12358_v63 = vshrl.u32 %v7015_v23, 16  ;;  %v7103_v23 = vld [vmem:[%s6633_s30 + $0x8c] sm:$0x3] }
  0x40   : > { %v614_v10 = vor.u32 %v613_v12, %v610_v11  ;;  %v12359_v18 = vshll.u32 %v7027_v30, 16  ;;  %v11916_v46 = vshll.u32 %v7047_v29, 16  ;;  %v11917_v47 = vshrl.u32 %v7056_v26, 16  ;;  %v7097_v11 = vld [vmem:[%s6633_s30 + $0x88] sm:$0xf] }
  0x41   : > { %v7071_v6 = vrot.slane %v600_v52, 4  ;;  %v623_v13 = vrot.slane %v12358_v63, 4  ;;  %v633_v14 = vrot.slane %v11910_v55, 4  ;;  %v11921_v25 = vshll.u32 %v7056_v26, 16 }
  0x42   : > { %v7086_v52 = vrot.slane %v12359_v18, 5  ;;  %v615_v12 = vrot.slane %v614_v10, 4  ;;  %v644_v55 = vrot.slane %v11917_v47, 4  ;;  %v11920_v30 = vshrl.u32 %v7065_v32, 16 }
  0x43   : > { %v606_v53 = vsel %vm6694_vm2, %v7071_v6, %v7043_v28  ;;  %v624_v63 = vor.u32 %v623_v13, %v7075_v45  ;;  %v639_v28 = vrot.slane %v11916_v46, 5  ;;  %v647_v18 = vrot.slane %v11921_v25, 5 }
  0x44   : > { %v634_v6 = vor.u32 %v633_v14, %v7086_v52  ;;  %v620_v10 = vsel %vm6694_vm2, %v615_v12, %v7075_v45  ;;  %v12360_v2 = vshll.u32 %v7065_v32, 16  ;;  %v657_v46 = vrot.slane %v11920_v30, 4 }
  0x45   : > { %v625_v13 = vrot.slane %v624_v63, 4  ;;  %v11923_v47 = vshll.u32 %v7097_v11, 16  ;;  %v648_v12 = vor.u32 %v647_v18, %v644_v55  ;;  %v11922_v63 = vshll.u32 %v7103_v23, 16 }
  0x46   : > { %v653_v35 = vrot.slane %v12360_v2, 5  ;;  %v635_v14 = vrot.slane %v634_v6, 4  ;;  %v12361_v2 = vsel %vm6694_vm2, %v6705_v37, %v6670_v20  ;;  %v12363_v20 = vsel %vm6694_vm2, %v6707_v38, %v6676_v22 }
  0x47   : > { %v630_v45 = vsel %vm6694_vm2, %v625_v13, %v7086_v52  ;;  %v7132_v6 = vmax.bf16 %v12361_v2, %v6636_v3  ;;  %v663_v29 = vrot.slane %v11923_v47, 5  ;;  %v12362_v52 = vshrl.u32 %v7097_v11, 16 }
  0x48   : > { %v640_v30 = vsel %vm6694_vm2, %v635_v14, %v639_v28  ;;  %v658_v25 = vor.u32 %v657_v46, %v653_v35  ;;  %v649_v18 = vrot.slane %v648_v12, 4  ;;  %v673_v13 = vrot.slane %v11922_v63, 5 }
  0x49   : > { %v667_v55 = vrot.slane %v12362_v52, 4  ;;  %v7148_v37 = vmax.bf16 %v12363_v20, %v6639_v4  ;;  %v12364_v46 = vsel %vm6694_vm2, %v6718_v42, %v6682_v24  ;;  %v12365_v2 = vsel %vm6694_vm2, %v6750_v56, %v6713_v40 }
  0x4a   : > { %v7156_v28 = vmax.bf16 %v12364_v46, %v6642_v5  ;;  %v659_v14 = vrot.slane %v658_v25, 4  ;;  %v7164_v52 = vmax.bf16 %v12365_v2, %v6648_v7  ;;  %v12366_v22 = vsel %vm6694_vm2, %v6761_v61, %v6724_v44  ;;  %v12384_v46 = vld [vmem:[#allocation33_spill] sm:$0xff]  ;;  %v12389_v2 = vld [vmem:[#allocation36_spill] sm:$0xff] }
  0x4b   : > { %v668_v12 = vor.u32 %v667_v55, %v663_v29  ;;  %v7172_v38 = vmax.bf16 %v12366_v22, %v6651_v8  ;;  %v654_v24 = vsel %vm6694_vm2, %v649_v18, %v653_v35  ;;  %v12367_v42 = vsel %vm6694_vm2, %v6763_v62, %v6754_v57  ;;  %v12378_v55 = vld [vmem:[#allocation20_spill] sm:$0xff]  ;;  %v12390_v22 = vld [vmem:[#allocation31_spill] sm:$0xff] }
  0x4c   : > { %v7182_v40 = vmax.bf16 %v12367_v42, %v6654_v9  ;;  %v12368_v56 = vsel %vm6694_vm2, %v6810_v21, %v6779_v19  ;;  %v12369_v35 = vsel %vm6694_vm2, %v6822_v54, %v6795_v39  ;;  %v664_v57 = vsel %vm6694_vm2, %v659_v14, %v663_v29  ;;  %v12385_v14 = vld [vmem:[#allocation28_spill] sm:$0xff] }
  0x4d   : > { %v7190_v44 = vmax.bf16 %v12368_v56, %v6703_v36  ;;  %v7198_v61 = vmax.bf16 %v12369_v35, %v6716_v41  ;;  %v669_v62 = vrot.slane %v668_v12, 4  ;;  %v12370_v19 = vsel %vm6694_vm2, %v6846_v59, %v6814_v0  ;;  %v12393_v35 = vld [vmem:[#allocation24_spill] sm:$0xff] }
  0x4e   : > { %v7208_v21 = vmax.bf16 %v12370_v19, %v6738_v50  ;;  %v12371_v54 = vsel %vm6694_vm2, %v6864_v58, %v6829_v34  ;;  %v12372_v29 = vsel %vm6694_vm2, %v6874_v15, %v6855_v17  ;;  %v12374_v59 = vsel %vm6694_vm2, %v6898_v49, %v6868_v43  ;;  %v12379_v15 = vld [vmem:[#allocation30_spill] sm:$0xff]  ;;  %v12380_v17 = vld [vmem:[#allocation25_spill] sm:$0xff] }
  0x4f   : > { %v7216_v39 = vmax.bf16 %v12371_v54, %v6759_v60  ;;  %v7224_v25 = vmax.bf16 %v12372_v29, %v6769_v1  ;;  %v7232_v0 = vmax.bf16 %v12374_v59, %v6800_v48  ;;  %v12376_v34 = vsel %vm6694_vm2, %v6926_v16, %v6902_v33  ;;  %v12383_v43 = vld [vmem:[#allocation21_spill] sm:$0xff]  ;;  %v12388_v16 = vld [vmem:[#allocation23_spill] sm:$0xff]  ;;  %v12398_v29 = vld [vmem:[#allocation26_spill] sm:$0xff] }
  0x50   : > { %v7240_v58 = vmax.bf16 %v12376_v34, %v6820_v27  ;;  %v12381_v18 = vsel %vm6694_vm2, %v12379_v15, %v12380_v17  ;;  %v674_v49 = vsel %vm6694_vm2, %v669_v62, %v673_v13  ;;  %v12386_v12 = vsel %vm6694_vm2, %v12384_v46, %v12385_v14  ;;  %v12394_v13 = vld [vmem:[#allocation40_spill] sm:$0xff]  ;;  %v12395_v62 = vld [vmem:[#allocation34_spill] sm:$0xff]  ;;  %v12399_v59 = vld [vmem:[#allocation43_spill] sm:$0xff] }
  0x51   : > { %12373 = vst [vmem:[#allocation49_spill] sm:$0xff] %v7224_v25  ;;  %12375 = vst [vmem:[#allocation50_spill] sm:$0xff] %v7232_v0  ;;  %v7248_v20 = vmax.bf16 %v12381_v18, %v12378_v55  ;;  %v7258_v33 = vmax.bf16 %v12386_v12, %v12383_v43  ;;  %v12391_v42 = vsel %vm6694_vm2, %v12389_v2, %v12390_v22  ;;  %v12400_v34 = vld [vmem:[#allocation38_spill] sm:$0xff]  ;;  %v12403_v18 = vld [vmem:[#allocation29_spill] sm:$0xff] }
  0x52   : > { %12377 = vst [vmem:[#allocation51_spill] sm:$0xff] %v7240_v58  ;;  %v7266_v56 = vmax.bf16 %v12391_v42, %v12388_v16  ;;  %v12396_v19 = vsel %vm6694_vm2, %v12394_v13, %v12395_v62  ;;  %v12401_v15 = vsel %vm6694_vm2, %v12399_v59, %v12400_v34  ;;  %v12404_v46 = vld [vmem:[#allocation46_spill] sm:$0xff]  ;;  %v12405_v14 = vld [vmem:[#allocation41_spill] sm:$0xff]  ;;  %v12408_v22 = vld [vmem:[#allocation32_spill] sm:$0xff]  ;;  %v7308_v31 = vmax.bf16 %v654_v24, %v7056_v26 }
  0x53   : > { %12382 = vst [vmem:[#allocation30_spill] sm:$0xff] %v7248_v20  ;;  %12387 = vst [vmem:[#allocation25_spill] sm:$0xff] %v7258_v33  ;;  %v7274_v54 = vmax.bf16 %v12396_v19, %v12393_v35  ;;  %v7282_v17 = vmax.bf16 %v12401_v15, %v12398_v29  ;;  %v12406_v12 = vsel %vm6694_vm2, %v12404_v46, %v12405_v14  ;;  %v12410_v13 = vld [vmem:[#allocation35_spill] sm:$0xff]  ;;  %v12414_v59 = vld [vmem:[#allocation42_spill] sm:$0xff]  ;;  %v1233_v46 = vrot.slane %v6642_v5, 5 }
  0x54   : > { %12392 = vst [vmem:[#allocation33_spill] sm:$0xff] %v7266_v56  ;;  %v7290_v2 = vmax.bf16 %v12406_v12, %v12403_v18  ;;  %v7293_v42 = vmax.bf16 %v596_v51, %v12408_v22  ;;  %v7296_v62 = vmax.bf16 %v606_v53, %v12410_v13  ;;  %v12412_v19 = vld [vmem:[#allocation39_spill] sm:$0xff]  ;;  %v7302_v34 = vmax.bf16 %v630_v45, %v12414_v59  ;;  %v12416_v15 = vld [vmem:[#allocation44_spill] sm:$0xff]  ;;  %v12424_v24 = vld [vmem:[#allocation5_spill] sm:$0xff] }
  0x55   : > { %12397 = vst [vmem:[#allocation28_spill] sm:$0xff] %v7274_v54  ;;  %12402 = vst [vmem:[#allocation36_spill] sm:$0xff] %v7282_v17  ;;  %v7299_v63 = vmax.bf16 %v620_v10, %v12412_v19  ;;  %v7305_v47 = vmax.bf16 %v640_v30, %v12416_v15  ;;  %v12419_v51 = vmov 0  ;;  %v7317_v53 = vmax.bf16 %v664_v57, %v7065_v32 }
  0x56   : > { %12407 = vst [vmem:[#allocation31_spill] sm:$0xff] %v7290_v2  ;;  %12409 = vst [vmem:[#allocation40_spill] sm:$0xff] %v7293_v42  ;;  %v12420_v51 = vsel %vm7312_vm5, 4294967295, %v12419_v51  ;;  %v7320_v10 = vmax.bf16 %v674_v49, %v7097_v11  ;;  %v6032_v45 = vrot.slane %v6636_v3, 9  ;;  %v1230_v30 = vrot.slane %v6639_v4, 5  ;;  %v12454_v42 = vld [vmem:[#allocation2_spill] sm:$0xff] }
  0x57   : > { %12411 = vst [vmem:[#allocation34_spill] sm:$0xff] %v7296_v62  ;;  %12413 = vst [vmem:[#allocation43_spill] sm:$0xff] %v7299_v63  ;;  %v1236_v14 = vrot.slane %v12424_v24, 5  ;;  %v6033_v12 = vrot.slane %v6648_v7, 9  ;;  %v1243_v49 = vrot.slane %v6654_v9, 5  ;;  %v1235_v3 = vrot.slane %v1233_v46, 4 }
  0x58   : > { %12415 = vst [vmem:[#allocation38_spill] sm:$0xff] %v7302_v34  ;;  %12417 = vst [vmem:[#allocation46_spill] sm:$0xff] %v7305_v47  ;;  %v7330_v47 = vsel %vm7312_vm5, %v6032_v45, %v1230_v30  ;;  %v1232_v57 = vrot.slane %v1230_v30, 4  ;;  %v6034_v24 = vrot.slane %v6703_v36, 9  ;;  %v1250_v45 = vrot.slane %v6716_v41, 5 }
  0x59   : > { %12418 = vst [vmem:[#allocation41_spill] sm:$0xff] %v7308_v31  ;;  %12421 = vst [vmem:[#allocation52_spill] sm:$0xff] %v12420_v51  ;;  %v1240_v31 = vrot.slane %v6651_v8, 5  ;;  %v1245_v7 = vrot.slane %v1243_v49, 4  ;;  %v1253_v30 = vrot.slane %v6738_v50, 5  ;;  %v6035_v36 = vrot.slane %v6759_v60, 9 }
  0x5a   : > { %12422 = vst [vmem:[#allocation53_spill] sm:$0xff] %v7317_v53  ;;  %12423 = vst [vmem:[#allocation54_spill] sm:$0xff] %v7320_v10  ;;  %v12425_v10 = vld [vmem:[#allocation9_spill] sm:$0xff]  ;;  %v7341_v8 = vsel %vm7312_vm5, %v1232_v57, %v1233_v46  ;;  %v7361_v57 = vsel %vm7312_vm5, %v6034_v24, %v1250_v45  ;;  %v1252_v50 = vrot.slane %v1250_v45, 4  ;;  %v1273_v24 = vrot.slane %v12383_v43, 5 }
  0x5b   : > { %v1246_v53 = vrot.slane %v12425_v10, 5  ;;  %v7336_v4 = vsel %vm7312_vm5, %v6033_v12, %v1240_v31  ;;  %v1242_v5 = vrot.slane %v1240_v31, 4  ;;  %v7347_v10 = vsel %vm7312_vm5, %v1235_v3, %v1236_v14  ;;  %v12426_v31 = vld [vmem:[#allocation14_spill] sm:$0xff] }
  0x5c   : > { %v1256_v9 = vrot.slane %v12426_v31, 5  ;;  %v1255_v41 = vrot.slane %v1253_v30, 4  ;;  %v1260_v3 = vrot.slane %v6769_v1, 5  ;;  %v1263_v14 = vrot.slane %v6800_v48, 5  ;;  %v12428_v1 = vld [vmem:[#allocation22_spill] sm:$0xff] }
  0x5d   : > { %v7351_v12 = vsel %vm7312_vm5, %v1242_v5, %v1243_v49  ;;  %v7357_v46 = vsel %vm7312_vm5, %v1245_v7, %v1246_v53  ;;  %v12427_v5 = vld [vmem:[#allocation18_spill] sm:$0xff]  ;;  %v6036_v31 = vrot.slane %v6820_v27, 9  ;;  %v7369_v60 = vsel %vm7312_vm5, %v1252_v50, %v1253_v30 }
  0x5e   : > { %v1266_v49 = vrot.slane %v12427_v5, 5  ;;  %v7373_v7 = vsel %vm7312_vm5, %v1255_v41, %v1256_v9  ;;  %v1270_v53 = vrot.slane %v12378_v55, 5  ;;  %v7379_v45 = vsel %vm7312_vm5, %v6035_v36, %v1260_v3 }
  0x5f   : > { %v1262_v48 = vrot.slane %v1260_v3, 4  ;;  %v1265_v5 = vrot.slane %v1263_v14, 4  ;;  %v1276_v27 = vrot.slane %v12428_v1, 5  ;;  %v1275_v34 = vrot.slane %v1273_v24, 4 }
  0x60   : > { %v7384_v50 = vsel %vm7312_vm5, %v6036_v31, %v1270_v53  ;;  %v1272_v30 = vrot.slane %v1270_v53, 4  ;;  %v6037_v9 = vrot.slane %v12388_v16, 9  ;;  %v1280_v3 = vrot.slane %v12393_v35, 5  ;;  %v12434_v16 = vld [vmem:[#allocation27_spill] sm:$0xff] }
  0x61   : > { %12429 = vst [vmem:[#allocation55_spill] sm:$0xff] %v7384_v50  ;;  %v7389_v41 = vsel %vm7312_vm5, %v1262_v48, %v1263_v14  ;;  %v7393_v36 = vsel %vm7312_vm5, %v1265_v5, %v1266_v49  ;;  %v1283_v1 = vrot.slane %v12398_v29, 5  ;;  %v7403_v53 = vsel %vm7312_vm5, %v1275_v34, %v1276_v27 }
  0x62   : > { %12430 = vst [vmem:[#allocation56_spill] sm:$0xff] %v7389_v41  ;;  %12431 = vst [vmem:[#allocation57_spill] sm:$0xff] %v7393_v36  ;;  %v7399_v31 = vsel %vm7312_vm5, %v1272_v30, %v1273_v24  ;;  %v1286_v43 = vrot.slane %v12434_v16, 5  ;;  %v6038_v48 = vrot.slane %v12403_v18, 9  ;;  %v7409_v14 = vsel %vm7312_vm5, %v6037_v9, %v1280_v3  ;;  %v12436_v24 = vld [vmem:[#allocation37_spill] sm:$0xff]  ;;  %v12512_v36 = vld [vmem:[#allocation22_spill] sm:$0xff] }
  0x63   : > { %12432 = vst [vmem:[#allocation58_spill] sm:$0xff] %v7399_v31  ;;  %12433 = vst [vmem:[#allocation59_spill] sm:$0xff] %v7403_v53  ;;  %v1282_v5 = vrot.slane %v1280_v3, 4  ;;  %v1285_v49 = vrot.slane %v1283_v1, 4  ;;  %v1290_v29 = vrot.slane %v12408_v22, 5  ;;  %v1293_v35 = vrot.slane %v12410_v13, 5 }
  0x64   : > { %12435 = vst [vmem:[#allocation60_spill] sm:$0xff] %v7409_v14  ;;  %v1296_v30 = vrot.slane %v12436_v24, 5  ;;  %v6039_v55 = vrot.slane %v12412_v19, 9  ;;  %v1300_v27 = vrot.slane %v12414_v59, 5  ;;  %v1303_v59 = vrot.slane %v12416_v15, 5 }
  0x65   : > { %v7418_v34 = vsel %vm7312_vm5, %v1282_v5, %v1283_v1  ;;  %v7422_v9 = vsel %vm7312_vm5, %v1285_v49, %v1286_v43  ;;  %v7426_v3 = vsel %vm7312_vm5, %v6038_v48, %v1290_v29  ;;  %v1292_v22 = vrot.slane %v1290_v29, 4  ;;  %v12442_v5 = vld [vmem:[#allocation45_spill] sm:$0xff] }
  0x66   : > { %12437 = vst [vmem:[#allocation61_spill] sm:$0xff] %v7418_v34  ;;  %12438 = vst [vmem:[#allocation62_spill] sm:$0xff] %v7422_v9  ;;  %v1295_v13 = vrot.slane %v1293_v35, 4  ;;  %v7430_v24 = vsel %vm7312_vm5, %v6039_v55, %v1300_v27  ;;  %v1302_v19 = vrot.slane %v1300_v27, 4  ;;  %v1306_v43 = vrot.slane %v12442_v5, 5 }
  0x67   : > { %12439 = vst [vmem:[#allocation63_spill] sm:$0xff] %v7426_v3  ;;  %12440 = vst [vmem:[#allocation64_spill] sm:$0xff] %v7430_v24  ;;  %v7435_v1 = vsel %vm7312_vm5, %v1292_v22, %v1293_v35  ;;  %v6040_v49 = vrot.slane %v7056_v26, 9  ;;  %v1310_v48 = vrot.slane %v7065_v32, 5  ;;  %v1305_v27 = vrot.slane %v1303_v59, 4  ;;  %v12457_v24 = vld [vmem:[#allocation3_spill] sm:$0xff] }
  0x68   : > { %12441 = vst [vmem:[#allocation65_spill] sm:$0xff] %v7435_v1  ;;  %v7442_v29 = vsel %vm7312_vm5, %v1295_v13, %v1296_v30  ;;  %v7446_v55 = vsel %vm7312_vm5, %v1302_v19, %v1303_v59  ;;  %v1313_v15 = vrot.slane %v7097_v11, 5  ;;  %v1316_v26 = vrot.slane %v7103_v23, 5 }
  0x69   : > { %12443 = vst [vmem:[#allocation66_spill] sm:$0xff] %v7442_v29  ;;  %12444 = vst [vmem:[#allocation67_spill] sm:$0xff] %v7446_v55  ;;  %v7451_v35 = vsel %vm7312_vm5, %v6040_v49, %v1310_v48  ;;  %v1312_v22 = vrot.slane %v1310_v48, 4  ;;  %v7458_v13 = vsel %vm7312_vm5, %v1305_v27, %v1306_v43  ;;  %v12459_v48 = vshll.u32 %v12457_v24, 16  ;;  %v12474_v29 = vld [vmem:[#allocation8_spill] sm:$0xff] }
  0x6a   : > { %12445 = vst [vmem:[#allocation68_spill] sm:$0xff] %v7451_v35  ;;  %12446 = vst [vmem:[#allocation69_spill] sm:$0xff] %v7458_v13  ;;  %v1315_v19 = vrot.slane %v1313_v15, 4  ;;  %v12460_v13 = vld [vmem:[#allocation4_spill] sm:$0xff]  ;;  %v12475_v1 = vshrl.u32 %v12474_v29, 16  ;;  %v1645_v25 = vshrl.u32 %v12512_v36, 16 }
  0x6b   : > { %v7466_v49 = vsel %vm7312_vm5, %v1312_v22, %v1313_v15  ;;  %v12456_v15 = vshll.u32 %v12454_v42, 16  ;;  %v12458_v22 = vshrl.u32 %v12457_v24, 16  ;;  %v1556_v59 = vrot.slane %v12459_v48, 6 }
  0x6c   : > { %12447 = vst [vmem:[#allocation70_spill] sm:$0xff] %v7466_v49  ;;  %v7476_v27 = vsel %vm7312_vm5, %v1315_v19, %v1316_v26  ;;  %v12455_v19 = vshrl.u32 %v12454_v42, 16  ;;  %v12461_v32 = vshrl.u32 %v12460_v13, 16  ;;  %v12462_v43 = vshll.u32 %v12460_v13, 16  ;;  %v12463_v26 = vld [vmem:[#allocation5_spill] sm:$0xff]  ;;  %v12465_v42 = vld [vmem:[#allocation6_spill] sm:$0xff] }
  0x6d   : > { %12448 = vst [vmem:[#allocation71_spill] sm:$0xff] %v7476_v27  ;;  %v1552_v63 = vrot.slane %v12456_v15, 6  ;;  %v1555_v30 = vrot.slane %v12458_v22, 5  ;;  %v1565_v2 = vshrl.u32 %v12463_v26, 16  ;;  %v12466_v15 = vshrl.u32 %v12465_v42, 16 }
  0x6e   : > { %v1551_v62 = vrot.slane %v12455_v19, 5  ;;  %v1560_v51 = vrot.slane %v12461_v32, 5  ;;  %v1561_v17 = vrot.slane %v12462_v43, 6  ;;  %v12464_v19 = vshll.u32 %v12463_v26, 16 }
  0x6f   : > { %v1571_v35 = vrot.slane %v12466_v15, 5  ;;  %v12467_v24 = vmov 0  ;;  %v7543_v48 = vor.u32 %v1556_v59, %v1555_v30  ;;  %v12470_v13 = vshll.u32 %v12465_v42, 16 }
  0x70   : > { %v1553_v49 = vor.u32 %v1552_v63, %v1551_v62  ;;  %v1568_v27 = vrot.slane %v12464_v19, 6  ;;  %v12468_v24 = vsel %vm7539_vm8, 4294967295, %v12467_v24  ;;  %v1562_v32 = vor.u32 %v1561_v17, %v1560_v51  ;;  %v12471_v62 = vld [vmem:[#allocation7_spill] sm:$0xff] }
  0x71   : > { %12469 = vst [vmem:[#allocation2_spill] sm:$0xff] %v12468_v24  ;;  %v1572_v63 = vrot.slane %v12470_v13, 6  ;;  %v12472_v43 = vshrl.u32 %v12471_v62, 16  ;;  %v1567_v19 = vrot.slane %v1565_v2, 5  ;;  %v12473_v15 = vshll.u32 %v12471_v62, 16  ;;  %v12477_v13 = vld [vmem:[#allocation9_spill] sm:$0xff] }
  0x72   : > { %v7549_v26 = vrot.slane %v1553_v49, 4  ;;  %v1580_v3 = vrot.slane %v12475_v1, 5  ;;  %v1559_v9 = vrot.slane %v7543_v48, 4  ;;  %v1564_v59 = vrot.slane %v1562_v32, 4  ;;  %v12485_v49 = vld [vmem:[#allocation13_spill] sm:$0xff] }
  0x73   : > { %v1575_v22 = vrot.slane %v12472_v43, 5  ;;  %v1576_v55 = vrot.slane %v12473_v15, 6  ;;  %v1573_v30 = vor.u32 %v1572_v63, %v1571_v35  ;;  %v12476_v17 = vshll.u32 %v12474_v29, 16 }
  0x74   : > { %v1569_v42 = vor.u32 %v1568_v27, %v1567_v19  ;;  %v1585_v62 = vshrl.u32 %v12477_v13, 16  ;;  %v7567_v1 = vsel %vm7539_vm8, %v1559_v9, %v1562_v32  ;;  %v12478_v29 = vshll.u32 %v12477_v13, 16 }
  0x75   : > { %v1581_v51 = vrot.slane %v12476_v17, 6  ;;  %v7562_v2 = vor.u32 %v1576_v55, %v1575_v22  ;;  %v7569_v43 = vrot.slane %v1573_v30, 4  ;;  %v12479_v22 = vld [vmem:[#allocation11_spill] sm:$0xff]  ;;  %v12486_v54 = vshrl.u32 %v12485_v49, 16 }
  0x76   : > { %v1588_v63 = vrot.slane %v12478_v29, 6  ;;  %v7575_v15 = vsel %vm7539_vm8, %v1564_v59, %v1569_v42  ;;  %v1587_v55 = vrot.slane %v1585_v62, 5  ;;  %v12480_v19 = vshrl.u32 %v12479_v22, 16 }
  0x77   : > { %v1582_v35 = vor.u32 %v1581_v51, %v1580_v3  ;;  %v1579_v27 = vrot.slane %v7562_v2, 4  ;;  %v12481_v3 = vshll.u32 %v12479_v22, 16  ;;  %v12482_v51 = vld [vmem:[#allocation12_spill] sm:$0xff]  ;;  %v1600_v34 = vrot.slane %v12486_v54, 5  ;;  %v12488_v22 = vld [vmem:[#allocation14_spill] sm:$0xff] }
  0x78   : > { %v1591_v17 = vrot.slane %v12480_v19, 5  ;;  %v12483_v13 = vshrl.u32 %v12482_v51, 16  ;;  %v1589_v42 = vor.u32 %v1588_v63, %v1587_v55  ;;  %v12484_v62 = vshll.u32 %v12482_v51, 16 }
  0x79   : > { %v1584_v32 = vrot.slane %v1582_v35, 4  ;;  %v1592_v30 = vrot.slane %v12481_v3, 6  ;;  %v7590_v59 = vsel %vm7539_vm8, %v1579_v27, %v1582_v35  ;;  %v12487_v9 = vshll.u32 %v12485_v49, 16  ;;  %v12490_v27 = vld [vmem:[#allocation15_spill] sm:$0xff] }
  0x7a   : > { %v1595_v29 = vrot.slane %v12483_v13, 5  ;;  %v1596_v19 = vrot.slane %v12484_v62, 6  ;;  %v1605_v3 = vshrl.u32 %v12488_v22, 16  ;;  %v12489_v33 = vshll.u32 %v12488_v22, 16  ;;  %v12493_v62 = vld [vmem:[#allocation16_spill] sm:$0xff] }
  0x7b   : > { %v1593_v56 = vor.u32 %v1592_v30, %v1591_v17  ;;  %v1601_v14 = vrot.slane %v12487_v9, 6  ;;  %v7603_v35 = vsel %vm7539_vm8, %v1584_v32, %v1589_v42  ;;  %v12491_v55 = vshrl.u32 %v12490_v27, 16  ;;  %v12496_v42 = vld [vmem:[#allocation17_spill] sm:$0xff] }
  0x7c   : > { %v1608_v13 = vrot.slane %v12489_v33, 6  ;;  %v7605_v63 = vor.u32 %v1596_v19, %v1595_v29  ;;  %v12492_v54 = vshll.u32 %v12490_v27, 16  ;;  %v1607_v9 = vrot.slane %v1605_v3, 5 }
  0x7d   : > { %v1611_v51 = vrot.slane %v12491_v55, 5  ;;  %v7611_v30 = vrot.slane %v1593_v56, 4  ;;  %v1602_v49 = vor.u32 %v1601_v14, %v1600_v34  ;;  %v12494_v53 = vshrl.u32 %v12493_v62, 16  ;;  %v12508_v56 = vld [vmem:[#allocation21_spill] sm:$0xff] }
  0x7e   : > { %v1612_v17 = vrot.slane %v12492_v54, 6  ;;  %v1599_v33 = vrot.slane %v7605_v63, 4  ;;  %v12495_v32 = vshll.u32 %v12493_v62, 16  ;;  %v12497_v19 = vshrl.u32 %v12496_v42, 16  ;;  %v12500_v54 = vld [vmem:[#allocation18_spill] sm:$0xff] }
  0x7f   : > { %v1615_v22 = vrot.slane %v12494_v53, 5  ;;  %v1604_v27 = vrot.slane %v1602_v49, 4  ;;  %v1609_v14 = vor.u32 %v1608_v13, %v1607_v9  ;;  %v12498_v34 = vshll.u32 %v12496_v42, 16  ;;  %v12502_v42 = vld [vmem:[#allocation19_spill] sm:$0xff] }
  0x80   : > { %v1613_v20 = vor.u32 %v1612_v17, %v1611_v51  ;;  %v1616_v29 = vrot.slane %v12495_v32, 6  ;;  %v1620_v31 = vrot.slane %v12497_v19, 5  ;;  %v7628_v53 = vsel %vm7539_vm8, %v1599_v33, %v1602_v49 }
  0x81   : > { %v1621_v3 = vrot.slane %v12498_v34, 6  ;;  %v1625_v17 = vshrl.u32 %v12500_v54, 16  ;;  %v7637_v62 = vsel %vm7539_vm8, %v1604_v27, %v1609_v14  ;;  %v12501_v13 = vshll.u32 %v12500_v54, 16  ;;  %v12505_v14 = vld [vmem:[#allocation20_spill] sm:$0xff] }
  0x82   : > { %v7630_v55 = vrot.slane %v1613_v20, 4  ;;  %v7632_v51 = vor.u32 %v1616_v29, %v1615_v22  ;;  %v12503_v19 = vshrl.u32 %v12502_v42, 16  ;;  %v12504_v33 = vshll.u32 %v12502_v42, 16 }
  0x83   : > { %v1622_v32 = vor.u32 %v1621_v3, %v1620_v31  ;;  %v1628_v9 = vrot.slane %v12501_v13, 6  ;;  %v1627_v22 = vrot.slane %v1625_v17, 5  ;;  %v12506_v31 = vshrl.u32 %v12505_v14, 16 }
  0x84   : > { %12499 = vst [vmem:[#allocation3_spill] sm:$0xff] %v7632_v51  ;;  %v1631_v34 = vrot.slane %v12503_v19, 5  ;;  %v1619_v49 = vrot.slane %v7632_v51, 4  ;;  %v1632_v29 = vrot.slane %v12504_v33, 6  ;;  %v12507_v54 = vshll.u32 %v12505_v14, 16 }
  0x85   : > { %v1624_v27 = vrot.slane %v1622_v32, 4  ;;  %v1635_v3 = vrot.slane %v12506_v31, 5  ;;  %v12509_v19 = vshrl.u32 %v12508_v56, 16  ;;  %v1629_v20 = vor.u32 %v1628_v9, %v1627_v22 }
  0x86   : > { %v1636_v13 = vrot.slane %v12507_v54, 6  ;;  %v7658_v50 = vsel %vm7539_vm8, %v1619_v49, %v1622_v32  ;;  %v1633_v0 = vor.u32 %v1632_v29, %v1631_v34  ;;  %v12510_v17 = vshll.u32 %v12508_v56, 16  ;;  %v12514_v54 = vld [vmem:[#allocation23_spill] sm:$0xff]  ;;  %v12519_v29 = vld [vmem:[#allocation24_spill] sm:$0xff] }
  0x87   : > { %v1640_v58 = vrot.slane %v12509_v19, 5  ;;  %v12513_v31 = vshll.u32 %v12512_v36, 16  ;;  %v12515_v41 = vshrl.u32 %v12514_v54, 16  ;;  %v7671_v19 = vsel %vm7539_vm8, %v1624_v27, %v1629_v20 }
  0x88   : > { %v1641_v42 = vrot.slane %v12510_v17, 6  ;;  %v7662_v33 = vor.u32 %v1636_v13, %v1635_v3  ;;  %12516 = vst [vmem:[#allocation5_spill] sm:$0xff] %v7671_v19  ;;  %v7673_v32 = vrot.slane %v1633_v0, 4  ;;  %v12518_v56 = vshll.u32 %v12514_v54, 16 }
  0x89   : > { %v1648_v14 = vrot.slane %v12513_v31, 6  ;;  %v1651_v51 = vrot.slane %v12515_v41, 5  ;;  %v1647_v22 = vrot.slane %v1645_v25, 5  ;;  %v12520_v3 = vshrl.u32 %v12519_v29, 16 }
  0x8a   : > { %12511 = vst [vmem:[#allocation4_spill] sm:$0xff] %v7662_v33  ;;  %12517 = vst [vmem:[#allocation6_spill] sm:$0xff] %v7673_v32  ;;  %v1642_v9 = vor.u32 %v1641_v42, %v1640_v58  ;;  %v1652_v34 = vrot.slane %v12518_v56, 6  ;;  %v1639_v49 = vrot.slane %v7662_v33, 4  ;;  %v12521_v13 = vshll.u32 %v12519_v29, 16  ;;  %v12522_v58 = vld [vmem:[#allocation26_spill] sm:$0xff] }
  0x8b   : > { %v1655_v36 = vrot.slane %v12520_v3, 5  ;;  %v12523_v27 = vshrl.u32 %v12522_v58, 16  ;;  %v1649_v25 = vor.u32 %v1648_v14, %v1647_v22  ;;  %v12526_v56 = vshll.u32 %v12522_v58, 16 }
  0x8c   : > { %v1656_v17 = vrot.slane %v12521_v13, 6  ;;  %v1644_v0 = vrot.slane %v1642_v9, 4  ;;  %v1653_v20 = vor.u32 %v1652_v34, %v1651_v51  ;;  %v7690_v31 = vsel %vm7539_vm8, %v1639_v49, %v1642_v9 }
  0x8d   : > { %v1660_v42 = vrot.slane %v12523_v27, 5  ;;  %12524 = vst [vmem:[#allocation7_spill] sm:$0xff] %v7690_v31  ;;  %v1661_v29 = vrot.slane %v12526_v56, 6  ;;  %v1665_v13 = vshrl.u32 %v12434_v16, 16  ;;  %v12528_v41 = vshll.u32 %v12434_v16, 16 }
  0x8e   : > { %v7692_v54 = vor.u32 %v1656_v17, %v1655_v36  ;;  %v7696_v3 = vrot.slane %v1653_v20, 4  ;;  %v12529_v34 = vshrl.u32 %v12403_v18, 16  ;;  %v7705_v9 = vsel %vm7539_vm8, %v1644_v0, %v1649_v25 }
  0x8f   : > { %v1668_v51 = vrot.slane %v12528_v41, 6  ;;  %12530 = vst [vmem:[#allocation11_spill] sm:$0xff] %v7705_v9  ;;  %v1662_v49 = vor.u32 %v1661_v29, %v1660_v42  ;;  %v12531_v22 = vshll.u32 %v12403_v18, 16  ;;  %v1667_v20 = vrot.slane %v1665_v13, 5  ;;  %v12532_v41 = vld [vmem:[#allocation32_spill] sm:$0xff]  ;;  %v12536_v29 = vld [vmem:[#allocation35_spill] sm:$0xff] }
  0x90   : > { %12525 = vst [vmem:[#allocation8_spill] sm:$0xff] %v7692_v54  ;;  %12527 = vst [vmem:[#allocation9_spill] sm:$0xff] %v7696_v3  ;;  %v1671_v27 = vrot.slane %v12529_v34, 5  ;;  %v1659_v14 = vrot.slane %v7692_v54, 4  ;;  %v12533_v56 = vshrl.u32 %v12532_v41, 16  ;;  %v12534_v34 = vshll.u32 %v12532_v41, 16 }
  0x91   : > { %v1672_v36 = vrot.slane %v12531_v22, 6  ;;  %v1664_v42 = vrot.slane %v1662_v49, 4  ;;  %v12537_v22 = vshrl.u32 %v12536_v29, 16  ;;  %v1669_v9 = vor.u32 %v1668_v51, %v1667_v20  ;;  %v12539_v54 = vld [vmem:[#allocation37_spill] sm:$0xff] }
  0x92   : > { %v1675_v16 = vrot.slane %v12533_v56, 5  ;;  %v1676_v58 = vrot.slane %v12534_v34, 6  ;;  %v7720_v0 = vsel %vm7539_vm8, %v1659_v14, %v1662_v49  ;;  %v12538_v13 = vshll.u32 %v12536_v29, 16  ;;  %v12541_v14 = vld [vmem:[#allocation39_spill] sm:$0xff]  ;;  %v12547_v29 = vld [vmem:[#allocation44_spill] sm:$0xff] }
  0x93   : > { %12535 = vst [vmem:[#allocation12_spill] sm:$0xff] %v7720_v0  ;;  %v1673_v25 = vor.u32 %v1672_v36, %v1671_v27  ;;  %v1680_v18 = vrot.slane %v12537_v22, 5  ;;  %v1685_v56 = vshrl.u32 %v12539_v54, 16  ;;  %v12540_v34 = vshll.u32 %v12539_v54, 16 }
  0x94   : > { %v7724_v31 = vor.u32 %v1676_v58, %v1675_v16  ;;  %v1681_v17 = vrot.slane %v12538_v13, 6  ;;  %v12542_v0 = vshrl.u32 %v12541_v14, 16  ;;  %v12543_v27 = vshll.u32 %v12541_v14, 16  ;;  %v12544_v13 = vld [vmem:[#allocation42_spill] sm:$0xff] }
  0x95   : > { %v7729_v3 = vrot.slane %v1673_v25, 4  ;;  %v1688_v41 = vrot.slane %v12540_v34, 6  ;;  %v1670_v16 = vsel %vm7539_vm8, %v1664_v42, %v1669_v9  ;;  %v1687_v20 = vrot.slane %v1685_v56, 5 }
  0x96   : > { %v1691_v49 = vrot.slane %v12542_v0, 5  ;;  %v1692_v36 = vrot.slane %v12543_v27, 6  ;;  %v1679_v58 = vrot.slane %v7724_v31, 4  ;;  %v1682_v51 = vor.u32 %v1681_v17, %v1680_v18 }
  0x97   : > { %v1678_v25 = vsel %vm7539_vm8, %v7729_v3, %v7724_v31  ;;  %v12545_v34 = vshrl.u32 %v12544_v13, 16  ;;  %v12546_v0 = vshll.u32 %v12544_v13, 16  ;;  %v1689_v42 = vor.u32 %v1688_v41, %v1687_v20 }
  0x98   : > { %v1693_v22 = vor.u32 %v1692_v36, %v1691_v49  ;;  %v1683_v27 = vsel %vm7539_vm8, %v1679_v58, %v1682_v51  ;;  %v1684_v9 = vrot.slane %v1682_v51, 4  ;;  %v12548_v18 = vshrl.u32 %v12547_v29, 16 }
  0x99   : > { %v1695_v54 = vrot.slane %v12545_v34, 5  ;;  %v1696_v14 = vrot.slane %v12546_v0, 6  ;;  %v12549_v32 = vshll.u32 %v12547_v29, 16  ;;  %v1705_v3 = vshrl.u32 %v12442_v5, 16  ;;  %v12551_v0 = vld [vmem:[#allocation47_spill] sm:$0xff]  ;;  %v12554_v29 = vld [vmem:[#allocation48_spill] sm:$0xff] }
  0x9a   : > { %v1700_v17 = vrot.slane %v12548_v18, 5  ;;  %v1694_v56 = vrot.slane %v1693_v22, 4  ;;  %v1690_v49 = vsel %vm7539_vm8, %v1684_v9, %v1689_v42  ;;  %v12550_v36 = vshll.u32 %v12442_v5, 16 }
  0x9b   : > { %v1697_v33 = vor.u32 %v1696_v14, %v1695_v54  ;;  %v1701_v31 = vrot.slane %v12549_v32, 6  ;;  %v12552_v58 = vshrl.u32 %v12551_v0, 16  ;;  %v12553_v41 = vshll.u32 %v12551_v0, 16 }
  0x9c   : > { %v1708_v34 = vrot.slane %v12550_v36, 6  ;;  %v1707_v32 = vrot.slane %v1705_v3, 5  ;;  %v12555_v13 = vshrl.u32 %v12554_v29, 16  ;;  %v12556_v9 = vshll.u32 %v12554_v29, 16 }
  0x9d   : > { %v1711_v51 = vrot.slane %v12552_v58, 5  ;;  %v1712_v20 = vrot.slane %v12553_v41, 6  ;;  %v1698_v54 = vsel %vm7539_vm8, %v1694_v56, %v1697_v33  ;;  %v1699_v14 = vrot.slane %v1697_v33, 4 }
  0x9e   : > { %v1702_v22 = vor.u32 %v1701_v31, %v1700_v17  ;;  %v1715_v19 = vrot.slane %v12555_v13, 5  ;;  %v1716_v42 = vrot.slane %v12556_v9, 6  ;;  %v12557_v36 = vshrl.u32 %v7097_v11, 16 }
  0x9f   : > { %v1713_v18 = vor.u32 %v1712_v20, %v1711_v51  ;;  %v1709_v0 = vor.u32 %v1708_v34, %v1707_v32  ;;  %v12558_v56 = vshll.u32 %v7097_v11, 16  ;;  %v1725_v3 = vshrl.u32 %v7103_v23, 16 }
  0xa0   : > { %v1720_v5 = vrot.slane %v12557_v36, 5  ;;  %v1703_v58 = vsel %vm7539_vm8, %v1699_v14, %v1702_v22  ;;  %v1704_v41 = vrot.slane %v1702_v22, 4  ;;  %v1717_v31 = vor.u32 %v1716_v42, %v1715_v19 }
  0xa1   : > { %v1721_v33 = vrot.slane %v12558_v56, 6  ;;  %v1714_v17 = vrot.slane %v1713_v18, 4  ;;  %v12559_v13 = vshll.u32 %v7103_v23, 16  ;;  %v12560_v36 = vmax.bf16 %v7330_v47, %v7132_v6  ;;  %v12585_v56 = vld [vmem:[#allocation6_spill] sm:$0xff] }
  0xa2   : > { %v1710_v20 = vsel %vm7539_vm8, %v1704_v41, %v1709_v0  ;;  %v12561_v34 = vsel %vm7539_vm8, %v7549_v26, %v7543_v48  ;;  %v12562_v19 = vmax.bf16 %v7341_v8, %v7148_v37  ;;  %v1727_v32 = vrot.slane %v1725_v3, 5  ;;  %v12583_v41 = vld [vmem:[#allocation51_spill] sm:$0xff]  ;;  %v12589_v3 = vld [vmem:[#allocation30_spill] sm:$0xff] }
  0xa3   : > { %v1728_v51 = vrot.slane %v12559_v13, 6  ;;  %v1722_v9 = vor.u32 %v1721_v33, %v1720_v5  ;;  %v7788_v14 = vmax.bf16 %v12561_v34, %v12560_v36  ;;  %v1718_v0 = vsel %vm7539_vm8, %v1714_v17, %v1717_v31  ;;  %v12586_v33 = vld [vmem:[#allocation4_spill] sm:$0xff]  ;;  %v12592_v36 = vld [vmem:[#allocation59_spill] sm:$0xff]  ;;  %v12593_v34 = vld [vmem:[#allocation25_spill] sm:$0xff] }
  0xa4   : > { %v7794_v22 = vmax.bf16 %v7567_v1, %v12562_v19  ;;  %v1719_v5 = vrot.slane %v1717_v31, 4  ;;  %v12563_v47 = vmax.bf16 %v7347_v10, %v7156_v28  ;;  %v12564_v26 = vmax.bf16 %v7336_v4, %v7164_v52 }
  0xa5   : > { %v1724_v48 = vrot.slane %v1722_v9, 4  ;;  %v12565_v8 = vsel %vm7539_vm8, %v7569_v43, %v7562_v2  ;;  %v12566_v1 = vmax.bf16 %v7351_v12, %v7172_v38  ;;  %v12567_v28 = vmax.bf16 %v7357_v46, %v7182_v40 }
  0xa6   : > { %v7802_v6 = vmax.bf16 %v7575_v15, %v12563_v47  ;;  %v7812_v37 = vmax.bf16 %v12565_v8, %v12564_v26  ;;  %v1723_v4 = vsel %vm7539_vm8, %v1719_v5, %v1722_v9  ;;  %v1729_v52 = vor.u32 %v1728_v51, %v1727_v32  ;;  %v12591_v51 = vld [vmem:[#allocation7_spill] sm:$0xff]  ;;  %v12596_v47 = vld [vmem:[#allocation60_spill] sm:$0xff]  ;;  %v12599_v8 = vld [vmem:[#allocation9_spill] sm:$0xff] }
  0xa7   : > { %v7818_v18 = vmax.bf16 %v7590_v59, %v12566_v1  ;;  %v7824_v10 = vmax.bf16 %v7603_v35, %v12567_v28  ;;  %v12568_v2 = vmax.bf16 %v7361_v57, %v7190_v44  ;;  %v12569_v38 = vsel %vm7539_vm8, %v7611_v30, %v7605_v63  ;;  %v12573_v57 = vld [vmem:[#allocation3_spill] sm:$0xff]  ;;  %v12600_v1 = vld [vmem:[#allocation8_spill] sm:$0xff] }
  0xa8   : > { %v12570_v40 = vmax.bf16 %v7369_v60, %v7198_v61  ;;  %v12571_v43 = vmax.bf16 %v7373_v7, %v7208_v21  ;;  %v12572_v44 = vmax.bf16 %v7379_v45, %v7216_v39  ;;  %v12574_v59 = vsel %vm7539_vm8, %v7630_v55, %v12573_v57  ;;  %v12575_v60 = vld [vmem:[#allocation56_spill] sm:$0xff]  ;;  %v12576_v61 = vld [vmem:[#allocation49_spill] sm:$0xff]  ;;  %v12579_v7 = vld [vmem:[#allocation50_spill] sm:$0xff] }
  0xa9   : > { %v7836_v12 = vmax.bf16 %v12569_v38, %v12568_v2  ;;  %v12577_v63 = vmax.bf16 %v12575_v60, %v12576_v61  ;;  %v12578_v21 = vld [vmem:[#allocation57_spill] sm:$0xff]  ;;  %v1730_v39 = vsel %vm7539_vm8, %v1724_v48, %v1729_v52  ;;  %v12582_v45 = vld [vmem:[#allocation55_spill] sm:$0xff]  ;;  %v12587_v17 = vsel %vm7539_vm8, %v12585_v56, %v12586_v33  ;;  %v12603_v38 = vld [vmem:[#allocation28_spill] sm:$0xff] }
  0xaa   : > { %v7842_v46 = vmax.bf16 %v7628_v53, %v12570_v40  ;;  %v7848_v15 = vmax.bf16 %v7637_v62, %v12571_v43  ;;  %v7858_v35 = vmax.bf16 %v12574_v59, %v12572_v44  ;;  %v12580_v53 = vmax.bf16 %v12578_v21, %v12579_v7  ;;  %v12581_v62 = vld [vmem:[#allocation5_spill] sm:$0xff]  ;;  %v12595_v5 = vld [vmem:[#allocation11_spill] sm:$0xff]  ;;  %v12605_v43 = vld [vmem:[#allocation12_spill] sm:$0xff] }
  0xab   : > { %v7864_v30 = vmax.bf16 %v7658_v50, %v12577_v63  ;;  %v12584_v55 = vmax.bf16 %v12582_v45, %v12583_v41  ;;  %v12588_v50 = vld [vmem:[#allocation58_spill] sm:$0xff]  ;;  %v12594_v19 = vmax.bf16 %v12592_v36, %v12593_v34  ;;  %v12597_v48 = vld [vmem:[#allocation33_spill] sm:$0xff]  ;;  %v12601_v28 = vsel %vm7539_vm8, %v12599_v8, %v12600_v1  ;;  %v12607_v59 = vld [vmem:[#allocation36_spill] sm:$0xff] }
  0xac   : > { %v7870_v42 = vmax.bf16 %v12581_v62, %v12580_v53  ;;  %v12590_v13 = vmax.bf16 %v12588_v50, %v12589_v3  ;;  %v12598_v26 = vmax.bf16 %v12596_v47, %v12597_v48  ;;  %v12602_v2 = vld [vmem:[#allocation61_spill] sm:$0xff]  ;;  %v12606_v57 = vld [vmem:[#allocation62_spill] sm:$0xff]  ;;  %v12609_v63 = vld [vmem:[#allocation63_spill] sm:$0xff] }
  0xad   : > { %v7882_v31 = vmax.bf16 %v12587_v17, %v12584_v55  ;;  %v7894_v32 = vmax.bf16 %v12595_v5, %v12594_v19  ;;  %v12604_v40 = vmax.bf16 %v12602_v2, %v12603_v38  ;;  %v12608_v60 = vmax.bf16 %v12606_v57, %v12607_v59  ;;  %v12610_v21 = vld [vmem:[#allocation31_spill] sm:$0xff]  ;;  %v12612_v62 = vld [vmem:[#allocation65_spill] sm:$0xff]  ;;  %v12613_v45 = vld [vmem:[#allocation40_spill] sm:$0xff] }
  0xae   : > { %v7888_v9 = vmax.bf16 %v12591_v51, %v12590_v13  ;;  %v7904_v52 = vmax.bf16 %v12601_v28, %v12598_v26  ;;  %v12611_v7 = vmax.bf16 %v12609_v63, %v12610_v21  ;;  %v12614_v41 = vmax.bf16 %v12612_v62, %v12613_v45  ;;  %v12615_v56 = vld [vmem:[#allocation66_spill] sm:$0xff]  ;;  %v12618_v3 = vld [vmem:[#allocation64_spill] sm:$0xff]  ;;  %v12619_v13 = vld [vmem:[#allocation43_spill] sm:$0xff] }
  0xaf   : > { %v7910_v44 = vmax.bf16 %v12605_v43, %v12604_v40  ;;  %v7915_v61 = vmax.bf16 %v1670_v16, %v12608_v60  ;;  %v12616_v33 = vld [vmem:[#allocation34_spill] sm:$0xff]  ;;  %v12620_v16 = vmax.bf16 %v12618_v3, %v12619_v13  ;;  %v12621_v36 = vld [vmem:[#allocation67_spill] sm:$0xff]  ;;  %v12625_v5 = vld [vmem:[#allocation69_spill] sm:$0xff]  ;;  %v12641_v63 = vmov 0 }
  0xb0   : > { %v7920_v53 = vmax.bf16 %v1678_v25, %v12611_v7  ;;  %v7925_v55 = vmax.bf16 %v1683_v27, %v12614_v41  ;;  %v12617_v17 = vmax.bf16 %v12615_v56, %v12616_v33  ;;  %v12622_v25 = vld [vmem:[#allocation38_spill] sm:$0xff]  ;;  %v12629_v26 = vld [vmem:[#allocation68_spill] sm:$0xff]  ;;  %v12634_v2 = vld [vmem:[#allocation53_spill] sm:$0xff]  ;;  %v12642_v63 = vsel %vm7964_vm11, 4294967295, %v12641_v63 }
  0xb1   : > { %v7935_v51 = vmax.bf16 %v1698_v54, %v12620_v16  ;;  %v12623_v34 = vmax.bf16 %v12621_v36, %v12622_v25  ;;  %v12626_v47 = vld [vmem:[#allocation46_spill] sm:$0xff]  ;;  %v12637_v40 = vld [vmem:[#allocation71_spill] sm:$0xff]  ;;  %12643 = vst [vmem:[#allocation18_spill] sm:$0xff] %v12642_v63  ;;  %v6486_v45 = vld [vmem:[%s6633_s30 + $0x10] sm:$0xf] }
  0xb2   : > { %v7930_v50 = vmax.bf16 %v1690_v49, %v12617_v17  ;;  %v12627_v27 = vmax.bf16 %v12625_v5, %v12626_v47  ;;  %v12630_v49 = vld [vmem:[#allocation41_spill] sm:$0xff]  ;;  %v12633_v28 = vld [vmem:[#allocation70_spill] sm:$0xff]  ;;  %v6484_v21 = vld [vmem:[%s6633_s30 + $0x8] sm:$0xf] }
  0xb3   : > { %v7940_v19 = vmax.bf16 %v1703_v58, %v12623_v34  ;;  %v12631_v8 = vmax.bf16 %v12629_v26, %v12630_v49  ;;  %v12635_v54 = vmax.bf16 %v12633_v28, %v12634_v2  ;;  %v12638_v58 = vld [vmem:[#allocation54_spill] sm:$0xff]  ;;  %v6485_v7 = vld [vmem:[%s6633_s30 + $0xc] sm:$0x3]  ;;  %v6487_v41 = vld [vmem:[%s6633_s30 + $0x14] sm:$0xf] }
  0xb4   : > { %v7945_v48 = vmax.bf16 %v1710_v20, %v12627_v27  ;;  %v12639_v43 = vmax.bf16 %v12637_v40, %v12638_v58  ;;  %v6482_v20 = vld [vmem:[%s6633_s30] sm:$0xf]  ;;  %v6483_v60 = vld [vmem:[%s6633_s30 + $0x4] sm:$0xf]  ;;  %v2082_v62 = vrot.slane %v6485_v7, 6  ;;  %v2086_v56 = vrot.slane %v6487_v41, 6 }
  0xb5   : > { %12624 = vst [vmem:[#allocation13_spill] sm:$0xff] %v7940_v19  ;;  %v7950_v1 = vmax.bf16 %v1718_v0, %v12631_v8  ;;  %v7955_v38 = vmax.bf16 %v1723_v4, %v12635_v54  ;;  %v6052_v59 = vrot.slane %v6482_v20, 10  ;;  %v2076_v0 = vrot.slane %v6483_v60, 6  ;;  %v6488_v3 = vld [vmem:[%s6633_s30 + $0x18] sm:$0xf] }
  0xb6   : > { %12628 = vst [vmem:[#allocation14_spill] sm:$0xff] %v7945_v48  ;;  %v7960_v57 = vmax.bf16 %v1730_v39, %v12639_v43  ;;  %v2079_v4 = vrot.slane %v6484_v21, 6  ;;  %v6053_v39 = vrot.slane %v6486_v45, 10  ;;  %v2089_v13 = vrot.slane %v6488_v3, 6  ;;  %v6489_v16 = vld [vmem:[%s6633_s30 + $0x1c] sm:$0x3] }
  0xb7   : > { %12632 = vst [vmem:[#allocation15_spill] sm:$0xff] %v7950_v1  ;;  %12636 = vst [vmem:[#allocation16_spill] sm:$0xff] %v7955_v38  ;;  %v7974_v33 = vsel %vm7964_vm11, %v6052_v59, %v2076_v0  ;;  %v2078_v17 = vrot.slane %v2076_v0, 4  ;;  %v2092_v36 = vrot.slane %v6489_v16, 6  ;;  %v2088_v5 = vrot.slane %v2086_v56, 4  ;;  %v12650_v1 = vld [vmem:[#allocation39_spill] sm:$0xff] }
  0xb8   : > { %12640 = vst [vmem:[#allocation17_spill] sm:$0xff] %v7960_v57  ;;  %v2081_v25 = vrot.slane %v2079_v4, 4  ;;  %v7980_v34 = vsel %vm7964_vm11, %v6053_v39, %v2086_v56  ;;  %v6490_v47 = vld [vmem:[%s6633_s30 + $0x20] sm:$0xf]  ;;  %v2091_v49 = vrot.slane %v2089_v13, 4 }
  0xb9   : > { %v6054_v27 = vrot.slane %v6490_v47, 10  ;;  %v7985_v26 = vsel %vm7964_vm11, %v2078_v17, %v2079_v4  ;;  %v6491_v8 = vld [vmem:[%s6633_s30 + $0x24] sm:$0xf]  ;;  %v6492_v2 = vld [vmem:[%s6633_s30 + $0x28] sm:$0xf]  ;;  %v7995_v58 = vsel %vm7964_vm11, %v2088_v5, %v2089_v13 }
  0xba   : > { %v2096_v28 = vrot.slane %v6491_v8, 6  ;;  %v2099_v54 = vrot.slane %v6492_v2, 6  ;;  %v7991_v40 = vsel %vm7964_vm11, %v2081_v25, %v2082_v62  ;;  %v6493_v43 = vld [vmem:[%s6633_s30 + $0x2c] sm:$0x3]  ;;  %v6494_v59 = vld [vmem:[%s6633_s30 + $0x30] sm:$0xf]  ;;  %v8001_v0 = vsel %vm7964_vm11, %v2091_v49, %v2092_v36 }
  0xbb   : > { %v2102_v20 = vrot.slane %v6493_v43, 6  ;;  %v6055_v60 = vrot.slane %v6494_v59, 10  ;;  %v6495_v62 = vld [vmem:[%s6633_s30 + $0x34] sm:$0xf]  ;;  %v6496_v39 = vld [vmem:[%s6633_s30 + $0x38] sm:$0xf] }
  0xbc   : > { %v8005_v21 = vsel %vm7964_vm11, %v6054_v27, %v2096_v28  ;;  %v2098_v4 = vrot.slane %v2096_v28, 4  ;;  %v2101_v7 = vrot.slane %v2099_v54, 4  ;;  %v2106_v45 = vrot.slane %v6495_v62, 6  ;;  %v6497_v56 = vld [vmem:[%s6633_s30 + $0x3c] sm:$0x3] }
  0xbd   : > { %v2109_v41 = vrot.slane %v6496_v39, 6  ;;  %v2112_v17 = vrot.slane %v6497_v56, 6  ;;  %v6498_v3 = vld [vmem:[%s6633_s30 + $0x40] sm:$0xf]  ;;  %v6499_v25 = vld [vmem:[%s6633_s30 + $0x44] sm:$0xf] }
  0xbe   : > { %v6056_v13 = vrot.slane %v6498_v3, 10  ;;  %v8013_v16 = vsel %vm7964_vm11, %v2098_v4, %v2099_v54  ;;  %v8017_v36 = vsel %vm7964_vm11, %v2101_v7, %v2102_v20  ;;  %v2116_v5 = vrot.slane %v6499_v25, 6  ;;  %v6500_v47 = vld [vmem:[%s6633_s30 + $0x48] sm:$0xf]  ;;  %v6501_v2 = vld [vmem:[%s6633_s30 + $0x4c] sm:$0x3] }
  0xbf   : > { %v2119_v27 = vrot.slane %v6500_v47, 6  ;;  %v2107_v49 = vsel %vm7964_vm11, %v6055_v60, %v2106_v45  ;;  %v2108_v8 = vrot.slane %v2106_v45, 4  ;;  %v2111_v28 = vrot.slane %v2109_v41, 4  ;;  %v6502_v62 = vld [vmem:[%s6633_s30 + $0x50] sm:$0xf]  ;;  %v12644_v60 = vld [vmem:[#allocation26_spill] sm:$0xff] }
  0xc0   : > { %v2122_v43 = vrot.slane %v6501_v2, 6  ;;  %v2117_v54 = vsel %vm7964_vm11, %v6056_v13, %v2116_v5  ;;  %v2118_v59 = vrot.slane %v2116_v5, 4  ;;  %v6057_v20 = vrot.slane %v6502_v62, 10  ;;  %v6503_v56 = vld [vmem:[%s6633_s30 + $0x54] sm:$0xf]  ;;  %v12645_v5 = vld [vmem:[#allocation27_spill] sm:$0xff] }
  0xc1   : > { %v2121_v4 = vrot.slane %v2119_v27, 4  ;;  %v2110_v7 = vsel %vm7964_vm11, %v2108_v8, %v2109_v41  ;;  %v2113_v39 = vsel %vm7964_vm11, %v2111_v28, %v2112_v17  ;;  %v2126_v3 = vrot.slane %v6503_v56, 6  ;;  %v12646_v2 = vld [vmem:[#allocation29_spill] sm:$0xff]  ;;  %v12647_v17 = vld [vmem:[#allocation32_spill] sm:$0xff]  ;;  %v12648_v56 = vld [vmem:[#allocation35_spill] sm:$0xff] }
  0xc2   : > { %v2129_v45 = vrot.slane %v12644_v60, 6  ;;  %v2120_v25 = vsel %vm7964_vm11, %v2118_v59, %v2119_v27  ;;  %v2132_v47 = vrot.slane %v12645_v5, 6  ;;  %v6058_v62 = vrot.slane %v12646_v2, 10  ;;  %v12649_v60 = vld [vmem:[#allocation37_spill] sm:$0xff]  ;;  %v12651_v59 = vld [vmem:[#allocation42_spill] sm:$0xff] }
  0xc3   : > { %v2123_v13 = vsel %vm7964_vm11, %v2121_v4, %v2122_v43  ;;  %v2127_v41 = vsel %vm7964_vm11, %v6057_v20, %v2126_v3  ;;  %v2128_v8 = vrot.slane %v2126_v3, 4  ;;  %v2136_v28 = vrot.slane %v12647_v17, 6 }
  0xc4   : > { %v2131_v24 = vrot.slane %v2129_v45, 4  ;;  %v2139_v57 = vrot.slane %v12648_v56, 6  ;;  %v2142_v38 = vrot.slane %v12649_v60, 6  ;;  %v6059_v27 = vrot.slane %v12650_v1, 10  ;;  %v12652_v56 = vld [vmem:[#allocation44_spill] sm:$0xff] }
  0xc5   : > { %v2146_v48 = vrot.slane %v12651_v59, 6  ;;  %v2130_v43 = vsel %vm7964_vm11, %v2128_v8, %v2129_v45  ;;  %v2137_v20 = vsel %vm7964_vm11, %v6058_v62, %v2136_v28  ;;  %v2138_v3 = vrot.slane %v2136_v28, 4  ;;  %v12653_v59 = vld [vmem:[#allocation45_spill] sm:$0xff]  ;;  %v12654_v45 = vld [vmem:[#allocation47_spill] sm:$0xff] }
  0xc6   : > { %v2133_v4 = vsel %vm7964_vm11, %v2131_v24, %v2132_v47  ;;  %v2141_v5 = vrot.slane %v2139_v57, 4  ;;  %v2149_v60 = vrot.slane %v12652_v56, 6  ;;  %v2152_v19 = vrot.slane %v12653_v59, 6 }
  0xc7   : > { %v2147_v2 = vsel %vm7964_vm11, %v6059_v27, %v2146_v48  ;;  %v2148_v17 = vrot.slane %v2146_v48, 4  ;;  %v2140_v1 = vsel %vm7964_vm11, %v2138_v3, %v2139_v57  ;;  %v6060_v8 = vrot.slane %v12654_v45, 10 }
  0xc8   : > { %v2156_v24 = vrot.slane %v12554_v29, 6  ;;  %v2143_v47 = vsel %vm7964_vm11, %v2141_v5, %v2142_v38  ;;  %v2151_v28 = vrot.slane %v2149_v60, 4  ;;  %v2159_v48 = vrot.slane %v7097_v11, 6 }
  0xc9   : > { %v2150_v62 = vsel %vm7964_vm11, %v2148_v17, %v2149_v60  ;;  %v2162_v57 = vrot.slane %v7103_v23, 6  ;;  %v2334_v3 = vmax.bf16 %v7974_v33, %v7788_v14  ;;  %v2335_v38 = vmax.bf16 %v7985_v26, %v7794_v22 }
  0xca   : > { %v2157_v27 = vsel %vm7964_vm11, %v6060_v8, %v2156_v24  ;;  %v2158_v56 = vrot.slane %v2156_v24, 4  ;;  %v2153_v29 = vsel %vm7964_vm11, %v2151_v28, %v2152_v19  ;;  %v2161_v59 = vrot.slane %v2159_v48, 4 }
  0xcb   : > { %v2336_v5 = vmax.bf16 %v7991_v40, %v7802_v6  ;;  %v2337_v17 = vmax.bf16 %v7980_v34, %v7812_v37  ;;  %v2338_v23 = vmax.bf16 %v7995_v58, %v7818_v18  ;;  %v2339_v14 = vmax.bf16 %v8001_v0, %v7824_v10 }
  0xcc   : > { %v2160_v11 = vsel %vm7964_vm11, %v2158_v56, %v2159_v48  ;;  %v2163_v19 = vsel %vm7964_vm11, %v2161_v59, %v2162_v57  ;;  %v2340_v22 = vmax.bf16 %v8005_v21, %v7836_v12  ;;  %v2341_v6 = vmax.bf16 %v8013_v16, %v7842_v46 }
  0xcd   : > { %v2342_v33 = vmax.bf16 %v8017_v36, %v7848_v15  ;;  %v2343_v37 = vmax.bf16 %v2107_v49, %v7858_v35  ;;  %v2344_v34 = vmax.bf16 %v2110_v7, %v7864_v30  ;;  %v2345_v18 = vmax.bf16 %v2113_v39, %v7870_v42 }
  0xce   : > { %v8096_v10 = vmax.bf16 %v2117_v54, %v7882_v31  ;;  %v8099_v26 = vmax.bf16 %v2120_v25, %v7888_v9  ;;  %v8102_v12 = vmax.bf16 %v2123_v13, %v7894_v32  ;;  %v8105_v46 = vmax.bf16 %v2127_v41, %v7904_v52  ;;  %v12662_v32 = vld [vmem:[#allocation13_spill] sm:$0xff]  ;;  %v6413_v41 = vld [vmem:[%s11816_s1] sm:$0xff]  }
  0xcf   : > { %v8108_v15 = vmax.bf16 %v2130_v43, %v7910_v44  ;;  %v8111_v35 = vmax.bf16 %v2133_v4, %v7915_v61  ;;  %v8114_v30 = vmax.bf16 %v2137_v20, %v7920_v53  ;;  %v8117_v42 = vmax.bf16 %v2140_v1, %v7925_v55  ;;  %v12664_v44 = vld [vmem:[#allocation14_spill] sm:$0xff]  ;;  %v12666_v61 = vld [vmem:[#allocation15_spill] sm:$0xff]  ;;  %v12668_v53 = vld [vmem:[#allocation16_spill] sm:$0xff]  ;;  %6311 = vmatprep.subr.bf16.mxu1 %v6413_v41 }
  0xd0   : > { %12655 = vst [vmem:[#allocation19_spill] sm:$0xff] %v8105_v46  ;;  %v8120_v31 = vmax.bf16 %v2143_v47, %v7930_v50  ;;  %v8123_v9 = vmax.bf16 %v2147_v2, %v7935_v51  ;;  %v8126_v52 = vmax.bf16 %v2150_v62, %v12662_v32  ;;  %v8129_v40 = vmax.bf16 %v2153_v29, %v12664_v44  ;;  %v12670_v55 = vld [vmem:[#allocation17_spill] sm:$0xff] }
  0xd1   : > { %12656 = vst [vmem:[#allocation20_spill] sm:$0xff] %v8108_v15  ;;  %12657 = vst [vmem:[#allocation21_spill] sm:$0xff] %v8111_v35  ;;  %v8132_v58 = vmax.bf16 %v2157_v27, %v12666_v61  ;;  %v8135_v0 = vmax.bf16 %v2160_v11, %v12668_v53  ;;  %v8138_v21 = vmax.bf16 %v2163_v19, %v12670_v55  ;;  %6312 = vmatpush3.bf16.msra.mxu1 %v6413_v41 }
  0xd2   : > { %12658 = vst [vmem:[#allocation22_spill] sm:$0xff] %v8114_v30  ;;  %12659 = vst [vmem:[#allocation23_spill] sm:$0xff] %v8117_v42  ;;  %v2394_v50 = vmax.bf16 %v2337_v17, %v2334_v3  ;;  %v2395_v16 = vmax.bf16 %v2338_v23, %v2335_v38  ;;  %v2396_v36 = vmax.bf16 %v2339_v14, %v2336_v5 }
  0xd3   : > { %12660 = vst [vmem:[#allocation24_spill] sm:$0xff] %v8120_v31  ;;  %12661 = vst [vmem:[#allocation48_spill] sm:$0xff] %v8123_v9  ;;  %v2397_v51 = vmax.bf16 %v2340_v22, %v2337_v17  ;;  %v2398_v49 = vmax.bf16 %v2341_v6, %v2338_v23  ;;  %v2399_v54 = vmax.bf16 %v2342_v33, %v2339_v14 }
  0xd4   : > { %12663 = vst [vmem:[#allocation3_spill] sm:$0xff] %v8126_v52  ;;  %12665 = vst [vmem:[#allocation56_spill] sm:$0xff] %v8129_v40  ;;  %v2400_v7 = vmax.bf16 %v2343_v37, %v2340_v22  ;;  %v2401_v39 = vmax.bf16 %v2344_v34, %v2341_v6  ;;  %v2402_v25 = vmax.bf16 %v2345_v18, %v2342_v33 }
  0xd5   : > { %12667 = vst [vmem:[#allocation49_spill] sm:$0xff] %v8132_v58  ;;  %12669 = vst [vmem:[#allocation57_spill] sm:$0xff] %v8135_v0  ;;  %v2403_v13 = vmax.bf16 %v8096_v10, %v2343_v37  ;;  %v2404_v43 = vmax.bf16 %v8099_v26, %v2344_v34  ;;  %v2405_v4 = vmax.bf16 %v8102_v12, %v2345_v18 }
  0xd6   : > { %12671 = vst [vmem:[#allocation50_spill] sm:$0xff] %v8138_v21  ;;  %v2406_v20 = vmax.bf16 %v8105_v46, %v8096_v10  ;;  %v2407_v2 = vmax.bf16 %v8108_v15, %v8099_v26  ;;  %v2408_v60 = vmax.bf16 %v8111_v35, %v8102_v12  ;;  %v2442_v1 = vmax.bf16 %v2394_v50, %v2340_v22 }
  0xd7   : > { %v2443_v45 = vmax.bf16 %v2395_v16, %v2341_v6  ;;  %v2444_v8 = vmax.bf16 %v2396_v36, %v2342_v33  ;;  %v2445_v24 = vmax.bf16 %v2397_v51, %v2343_v37  ;;  %v2446_v47 = vmax.bf16 %v2398_v49, %v2344_v34 }
  0xd8   : > { %v2447_v62 = vmax.bf16 %v2399_v54, %v2345_v18  ;;  %v2448_v28 = vmax.bf16 %v2400_v7, %v8096_v10  ;;  %v2449_v48 = vmax.bf16 %v2401_v39, %v8099_v26  ;;  %v2450_v27 = vmax.bf16 %v2402_v25, %v8102_v12 }
  0xd9   : > { %v2451_v56 = vmax.bf16 %v2403_v13, %v8105_v46  ;;  %v2452_v57 = vmax.bf16 %v2404_v43, %v8108_v15  ;;  %v2453_v3 = vmax.bf16 %v2405_v4, %v8111_v35  ;;  %v2454_v29 = vmax.bf16 %v2406_v20, %v8114_v30 }
  0xda   : > { %v2455_v59 = vmax.bf16 %v2407_v2, %v8117_v42  ;;  %v2456_v38 = vmax.bf16 %v2408_v60, %v8120_v31  ;;  %v2490_v5 = vmax.bf16 %v2442_v1, %v2343_v37  ;;  %v2491_v11 = vmax.bf16 %v2443_v45, %v2344_v34 }
  0xdb   : > { %v2492_v17 = vmax.bf16 %v2444_v8, %v2345_v18  ;;  %v2493_v23 = vmax.bf16 %v2445_v24, %v8096_v10  ;;  %v2494_v14 = vmax.bf16 %v2446_v47, %v8099_v26  ;;  %v2495_v19 = vmax.bf16 %v2447_v62, %v8102_v12 }
  0xdc   : > { %v2496_v22 = vmax.bf16 %v2448_v28, %v8105_v46  ;;  %v2497_v6 = vmax.bf16 %v2449_v48, %v8108_v15  ;;  %v2498_v33 = vmax.bf16 %v2450_v27, %v8111_v35  ;;  %v2499_v32 = vmax.bf16 %v2451_v56, %v8114_v30 }
  0xdd   : > { %v2500_v44 = vmax.bf16 %v2452_v57, %v8117_v42  ;;  %v2501_v37 = vmax.bf16 %v2453_v3, %v8120_v31  ;;  %v2502_v34 = vmax.bf16 %v2454_v29, %v8123_v9  ;;  %v2503_v18 = vmax.bf16 %v2455_v59, %v8126_v52 }
  0xde   : > { %v2504_v61 = vmax.bf16 %v2456_v38, %v8129_v40  ;;  %v8174_v53 = vmax.bf16 %v2490_v5, %v8096_v10  ;;  %v8177_v55 = vmax.bf16 %v2491_v11, %v8099_v26  ;;  %v8180_v50 = vmax.bf16 %v2492_v17, %v8102_v12 }
  0xdf   : > { %v8183_v16 = vmax.bf16 %v2493_v23, %v8105_v46  ;;  %v8186_v36 = vmax.bf16 %v2494_v14, %v8108_v15  ;;  %v8189_v51 = vmax.bf16 %v2495_v19, %v8111_v35  ;;  %v8192_v49 = vmax.bf16 %v2496_v22, %v8114_v30 }
  0xe0   : > { %v8195_v10 = vmax.bf16 %v2497_v6, %v8117_v42  ;;  %v8198_v26 = vmax.bf16 %v2498_v33, %v8120_v31  ;;  %v8201_v12 = vmax.bf16 %v2499_v32, %v8123_v9  ;;  %v8204_v54 = vmax.bf16 %v2500_v44, %v8126_v52 }
  0xe1   : > { %12672 = vst [vmem:[#allocation5_spill] sm:$0xff] %v8183_v16  ;;  %12673 = vst [vmem:[#allocation55_spill] sm:$0xff] %v8189_v51  ;;  %v8207_v7 = vmax.bf16 %v2501_v37, %v8129_v40  ;;  %v8210_v39 = vmax.bf16 %v2502_v34, %v8132_v58  ;;  %v8213_v25 = vmax.bf16 %v2503_v18, %v8135_v0  ;;  %v12050_v41 = vshrl.u32 %v8174_v53, 16 }
  0xe2   : > { %12674 = vst [vmem:[#allocation51_spill] sm:$0xff] %v8192_v49  ;;  %12675 = vst [vmem:[#allocation6_spill] sm:$0xff] %v8195_v10  ;;  %v8216_v13 = vmax.bf16 %v2504_v61, %v8138_v21  ;;  %v12045_v4 = vshll.u32 %v8174_v53, 16  ;;  %v12039_v20 = vshll.u32 %v8177_v55, 16  ;;  %v12042_v2 = vshrl.u32 %v8177_v55, 16 }
  0xe3   : > { %12676 = vst [vmem:[#allocation4_spill] sm:$0xff] %v8198_v26  ;;  %12677 = vst [vmem:[#allocation58_spill] sm:$0xff] %v8201_v12  ;;  %v6072_v43 = vrot.slane %v8210_v39, 10  ;;  %v2612_v60 = vrot.slane %v8213_v25, 6  ;;  %v2989_v45 = vrot.slane %v12050_v41, 4  ;;  %v12033_v8 = vshll.u32 %v8180_v50, 16 }
  0xe4   : > { %12678 = vst [vmem:[#allocation30_spill] sm:$0xff] %v8204_v54  ;;  %12679 = vst [vmem:[#allocation7_spill] sm:$0xff] %v8207_v7  ;;  %v12020_v1 = vrot.slane %v8216_v13, 6  ;;  %v2992_v24 = vrot.slane %v12045_v4, 5  ;;  %v8232_v47 = vrot.slane %v12039_v20, 5  ;;  %v3002_v62 = vrot.slane %v12042_v2, 4 }
  0xe5   : > { %v12036_v28 = vshrl.u32 %v8180_v50, 16  ;;  %v8239_v48 = vsel %vm7964_vm11, %v6072_v43, %v2612_v60  ;;  %v2614_v27 = vrot.slane %v2612_v60, 4  ;;  %v8243_v56 = vrot.slane %v12033_v8, 5 }
  0xe6   : > { %12680 = vst [vmem:[#allocation59_spill] sm:$0xff] %v8239_v48  ;;  %v12030_v57 = vshrl.u32 %v8183_v16, 16  ;;  %v2993_v3 = vor.u32 %v2992_v24, %v2989_v45  ;;  %v3003_v29 = vor.u32 %v3002_v62, %v8232_v47  ;;  %v12028_v38 = vshll.u32 %v8183_v16, 16 }
  0xe7   : > { %v3012_v59 = vrot.slane %v12036_v28, 4  ;;  %v8254_v5 = vsel %vm7964_vm11, %v2614_v27, %v12020_v1  ;;  %v12023_v17 = vshll.u32 %v8186_v36, 16  ;;  %v12026_v23 = vshrl.u32 %v8186_v36, 16 }
  0xe8   : > { %12681 = vst [vmem:[#allocation25_spill] sm:$0xff] %v8254_v5  ;;  %v3018_v11 = vrot.slane %v12030_v57, 4  ;;  %v6084_v14 = vcombine.low %v8239_v48, %v8254_v5  ;;  %v8262_v19 = vrot.slane %v2993_v3, 4  ;;  %v8264_v22 = vrot.slane %v3003_v29, 4 }
  0xe9   : > { %v3013_v6 = vor.u32 %v3012_v59, %v8243_v56  ;;  %v3021_v33 = vrot.slane %v12028_v38, 5  ;;  %v8271_v32 = vrot.slane %v12023_v17, 5  ;;  %v3031_v44 = vrot.slane %v12026_v23, 4 }
  0xea   : > { %v12021_v37 = vshll.u32 %v8189_v51, 16  ;;  %6293 = vmatprep.mubr.msk.bf16.mxu0 %vm2707_vm12, %v6084_v14  ;;  %v2999_v18 = vsel %vm6694_vm2, %v8262_v19, %v8232_v47  ;;  %v3009_v61 = vsel %vm6694_vm2, %v8264_v22, %v8243_v56  ;;  %v12022_v60 = vshrl.u32 %v8189_v51, 16 }
  0xeb   : > { %v8285_v43 = vrot.slane %v3013_v6, 4  ;;  %v3022_v45 = vor.u32 %v3021_v33, %v3018_v11  ;;  %v3032_v24 = vor.u32 %v3031_v44, %v8271_v32  ;;  %v12024_v27 = vshrl.u32 %v8192_v49, 16 }
  0xec   : > { %v8291_v62 = vrot.slane %v12021_v37, 5  ;;  %v3041_v3 = vrot.slane %v12022_v60, 4  ;;  %v12025_v29 = vshll.u32 %v8192_v49, 16  ;;  %v12027_v59 = vshll.u32 %v8195_v10, 16 }
  0xed   : > { %v12029_v14 = vshrl.u32 %v8195_v10, 16  ;;  %v3023_v6 = vrot.slane %v3022_v45, 4  ;;  %v3033_v1 = vrot.slane %v3032_v24, 4  ;;  %v3047_v11 = vrot.slane %v12024_v27, 4 }
  0xee   : > { %v12031_v33 = vshll.u32 %v8198_v26, 16  ;;  %v3042_v44 = vor.u32 %v3041_v3, %v8291_v62  ;;  %v3050_v37 = vrot.slane %v12025_v29, 5  ;;  %v3056_v60 = vrot.slane %v12027_v59, 5 }
  0xef   : > { %v3060_v17 = vrot.slane %v12029_v14, 4  ;;  %v3028_v45 = vsel %vm6694_vm2, %v3023_v6, %v8271_v32  ;;  %v3038_v24 = vsel %vm6694_vm2, %v3033_v1, %v8291_v62  ;;  %v12032_v27 = vshrl.u32 %v8198_v26, 16 }
  0xf0   : > { %v3066_v3 = vrot.slane %v12031_v33, 5  ;;  %v8318_v29 = vrot.slane %v3042_v44, 4  ;;  %v3051_v23 = vor.u32 %v3050_v37, %v3047_v11  ;;  %v12034_v38 = vshrl.u32 %v8201_v12, 16 }
  0xf1   : > { %v3061_v59 = vor.u32 %v3060_v17, %v3056_v60  ;;  %v3070_v14 = vrot.slane %v12032_v27, 4  ;;  %v12035_v32 = vshll.u32 %v8201_v12, 16  ;;  %v12037_v6 = vshll.u32 %v8204_v54, 16 }
  0xf2   : > { %v12038_v1 = vshrl.u32 %v8204_v54, 16  ;;  %v3052_v62 = vrot.slane %v3051_v23, 4  ;;  %v3076_v33 = vrot.slane %v12034_v38, 4  ;;  %v12040_v44 = vshll.u32 %v8207_v7, 16 }
  0xf3   : > { %v3062_v57 = vrot.slane %v3061_v59, 4  ;;  %v3071_v37 = vor.u32 %v3070_v14, %v3066_v3  ;;  %v3079_v17 = vrot.slane %v12035_v32, 5  ;;  %v3085_v11 = vrot.slane %v12037_v6, 5 }
  0xf4   : > { %v3089_v27 = vrot.slane %v12038_v1, 4  ;;  %v3057_v8 = vsel %vm6694_vm2, %v3052_v62, %v3056_v60  ;;  %v3095_v59 = vrot.slane %v12040_v44, 5  ;;  %v12041_v14 = vshrl.u32 %v8207_v7, 16 }
  0xf5   : > { %v3067_v23 = vsel %vm6694_vm2, %v3062_v57, %v3066_v3  ;;  %v8342_v38 = vrot.slane %v3071_v37, 4  ;;  %v3080_v32 = vor.u32 %v3079_v17, %v3076_v33  ;;  %v12043_v6 = vshrl.u32 %v8210_v39, 16 }
  0xf6   : > { %v3090_v28 = vor.u32 %v3089_v27, %v3085_v11  ;;  %v3099_v1 = vrot.slane %v12041_v14, 4  ;;  %v12044_v20 = vshll.u32 %v8210_v39, 16  ;;  %v12046_v60 = vshll.u32 %v8213_v25, 16 }
  0xf7   : > { %v12049_v57 = vshrl.u32 %v8213_v25, 16  ;;  %v3081_v3 = vrot.slane %v3080_v32, 4  ;;  %v3105_v44 = vrot.slane %v12043_v6, 4  ;;  %v12047_v37 = vshll.u32 %v8216_v13, 16 }
  0xf8   : > { %v3091_v62 = vrot.slane %v3090_v28, 4  ;;  %v3100_v33 = vor.u32 %v3099_v1, %v3095_v59  ;;  %v3108_v27 = vrot.slane %v12044_v20, 5  ;;  %v3114_v17 = vrot.slane %v12046_v60, 5 }
  0xf9   : > { %v3118_v14 = vrot.slane %v12049_v57, 4  ;;  %v3086_v2 = vsel %vm6694_vm2, %v3081_v3, %v3085_v11  ;;  %v3124_v32 = vrot.slane %v12047_v37, 5  ;;  %v12048_v1 = vshrl.u32 %v8216_v13, 16 }
  0xfa   : > { %v3096_v28 = vsel %vm6694_vm2, %v3091_v62, %v3095_v59  ;;  %v8366_v6 = vrot.slane %v3100_v33, 4  ;;  %v3109_v20 = vor.u32 %v3108_v27, %v3105_v44  ;;  %v8374_v60 = vmax.bf16 %v2999_v18, %v8174_v53 }
  0xfb   : > { %v3119_v4 = vor.u32 %v3118_v14, %v3114_v17  ;;  %v3128_v11 = vrot.slane %v12048_v1, 4  ;;  %v8384_v59 = vmax.bf16 %v3009_v61, %v8177_v55  ;;  %v3500_v44 = vmax.bf16 %v8285_v43, %v8180_v50 }
  0xfc   : > { %v8389_v14 = vmax.bf16 %v3028_v45, %v8183_v16  ;;  %v3110_v47 = vrot.slane %v3109_v20, 4  ;;  %v8392_v18 = vmax.bf16 %v3038_v24, %v8186_v36  ;;  %v3503_v3 = vmax.bf16 %v8318_v29, %v8189_v51 }
  0xfd   : > { %v3120_v19 = vrot.slane %v3119_v4, 4  ;;  %v3129_v62 = vor.u32 %v3128_v11, %v3124_v32  ;;  %v8397_v33 = vmax.bf16 %v3057_v8, %v8192_v49  ;;  %v8400_v56 = vmax.bf16 %v3067_v23, %v8195_v10 }
  0xfe   : > { %v3506_v22 = vmax.bf16 %v8342_v38, %v8198_v26  ;;  %v3115_v20 = vsel %vm6694_vm2, %v3110_v47, %v3114_v17  ;;  %v8409_v61 = vmax.bf16 %v3086_v2, %v8201_v12  ;;  %v8412_v43 = vmax.bf16 %v3096_v28, %v8204_v54 }
  0xff   : > { %v3125_v4 = vsel %vm6694_vm2, %v3120_v19, %v3124_v32  ;;  %v3130_v8 = vrot.slane %v3129_v62, 4  ;;  %v3509_v29 = vmax.bf16 %v8366_v6, %v8207_v7  ;;  %v8417_v45 = vmax.bf16 %v3115_v20, %v8210_v39 }
 0x100   : > { %v8420_v38 = vmax.bf16 %v3125_v4, %v8213_v25  ;;  %v6120_v24 = vrot.slane %v8174_v53, 9  ;;  %v3572_v23 = vrot.slane %v8177_v55, 5  ;;  %v3575_v2 = vrot.slane %v8180_v50, 5 }
 0x101   : > { %v6121_v27 = vrot.slane %v8183_v16, 9  ;;  %v3512_v17 = vmax.bf16 %v3130_v8, %v8216_v13  ;;  %v3580_v28 = vrot.slane %v8186_v36, 5  ;;  %v3583_v6 = vrot.slane %v8189_v51, 5 }
 0x102   : > { %v6122_v32 = vrot.slane %v8192_v49, 9  ;;  %v8432_v47 = vsel %vm7312_vm5, %v6120_v24, %v3572_v23  ;;  %v3574_v19 = vrot.slane %v3572_v23, 4  ;;  %v3577_v62 = vrot.slane %v3575_v2, 4 }
 0x103   : > { %v3588_v20 = vrot.slane %v8195_v10, 5  ;;  %v8437_v4 = vsel %vm7312_vm5, %v6121_v27, %v3580_v28  ;;  %v3582_v37 = vrot.slane %v3580_v28, 4  ;;  %v3585_v8 = vrot.slane %v3583_v6, 4 }
 0x104   : > { %v3591_v1 = vrot.slane %v8198_v26, 5  ;;  %v8442_v57 = vsel %vm7312_vm5, %v3574_v19, %v3575_v2  ;;  %v6123_v41 = vrot.slane %v8201_v12, 9  ;;  %v3596_v28 = vrot.slane %v8204_v54, 5 }
 0x105   : > { %v8446_v24 = vsel %vm7312_vm5, %v6122_v32, %v3588_v20  ;;  %v3590_v23 = vrot.slane %v3588_v20, 4  ;;  %v8451_v21 = vsel %vm7312_vm5, %v3582_v37, %v3583_v6  ;;  %v3599_v0 = vrot.slane %v8207_v7, 5 }
 0x106   : > { %v3593_v27 = vrot.slane %v3591_v1, 4  ;;  %v6124_v19 = vrot.slane %v8210_v39, 9  ;;  %v3604_v32 = vrot.slane %v8213_v25, 5  ;;  %v3607_v20 = vrot.slane %v8216_v13, 5 }
 0x107   : > { %v8457_v2 = vsel %vm7312_vm5, %v3590_v23, %v3591_v1  ;;  %v8464_v58 = vsel %vm7312_vm5, %v6123_v41, %v3596_v28  ;;  %v3598_v37 = vrot.slane %v3596_v28, 4  ;;  %v3601_v6 = vrot.slane %v3599_v0, 4 }
 0x108   : > { %v8470_v52 = vsel %vm7312_vm5, %v6124_v19, %v3604_v32  ;;  %v3606_v1 = vrot.slane %v3604_v32, 4  ;;  %v3609_v23 = vrot.slane %v3607_v20, 4  ;;  %v8478_v41 = vmax.bf16 %v3577_v62, %v3500_v44 }
 0x109   : > { %v8476_v31 = vsel %vm7312_vm5, %v3598_v37, %v3599_v0  ;;  %v8488_v32 = vmax.bf16 %v3585_v8, %v3503_v3  ;;  %v8494_v44 = vmax.bf16 %v3593_v27, %v3506_v22  ;;  %v8500_v40 = vmax.bf16 %v3601_v6, %v3509_v29 }
 0x10a   : > { %v8486_v19 = vsel %vm7312_vm5, %v3606_v1, %v3607_v20  ;;  %v8506_v20 = vmax.bf16 %v3609_v23, %v3512_v17  ;;  %v12684_v1 = vshrl.u32 %v8174_v53, 16  ;;  %v12685_v27 = vshll.u32 %v8174_v53, 16 }
 0x10b   : > { %v12686_v62 = vshrl.u32 %v8177_v55, 16  ;;  %v12687_v29 = vshll.u32 %v8177_v55, 16  ;;  %v12688_v37 = vshrl.u32 %v8180_v50, 16  ;;  %v12689_v28 = vshll.u32 %v8180_v50, 16 }
 0x10c   : > { %v3794_v22 = vrot.slane %v12684_v1, 5  ;;  %v3795_v0 = vrot.slane %v12685_v27, 6  ;;  %v12690_v17 = vshrl.u32 %v8183_v16, 16  ;;  %v12691_v1 = vshll.u32 %v8183_v16, 16 }
 0x10d   : > { %v3798_v9 = vrot.slane %v12686_v62, 5  ;;  %v3799_v6 = vrot.slane %v12687_v29, 6  ;;  %v3803_v3 = vrot.slane %v12688_v37, 5  ;;  %v3804_v8 = vrot.slane %v12689_v28, 6 }
 0x10e   : > { %v3808_v23 = vrot.slane %v12690_v17, 5  ;;  %v3809_v35 = vrot.slane %v12691_v1, 6  ;;  %v12692_v27 = vshrl.u32 %v8186_v36, 16  ;;  %v3796_v15 = vor.u32 %v3795_v0, %v3794_v22 }
 0x10f   : > { %v3800_v62 = vor.u32 %v3799_v6, %v3798_v9  ;;  %v12693_v30 = vshll.u32 %v8186_v36, 16  ;;  %v12694_v46 = vshrl.u32 %v8189_v51, 16  ;;  %v3805_v34 = vor.u32 %v3804_v8, %v3803_v3 }
 0x110   : > { %v3812_v42 = vrot.slane %v12692_v27, 5  ;;  %v3810_v11 = vor.u32 %v3809_v35, %v3808_v23  ;;  %v12695_v28 = vshll.u32 %v8189_v51, 16  ;;  %v12696_v17 = vshrl.u32 %v8192_v49, 16 }
 0x111   : > { %v3813_v29 = vrot.slane %v12693_v30, 6  ;;  %v3817_v37 = vrot.slane %v12694_v46, 5  ;;  %v3797_v1 = vrot.slane %v3796_v15, 4  ;;  %v3802_v63 = vrot.slane %v3800_v62, 4 }
 0x112   : > { %v3818_v5 = vrot.slane %v12695_v28, 6  ;;  %v3822_v48 = vrot.slane %v12696_v17, 5  ;;  %v12697_v0 = vshll.u32 %v8192_v49, 16  ;;  %v3807_v22 = vrot.slane %v3805_v34, 4 }
 0x113   : > { %v3814_v16 = vor.u32 %v3813_v29, %v3812_v42  ;;  %v3811_v6 = vrot.slane %v3810_v11, 4  ;;  %v12698_v27 = vshrl.u32 %v8195_v10, 16  ;;  %v3801_v35 = vsel %vm7539_vm8, %v3797_v1, %v3800_v62 }
 0x114   : > { %v3823_v9 = vrot.slane %v12697_v0, 6  ;;  %v3819_v30 = vor.u32 %v3818_v5, %v3817_v37  ;;  %v3806_v8 = vsel %vm7539_vm8, %v3802_v63, %v3805_v34  ;;  %v12700_v29 = vshll.u32 %v8195_v10, 16 }
 0x115   : > { %v3826_v46 = vrot.slane %v12698_v27, 5  ;;  %v3816_v23 = vrot.slane %v3814_v16, 4  ;;  %v3815_v15 = vsel %vm7539_vm8, %v3811_v6, %v3814_v16  ;;  %v12701_v5 = vshrl.u32 %v8198_v26, 16 }
 0x116   : > { %v3824_v28 = vor.u32 %v3823_v9, %v3822_v48  ;;  %v3821_v42 = vrot.slane %v3819_v30, 4  ;;  %v3827_v17 = vrot.slane %v12700_v29, 6  ;;  %v12702_v62 = vshll.u32 %v8198_v26, 16 }
 0x117   : > { %v3831_v11 = vrot.slane %v12701_v5, 5  ;;  %v3820_v37 = vsel %vm7539_vm8, %v3816_v23, %v3819_v30  ;;  %v12703_v63 = vshrl.u32 %v8201_v12, 16  ;;  %v12704_v16 = vshll.u32 %v8201_v12, 16 }
 0x118   : > { %v3825_v0 = vrot.slane %v3824_v28, 4  ;;  %v3832_v1 = vrot.slane %v12702_v62, 6  ;;  %v3828_v34 = vor.u32 %v3827_v17, %v3826_v46  ;;  %v12705_v6 = vshrl.u32 %v8204_v54, 16 }
 0x119   : > { %v3836_v48 = vrot.slane %v12703_v63, 5  ;;  %v3837_v9 = vrot.slane %v12704_v16, 6  ;;  %v12706_v29 = vshll.u32 %v8204_v54, 16  ;;  %v12707_v30 = vshrl.u32 %v8207_v7, 16 }
 0x11a   : > { %v3840_v27 = vrot.slane %v12705_v6, 5  ;;  %v3833_v10 = vor.u32 %v3832_v1, %v3831_v11  ;;  %v12708_v28 = vshll.u32 %v8207_v7, 16  ;;  %v12709_v26 = vshrl.u32 %v8210_v39, 16 }
 0x11b   : > { %v3841_v5 = vrot.slane %v12706_v29, 6  ;;  %v3845_v23 = vrot.slane %v12707_v30, 5  ;;  %v3829_v46 = vsel %vm7539_vm8, %v3825_v0, %v3828_v34  ;;  %v3830_v17 = vrot.slane %v3828_v34, 4 }
 0x11c   : > { %v3846_v62 = vrot.slane %v12708_v28, 6  ;;  %v3850_v63 = vrot.slane %v12709_v26, 5  ;;  %v3838_v16 = vor.u32 %v3837_v9, %v3836_v48  ;;  %v3835_v6 = vrot.slane %v3833_v10, 4 }
 0x11d   : > { %v3842_v12 = vor.u32 %v3841_v5, %v3840_v27  ;;  %v12710_v29 = vshll.u32 %v8210_v39, 16  ;;  %v12711_v1 = vshrl.u32 %v8213_v25, 16  ;;  %v3834_v28 = vsel %vm7539_vm8, %v3830_v17, %v3833_v10 }
 0x11e   : > { %v3847_v49 = vor.u32 %v3846_v62, %v3845_v23  ;;  %v3839_v7 = vrot.slane %v3838_v16, 4  ;;  %v12712_v26 = vshll.u32 %v8213_v25, 16  ;;  %v12713_v48 = vshrl.u32 %v8216_v13, 16 }
 0x11f   : > { %v3851_v11 = vrot.slane %v12710_v29, 6  ;;  %v3854_v30 = vrot.slane %v12711_v1, 5  ;;  %v3844_v54 = vrot.slane %v3842_v12, 4  ;;  %v12714_v27 = vshll.u32 %v8216_v13, 16 }
 0x120   : > { %v3855_v51 = vrot.slane %v12712_v26, 6  ;;  %v3849_v0 = vrot.slane %v3847_v49, 4  ;;  %v3859_v9 = vrot.slane %v12713_v48, 5  ;;  %v3843_v5 = vsel %vm7539_vm8, %v3839_v7, %v3842_v12 }
 0x121   : > { %v3852_v34 = vor.u32 %v3851_v11, %v3850_v63  ;;  %v3860_v39 = vrot.slane %v12714_v27, 6  ;;  %v3848_v23 = vsel %vm7539_vm8, %v3844_v54, %v3847_v49  ;;  %v12715_v62 = vmax.bf16 %v8432_v47, %v8374_v60 }
 0x122   : > { %v3856_v10 = vor.u32 %v3855_v51, %v3854_v30  ;;  %v12716_v16 = vmax.bf16 %v8442_v57, %v8384_v59  ;;  %v8595_v11 = vmax.bf16 %v3807_v22, %v8478_v41  ;;  %v12717_v49 = vmax.bf16 %v8437_v4, %v8389_v14 }
 0x123   : > { %v8587_v25 = vmax.bf16 %v3801_v35, %v12715_v62  ;;  %v3853_v17 = vrot.slane %v3852_v34, 4  ;;  %v3861_v63 = vor.u32 %v3860_v39, %v3859_v9  ;;  %v12718_v54 = vmax.bf16 %v8451_v21, %v8392_v18  ;;  %v12731_v9 = vld [vmem:[#allocation58_spill] sm:$0xff] }
 0x124   : > { %v8592_v29 = vmax.bf16 %v3806_v8, %v12716_v16  ;;  %v3858_v12 = vrot.slane %v3856_v10, 4  ;;  %v4069_v51 = vmax.bf16 %v3815_v15, %v12717_v49  ;;  %v4071_v60 = vmax.bf16 %v3821_v42, %v8488_v32 }
 0x125   : > { %v4070_v7 = vmax.bf16 %v3820_v37, %v12718_v54  ;;  %v3857_v47 = vsel %vm7539_vm8, %v3853_v17, %v3856_v10  ;;  %v3863_v57 = vrot.slane %v3861_v63, 4  ;;  %v12719_v59 = vmax.bf16 %v8446_v24, %v8397_v33  ;;  %v12726_v37 = vld [vmem:[#allocation55_spill] sm:$0xff] }
 0x126   : > { %v12720_v22 = vmax.bf16 %v8457_v2, %v8400_v56  ;;  %v3862_v14 = vsel %vm7539_vm8, %v3858_v12, %v3861_v63  ;;  %v4074_v21 = vmax.bf16 %v3835_v6, %v8494_v44  ;;  %v12721_v18 = vmax.bf16 %v8464_v58, %v8409_v61  ;;  %v12728_v6 = vld [vmem:[#allocation6_spill] sm:$0xff]  ;;  %v12733_v10 = vld [vmem:[#allocation7_spill] sm:$0xff] }
 0x127   : > { %v4072_v41 = vmax.bf16 %v3829_v46, %v12719_v59  ;;  %v12722_v32 = vmax.bf16 %v8476_v31, %v8412_v43  ;;  %v4077_v33 = vmax.bf16 %v3849_v0, %v8500_v40  ;;  %v12723_v24 = vmax.bf16 %v8470_v52, %v8417_v45  ;;  %v12725_v31 = vld [vmem:[#allocation5_spill] sm:$0xff]  ;;  %v12727_v52 = vld [vmem:[#allocation51_spill] sm:$0xff] }
 0x128   : > { %v4073_v35 = vmax.bf16 %v3834_v28, %v12720_v22  ;;  %v4075_v4 = vmax.bf16 %v3843_v5, %v12721_v18  ;;  %v12724_v2 = vmax.bf16 %v8486_v19, %v8420_v38  ;;  %v4080_v44 = vmax.bf16 %v3863_v57, %v8506_v20  ;;  %v12732_v5 = vld [vmem:[#allocation30_spill] sm:$0xff] }
 0x129   : > { %v4076_v8 = vmax.bf16 %v3848_v23, %v12722_v32  ;;  %v4078_v56 = vmax.bf16 %v3857_v47, %v12723_v24  ;;  %v6136_v42 = vrot.slane %v8174_v53, 10  ;;  %v4116_v58 = vrot.slane %v8177_v55, 6  ;;  %v12730_v53 = vld [vmem:[#allocation4_spill] sm:$0xff] }
 0x12a   : > { %v4079_v15 = vmax.bf16 %v3862_v14, %v12724_v2  ;;  %v4119_v61 = vrot.slane %v8180_v50, 6  ;;  %v6137_v43 = vrot.slane %v12725_v31, 10  ;;  %v4124_v40 = vrot.slane %v8186_v36, 6 }
 0x12b   : > { %v4127_v46 = vrot.slane %v12726_v37, 6  ;;  %v6138_v45 = vrot.slane %v12727_v52, 10  ;;  %v4132_v1 = vrot.slane %v12728_v6, 6  ;;  %v4117_v19 = vsel %vm7964_vm11, %v6136_v42, %v4116_v58 }
 0x12c   : > { %v4118_v20 = vrot.slane %v4116_v58, 4  ;;  %v4121_v30 = vrot.slane %v4119_v61, 4  ;;  %v4135_v28 = vrot.slane %v12730_v53, 6  ;;  %v4125_v55 = vsel %vm7964_vm11, %v6137_v43, %v4124_v40 }
 0x12d   : > { %v4126_v50 = vrot.slane %v4124_v40, 4  ;;  %v4129_v26 = vrot.slane %v4127_v46, 4  ;;  %v4133_v36 = vsel %vm7964_vm11, %v6138_v45, %v4132_v1  ;;  %v4134_v34 = vrot.slane %v4132_v1, 4  ;;  %v8689_v45 = vld [vmem:[%s6633_s30 + $0x90] sm:$0xf] }
 0x12e   : > { %v4120_v0 = vsel %vm7964_vm11, %v4118_v20, %v4119_v61  ;;  %v4137_v48 = vrot.slane %v4135_v28, 4  ;;  %v6139_v27 = vrot.slane %v12731_v9, 10  ;;  %v4140_v23 = vrot.slane %v12732_v5, 6  ;;  %v12736_v61 = vld [vmem:[#allocation25_spill] sm:$0xff]  ;;  %12738 = vst [vmem:[#allocation60_spill] sm:$0xff] %v8689_v45 }
 0x12f   : > { %v4128_v39 = vsel %vm7964_vm11, %v4126_v50, %v4127_v46  ;;  %v4143_v62 = vrot.slane %v12733_v10, 6  ;;  %v12734_v17 = vrot.slane %v8216_v13, 6  ;;  %v4136_v16 = vsel %vm7964_vm11, %v4134_v34, %v4135_v28  ;;  %v8710_v50 = vld [vmem:[%s6633_s30 + $0x94] sm:$0xf]  ;;  %v8740_v10 = vld [vmem:[%s11816_s1 + $0x38] sm:$0xff]  }
 0x130   : > { %v4234_v12 = vmax.bf16 %v4117_v19, %v8587_v25  ;;  %v4235_v49 = vmax.bf16 %v4120_v0, %v8592_v29  ;;  %v4236_v54 = vmax.bf16 %v4121_v30, %v8595_v11  ;;  %v4141_v47 = vsel %vm7964_vm11, %v6139_v27, %v4140_v23  ;;  %v12735_v11 = vld [vmem:[#allocation59_spill] sm:$0xff]  ;;  %12740 = vst [vmem:[#allocation9_spill] sm:$0xff] %v8710_v50 }
 0x131   : > { %v4146_v63 = vrot.slane %v12734_v17, 4  ;;  %v4142_v57 = vrot.slane %v4140_v23, 4  ;;  %v4145_v59 = vrot.slane %v4143_v62, 4  ;;  %v4237_v22 = vmax.bf16 %v4125_v55, %v4069_v51  ;;  %v8735_v23 = vld [vmem:[%s11816_s1 + $0x28] sm:$0xff]   ;;  %6349 = vmatprep.subr.bf16.mxu1 %v8740_v10 }
 0x132   : > { %v4238_v14 = vmax.bf16 %v4128_v39, %v4070_v7  ;;  %v4239_v18 = vmax.bf16 %v4129_v26, %v4071_v60  ;;  %v4240_v32 = vmax.bf16 %v4133_v36, %v4072_v41  ;;  %v4241_v13 = vmax.bf16 %v4136_v16, %v4073_v35  ;;  %v8713_v26 = vld [vmem:[%s6633_s30 + $0x98] sm:$0xf]  ;;  %6329 = vmatprep.subr.bf16.mxu0 %v8735_v23 }
 0x133   : > { %v4144_v24 = vsel %vm7964_vm11, %v4142_v57, %v4143_v62  ;;  %v4242_v2 = vmax.bf16 %v4137_v48, %v4074_v21  ;;  %v8662_v42 = vmax.bf16 %v4141_v47, %v4075_v4  ;;  %v8664_v25 = vmax.bf16 %v4145_v59, %v4077_v33  ;;  %12741 = vst [vmem:[#allocation8_spill] sm:$0xff] %v8713_v26  ;;  %v8750_v57 = vld [vmem:[%s6633_s30 + $0x9c] sm:$0x3] }
 0x134   : > { %v8666_v29 = vmax.bf16 %v4144_v24, %v4076_v8  ;;  %v8669_v58 = vmax.bf16 %v4078_v56, %v12735_v11  ;;  %v8672_v31 = vmax.bf16 %v4079_v15, %v12736_v61  ;;  %v8674_v51 = vmax.bf16 %v4146_v63, %v4080_v44 }
 0x135   : > { %v4282_v7 = vmax.bf16 %v4237_v22, %v4234_v12  ;;  %v4283_v60 = vmax.bf16 %v4238_v14, %v4235_v49  ;;  %v4284_v41 = vmax.bf16 %v4239_v18, %v4236_v54  ;;  %v4285_v35 = vmax.bf16 %v4240_v32, %v4237_v22 }
 0x136   : > { %12737 = vst [vmem:[#allocation11_spill] sm:$0xff] %v8674_v51  ;;  %v4286_v21 = vmax.bf16 %v4241_v13, %v4238_v14  ;;  %v4287_v4 = vmax.bf16 %v4242_v2, %v4239_v18  ;;  %v4288_v33 = vmax.bf16 %v8662_v42, %v4240_v32  ;;  %v4289_v8 = vmax.bf16 %v8666_v29, %v4241_v13 }
 0x137   : > { %v4290_v43 = vmax.bf16 %v8664_v25, %v4242_v2  ;;  %v4318_v40 = vmax.bf16 %v4282_v7, %v4240_v32  ;;  %v4319_v37 = vmax.bf16 %v4283_v60, %v4241_v13  ;;  %v4320_v46 = vmax.bf16 %v4284_v41, %v4242_v2 }
 0x138   : > { %v8686_v52 = vmax.bf16 %v4285_v35, %v8662_v42  ;;  %v8692_v6 = vmax.bf16 %v4286_v21, %v8666_v29  ;;  %v8695_v1 = vmax.bf16 %v4287_v4, %v8664_v25  ;;  %v8698_v19 = vmax.bf16 %v4288_v33, %v8669_v58 }
 0x139   : > { %v8701_v20 = vmax.bf16 %v4289_v8, %v8672_v31  ;;  %v8704_v30 = vmax.bf16 %v4290_v43, %v8674_v51  ;;  %v4354_v53 = vmax.bf16 %v4318_v40, %v8662_v42  ;;  %v4355_v28 = vmax.bf16 %v4319_v37, %v8666_v29 }
 0x13a   : > { %v4356_v55 = vmax.bf16 %v4320_v46, %v8664_v25  ;;  %v676_v48 = vshrl.u32 %v8689_v45, 16  ;;  %v679_v5 = vshll.u32 %v8689_v45, 16  ;;  %v685_v17 = vshll.u32 %v8710_v50, 16 }
 0x13b   : > { %12739 = vst [vmem:[#allocation33_spill] sm:$0xff] %v8704_v30  ;;  %v8723_v9 = vmax.bf16 %v4354_v53, %v8669_v58  ;;  %v8726_v27 = vmax.bf16 %v4355_v28, %v8672_v31  ;;  %v689_v63 = vshrl.u32 %v8710_v50, 16  ;;  %v695_v16 = vshll.u32 %v8713_v26, 16 }
 0x13c   : > { %v8729_v39 = vmax.bf16 %v4356_v55, %v8674_v51  ;;  %v678_v62 = vrot.slane %v676_v48, 4  ;;  %v681_v59 = vrot.slane %v679_v5, 5  ;;  %v687_v22 = vrot.slane %v685_v17, 5 }
 0x13d   : > { %12742 = vst [vmem:[#allocation61_spill] sm:$0xff] %v8723_v9  ;;  %12743 = vst [vmem:[#allocation28_spill] sm:$0xff] %v8726_v27  ;;  %v12088_v12 = vshrl.u32 %v8723_v9, 16  ;;  %v12087_v49 = vshll.u32 %v8723_v9, 16  ;;  %v12086_v47 = vshrl.u32 %v8726_v27, 16  ;;  %v691_v14 = vrot.slane %v689_v63, 4 }
 0x13e   : > { %12744 = vst [vmem:[#allocation12_spill] sm:$0xff] %v8729_v39  ;;  %v697_v18 = vrot.slane %v695_v16, 5  ;;  %v699_v2 = vshrl.u32 %v8713_v26, 16  ;;  %v682_v11 = vor.u32 %v681_v59, %v678_v62  ;;  %v705_v7 = vshll.u32 %v8750_v57, 16 }
 0x13f   : > { %v8756_v32 = vrot.slane %v12088_v12, 4  ;;  %v8760_v13 = vrot.slane %v12087_v49, 5  ;;  %v8764_v24 = vrot.slane %v12086_v47, 4  ;;  %v692_v61 = vor.u32 %v691_v14, %v687_v22 }
 0x140   : > { %v6041_v60 = vrot.slane %v8689_v45, 9  ;;  %v701_v41 = vrot.slane %v699_v2, 4  ;;  %v1320_v35 = vrot.slane %v8710_v50, 5  ;;  %v1323_v21 = vrot.slane %v8713_v26, 5 }
 0x141   : > { %12745 = vst [vmem:[#allocation62_spill] sm:$0xff] %v8756_v32  ;;  %12746 = vst [vmem:[#allocation36_spill] sm:$0xff] %v8760_v13  ;;  %v1326_v4 = vrot.slane %v8750_v57, 5  ;;  %v683_v33 = vrot.slane %v682_v11, 4  ;;  %v693_v8 = vrot.slane %v692_v61, 4  ;;  %v707_v43 = vrot.slane %v705_v7, 5 }
 0x142   : > { %12747 = vst [vmem:[#allocation63_spill] sm:$0xff] %v8764_v24  ;;  %v1731_v40 = vrot.slane %v676_v48, 5  ;;  %v702_v37 = vor.u32 %v701_v41, %v697_v18  ;;  %v1321_v53 = vsel %vm7312_vm5, %v6041_v60, %v1320_v35  ;;  %v1322_v28 = vrot.slane %v1320_v35, 4 }
 0x143   : > { %v1325_v55 = vrot.slane %v1323_v21, 4  ;;  %v688_v59 = vsel %vm6694_vm2, %v683_v33, %v687_v22  ;;  %v698_v14 = vsel %vm6694_vm2, %v693_v8, %v697_v18  ;;  %v1732_v47 = vrot.slane %v679_v5, 6 }
 0x144   : > { %v1735_v49 = vrot.slane %v689_v63, 5  ;;  %v703_v12 = vrot.slane %v702_v37, 4  ;;  %v1136_v11 = vmax.bf16 %v688_v59, %v8689_v45  ;;  %v1137_v61 = vmax.bf16 %v698_v14, %v8710_v50 }
 0x145   : > { %v1324_v48 = vsel %vm7312_vm5, %v1322_v28, %v1323_v21  ;;  %v1327_v60 = vsel %vm7312_vm5, %v1325_v55, %v1326_v4  ;;  %v1733_v41 = vor.u32 %v1732_v47, %v1731_v40  ;;  %v1736_v35 = vrot.slane %v685_v17, 6 }
 0x146   : > { %v1740_v54 = vrot.slane %v699_v2, 5  ;;  %v708_v22 = vsel %vm6694_vm2, %v703_v12, %v707_v43  ;;  %v1515_v18 = vmax.bf16 %v1321_v53, %v1136_v11  ;;  %v1516_v5 = vmax.bf16 %v1324_v48, %v1137_v61  ;;  %v12751_v48 = vld [vmem:[#allocation19_spill] sm:$0xff] }
 0x147   : > { %v1741_v63 = vrot.slane %v695_v16, 6  ;;  %v1138_v33 = vmax.bf16 %v708_v22, %v8713_v26  ;;  %v1734_v8 = vrot.slane %v1733_v41, 4  ;;  %v1737_v37 = vor.u32 %v1736_v35, %v1735_v49  ;;  %v12753_v35 = vld [vmem:[#allocation20_spill] sm:$0xff]  ;;  %v12754_v22 = vld [vmem:[#allocation23_spill] sm:$0xff] }
 0x148   : > { %v1745_v59 = vshrl.u32 %v8750_v57, 16  ;;  %v1748_v21 = vrot.slane %v705_v7, 6  ;;  %v6061_v28 = vrot.slane %v8689_v45, 10  ;;  %v2166_v47 = vrot.slane %v8710_v50, 6 }
 0x149   : > { %v1742_v14 = vor.u32 %v1741_v63, %v1740_v54  ;;  %v1517_v17 = vmax.bf16 %v1327_v60, %v1138_v33  ;;  %v1738_v2 = vsel %vm7539_vm8, %v1734_v8, %v1737_v37  ;;  %v1739_v12 = vrot.slane %v1737_v37, 4  ;;  %v12752_v60 = vld [vmem:[#allocation22_spill] sm:$0xff]  ;;  %v12755_v37 = vld [vmem:[#allocation21_spill] sm:$0xff] }
 0x14a   : > { %v1747_v4 = vrot.slane %v1745_v59, 5  ;;  %v2038_v16 = vmax.bf16 %v1738_v2, %v1515_v18  ;;  %v2167_v40 = vsel %vm7964_vm11, %v6061_v28, %v2166_v47  ;;  %v2168_v49 = vrot.slane %v2166_v47, 4  ;;  %v12756_v59 = vld [vmem:[#allocation24_spill] sm:$0xff]  ;;  %v12759_v47 = vld [vmem:[#allocation3_spill] sm:$0xff] }
 0x14b   : > { %v1744_v43 = vrot.slane %v1742_v14, 4  ;;  %v1743_v54 = vsel %vm7539_vm8, %v1739_v12, %v1742_v14  ;;  %v2169_v53 = vrot.slane %v8713_v26, 6  ;;  %v2172_v55 = vrot.slane %v8750_v57, 6 }
 0x14c   : > { %v1749_v7 = vor.u32 %v1748_v21, %v1747_v4  ;;  %v2039_v11 = vmax.bf16 %v1743_v54, %v1516_v5  ;;  %v8798_v61 = vmax.bf16 %v2167_v40, %v2038_v16  ;;  %v2409_v41 = vmax.bf16 %v12752_v60, %v12751_v48  ;;  %v12758_v21 = vld [vmem:[#allocation48_spill] sm:$0xff]  ;;  %v12762_v40 = vld [vmem:[#allocation49_spill] sm:$0xff]  ;;  %v12767_v48 = vld [vmem:[#allocation50_spill] sm:$0xff] }
 0x14d   : > { %v2410_v18 = vmax.bf16 %v12754_v22, %v12753_v35  ;;  %v2170_v33 = vsel %vm7964_vm11, %v2168_v49, %v2169_v53  ;;  %v2171_v8 = vrot.slane %v2169_v53, 4  ;;  %v2411_v57 = vmax.bf16 %v12756_v59, %v12755_v37  ;;  %v12760_v4 = vld [vmem:[#allocation56_spill] sm:$0xff]  ;;  %v12763_v49 = vld [vmem:[#allocation57_spill] sm:$0xff]  ;;  %v6504_v53 = vld [vmem:[%s6633_s30 + $0x60] sm:$0xf] }
 0x14e   : > { %12750 = vst [vmem:[#allocation31_spill] sm:$0xff] %v8798_v61  ;;  %v1750_v63 = vsel %vm7539_vm8, %v1744_v43, %v1749_v7  ;;  %v8810_v14 = vmax.bf16 %v2170_v33, %v2039_v11  ;;  %v2457_v28 = vmax.bf16 %v2409_v41, %v12758_v21  ;;  %v12764_v7 = vmov 0  ;;  %v6505_v35 = vld [vmem:[%s6633_s30 + $0x64] sm:$0xf] }
 0x14f   : > { %v2040_v5 = vmax.bf16 %v1750_v63, %v1517_v17  ;;  %v2458_v2 = vmax.bf16 %v2410_v18, %v12759_v47  ;;  %v2173_v12 = vsel %vm7964_vm11, %v2171_v8, %v2172_v55  ;;  %v2459_v43 = vmax.bf16 %v2411_v57, %v12760_v4  ;;  %v8827_v55 = vld [vmem:[%s6633_s30 + $0xa0] sm:$0xf]  ;;  %v8832_v63 = vld [vmem:[%s6633_s30 + $0x68] sm:$0xf]  ;;  %v8836_v8 = vld [vmem:[%s6633_s30 + $0x70] sm:$0xf] }
 0x150   : > { %12757 = vst [vmem:[#allocation65_spill] sm:$0xff] %v8810_v14  ;;  %v2505_v17 = vmax.bf16 %v2457_v28, %v12762_v40  ;;  %v12765_v7 = vsel %vm8821_vm15, 4294967295, %v12764_v7  ;;  %v6024_v11 = vrot.slane %v6504_v53, 11  ;;  %v308_v18 = vrot.slane %v6505_v35, 7  ;;  %v8842_v28 = vld [vmem:[%s6633_s30 + $0x74] sm:$0xf] }
 0x151   : > { %v8817_v16 = vmax.bf16 %v2173_v12, %v2040_v5  ;;  %v2506_v54 = vmax.bf16 %v2458_v2, %v12763_v49  ;;  %12766 = vst [vmem:[#allocation66_spill] sm:$0xff] %v12765_v7  ;;  %v2507_v41 = vmax.bf16 %v2459_v43, %v12767_v48  ;;  %v8846_v12 = vld [vmem:[%s6633_s30 + $0x78] sm:$0xf] }
 0x152   : > { %v2553_v57 = vmax.bf16 %v2505_v17, %v8798_v61  ;;  %v8852_v35 = vsel %vm8821_vm15, %v6024_v11, %v308_v18  ;;  %v310_v34 = vrot.slane %v308_v18, 4 }
 0x153   : > { %12761 = vst [vmem:[#allocation40_spill] sm:$0xff] %v8817_v16  ;;  %v2554_v5 = vmax.bf16 %v2506_v54, %v8810_v14  ;;  %v2555_v53 = vmax.bf16 %v2507_v41, %v8817_v16 }
 0x154   : > { %v6073_v17 = vrot.slane %v2553_v57, 10  ;;  %v3132_v54 = vshrl.u32 %v2553_v57, 16  ;;  %v3135_v36 = vshll.u32 %v2553_v57, 16  ;;  %v6125_v13 = vrot.slane %v2553_v57, 9 }
 0x155   : > { %v2619_v44 = vrot.slane %v2554_v5, 6  ;;  %v2622_v15 = vrot.slane %v2555_v53, 6  ;;  %v3141_v56 = vshll.u32 %v2554_v5, 16  ;;  %v3145_v37 = vshrl.u32 %v2554_v5, 16 }
 0x156   : > { %v3151_v2 = vshll.u32 %v2555_v53, 16  ;;  %v3134_v41 = vrot.slane %v3132_v54, 4  ;;  %v3137_v9 = vrot.slane %v3135_v36, 5  ;;  %v3155_v18 = vshrl.u32 %v2555_v53, 16 }
 0x157   : > { %v2620_v43 = vsel %vm7964_vm11, %v6073_v17, %v2619_v44  ;;  %v2621_v33 = vrot.slane %v2619_v44, 4  ;;  %v3143_v24 = vrot.slane %v3141_v56, 5  ;;  %v3147_v11 = vrot.slane %v3145_v37, 4 }
 0x158   : > { %v3153_v39 = vrot.slane %v3151_v2, 5  ;;  %v3138_v27 = vor.u32 %v3137_v9, %v3134_v41  ;;  %v3612_v32 = vrot.slane %v2554_v5, 5  ;;  %v3157_v50 = vrot.slane %v3155_v18, 4 }
 0x159   : > { %v2623_v0 = vsel %vm7964_vm11, %v2621_v33, %v2622_v15  ;;  %v3148_v26 = vor.u32 %v3147_v11, %v3143_v24  ;;  %v3615_v45 = vrot.slane %v2555_v53, 5  ;;  %v3864_v14 = vrot.slane %v3132_v54, 5 }
 0x15a   : > { %v6085_v30 = vcombine.low %v2620_v43, %v2623_v0  ;;  %v3139_v16 = vrot.slane %v3138_v27, 4  ;;  %v3613_v44 = vsel %vm7312_vm5, %v6125_v13, %v3612_v32  ;;  %v3614_v17 = vrot.slane %v3612_v32, 4 }
 0x15b   : > { %v3149_v61 = vrot.slane %v3148_v26, 4  ;;  %v3158_v48 = vor.u32 %v3157_v50, %v3153_v39  ;;  %v3617_v49 = vrot.slane %v3615_v45, 4  ;;  %v3865_v40 = vrot.slane %v3135_v36, 6 }
 0x15c   : > { %6294 = vmatmul.mubr.msk.bf16.vlgmr.msra.gmra.mxu0 %vm2707_vm12, %v6085_v30  ;;  %v3144_v9 = vsel %vm6694_vm2, %v3139_v16, %v3143_v24  ;;  %v3616_v33 = vsel %vm7312_vm5, %v3614_v17, %v3615_v45  ;;  %v3868_v41 = vrot.slane %v3145_v37, 5  ;;  %v3869_v11 = vrot.slane %v3141_v56, 6 }
 0x15d   : > { %6330 = vmatpush3.bf16.msra.mxu0 %v8735_v23  ;;  %v3154_v27 = vsel %vm6694_vm2, %v3149_v61, %v3153_v39  ;;  %v3159_v32 = vrot.slane %v3158_v48, 4  ;;  %v3513_v30 = vmax.bf16 %v3144_v9, %v2553_v57  ;;  %v3866_v26 = vor.u32 %v3865_v40, %v3864_v14  ;;  %v8874_v61 = vld [vmem:[%s6633_s30 + $0xa4] sm:$0xf] }
 0x15e   : > { %v3514_v50 = vmax.bf16 %v3154_v27, %v2554_v5  ;;  %v3870_v13 = vor.u32 %v3869_v11, %v3868_v41  ;;  %v3873_v36 = vrot.slane %v3155_v18, 5  ;;  %v3874_v54 = vrot.slane %v3151_v2, 6 }
 0x15f   : > { %v3515_v4 = vmax.bf16 %v3159_v32, %v2555_v53  ;;  %v3761_v24 = vmax.bf16 %v3613_v44, %v3513_v30  ;;  %v3867_v16 = vrot.slane %v3866_v26, 4  ;;  %v4147_v59 = vrot.slane %v2622_v15, 4 }
 0x160   : > { %v3762_v45 = vmax.bf16 %v3616_v33, %v3514_v50  ;;  %v3872_v37 = vrot.slane %v3870_v13, 4  ;;  %v3875_v56 = vor.u32 %v3874_v54, %v3873_v36  ;;  %v12768_v23 = vrot.slane %v8832_v63, 7  ;;  %v8916_v36 = vld [vmem:[%s6633_s30 + $0xa8] sm:$0xf] }
 0x161   : > { %v3763_v48 = vmax.bf16 %v3617_v49, %v3515_v4  ;;  %v3871_v14 = vsel %vm7539_vm8, %v3867_v16, %v3870_v13  ;;  %v12769_v57 = vrot.slane %v8842_v28, 7  ;;  %v12770_v15 = vrot.slane %v8836_v8, 11 }
 0x162   : > { %v312_v39 = vsel %vm8821_vm15, %v310_v34, %v12768_v23  ;;  %v3876_v63 = vsel %vm7539_vm8, %v3872_v37, %v3875_v56  ;;  %v3877_v2 = vrot.slane %v3875_v56, 4  ;;  %v4081_v34 = vmax.bf16 %v3871_v14, %v3761_v24 }
 0x163   : > { %v6102_v40 = vcombine.low %v8852_v35, %v312_v39  ;;  %v316_v5 = vsel %vm8821_vm15, %v12770_v15, %v12769_v57  ;;  %v12771_v53 = vmov %v12769_v57  ;;  %v4082_v49 = vmax.bf16 %v3876_v63, %v3762_v45 }
 0x164   : > { %v317_v4 = vrot.slane %v12771_v53, 4  ;;  %v12772_v35 = vshrl.u32 %v8827_v55, 16  ;;  %v713_v8 = vshll.u32 %v8827_v55, 16  ;;  %v719_v44 = vshll.u32 %v8874_v61, 16 }
 0x165   : > { %6313 = vmatprep.mubr.msk.bf16.mxu1 %vm2707_vm12, %v6102_v40  ;;  %v4083_v17 = vmax.bf16 %v3877_v2, %v3763_v48  ;;  %v8894_v9 = vmax.bf16 %v4081_v34, %v2620_v43  ;;  %v12773_v33 = vrot.slane %v8846_v12, 7  ;;  %v723_v41 = vshrl.u32 %v8874_v61, 16 }
 0x166   : > { %v712_v18 = vrot.slane %v12772_v35, 4  ;;  %v8901_v11 = vmax.bf16 %v4082_v49, %v2623_v0  ;;  %v715_v32 = vrot.slane %v713_v8, 5  ;;  %v721_v30 = vrot.slane %v719_v44, 5  ;;  %v8919_v0 = vld [vmem:[%s6633_s30 + $0xac] sm:$0x3] }
 0x167   : > { %v319_v28 = vsel %vm8821_vm15, %v317_v4, %v12773_v33  ;;  %v8903_v26 = vmax.bf16 %v4147_v59, %v4083_v17  ;;  %v12775_v43 = vmax.bf16 %v8669_v58, %v8662_v42  ;;  %v12776_v54 = vmax.bf16 %v8672_v31, %v8666_v29 }
 0x168   : > { %v6103_v27 = vcombine.low %v316_v5, %v319_v28  ;;  %v12777_v16 = vmax.bf16 %v8686_v52, %v8669_v58  ;;  %v12779_v37 = vmax.bf16 %v8674_v51, %v8664_v25  ;;  %v12780_v29 = vmax.bf16 %v8692_v6, %v8672_v31 }
 0x169   : > { %12774 = vst [vmem:[#allocation34_spill] sm:$0xff] %v8903_v26  ;;  %v8911_v12 = vmax.bf16 %v12775_v43, %v8894_v9  ;;  %v8927_v24 = vmax.bf16 %v12776_v54, %v8901_v11  ;;  %v12782_v52 = vmax.bf16 %v8695_v1, %v8674_v51  ;;  %v716_v48 = vor.u32 %v715_v32, %v712_v18 }
 0x16a   : > { %v8935_v45 = vmax.bf16 %v12777_v16, %v8894_v9  ;;  %6314 = vmatmul.mubr.msk.bf16.vlgmr.msra.gmra.mxu1 %vm2707_vm12, %v6103_v27  ;;  %v8942_v56 = vmax.bf16 %v12779_v37, %v8903_v26  ;;  %v8948_v23 = vmax.bf16 %v12780_v29, %v8901_v11  ;;  %v725_v14 = vrot.slane %v723_v41, 4 }
 0x16b   : > { %v8954_v39 = vmax.bf16 %v12782_v52, %v8903_v26  ;;  %6350 = vmatpush3.bf16.msra.mxu1 %v8740_v10  ;;  %v729_v25 = vshll.u32 %v8916_v36, 16  ;;  %v733_v40 = vshrl.u32 %v8916_v36, 16  ;;  %v739_v57 = vshll.u32 %v8919_v0, 16 }
 0x16c   : > { %12778 = vst [vmem:[#allocation64_spill] sm:$0xff] %v8935_v45  ;;  %12781 = vst [vmem:[#allocation43_spill] sm:$0xff] %v8948_v23  ;;  %v717_v15 = vrot.slane %v716_v48, 4  ;;  %v6042_v6 = vrot.slane %v8827_v55, 9  ;;  %v1330_v5 = vrot.slane %v8874_v61, 5  ;;  %v1333_v63 = vrot.slane %v8916_v36, 5 }
 0x16d   : > { %12783 = vst [vmem:[#allocation67_spill] sm:$0xff] %v8954_v39  ;;  %v726_v1 = vor.u32 %v725_v14, %v721_v30  ;;  %v731_v2 = vrot.slane %v729_v25, 5  ;;  %v735_v34 = vrot.slane %v733_v40, 4  ;;  %v741_v53 = vrot.slane %v739_v57, 5 }
 0x16e   : > { %v722_v10 = vsel %vm6694_vm2, %v717_v15, %v721_v30  ;;  %v1331_v4 = vsel %vm7312_vm5, %v6042_v6, %v1330_v5  ;;  %v1332_v49 = vrot.slane %v1330_v5, 4  ;;  %v1335_v35 = vrot.slane %v1333_v63, 4 }
 0x16f   : > { %v727_v18 = vrot.slane %v726_v1, 4  ;;  %v736_v17 = vor.u32 %v735_v34, %v731_v2  ;;  %v1139_v33 = vmax.bf16 %v722_v10, %v8827_v55  ;;  %v1336_v28 = vrot.slane %v8919_v0, 5 }
 0x170   : > { %v1334_v27 = vsel %vm7312_vm5, %v1332_v49, %v1333_v63  ;;  %v12784_v32 = vshrl.u32 %v8827_v55, 16  ;;  %v1752_v54 = vrot.slane %v713_v8, 6  ;;  %v1755_v16 = vrot.slane %v723_v41, 5 }
 0x171   : > { %v732_v30 = vsel %vm6694_vm2, %v727_v18, %v731_v2  ;;  %v737_v37 = vrot.slane %v736_v17, 4  ;;  %v1337_v29 = vsel %vm7312_vm5, %v1335_v35, %v1336_v28  ;;  %v1518_v52 = vmax.bf16 %v1331_v4, %v1139_v33 }
 0x172   : > { %v1751_v43 = vrot.slane %v12784_v32, 5  ;;  %v1140_v48 = vmax.bf16 %v732_v30, %v8874_v61  ;;  %v1756_v15 = vrot.slane %v719_v44, 6  ;;  %v1760_v6 = vrot.slane %v733_v40, 5 }
 0x173   : > { %v742_v5 = vsel %vm6694_vm2, %v737_v37, %v741_v53  ;;  %v1761_v63 = vrot.slane %v729_v25, 6  ;;  %v1765_v8 = vshrl.u32 %v8919_v0, 16  ;;  %v1768_v41 = vrot.slane %v739_v57, 6  ;;  %v9002_v37 = vld [vmem:[%s6633_s30 + $0xb4] sm:$0xf] }
 0x174   : > { %v1753_v14 = vor.u32 %v1752_v54, %v1751_v43  ;;  %v1141_v1 = vmax.bf16 %v742_v5, %v8916_v36  ;;  %v1519_v2 = vmax.bf16 %v1334_v27, %v1140_v48  ;;  %v1757_v10 = vor.u32 %v1756_v15, %v1755_v16  ;;  %v8993_v43 = vld [vmem:[%s6633_s30 + $0xb0] sm:$0xf] }
 0x175   : > { %v1762_v49 = vor.u32 %v1761_v63, %v1760_v6  ;;  %v1767_v4 = vrot.slane %v1765_v8, 5  ;;  %v6062_v35 = vrot.slane %v8827_v55, 10  ;;  %v2176_v44 = vrot.slane %v8874_v61, 6  ;;  %v12787_v15 = vld [vmem:[#allocation24_spill] sm:$0xff]  ;;  %v12789_v63 = vld [vmem:[#allocation49_spill] sm:$0xff] }
 0x176   : > { %v1754_v34 = vrot.slane %v1753_v14, 4  ;;  %v1520_v40 = vmax.bf16 %v1337_v29, %v1141_v1  ;;  %v1759_v25 = vrot.slane %v1757_v10, 4  ;;  %v2179_v57 = vrot.slane %v8916_v36, 6  ;;  %v12788_v6 = vld [vmem:[#allocation56_spill] sm:$0xff]  ;;  %v9016_v8 = vld [vmem:[%s6633_s30 + $0xb8] sm:$0xf] }
 0x177   : > { %v1764_v18 = vrot.slane %v1762_v49, 4  ;;  %v1769_v17 = vor.u32 %v1768_v41, %v1767_v4  ;;  %v2177_v28 = vsel %vm7964_vm11, %v6062_v35, %v2176_v44  ;;  %v2178_v55 = vrot.slane %v2176_v44, 4  ;;  %v12793_v35 = vld [vmem:[#allocation31_spill] sm:$0xff] }
 0x178   : > { %v1758_v53 = vsel %vm7539_vm8, %v1754_v34, %v1757_v10  ;;  %v1763_v27 = vsel %vm7539_vm8, %v1759_v25, %v1762_v49  ;;  %v2181_v61 = vrot.slane %v2179_v57, 4  ;;  %v2182_v32 = vrot.slane %v8919_v0, 6 }
 0x179   : > { %v2041_v33 = vmax.bf16 %v1758_v53, %v1518_v52  ;;  %v1770_v54 = vsel %vm7539_vm8, %v1764_v18, %v1769_v17  ;;  %v2042_v36 = vmax.bf16 %v1763_v27, %v1519_v2  ;;  %v2412_v30 = vmax.bf16 %v12758_v21, %v12752_v60  ;;  %v12791_v2 = vld [vmem:[#allocation57_spill] sm:$0xff]  ;;  %v12795_v27 = vld [vmem:[#allocation40_spill] sm:$0xff] }
 0x17a   : > { %v2043_v29 = vmax.bf16 %v1770_v54, %v1520_v40  ;;  %v2180_v52 = vsel %vm7964_vm11, %v2178_v55, %v2179_v57  ;;  %v2183_v0 = vsel %vm7964_vm11, %v2181_v61, %v2182_v32  ;;  %v2413_v48 = vmax.bf16 %v12759_v47, %v12754_v22  ;;  %v12792_v22 = vld [vmem:[#allocation50_spill] sm:$0xff]  ;;  %v9027_v40 = vld [vmem:[%s6633_s30 + $0xbc] sm:$0x3] }
 0x17b   : > { %v8997_v16 = vmax.bf16 %v2177_v28, %v2041_v33  ;;  %v9010_v14 = vmax.bf16 %v2180_v52, %v2042_v36  ;;  %v2414_v5 = vmax.bf16 %v12788_v6, %v12787_v15  ;;  %v2460_v60 = vmax.bf16 %v2412_v30, %v12789_v63  ;;  %v12794_v57 = vld [vmem:[#allocation65_spill] sm:$0xff] }
 0x17c   : > { %v12108_v41 = vshrl.u32 %v8993_v43, 16  ;;  %v9019_v1 = vmax.bf16 %v2183_v0, %v2043_v29  ;;  %v2461_v34 = vmax.bf16 %v2413_v48, %v12791_v2  ;;  %v12106_v10 = vshll.u32 %v8993_v43, 16 }
 0x17d   : > { %12785 = vst [vmem:[#allocation38_spill] sm:$0xff] %v8997_v16  ;;  %12786 = vst [vmem:[#allocation69_spill] sm:$0xff] %v9010_v14  ;;  %v12104_v49 = vshll.u32 %v9002_v37, 16  ;;  %v2462_v4 = vmax.bf16 %v2414_v5, %v12792_v22  ;;  %v2508_v44 = vmax.bf16 %v2460_v60, %v12793_v35  ;;  %v12105_v25 = vshrl.u32 %v9002_v37, 16 }
 0x17e   : > { %12790 = vst [vmem:[#allocation46_spill] sm:$0xff] %v9019_v1  ;;  %v9031_v53 = vrot.slane %v12108_v41, 4  ;;  %v2509_v18 = vmax.bf16 %v2461_v34, %v12794_v57  ;;  %v9037_v17 = vrot.slane %v12106_v10, 5  ;;  %v12107_v28 = vshll.u32 %v9016_v8, 16 }
 0x17f   : > { %v9041_v33 = vrot.slane %v12104_v49, 5  ;;  %v2510_v55 = vmax.bf16 %v2462_v4, %v12795_v27  ;;  %v2556_v61 = vmax.bf16 %v2508_v44, %v8997_v16  ;;  %v9048_v32 = vrot.slane %v12105_v25, 4 }
 0x180   : > { %v2557_v36 = vmax.bf16 %v2509_v18, %v9010_v14  ;;  %v750_v30 = vor.u32 %v9037_v17, %v9031_v53  ;;  %v9056_v29 = vrot.slane %v12107_v28, 5 }
 0x181   : > { %v2558_v0 = vmax.bf16 %v2510_v55, %v9019_v1  ;;  %v6074_v48 = vrot.slane %v2556_v61, 10  ;;  %v3161_v15 = vshrl.u32 %v2556_v61, 16  ;;  %v3164_v5 = vshll.u32 %v2556_v61, 16 }
 0x182   : > { %v2626_v60 = vrot.slane %v2557_v36, 6  ;;  %v3170_v34 = vshll.u32 %v2557_v36, 16  ;;  %v3174_v4 = vshrl.u32 %v2557_v36, 16  ;;  %v6126_v44 = vrot.slane %v2556_v61, 9 }
 0x183   : > { %v2629_v49 = vrot.slane %v2558_v0, 6  ;;  %v3163_v18 = vrot.slane %v3161_v15, 4  ;;  %v3166_v25 = vrot.slane %v3164_v5, 5  ;;  %v3180_v10 = vshll.u32 %v2558_v0, 16 }
 0x184   : > { %v2627_v53 = vsel %vm7964_vm11, %v6074_v48, %v2626_v60  ;;  %v2628_v17 = vrot.slane %v2626_v60, 4  ;;  %v3172_v28 = vrot.slane %v3170_v34, 5  ;;  %v3176_v41 = vrot.slane %v3174_v4, 4 }
 0x185   : > { %v3167_v42 = vor.u32 %v3166_v25, %v3163_v18  ;;  %v3182_v59 = vrot.slane %v3180_v10, 5  ;;  %v3184_v55 = vshrl.u32 %v2558_v0, 16  ;;  %v3620_v13 = vrot.slane %v2557_v36, 5 }
 0x186   : > { %v2630_v50 = vsel %vm7964_vm11, %v2628_v17, %v2629_v49  ;;  %v3177_v52 = vor.u32 %v3176_v41, %v3172_v28  ;;  %v3623_v54 = vrot.slane %v2558_v0, 5  ;;  %v3878_v39 = vrot.slane %v3161_v15, 5 }
 0x187   : > { %v6086_v23 = vcombine.low %v2627_v53, %v2630_v50  ;;  %v3168_v45 = vrot.slane %v3167_v42, 4  ;;  %v3186_v51 = vrot.slane %v3184_v55, 4  ;;  %v3621_v26 = vsel %vm7312_vm5, %v6126_v44, %v3620_v13 }
 0x188   : > { %v3178_v48 = vrot.slane %v3177_v52, 4  ;;  %v3622_v60 = vrot.slane %v3620_v13, 4  ;;  %v3625_v7 = vrot.slane %v3623_v54, 4  ;;  %v3879_v1 = vrot.slane %v3164_v5, 6 }
 0x189   : > { %6297 = vmatprep.mubr.msk.bf16.mxu0 %vm2707_vm12, %v6086_v23  ;;  %v3173_v25 = vsel %vm6694_vm2, %v3168_v45, %v3172_v28  ;;  %v3187_v18 = vor.u32 %v3186_v51, %v3182_v59  ;;  %v3882_v17 = vrot.slane %v3174_v4, 5  ;;  %v3883_v41 = vrot.slane %v3170_v34, 6 }
 0x18a   : > { %v3183_v15 = vsel %vm6694_vm2, %v3178_v48, %v3182_v59  ;;  %v3516_v42 = vmax.bf16 %v3173_v25, %v2556_v61  ;;  %v3624_v14 = vsel %vm7312_vm5, %v3622_v60, %v3623_v54  ;;  %v3880_v44 = vor.u32 %v3879_v1, %v3878_v39 }
 0x18b   : > { %v3188_v52 = vrot.slane %v3187_v18, 4  ;;  %v3517_v13 = vmax.bf16 %v3183_v15, %v2557_v36  ;;  %v3884_v16 = vor.u32 %v3883_v41, %v3882_v17  ;;  %v3887_v5 = vrot.slane %v3184_v55, 5 }
 0x18c   : > { %v3764_v27 = vmax.bf16 %v3621_v26, %v3516_v42  ;;  %v3881_v23 = vrot.slane %v3880_v44, 4  ;;  %v3888_v57 = vrot.slane %v3180_v10, 6  ;;  %v4148_v35 = vrot.slane %v2629_v49, 4 }
 0x18d   : > { %v3518_v45 = vmax.bf16 %v3188_v52, %v2558_v0  ;;  %v3765_v51 = vmax.bf16 %v3624_v14, %v3517_v13  ;;  %v3886_v28 = vrot.slane %v3884_v16, 4  ;;  %v751_v34 = vrot.slane %v750_v30, 4 }
 0x18e   : > { %v3885_v59 = vsel %vm7539_vm8, %v3881_v23, %v3884_v16  ;;  %v3889_v61 = vor.u32 %v3888_v57, %v3887_v5  ;;  %v760_v54 = vor.u32 %v9048_v32, %v9041_v33  ;;  %v12796_v39 = vshrl.u32 %v9016_v8, 16 }
 0x18f   : > { %v3766_v36 = vmax.bf16 %v3625_v7, %v3518_v45  ;;  %v4084_v4 = vmax.bf16 %v3885_v59, %v3764_v27  ;;  %v756_v26 = vsel %vm6694_vm2, %v751_v34, %v9041_v33  ;;  %v12797_v14 = vshll.u32 %v9027_v40, 16 }
 0x190   : > { %v769_v1 = vrot.slane %v12796_v39, 4  ;;  %v3890_v49 = vsel %vm7539_vm8, %v3886_v28, %v3889_v61  ;;  %v3891_v16 = vrot.slane %v3889_v61, 4  ;;  %v761_v57 = vrot.slane %v760_v54, 4 }
 0x191   : > { %v775_v10 = vrot.slane %v12797_v14, 5  ;;  %v4085_v32 = vmax.bf16 %v3890_v49, %v3765_v51  ;;  %v9087_v0 = vmax.bf16 %v4084_v4, %v2627_v53  ;;  %v1142_v7 = vmax.bf16 %v756_v26, %v8993_v43 }
 0x192   : > { %v770_v30 = vor.u32 %v769_v1, %v9056_v29  ;;  %v6043_v27 = vrot.slane %v8993_v43, 9  ;;  %v4086_v55 = vmax.bf16 %v3891_v16, %v3766_v36  ;;  %v766_v33 = vsel %vm6694_vm2, %v761_v57, %v9056_v29 }
 0x193   : > { %v1340_v60 = vrot.slane %v9002_v37, 5  ;;  %v9095_v25 = vmax.bf16 %v4085_v32, %v2630_v50  ;;  %v12798_v53 = vmax.bf16 %v8894_v9, %v8669_v58  ;;  %v12800_v29 = vmax.bf16 %v8698_v19, %v8894_v9 }
 0x194   : > { %v771_v48 = vrot.slane %v770_v30, 4  ;;  %v9107_v15 = vmax.bf16 %v4148_v35, %v4086_v55  ;;  %v1143_v44 = vmax.bf16 %v766_v33, %v9002_v37  ;;  %v12802_v52 = vmax.bf16 %v8901_v11, %v8672_v31 }
 0x195   : > { %v9103_v17 = vmax.bf16 %v12798_v53, %v9087_v0  ;;  %v9113_v50 = vmax.bf16 %v12800_v29, %v9087_v0  ;;  %v12803_v19 = vmax.bf16 %v8701_v20, %v8901_v11  ;;  %v1341_v51 = vsel %vm7312_vm5, %v6043_v27, %v1340_v60 }
 0x196   : > { %12799 = vst [vmem:[#allocation68_spill] sm:$0xff] %v9107_v15  ;;  %v776_v42 = vsel %vm6694_vm2, %v771_v48, %v775_v10  ;;  %v9124_v35 = vmax.bf16 %v12802_v52, %v9095_v25  ;;  %v1342_v31 = vrot.slane %v1340_v60, 4  ;;  %v1343_v28 = vrot.slane %v9016_v8, 5 }
 0x197   : > { %12801 = vst [vmem:[#allocation41_spill] sm:$0xff] %v9113_v50  ;;  %v9132_v5 = vmax.bf16 %v12803_v19, %v9095_v25  ;;  %v1144_v45 = vmax.bf16 %v776_v42, %v9016_v8  ;;  %v1346_v34 = vrot.slane %v9027_v40, 5  ;;  %v1521_v59 = vmax.bf16 %v1341_v51, %v1142_v7 }
 0x198   : > { %v12805_v61 = vshrl.u32 %v8993_v43, 16  ;;  %v12806_v20 = vshll.u32 %v8993_v43, 16  ;;  %v12807_v1 = vshrl.u32 %v9002_v37, 16  ;;  %v12808_v4 = vshll.u32 %v9002_v37, 16 }
 0x199   : > { %12804 = vst [vmem:[#allocation70_spill] sm:$0xff] %v9132_v5  ;;  %v12809_v14 = vshrl.u32 %v9016_v8, 16  ;;  %v1344_v49 = vsel %vm7312_vm5, %v1342_v31, %v1343_v28  ;;  %v1345_v16 = vrot.slane %v1343_v28, 4  ;;  %v12810_v57 = vshll.u32 %v9016_v8, 16 }
 0x19a   : > { %v1771_v54 = vrot.slane %v12805_v61, 5  ;;  %v1772_v39 = vrot.slane %v12806_v20, 6  ;;  %v1775_v36 = vrot.slane %v12807_v1, 5  ;;  %v1776_v26 = vrot.slane %v12808_v4, 6 }
 0x19b   : > { %v1780_v10 = vrot.slane %v12809_v14, 5  ;;  %v1781_v30 = vrot.slane %v12810_v57, 6  ;;  %v1785_v32 = vshrl.u32 %v9027_v40, 16  ;;  %v1522_v7 = vmax.bf16 %v1344_v49, %v1143_v44  ;;  %v12815_v57 = vld [vmem:[#allocation31_spill] sm:$0xff] }
 0x19c   : > { %v1773_v27 = vor.u32 %v1772_v39, %v1771_v54  ;;  %v1777_v55 = vor.u32 %v1776_v26, %v1775_v36  ;;  %v12811_v33 = vshll.u32 %v9027_v40, 16  ;;  %v1347_v60 = vsel %vm7312_vm5, %v1345_v16, %v1346_v34 }
 0x19d   : > { %v1782_v53 = vor.u32 %v1781_v30, %v1780_v10  ;;  %v1787_v29 = vrot.slane %v1785_v32, 5  ;;  %v6063_v42 = vrot.slane %v8993_v43, 10  ;;  %v1523_v52 = vmax.bf16 %v1347_v60, %v1144_v45  ;;  %v12816_v32 = vld [vmem:[#allocation65_spill] sm:$0xff] }
 0x19e   : > { %v1788_v48 = vrot.slane %v12811_v33, 6  ;;  %v1774_v19 = vrot.slane %v1773_v27, 4  ;;  %v1779_v51 = vrot.slane %v1777_v55, 4  ;;  %v2186_v31 = vrot.slane %v9002_v37, 6 }
 0x19f   : > { %v1784_v28 = vrot.slane %v1782_v53, 4  ;;  %v2189_v44 = vrot.slane %v9016_v8, 6  ;;  %v2192_v54 = vrot.slane %v9027_v40, 6  ;;  %v2415_v4 = vmax.bf16 %v12789_v63, %v12758_v21  ;;  %v6510_v21 = vld [vmem:[%s6633_s30 + $0x80] sm:$0xf] }
 0x1a0   : > { %v1789_v61 = vor.u32 %v1788_v48, %v1787_v29  ;;  %v1778_v20 = vsel %vm7539_vm8, %v1774_v19, %v1777_v55  ;;  %v1783_v34 = vsel %vm7539_vm8, %v1779_v51, %v1782_v53  ;;  %v2187_v43 = vsel %vm7964_vm11, %v6063_v42, %v2186_v31  ;;  %v9192_v55 = vld [vmem:[%s6633_s30 + $0xc0] sm:$0xf]  ;;  %v6511_v48 = vld [vmem:[%s6633_s30 + $0x84] sm:$0xf]  ;;  %v6512_v53 = vld [vmem:[%s6633_s30 + $0x88] sm:$0xf] }
 0x1a1   : > { %v2188_v45 = vrot.slane %v2186_v31, 4  ;;  %v2044_v39 = vmax.bf16 %v1778_v20, %v1521_v59  ;;  %v2045_v1 = vmax.bf16 %v1783_v34, %v1522_v7  ;;  %v2191_v8 = vrot.slane %v2189_v44, 4  ;;  %v12818_v42 = vld [vmem:[#allocation60_spill] sm:$0xff]  ;;  %v12819_v19 = vld [vmem:[#allocation38_spill] sm:$0xff]  ;;  %v12820_v51 = vld [vmem:[#allocation69_spill] sm:$0xff] }
 0x1a2   : > { %v1790_v37 = vsel %vm7539_vm8, %v1784_v28, %v1789_v61  ;;  %v2416_v26 = vmax.bf16 %v12791_v2, %v12759_v47  ;;  %v2417_v49 = vmax.bf16 %v12792_v22, %v12788_v6  ;;  %v2463_v30 = vmax.bf16 %v2415_v4, %v12815_v57  ;;  %v12817_v47 = vld [vmem:[#allocation40_spill] sm:$0xff]  ;;  %v12821_v28 = vld [vmem:[#allocation9_spill] sm:$0xff]  ;;  %v12823_v20 = vld [vmem:[#allocation46_spill] sm:$0xff] }
 0x1a3   : > { %v2046_v40 = vmax.bf16 %v1790_v37, %v1523_v52  ;;  %v2190_v36 = vsel %vm7964_vm11, %v2188_v45, %v2189_v44  ;;  %v2193_v14 = vsel %vm7964_vm11, %v2191_v8, %v2192_v54  ;;  %v9180_v10 = vmax.bf16 %v2187_v43, %v2044_v39  ;;  %v12822_v44 = vld [vmem:[#allocation8_spill] sm:$0xff] }
 0x1a4   : > { %v9182_v59 = vmax.bf16 %v2190_v36, %v2045_v1  ;;  %v2464_v7 = vmax.bf16 %v2416_v26, %v12816_v32  ;;  %v6026_v27 = vrot.slane %v6510_v21, 11  ;;  %v2465_v33 = vmax.bf16 %v2417_v49, %v12817_v47 }
 0x1a5   : > { %12812 = vst [vmem:[#allocation53_spill] sm:$0xff] %v9180_v10  ;;  %v9186_v16 = vmax.bf16 %v2193_v14, %v2046_v40  ;;  %v322_v60 = vrot.slane %v6511_v48, 7  ;;  %v325_v29 = vrot.slane %v6512_v53, 7  ;;  %v6027_v52 = vrot.slane %v12818_v42, 11 }
 0x1a6   : > { %12813 = vst [vmem:[#allocation71_spill] sm:$0xff] %v9182_v59  ;;  %v2511_v6 = vmax.bf16 %v2463_v30, %v12819_v19  ;;  %v2512_v31 = vmax.bf16 %v2464_v7, %v12820_v51  ;;  %v329_v61 = vrot.slane %v12821_v28, 7  ;;  %v2513_v34 = vmax.bf16 %v2465_v33, %v12823_v20 }
 0x1a7   : > { %12814 = vst [vmem:[#allocation54_spill] sm:$0xff] %v9186_v16  ;;  %v9205_v45 = vsel %vm8821_vm15, %v6026_v27, %v322_v60  ;;  %v324_v37 = vrot.slane %v322_v60, 4  ;;  %v12123_v39 = vshrl.u32 %v9192_v55, 16 }
 0x1a8   : > { %v2559_v1 = vmax.bf16 %v2511_v6, %v9180_v10  ;;  %v2560_v8 = vmax.bf16 %v2512_v31, %v9182_v59  ;;  %v9212_v40 = vsel %vm8821_vm15, %v6027_v52, %v329_v61  ;;  %v331_v36 = vrot.slane %v329_v61, 4 }
 0x1a9   : > { %v2561_v4 = vmax.bf16 %v2513_v34, %v9186_v16  ;;  %v9217_v26 = vsel %vm8821_vm15, %v324_v37, %v325_v29  ;;  %v9221_v14 = vrot.slane %v12123_v39, 4 }
 0x1aa   : > { %v6075_v30 = vrot.slane %v2559_v1, 10  ;;  %v2633_v7 = vrot.slane %v2560_v8, 6  ;;  %v3190_v21 = vshrl.u32 %v2559_v1, 16  ;;  %v3193_v27 = vshll.u32 %v2559_v1, 16 }
 0x1ab   : > { %v2636_v33 = vrot.slane %v2561_v4, 6  ;;  %v3199_v48 = vshll.u32 %v2560_v8, 16  ;;  %v3203_v60 = vshrl.u32 %v2560_v8, 16  ;;  %v3209_v53 = vshll.u32 %v2561_v4, 16 }
 0x1ac   : > { %v2634_v42 = vsel %vm7964_vm11, %v6075_v30, %v2633_v7  ;;  %v2635_v52 = vrot.slane %v2633_v7, 4  ;;  %v3192_v29 = vrot.slane %v3190_v21, 4  ;;  %v3195_v6 = vrot.slane %v3193_v27, 5 }
 0x1ad   : > { %v3201_v31 = vrot.slane %v3199_v48, 5  ;;  %v3205_v28 = vrot.slane %v3203_v60, 4  ;;  %v3211_v61 = vrot.slane %v3209_v53, 5  ;;  %v3213_v34 = vshrl.u32 %v2561_v4, 16 }
 0x1ae   : > { %v2637_v37 = vsel %vm7964_vm11, %v2635_v52, %v2636_v33  ;;  %v3196_v39 = vor.u32 %v3195_v6, %v3192_v29  ;;  %v6127_v23 = vrot.slane %v2559_v1, 9  ;;  %v3628_v13 = vrot.slane %v2560_v8, 5 }
 0x1af   : > { %v6087_v41 = vcombine.low %v2634_v42, %v2637_v37  ;;  %v3206_v58 = vor.u32 %v3205_v28, %v3201_v31  ;;  %v3215_v18 = vrot.slane %v3213_v34, 4  ;;  %v3631_v49 = vrot.slane %v2561_v4, 5 }
 0x1b0   : > { %v3197_v54 = vrot.slane %v3196_v39, 4  ;;  %v3629_v30 = vsel %vm7312_vm5, %v6127_v23, %v3628_v13  ;;  %v3630_v7 = vrot.slane %v3628_v13, 4  ;;  %v3892_v5 = vrot.slane %v3190_v21, 5 }
 0x1b1   : > { %6298 = vmatmul.mubr.msk.bf16.gmra.mxu0 %vm2707_vm12, %v6087_v41  ;;  %v3207_v50 = vrot.slane %v3206_v58, 4  ;;  %v3216_v16 = vor.u32 %v3215_v18, %v3211_v61  ;;  %v3633_v59 = vrot.slane %v3631_v49, 4  ;;  %v3893_v10 = vrot.slane %v3193_v27, 6 }
 0x1b2   : > { %v3202_v52 = vsel %vm6694_vm2, %v3197_v54, %v3201_v31  ;;  %v3632_v29 = vsel %vm7312_vm5, %v3630_v7, %v3631_v49  ;;  %v3896_v6 = vrot.slane %v3203_v60, 5  ;;  %v3897_v28 = vrot.slane %v3199_v48, 6 }
 0x1b3   : > { %v3212_v39 = vsel %vm6694_vm2, %v3207_v50, %v3211_v61  ;;  %v3217_v13 = vrot.slane %v3216_v16, 4  ;;  %v3519_v23 = vmax.bf16 %v3202_v52, %v2559_v1  ;;  %v3894_v21 = vor.u32 %v3893_v10, %v3892_v5  ;;  %v9240_v50 = vld [vmem:[%s6633_s30 + $0xc4] sm:$0xf] }
 0x1b4   : > { %v3520_v41 = vmax.bf16 %v3212_v39, %v2560_v8  ;;  %v3898_v18 = vor.u32 %v3897_v28, %v3896_v6  ;;  %v3901_v58 = vrot.slane %v3213_v34, 5  ;;  %v3902_v27 = vrot.slane %v3209_v53, 6  ;;  %v9249_v8 = vld [vmem:[%s6633_s30 + $0xc8] sm:$0xf] }
 0x1b5   : > { %v3521_v20 = vmax.bf16 %v3217_v13, %v2561_v4  ;;  %v3767_v51 = vmax.bf16 %v3629_v30, %v3519_v23  ;;  %v3895_v54 = vrot.slane %v3894_v21, 4  ;;  %v4149_v31 = vrot.slane %v2636_v33, 4  ;;  %v9280_v13 = vld [vmem:[%s6633_s30 + $0xcc] sm:$0x3] }
 0x1b6   : > { %v3768_v19 = vmax.bf16 %v3632_v29, %v3520_v41  ;;  %v3900_v49 = vrot.slane %v3898_v18, 4  ;;  %v3903_v60 = vor.u32 %v3902_v27, %v3901_v58  ;;  %v6104_v48 = vcombine.low %v9205_v45, %v9217_v26 }
 0x1b7   : > { %v3769_v16 = vmax.bf16 %v3633_v59, %v3521_v20  ;;  %v3899_v5 = vsel %vm7539_vm8, %v3895_v54, %v3898_v18  ;;  %v12825_v10 = vrot.slane %v12822_v44, 7  ;;  %v12826_v4 = vshll.u32 %v9192_v55, 16 }
 0x1b8   : > { %v3904_v53 = vsel %vm7539_vm8, %v3900_v49, %v3903_v60  ;;  %v3905_v45 = vrot.slane %v3903_v60, 4  ;;  %v4087_v26 = vmax.bf16 %v3899_v5, %v3767_v51  ;;  %6317 = vmatprep.mubr.msk.bf16.mxu1 %vm2707_vm12, %v6104_v48  ;;  %v791_v61 = vshrl.u32 %v9240_v50, 16 }
 0x1b9   : > { %v333_v1 = vsel %vm8821_vm15, %v331_v36, %v12825_v10  ;;  %v783_v33 = vrot.slane %v12826_v4, 5  ;;  %v4088_v20 = vmax.bf16 %v3904_v53, %v3768_v19  ;;  %v787_v36 = vshll.u32 %v9240_v50, 16 }
 0x1ba   : > { %v6105_v59 = vcombine.low %v9212_v40, %v333_v1  ;;  %v4089_v34 = vmax.bf16 %v3905_v45, %v3769_v16  ;;  %v9260_v30 = vmax.bf16 %v4087_v26, %v2634_v42  ;;  %v797_v7 = vshll.u32 %v9249_v8, 16 }
 0x1bb   : > { %v784_v44 = vor.u32 %v783_v33, %v9221_v14  ;;  %v801_v51 = vshrl.u32 %v9249_v8, 16  ;;  %v9265_v52 = vmax.bf16 %v4088_v20, %v2637_v37  ;;  %v789_v19 = vrot.slane %v787_v36, 5 }
 0x1bc   : > { %6318 = vmatmul.mubr.msk.bf16.gmra.mxu1 %vm2707_vm12, %v6105_v59  ;;  %v793_v29 = vrot.slane %v791_v61, 4  ;;  %v9267_v14 = vmax.bf16 %v4149_v31, %v4089_v34  ;;  %v12828_v42 = vmax.bf16 %v9087_v0, %v8894_v9  ;;  %v12829_v23 = vmax.bf16 %v9095_v25, %v8901_v11 }
 0x1bd   : > { %v785_v40 = vrot.slane %v784_v44, 4  ;;  %v12830_v9 = vmax.bf16 %v8911_v12, %v9087_v0  ;;  %v12832_v58 = vmax.bf16 %v8927_v24, %v9095_v25  ;;  %v12834_v11 = vmax.bf16 %v8942_v56, %v9107_v15 }
 0x1be   : > { %12827 = vst [vmem:[#allocation26_spill] sm:$0xff] %v9267_v14  ;;  %v9275_v28 = vmax.bf16 %v12828_v42, %v9260_v30  ;;  %v9288_v21 = vmax.bf16 %v12829_v23, %v9265_v52  ;;  %v794_v49 = vor.u32 %v793_v29, %v789_v19  ;;  %v799_v60 = vrot.slane %v797_v7, 5 }
 0x1bf   : > { %v9296_v18 = vmax.bf16 %v12830_v9, %v9260_v30  ;;  %v9302_v27 = vmax.bf16 %v12832_v58, %v9265_v52  ;;  %v9308_v54 = vmax.bf16 %v12834_v11, %v9267_v14  ;;  %v790_v31 = vsel %vm6694_vm2, %v785_v40, %v789_v19 }
 0x1c0   : > { %v803_v12 = vrot.slane %v801_v51, 4  ;;  %v807_v48 = vshll.u32 %v9280_v13, 16  ;;  %v1145_v16 = vmax.bf16 %v790_v31, %v9192_v55  ;;  %v795_v5 = vrot.slane %v794_v49, 4 }
 0x1c1   : > { %12831 = vst [vmem:[#allocation27_spill] sm:$0xff] %v9296_v18  ;;  %12833 = vst [vmem:[#allocation29_spill] sm:$0xff] %v9302_v27  ;;  %v6044_v24 = vrot.slane %v9192_v55, 9  ;;  %v1350_v10 = vrot.slane %v9240_v50, 5  ;;  %v1353_v1 = vrot.slane %v9249_v8, 5  ;;  %v1356_v33 = vrot.slane %v9280_v13, 5 }
 0x1c2   : > { %12835 = vst [vmem:[#allocation32_spill] sm:$0xff] %v9308_v54  ;;  %v804_v56 = vor.u32 %v803_v12, %v799_v60  ;;  %v809_v4 = vrot.slane %v807_v48, 5  ;;  %v12836_v53 = vshrl.u32 %v9192_v55, 16  ;;  %v800_v26 = vsel %vm6694_vm2, %v795_v5, %v799_v60 }
 0x1c3   : > { %v1351_v59 = vsel %vm7312_vm5, %v6044_v24, %v1350_v10  ;;  %v1352_v20 = vrot.slane %v1350_v10, 4  ;;  %v1355_v44 = vrot.slane %v1353_v1, 4  ;;  %v1146_v40 = vmax.bf16 %v800_v26, %v9240_v50 }
 0x1c4   : > { %v1791_v45 = vrot.slane %v12836_v53, 5  ;;  %v805_v34 = vrot.slane %v804_v56, 4  ;;  %v1524_v19 = vmax.bf16 %v1351_v59, %v1145_v16  ;;  %v12837_v29 = vshll.u32 %v9192_v55, 16 }
 0x1c5   : > { %v1354_v23 = vsel %vm7312_vm5, %v1352_v20, %v1353_v1  ;;  %v1357_v9 = vsel %vm7312_vm5, %v1355_v44, %v1356_v33  ;;  %v1795_v58 = vrot.slane %v791_v61, 5  ;;  %v1796_v11 = vrot.slane %v787_v36, 6 }
 0x1c6   : > { %v1792_v42 = vrot.slane %v12837_v29, 6  ;;  %v810_v31 = vsel %vm6694_vm2, %v805_v34, %v809_v4  ;;  %v1525_v49 = vmax.bf16 %v1354_v23, %v1146_v40  ;;  %v1800_v12 = vrot.slane %v801_v51, 5 }
 0x1c7   : > { %v1147_v5 = vmax.bf16 %v810_v31, %v9249_v8  ;;  %v1797_v16 = vor.u32 %v1796_v11, %v1795_v58  ;;  %v1801_v24 = vrot.slane %v797_v7, 6  ;;  %v1805_v10 = vshrl.u32 %v9280_v13, 16  ;;  %v9359_v58 = vld [vmem:[%s6633_s30 + $0xd4] sm:$0xf] }
 0x1c8   : > { %v1793_v60 = vor.u32 %v1792_v42, %v1791_v45  ;;  %v1808_v53 = vrot.slane %v807_v48, 6  ;;  %v6064_v1 = vrot.slane %v9192_v55, 10  ;;  %v2196_v33 = vrot.slane %v9240_v50, 6  ;;  %v9348_v42 = vld [vmem:[%s6633_s30 + $0xd0] sm:$0xf] }
 0x1c9   : > { %v1526_v61 = vmax.bf16 %v1357_v9, %v1147_v5  ;;  %v1799_v36 = vrot.slane %v1797_v16, 4  ;;  %v1802_v26 = vor.u32 %v1801_v24, %v1800_v12  ;;  %v1807_v4 = vrot.slane %v1805_v10, 5  ;;  %v12841_v5 = vld [vmem:[#allocation69_spill] sm:$0xff] }
 0x1ca   : > { %v1794_v56 = vrot.slane %v1793_v60, 4  ;;  %v2197_v45 = vsel %vm7964_vm11, %v6064_v1, %v2196_v33  ;;  %v2198_v7 = vrot.slane %v2196_v33, 4  ;;  %v2199_v59 = vrot.slane %v9249_v8, 6  ;;  %v12840_v60 = vld [vmem:[#allocation38_spill] sm:$0xff] }
 0x1cb   : > { %v1803_v55 = vsel %vm7539_vm8, %v1799_v36, %v1802_v26  ;;  %v1804_v48 = vrot.slane %v1802_v26, 4  ;;  %v1809_v50 = vor.u32 %v1808_v53, %v1807_v4  ;;  %v2202_v29 = vrot.slane %v9280_v13, 6  ;;  %v12845_v36 = vld [vmem:[#allocation71_spill] sm:$0xff]  ;;  %v9382_v4 = vld [vmem:[%s6633_s30 + $0xdc] sm:$0x3] }
 0x1cc   : > { %v1798_v51 = vsel %vm7539_vm8, %v1794_v56, %v1797_v16  ;;  %v2048_v44 = vmax.bf16 %v1803_v55, %v1525_v49  ;;  %v2200_v34 = vsel %vm7964_vm11, %v2198_v7, %v2199_v59  ;;  %v2201_v40 = vrot.slane %v2199_v59, 4  ;;  %v12843_v56 = vld [vmem:[#allocation46_spill] sm:$0xff] }
 0x1cd   : > { %v2047_v20 = vmax.bf16 %v1798_v51, %v1524_v19  ;;  %v1810_v23 = vsel %vm7539_vm8, %v1804_v48, %v1809_v50  ;;  %v2418_v9 = vmax.bf16 %v12815_v57, %v12789_v63  ;;  %v2419_v19 = vmax.bf16 %v12816_v32, %v12791_v2  ;;  %v9370_v63 = vld [vmem:[%s6633_s30 + $0xd8] sm:$0xf]  ;;  %v12846_v7 = vld [vmem:[#allocation54_spill] sm:$0xff] }
 0x1ce   : > { %v2049_v11 = vmax.bf16 %v1810_v23, %v1526_v61  ;;  %v2203_v13 = vsel %vm7964_vm11, %v2201_v40, %v2202_v29  ;;  %v9363_v31 = vmax.bf16 %v2200_v34, %v2048_v44  ;;  %v2420_v49 = vmax.bf16 %v12817_v47, %v12792_v22  ;;  %v12844_v61 = vld [vmem:[#allocation53_spill] sm:$0xff] }
 0x1cf   : > { %v9352_v8 = vmax.bf16 %v2197_v45, %v2047_v20  ;;  %v2466_v12 = vmax.bf16 %v2418_v9, %v12840_v60  ;;  %v2467_v16 = vmax.bf16 %v2419_v19, %v12841_v5  ;;  %v12136_v2 = vshrl.u32 %v9348_v42, 16 }
 0x1d0   : > { %12839 = vst [vmem:[#allocation37_spill] sm:$0xff] %v9363_v31  ;;  %v12135_v24 = vshll.u32 %v9348_v42, 16  ;;  %v9374_v10 = vmax.bf16 %v2203_v13, %v2049_v11  ;;  %v2468_v53 = vmax.bf16 %v2420_v49, %v12843_v56  ;;  %v12132_v1 = vshll.u32 %v9359_v58, 16 }
 0x1d1   : > { %12838 = vst [vmem:[#allocation35_spill] sm:$0xff] %v9352_v8  ;;  %v12133_v33 = vshrl.u32 %v9359_v58, 16  ;;  %v2514_v22 = vmax.bf16 %v2466_v12, %v12844_v61  ;;  %v2515_v26 = vmax.bf16 %v2467_v16, %v12845_v36  ;;  %v9386_v51 = vrot.slane %v12136_v2, 4 }
 0x1d2   : > { %12842 = vst [vmem:[#allocation39_spill] sm:$0xff] %v9374_v10  ;;  %v9390_v45 = vrot.slane %v12135_v24, 5  ;;  %v2516_v59 = vmax.bf16 %v2468_v53, %v12846_v7  ;;  %v9395_v55 = vrot.slane %v12132_v1, 5  ;;  %v12134_v50 = vshll.u32 %v9370_v63, 16 }
 0x1d3   : > { %v9399_v48 = vrot.slane %v12133_v33, 4  ;;  %v2562_v20 = vmax.bf16 %v2514_v22, %v9352_v8  ;;  %v2563_v44 = vmax.bf16 %v2515_v26, %v9363_v31 }
 0x1d4   : > { %v818_v34 = vor.u32 %v9390_v45, %v9386_v51  ;;  %v2564_v29 = vmax.bf16 %v2516_v59, %v9374_v10  ;;  %v9412_v9 = vrot.slane %v12134_v50, 5 }
 0x1d5   : > { %v828_v23 = vor.u32 %v9399_v48, %v9395_v55  ;;  %v6076_v11 = vrot.slane %v2562_v20, 10  ;;  %v2640_v13 = vrot.slane %v2563_v44, 6  ;;  %v3219_v49 = vshrl.u32 %v2562_v20, 16 }
 0x1d6   : > { %v3222_v12 = vshll.u32 %v2562_v20, 16  ;;  %v2643_v16 = vrot.slane %v2564_v29, 6  ;;  %v3228_v53 = vshll.u32 %v2563_v44, 16  ;;  %v3232_v22 = vshrl.u32 %v2563_v44, 16 }
 0x1d7   : > { %v3238_v26 = vshll.u32 %v2564_v29, 16  ;;  %v2641_v51 = vsel %vm7964_vm11, %v6076_v11, %v2640_v13  ;;  %v2642_v45 = vrot.slane %v2640_v13, 4  ;;  %v3221_v59 = vrot.slane %v3219_v49, 4 }
 0x1d8   : > { %v3224_v48 = vrot.slane %v3222_v12, 5  ;;  %v3230_v1 = vrot.slane %v3228_v53, 5  ;;  %v3234_v33 = vrot.slane %v3232_v22, 4  ;;  %v3242_v24 = vshrl.u32 %v2564_v29, 16 }
 0x1d9   : > { %v3240_v50 = vrot.slane %v3238_v26, 5  ;;  %v2644_v2 = vsel %vm7964_vm11, %v2642_v45, %v2643_v16  ;;  %v6128_v39 = vrot.slane %v2562_v20, 9  ;;  %v3636_v37 = vrot.slane %v2563_v44, 5 }
 0x1da   : > { %v3225_v41 = vor.u32 %v3224_v48, %v3221_v59  ;;  %v6088_v6 = vcombine.low %v2641_v51, %v2644_v2  ;;  %v3235_v19 = vor.u32 %v3234_v33, %v3230_v1  ;;  %v3244_v40 = vrot.slane %v3242_v24, 4 }
 0x1db   : > { %v3639_v14 = vrot.slane %v2564_v29, 5  ;;  %v3637_v11 = vsel %vm7312_vm5, %v6128_v39, %v3636_v37  ;;  %v3638_v13 = vrot.slane %v3636_v37, 4  ;;  %v3906_v27 = vrot.slane %v3219_v49, 5 }
 0x1dc   : > { %v3226_v54 = vrot.slane %v3225_v41, 4  ;;  %6301 = vmatprep.mubr.msk.bf16.mxu0 %vm2707_vm12, %v6088_v6  ;;  %v3236_v18 = vrot.slane %v3235_v19, 4  ;;  %v3245_v15 = vor.u32 %v3244_v40, %v3240_v50  ;;  %v3907_v10 = vrot.slane %v3222_v12, 6 }
 0x1dd   : > { %v3641_v43 = vrot.slane %v3639_v14, 4  ;;  %v3640_v33 = vsel %vm7312_vm5, %v3638_v13, %v3639_v14  ;;  %v3910_v59 = vrot.slane %v3232_v22, 5  ;;  %v3911_v48 = vrot.slane %v3228_v53, 6 }
 0x1de   : > { %v3231_v45 = vsel %vm6694_vm2, %v3226_v54, %v3230_v1  ;;  %v3241_v41 = vsel %vm6694_vm2, %v3236_v18, %v3240_v50  ;;  %v3246_v39 = vrot.slane %v3245_v15, 4  ;;  %v3908_v49 = vor.u32 %v3907_v10, %v3906_v27 }
 0x1df   : > { %v3522_v37 = vmax.bf16 %v3231_v45, %v2562_v20  ;;  %v3523_v31 = vmax.bf16 %v3241_v41, %v2563_v44  ;;  %v3912_v6 = vor.u32 %v3911_v48, %v3910_v59  ;;  %v3915_v19 = vrot.slane %v3242_v24, 5 }
 0x1e0   : > { %v3916_v40 = vrot.slane %v3238_v26, 6  ;;  %v3524_v8 = vmax.bf16 %v3246_v39, %v2564_v29  ;;  %v3909_v7 = vrot.slane %v3908_v49, 4  ;;  %v4150_v36 = vrot.slane %v2643_v16, 4 }
 0x1e1   : > { %v3770_v12 = vmax.bf16 %v3637_v11, %v3522_v37  ;;  %v3771_v54 = vmax.bf16 %v3640_v33, %v3523_v31  ;;  %v3914_v1 = vrot.slane %v3912_v6, 4  ;;  %v819_v14 = vrot.slane %v818_v34, 4 }
 0x1e2   : > { %v3917_v61 = vor.u32 %v3916_v40, %v3915_v19  ;;  %v3772_v22 = vmax.bf16 %v3641_v43, %v3524_v8  ;;  %v3913_v53 = vsel %vm7539_vm8, %v3909_v7, %v3912_v6  ;;  %v829_v18 = vrot.slane %v828_v23, 4 }
 0x1e3   : > { %v12847_v15 = vshrl.u32 %v9370_v63, 16  ;;  %v4090_v50 = vmax.bf16 %v3913_v53, %v3770_v12  ;;  %v824_v31 = vsel %vm6694_vm2, %v819_v14, %v9395_v55  ;;  %v12848_v7 = vshll.u32 %v9382_v4, 16 }
 0x1e4   : > { %v3918_v24 = vsel %vm7539_vm8, %v3914_v1, %v3917_v61  ;;  %v3919_v10 = vrot.slane %v3917_v61, 4  ;;  %v834_v43 = vsel %vm6694_vm2, %v829_v18, %v9412_v9  ;;  %v1148_v61 = vmax.bf16 %v824_v31, %v9348_v42 }
 0x1e5   : > { %v837_v27 = vrot.slane %v12847_v15, 4  ;;  %v4091_v20 = vmax.bf16 %v3918_v24, %v3771_v54  ;;  %v843_v44 = vrot.slane %v12848_v7, 5  ;;  %v9443_v29 = vmax.bf16 %v4090_v50, %v2641_v51 }
 0x1e6   : > { %v4092_v34 = vmax.bf16 %v3919_v10, %v3772_v22  ;;  %v1149_v23 = vmax.bf16 %v834_v43, %v9359_v58  ;;  %v6045_v26 = vrot.slane %v9348_v42, 9  ;;  %v1360_v11 = vrot.slane %v9359_v58, 5 }
 0x1e7   : > { %v838_v8 = vor.u32 %v837_v27, %v9412_v9  ;;  %v9447_v16 = vmax.bf16 %v4091_v20, %v2644_v2  ;;  %v12850_v51 = vmax.bf16 %v9260_v30, %v9087_v0  ;;  %v12852_v0 = vmax.bf16 %v9103_v17, %v9260_v30 }
 0x1e8   : > { %v9451_v13 = vmax.bf16 %v4150_v36, %v4092_v34  ;;  %v12851_v36 = vmax.bf16 %v9265_v52, %v9095_v25  ;;  %v12854_v39 = vmax.bf16 %v9124_v35, %v9265_v52  ;;  %v1361_v49 = vsel %vm7312_vm5, %v6045_v26, %v1360_v11 }
 0x1e9   : > { %v839_v55 = vrot.slane %v838_v8, 4  ;;  %v9459_v45 = vmax.bf16 %v12850_v51, %v9443_v29  ;;  %v9477_v41 = vmax.bf16 %v12852_v0, %v9443_v29  ;;  %v1362_v6 = vrot.slane %v1360_v11, 4 }
 0x1ea   : > { %12849 = vst [vmem:[#allocation42_spill] sm:$0xff] %v9451_v13  ;;  %v9469_v59 = vmax.bf16 %v12851_v36, %v9447_v16  ;;  %v9483_v37 = vmax.bf16 %v12854_v39, %v9447_v16  ;;  %v1363_v40 = vrot.slane %v9370_v63, 5  ;;  %v1366_v17 = vrot.slane %v9382_v4, 5 }
 0x1eb   : > { %12853 = vst [vmem:[#allocation44_spill] sm:$0xff] %v9477_v41  ;;  %v844_v25 = vsel %vm6694_vm2, %v839_v55, %v843_v44  ;;  %v1527_v12 = vmax.bf16 %v1361_v49, %v1148_v61  ;;  %v12856_v54 = vshrl.u32 %v9348_v42, 16  ;;  %v12857_v35 = vshll.u32 %v9348_v42, 16 }
 0x1ec   : > { %12855 = vst [vmem:[#allocation45_spill] sm:$0xff] %v9483_v37  ;;  %v1150_v19 = vmax.bf16 %v844_v25, %v9370_v63  ;;  %v12858_v22 = vshrl.u32 %v9359_v58, 16  ;;  %v12859_v18 = vshll.u32 %v9359_v58, 16  ;;  %v1364_v27 = vsel %vm7312_vm5, %v1362_v6, %v1363_v40 }
 0x1ed   : > { %v1811_v1 = vrot.slane %v12856_v54, 5  ;;  %v1812_v14 = vrot.slane %v12857_v35, 6  ;;  %v1365_v24 = vrot.slane %v1363_v40, 4  ;;  %v12860_v10 = vshrl.u32 %v9370_v63, 16 }
 0x1ee   : > { %v1815_v53 = vrot.slane %v12858_v22, 5  ;;  %v1816_v15 = vrot.slane %v12859_v18, 6  ;;  %v12861_v31 = vshll.u32 %v9370_v63, 16  ;;  %v1528_v43 = vmax.bf16 %v1364_v27, %v1149_v23  ;;  %v12864_v18 = vld [vmem:[#allocation53_spill] sm:$0xff] }
 0x1ef   : > { %v1820_v50 = vrot.slane %v12860_v10, 5  ;;  %v1813_v8 = vor.u32 %v1812_v14, %v1811_v1  ;;  %v1825_v44 = vshrl.u32 %v9382_v4, 16  ;;  %v1367_v34 = vsel %vm7312_vm5, %v1365_v24, %v1366_v17  ;;  %v12866_v10 = vld [vmem:[#allocation71_spill] sm:$0xff] }
 0x1f0   : > { %v1821_v20 = vrot.slane %v12861_v31, 6  ;;  %v1817_v7 = vor.u32 %v1816_v15, %v1815_v53  ;;  %v12862_v55 = vshll.u32 %v9382_v4, 16  ;;  %v6065_v11 = vrot.slane %v9348_v42, 10 }
 0x1f1   : > { %v1529_v51 = vmax.bf16 %v1367_v34, %v1150_v19  ;;  %v1814_v36 = vrot.slane %v1813_v8, 4  ;;  %v1827_v39 = vrot.slane %v1825_v44, 5  ;;  %v2206_v23 = vrot.slane %v9359_v58, 6  ;;  %v12870_v34 = vld [vmem:[#allocation37_spill] sm:$0xff] }
 0x1f2   : > { %v1822_v61 = vor.u32 %v1821_v20, %v1820_v50  ;;  %v1828_v26 = vrot.slane %v12862_v55, 6  ;;  %v1819_v0 = vrot.slane %v1817_v7, 4  ;;  %v2209_v49 = vrot.slane %v9370_v63, 6  ;;  %v12867_v50 = vld [vmem:[#allocation54_spill] sm:$0xff]  ;;  %v12869_v20 = vld [vmem:[#allocation35_spill] sm:$0xff] }
 0x1f3   : > { %v2212_v6 = vrot.slane %v9382_v4, 6  ;;  %v1818_v40 = vsel %vm7539_vm8, %v1814_v36, %v1817_v7  ;;  %v2421_v42 = vmax.bf16 %v12840_v60, %v12815_v57  ;;  %v2207_v35 = vsel %vm7964_vm11, %v6065_v11, %v2206_v23  ;;  %v6513_v7 = vld [vmem:[%s6633_s30 + $0xa0] sm:$0xf] }
 0x1f4   : > { %v1824_v25 = vrot.slane %v1822_v61, 4  ;;  %v1823_v17 = vsel %vm7539_vm8, %v1819_v0, %v1822_v61  ;;  %v1829_v54 = vor.u32 %v1828_v26, %v1827_v39  ;;  %v2050_v19 = vmax.bf16 %v1818_v40, %v1527_v12  ;;  %v12871_v26 = vld [vmem:[#allocation39_spill] sm:$0xff] }
 0x1f5   : > { %v2051_v1 = vmax.bf16 %v1823_v17, %v1528_v43  ;;  %v2208_v58 = vrot.slane %v2206_v23, 4  ;;  %v2211_v4 = vrot.slane %v2209_v49, 4  ;;  %v2422_v14 = vmax.bf16 %v12841_v5, %v12816_v32 }
 0x1f6   : > { %v1830_v63 = vsel %vm7539_vm8, %v1824_v25, %v1829_v54  ;;  %v2423_v22 = vmax.bf16 %v12843_v56, %v12817_v47  ;;  %v9531_v12 = vmax.bf16 %v2207_v35, %v2050_v19  ;;  %v2469_v15 = vmax.bf16 %v2421_v42, %v12864_v18  ;;  %v9555_v25 = vld [vmem:[%s6633_s30 + $0xa8] sm:$0xf] }
 0x1f7   : > { %v2052_v53 = vmax.bf16 %v1830_v63, %v1529_v51  ;;  %v2210_v57 = vsel %vm7964_vm11, %v2208_v58, %v2209_v49  ;;  %v2213_v27 = vsel %vm7964_vm11, %v2211_v4, %v2212_v6  ;;  %v2470_v32 = vmax.bf16 %v2422_v14, %v12866_v10  ;;  %v6514_v51 = vld [vmem:[%s6633_s30 + $0xa4] sm:$0xf]  ;;  %v9559_v49 = vld [vmem:[%s6633_s30 + $0xb0] sm:$0xf] }
 0x1f8   : > { %12863 = vst [vmem:[#allocation47_spill] sm:$0xff] %v9531_v12  ;;  %v9536_v24 = vmax.bf16 %v2210_v57, %v2051_v1  ;;  %v2471_v47 = vmax.bf16 %v2423_v22, %v12867_v50  ;;  %v2517_v8 = vmax.bf16 %v2469_v15, %v12869_v20  ;;  %v6028_v44 = vrot.slane %v6513_v7, 11 }
 0x1f9   : > { %v9540_v31 = vmax.bf16 %v2213_v27, %v2052_v53  ;;  %v2518_v55 = vmax.bf16 %v2470_v32, %v12870_v34  ;;  %v336_v36 = vrot.slane %v6514_v51, 7  ;;  %v339_v23 = vrot.slane %v9555_v25, 7 }
 0x1fa   : > { %12865 = vst [vmem:[#allocation13_spill] sm:$0xff] %v9536_v24  ;;  %v2519_v11 = vmax.bf16 %v2471_v47, %v12871_v26  ;;  %v2565_v39 = vmax.bf16 %v2517_v8, %v9531_v12 }
 0x1fb   : > { %12868 = vst [vmem:[#allocation14_spill] sm:$0xff] %v9540_v31  ;;  %v2566_v40 = vmax.bf16 %v2518_v55, %v9536_v24  ;;  %v9566_v42 = vsel %vm8821_vm15, %v6028_v44, %v336_v36  ;;  %v338_v19 = vrot.slane %v336_v36, 4 }
 0x1fc   : > { %v2567_v17 = vmax.bf16 %v2519_v11, %v9540_v31  ;;  %v6077_v1 = vrot.slane %v2565_v39, 10  ;;  %v3248_v35 = vshrl.u32 %v2565_v39, 16  ;;  %v3251_v58 = vshll.u32 %v2565_v39, 16 }
 0x1fd   : > { %v6129_v63 = vrot.slane %v2565_v39, 9  ;;  %v2647_v4 = vrot.slane %v2566_v40, 6  ;;  %v3257_v22 = vshll.u32 %v2566_v40, 16  ;;  %v3261_v53 = vshrl.u32 %v2566_v40, 16 }
 0x1fe   : > { %v2650_v14 = vrot.slane %v2567_v17, 6  ;;  %v3250_v57 = vrot.slane %v3248_v35, 4  ;;  %v3253_v15 = vrot.slane %v3251_v58, 5  ;;  %v3267_v27 = vshll.u32 %v2567_v17, 16 }
 0x1ff   : > { %v3271_v32 = vshrl.u32 %v2567_v17, 16  ;;  %v2648_v47 = vsel %vm7964_vm11, %v6077_v1, %v2647_v4  ;;  %v2649_v8 = vrot.slane %v2647_v4, 4  ;;  %v3259_v7 = vrot.slane %v3257_v22, 5 }
 0x200   : > { %v3263_v44 = vrot.slane %v3261_v53, 4  ;;  %v3254_v55 = vor.u32 %v3253_v15, %v3250_v57  ;;  %v3269_v11 = vrot.slane %v3267_v27, 5  ;;  %v3644_v36 = vrot.slane %v2566_v40, 5 }
 0x201   : > { %v3273_v51 = vrot.slane %v3271_v32, 4  ;;  %v2651_v25 = vsel %vm7964_vm11, %v2649_v8, %v2650_v14  ;;  %v3647_v61 = vrot.slane %v2567_v17, 5  ;;  %v3920_v43 = vrot.slane %v3248_v35, 5 }
 0x202   : > { %v3264_v0 = vor.u32 %v3263_v44, %v3259_v7  ;;  %v6089_v48 = vcombine.low %v2648_v47, %v2651_v25  ;;  %v3255_v33 = vrot.slane %v3254_v55, 4  ;;  %v3645_v9 = vsel %vm7312_vm5, %v6129_v63, %v3644_v36 }
 0x203   : > { %v3274_v2 = vor.u32 %v3273_v51, %v3269_v11  ;;  %v3646_v4 = vrot.slane %v3644_v36, 4  ;;  %v3649_v6 = vrot.slane %v3647_v61, 4  ;;  %v3921_v13 = vrot.slane %v3251_v58, 6 }
 0x204   : > { %v3265_v1 = vrot.slane %v3264_v0, 4  ;;  %6302 = vmatmul.mubr.msk.bf16.gmra.mxu0 %vm2707_vm12, %v6089_v48  ;;  %v3260_v57 = vsel %vm6694_vm2, %v3255_v33, %v3259_v7  ;;  %v3924_v8 = vrot.slane %v3261_v53, 5  ;;  %v3925_v44 = vrot.slane %v3257_v22, 6  ;;  %v9582_v22 = vld [vmem:[%s6633_s30 + $0xe0] sm:$0xf] }
 0x205   : > { %v3275_v15 = vrot.slane %v3274_v2, 4  ;;  %v3525_v55 = vmax.bf16 %v3260_v57, %v2565_v39  ;;  %v3648_v63 = vsel %vm7312_vm5, %v3646_v4, %v3647_v61  ;;  %v3922_v0 = vor.u32 %v3921_v13, %v3920_v43 }
 0x206   : > { %v3270_v35 = vsel %vm6694_vm2, %v3265_v1, %v3269_v11  ;;  %v3926_v36 = vor.u32 %v3925_v44, %v3924_v8  ;;  %v3929_v48 = vrot.slane %v3271_v32, 5  ;;  %v3930_v2 = vrot.slane %v3267_v27, 6  ;;  %v6518_v1 = vld [vmem:[%s6633_s30 + $0xb8] sm:$0xf] }
 0x207   : > { %v3526_v51 = vmax.bf16 %v3270_v35, %v2566_v40  ;;  %v3527_v58 = vmax.bf16 %v3275_v15, %v2567_v17  ;;  %v3773_v37 = vmax.bf16 %v3645_v9, %v3525_v55  ;;  %v3923_v33 = vrot.slane %v3922_v0, 4  ;;  %v6517_v17 = vld [vmem:[%s6633_s30 + $0xb4] sm:$0xf] }
 0x208   : > { %v4151_v53 = vrot.slane %v2650_v14, 4  ;;  %v3928_v39 = vrot.slane %v3926_v36, 4  ;;  %v340_v61 = vsel %vm8821_vm15, %v338_v19, %v339_v23  ;;  %v3931_v43 = vor.u32 %v3930_v2, %v3929_v48  ;;  %v9592_v14 = vld [vmem:[%s6633_s30 + $0xe4] sm:$0xf] }
 0x209   : > { %v3774_v7 = vmax.bf16 %v3648_v63, %v3526_v51  ;;  %v3775_v11 = vmax.bf16 %v3649_v6, %v3527_v58  ;;  %v3927_v13 = vsel %vm7539_vm8, %v3923_v33, %v3926_v36  ;;  %v6106_v40 = vcombine.low %v9566_v42, %v340_v61  ;;  %v9622_v33 = vld [vmem:[%s6633_s30 + $0xe8] sm:$0xf] }
 0x20a   : > { %v343_v9 = vrot.slane %v6517_v17, 7  ;;  %v4093_v32 = vmax.bf16 %v3927_v13, %v3773_v37  ;;  %v346_v27 = vrot.slane %v6518_v1, 7  ;;  %v846_v4 = vshrl.u32 %v9582_v22, 16 }
 0x20b   : > { %v849_v6 = vshll.u32 %v9582_v22, 16  ;;  %v3932_v23 = vsel %vm7539_vm8, %v3928_v39, %v3931_v43  ;;  %v3933_v19 = vrot.slane %v3931_v43, 4  ;;  %6321 = vmatprep.mubr.msk.bf16.mxu1 %vm2707_vm12, %v6106_v40  ;;  %v12873_v42 = vrot.slane %v9559_v49, 11  ;;  %v9633_v39 = vld [vmem:[%s6633_s30 + $0xec] sm:$0x3] }
 0x20c   : > { %v345_v57 = vrot.slane %v343_v9, 4  ;;  %v4094_v15 = vmax.bf16 %v3932_v23, %v3774_v7  ;;  %v9603_v8 = vmax.bf16 %v4093_v32, %v2648_v47  ;;  %v848_v44 = vrot.slane %v846_v4, 4 }
 0x20d   : > { %v344_v37 = vsel %vm8821_vm15, %v12873_v42, %v343_v9  ;;  %v851_v35 = vrot.slane %v849_v6, 5  ;;  %v4095_v55 = vmax.bf16 %v3933_v19, %v3775_v11  ;;  %v855_v0 = vshll.u32 %v9592_v14, 16 }
 0x20e   : > { %12874 = vst [vmem:[#allocation15_spill] sm:$0xff] %v9603_v8  ;;  %v347_v63 = vsel %vm8821_vm15, %v345_v57, %v346_v27  ;;  %v859_v51 = vshrl.u32 %v9592_v14, 16  ;;  %v9609_v58 = vmax.bf16 %v4094_v15, %v2651_v25  ;;  %v12876_v47 = vmax.bf16 %v9443_v29, %v9260_v30 }
 0x20f   : > { %v9624_v2 = vmax.bf16 %v4151_v53, %v4095_v55  ;;  %v12879_v25 = vmax.bf16 %v9275_v28, %v9443_v29  ;;  %v6107_v11 = vcombine.low %v344_v37, %v347_v63  ;;  %v852_v61 = vor.u32 %v851_v35, %v848_v44 }
 0x210   : > { %12875 = vst [vmem:[#allocation16_spill] sm:$0xff] %v9609_v58  ;;  %v9617_v36 = vmax.bf16 %v12876_v47, %v9603_v8  ;;  %v12881_v13 = vmax.bf16 %v9447_v16, %v9265_v52  ;;  %v12883_v28 = vmax.bf16 %v9288_v21, %v9447_v16  ;;  %v857_v9 = vrot.slane %v855_v0, 5 }
 0x211   : > { %12878 = vst [vmem:[#allocation2_spill] sm:$0xff] %v9624_v2  ;;  %v9630_v7 = vmax.bf16 %v12879_v25, %v9603_v8  ;;  %6322 = vmatmul.mubr.msk.bf16.gmra.mxu1 %vm2707_vm12, %v6107_v11  ;;  %v853_v17 = vrot.slane %v852_v61, 4  ;;  %v861_v32 = vrot.slane %v859_v51, 4  ;;  %v865_v1 = vshll.u32 %v9622_v33, 16 }
 0x212   : > { %12877 = vst [vmem:[#allocation17_spill] sm:$0xff] %v9617_v36  ;;  %v9641_v43 = vmax.bf16 %v12881_v13, %v9609_v58  ;;  %v9649_v40 = vmax.bf16 %v12883_v28, %v9609_v58  ;;  %v869_v52 = vshrl.u32 %v9622_v33, 16  ;;  %v875_v27 = vshll.u32 %v9633_v39, 16  ;;  %v9972_v36 = vld [vmem:[%s6633_s30 + $0x130] sm:$0xf] }
 0x213   : > { %12880 = vst [vmem:[#allocation5_spill] sm:$0xff] %v9630_v7  ;;  %v6046_v23 = vrot.slane %v9582_v22, 9  ;;  %v1370_v19 = vrot.slane %v9592_v14, 5  ;;  %v858_v21 = vsel %vm6694_vm2, %v853_v17, %v857_v9  ;;  %v862_v42 = vor.u32 %v861_v32, %v857_v9  ;;  %12921 = vst [vmem:[#allocation69_spill] sm:$0xff] %v9972_v36 }
 0x214   : > { %12882 = vst [vmem:[#allocation55_spill] sm:$0xff] %v9641_v43  ;;  %12884 = vst [vmem:[#allocation51_spill] sm:$0xff] %v9649_v40  ;;  %v867_v37 = vrot.slane %v865_v1, 5  ;;  %v1373_v57 = vrot.slane %v9622_v33, 5  ;;  %v871_v15 = vrot.slane %v869_v52, 4  ;;  %v877_v44 = vrot.slane %v875_v27, 5 }
 0x215   : > { %v1151_v35 = vmax.bf16 %v858_v21, %v9582_v22  ;;  %v1371_v55 = vsel %vm7312_vm5, %v6046_v23, %v1370_v19  ;;  %v863_v63 = vrot.slane %v862_v42, 4  ;;  %v1372_v47 = vrot.slane %v1370_v19, 4 }
 0x216   : > { %v1375_v25 = vrot.slane %v1373_v57, 4  ;;  %v1376_v11 = vrot.slane %v9633_v39, 5  ;;  %v872_v61 = vor.u32 %v871_v15, %v867_v37  ;;  %v1831_v28 = vrot.slane %v846_v4, 5 }
 0x217   : > { %v1530_v13 = vmax.bf16 %v1371_v55, %v1151_v35  ;;  %v1832_v17 = vrot.slane %v849_v6, 6  ;;  %v868_v9 = vsel %vm6694_vm2, %v863_v63, %v867_v37  ;;  %v1374_v32 = vsel %vm7312_vm5, %v1372_v47, %v1373_v57 }
 0x218   : > { %v1377_v21 = vsel %vm7312_vm5, %v1375_v25, %v1376_v11  ;;  %v1835_v53 = vrot.slane %v859_v51, 5  ;;  %v873_v23 = vrot.slane %v872_v61, 4  ;;  %v1152_v19 = vmax.bf16 %v868_v9, %v9592_v14 }
 0x219   : > { %v1833_v42 = vor.u32 %v1832_v17, %v1831_v28  ;;  %v1836_v48 = vrot.slane %v855_v0, 6  ;;  %v1840_v30 = vrot.slane %v869_v52, 5  ;;  %v1841_v15 = vrot.slane %v865_v1, 6 }
 0x21a   : > { %v1845_v4 = vshrl.u32 %v9633_v39, 16  ;;  %v1848_v6 = vrot.slane %v875_v27, 6  ;;  %v878_v37 = vsel %vm6694_vm2, %v873_v23, %v877_v44  ;;  %v1531_v35 = vmax.bf16 %v1374_v32, %v1152_v19  ;;  %v9696_v19 = vld [vmem:[%s6633_s30 + $0xf0] sm:$0xf] }
 0x21b   : > { %v1834_v55 = vrot.slane %v1833_v42, 4  ;;  %v1837_v57 = vor.u32 %v1836_v48, %v1835_v53  ;;  %v1153_v63 = vmax.bf16 %v878_v37, %v9622_v33  ;;  %v1842_v47 = vor.u32 %v1841_v15, %v1840_v30  ;;  %12886 = vst [vmem:[#allocation4_spill] sm:$0xff] %v9696_v19 }
 0x21c   : > { %v1847_v51 = vrot.slane %v1845_v4, 5  ;;  %v6066_v25 = vrot.slane %v9582_v22, 10  ;;  %v2216_v1 = vrot.slane %v9592_v14, 6  ;;  %v2219_v27 = vrot.slane %v9622_v33, 6 }
 0x21d   : > { %v1838_v0 = vsel %vm7539_vm8, %v1834_v55, %v1837_v57  ;;  %v1839_v52 = vrot.slane %v1837_v57, 4  ;;  %v1532_v11 = vmax.bf16 %v1377_v21, %v1153_v63  ;;  %v1844_v44 = vrot.slane %v1842_v47, 4  ;;  %v9717_v55 = vld [vmem:[%s6633_s30 + $0xf4] sm:$0xf] }
 0x21e   : > { %v1849_v61 = vor.u32 %v1848_v6, %v1847_v51  ;;  %v2053_v28 = vmax.bf16 %v1838_v0, %v1530_v13  ;;  %v2217_v30 = vsel %vm7964_vm11, %v6066_v25, %v2216_v1  ;;  %v2218_v22 = vrot.slane %v2216_v1, 4  ;;  %12891 = vst [vmem:[#allocation59_spill] sm:$0xff] %v9717_v55  ;;  %v9729_v51 = vld [vmem:[%s6633_s30 + $0xf8] sm:$0xf] }
 0x21f   : > { %v1843_v48 = vsel %vm7539_vm8, %v1839_v52, %v1842_v47  ;;  %v2221_v53 = vrot.slane %v2219_v27, 4  ;;  %v2222_v14 = vrot.slane %v9633_v39, 6  ;;  %v2424_v21 = vmax.bf16 %v12864_v18, %v12840_v60  ;;  %12894 = vst [vmem:[#allocation19_spill] sm:$0xff] %v9729_v51 }
 0x220   : > { %v1850_v17 = vsel %vm7539_vm8, %v1844_v44, %v1849_v61  ;;  %v2054_v9 = vmax.bf16 %v1843_v48, %v1531_v35  ;;  %v9687_v33 = vmax.bf16 %v2217_v30, %v2053_v28  ;;  %v2220_v13 = vsel %vm7964_vm11, %v2218_v22, %v2219_v27 }
 0x221   : > { %v2055_v32 = vmax.bf16 %v1850_v17, %v1532_v11  ;;  %v2425_v23 = vmax.bf16 %v12866_v10, %v12841_v5  ;;  %v2223_v42 = vsel %vm7964_vm11, %v2221_v53, %v2222_v14  ;;  %v2426_v39 = vmax.bf16 %v12867_v50, %v12843_v56 }
 0x222   : > { %12885 = vst [vmem:[#allocation6_spill] sm:$0xff] %v9687_v33  ;;  %v9700_v15 = vmax.bf16 %v2220_v13, %v2054_v9  ;;  %v2472_v60 = vmax.bf16 %v2424_v21, %v12869_v20  ;;  %v12889_v5 = vmax.bf16 %v9531_v12, %v12869_v20  ;;  %v12892_v63 = vmax.bf16 %v9536_v24, %v12870_v34 }
 0x223   : > { %v9706_v6 = vmax.bf16 %v2223_v42, %v2055_v32  ;;  %v2473_v37 = vmax.bf16 %v2425_v23, %v12870_v34  ;;  %v2474_v57 = vmax.bf16 %v2426_v39, %v12871_v26  ;;  %v12155_v25 = vshrl.u32 %v9696_v19, 16 }
 0x224   : > { %12887 = vst [vmem:[#allocation58_spill] sm:$0xff] %v9700_v15  ;;  %v9714_v35 = vmax.bf16 %v12889_v5, %v9687_v33  ;;  %v9726_v47 = vmax.bf16 %v12892_v63, %v9700_v15  ;;  %v12895_v52 = vmax.bf16 %v9540_v31, %v12871_v26  ;;  %v2520_v27 = vmax.bf16 %v2472_v60, %v9531_v12 }
 0x225   : > { %12888 = vst [vmem:[#allocation30_spill] sm:$0xff] %v9706_v6  ;;  %v2521_v11 = vmax.bf16 %v2473_v37, %v9536_v24  ;;  %v2522_v44 = vmax.bf16 %v2474_v57, %v9540_v31  ;;  %v9745_v61 = vrot.slane %v12155_v25, 4  ;;  %v12154_v28 = vshll.u32 %v9696_v19, 16 }
 0x226   : > { %12890 = vst [vmem:[#allocation7_spill] sm:$0xff] %v9714_v35  ;;  %12893 = vst [vmem:[#allocation25_spill] sm:$0xff] %v9726_v47  ;;  %v9738_v1 = vmax.bf16 %v12895_v52, %v9706_v6  ;;  %v12153_v48 = vshll.u32 %v9717_v55, 16  ;;  %v2568_v30 = vmax.bf16 %v2520_v27, %v9687_v33 }
 0x227   : > { %v2569_v22 = vmax.bf16 %v2521_v11, %v9700_v15  ;;  %v2570_v9 = vmax.bf16 %v2522_v44, %v9706_v6  ;;  %v9756_v14 = vrot.slane %v12154_v28, 5 }
 0x228   : > { %12896 = vst [vmem:[#allocation22_spill] sm:$0xff] %v9738_v1  ;;  %v9760_v32 = vrot.slane %v12153_v48, 5  ;;  %v6078_v21 = vrot.slane %v2568_v30, 10  ;;  %v3277_v42 = vshrl.u32 %v2568_v30, 16  ;;  %v3280_v39 = vshll.u32 %v2568_v30, 16 }
 0x229   : > { %v2654_v23 = vrot.slane %v2569_v22, 6  ;;  %v2657_v60 = vrot.slane %v2570_v9, 6  ;;  %v3286_v37 = vshll.u32 %v2569_v22, 16  ;;  %v3290_v5 = vshrl.u32 %v2569_v22, 16 }
 0x22a   : > { %v3296_v57 = vshll.u32 %v2570_v9, 16  ;;  %v3279_v27 = vrot.slane %v3277_v42, 4  ;;  %v3282_v11 = vrot.slane %v3280_v39, 5  ;;  %v3300_v4 = vshrl.u32 %v2570_v9, 16 }
 0x22b   : > { %v2655_v63 = vsel %vm7964_vm11, %v6078_v21, %v2654_v23  ;;  %v2656_v52 = vrot.slane %v2654_v23, 4  ;;  %v3288_v44 = vrot.slane %v3286_v37, 5  ;;  %v3292_v0 = vrot.slane %v3290_v5, 4 }
 0x22c   : > { %v3298_v56 = vrot.slane %v3296_v57, 5  ;;  %v3283_v28 = vor.u32 %v3282_v11, %v3279_v27  ;;  %v6130_v25 = vrot.slane %v2568_v30, 9  ;;  %v3652_v49 = vrot.slane %v2569_v22, 5 }
 0x22d   : > { %v2658_v48 = vsel %vm7964_vm11, %v2656_v52, %v2657_v60  ;;  %v3293_v17 = vor.u32 %v3292_v0, %v3288_v44  ;;  %v3302_v53 = vrot.slane %v3300_v4, 4  ;;  %v3655_v2 = vrot.slane %v2570_v9, 5 }
 0x22e   : > { %v6090_v13 = vcombine.low %v2655_v63, %v2658_v48  ;;  %v3284_v40 = vrot.slane %v3283_v28, 4  ;;  %v3653_v21 = vsel %vm7312_vm5, %v6130_v25, %v3652_v49  ;;  %v3654_v23 = vrot.slane %v3652_v49, 4 }
 0x22f   : > { %v3934_v7 = vrot.slane %v3277_v42, 5  ;;  %v3294_v41 = vrot.slane %v3293_v17, 4  ;;  %v3303_v54 = vor.u32 %v3302_v53, %v3298_v56  ;;  %v3657_v1 = vrot.slane %v3655_v2, 4 }
 0x230   : > { %6305 = vmatprep.mubr.msk.bf16.mxu0 %vm2707_vm12, %v6090_v13  ;;  %v3935_v47 = vrot.slane %v3280_v39, 6  ;;  %v3289_v52 = vsel %vm6694_vm2, %v3284_v40, %v3288_v44  ;;  %v3656_v0 = vsel %vm7312_vm5, %v3654_v23, %v3655_v2  ;;  %v3938_v27 = vrot.slane %v3290_v5, 5 }
 0x231   : > { %v3939_v11 = vrot.slane %v3286_v37, 6  ;;  %v3299_v25 = vsel %vm6694_vm2, %v3294_v41, %v3298_v56  ;;  %v3304_v49 = vrot.slane %v3303_v54, 4  ;;  %v3528_v28 = vmax.bf16 %v3289_v52, %v2568_v30  ;;  %v9777_v37 = vld [vmem:[%s6633_s30 + $0xfc] sm:$0x3]  ;;  %v9784_v56 = vld [vmem:[%s6633_s30 + $0x100] sm:$0xf] }
 0x232   : > { %v3936_v42 = vor.u32 %v3935_v47, %v3934_v7  ;;  %v3529_v17 = vmax.bf16 %v3299_v25, %v2569_v22  ;;  %v3943_v13 = vrot.slane %v3300_v4, 5  ;;  %v3944_v39 = vrot.slane %v3296_v57, 6  ;;  %12897 = vst [vmem:[#allocation20_spill] sm:$0xff] %v9777_v37  ;;  %12898 = vst [vmem:[#allocation23_spill] sm:$0xff] %v9784_v56 }
 0x233   : > { %v3940_v53 = vor.u32 %v3939_v11, %v3938_v27  ;;  %v3530_v35 = vmax.bf16 %v3304_v49, %v2570_v9  ;;  %v3776_v31 = vmax.bf16 %v3653_v21, %v3528_v28  ;;  %v4152_v44 = vrot.slane %v2657_v60, 4 }
 0x234   : > { %v3937_v40 = vrot.slane %v3936_v42, 4  ;;  %v3777_v24 = vmax.bf16 %v3656_v0, %v3529_v17  ;;  %v3945_v5 = vor.u32 %v3944_v39, %v3943_v13  ;;  %v886_v41 = vor.u32 %v9756_v14, %v9745_v61  ;;  %v9832_v13 = vld [vmem:[%s6633_s30 + $0x108] sm:$0xf] }
 0x235   : > { %v3942_v2 = vrot.slane %v3940_v53, 4  ;;  %v3778_v54 = vmax.bf16 %v3657_v1, %v3530_v35  ;;  %v12899_v4 = vshrl.u32 %v9717_v55, 16  ;;  %v12900_v30 = vshll.u32 %v9729_v51, 16  ;;  %12908 = vst [vmem:[#allocation49_spill] sm:$0xff] %v9832_v13 }
 0x236   : > { %v3941_v7 = vsel %vm7539_vm8, %v3937_v40, %v3940_v53  ;;  %v3947_v60 = vrot.slane %v3945_v5, 4  ;;  %v9794_v21 = vrot.slane %v886_v41, 4  ;;  %v12901_v61 = vshrl.u32 %v9729_v51, 16  ;;  %v9829_v53 = vld [vmem:[%s6633_s30 + $0x104] sm:$0xf] }
 0x237   : > { %v895_v47 = vrot.slane %v12899_v4, 4  ;;  %v9790_v22 = vrot.slane %v12900_v30, 5  ;;  %v3946_v9 = vsel %vm7539_vm8, %v3942_v2, %v3945_v5  ;;  %v4096_v57 = vmax.bf16 %v3941_v7, %v3776_v31  ;;  %12907 = vst [vmem:[#allocation56_spill] sm:$0xff] %v9829_v53  ;;  %v9851_v41 = vld [vmem:[%s6633_s30 + $0x10c] sm:$0x3] }
 0x238   : > { %v4097_v35 = vmax.bf16 %v3946_v9, %v3777_v24  ;;  %v905_v14 = vrot.slane %v12901_v61, 4  ;;  %v12173_v23 = vshll.u32 %v9777_v37, 16  ;;  %v4098_v52 = vmax.bf16 %v3947_v60, %v3778_v54  ;;  %12913 = vst [vmem:[#allocation31_spill] sm:$0xff] %v9851_v41  ;;  %v9854_v54 = vld [vmem:[%s6633_s30 + $0x110] sm:$0xf] }
 0x239   : > { %v896_v1 = vor.u32 %v895_v47, %v9760_v32  ;;  %v9800_v0 = vmax.bf16 %v4096_v57, %v2655_v63  ;;  %v12171_v24 = vshrl.u32 %v9784_v56, 16  ;;  %v12905_v42 = vmax.bf16 %v9603_v8, %v9443_v29  ;;  %12914 = vst [vmem:[#allocation65_spill] sm:$0xff] %v9854_v54  ;;  %v9875_v57 = vld [vmem:[%s6633_s30 + $0x114] sm:$0xf] }
 0x23a   : > { %v9807_v27 = vmax.bf16 %v4097_v35, %v2658_v48  ;;  %v906_v25 = vor.u32 %v905_v14, %v9790_v22  ;;  %v9814_v49 = vrot.slane %v12173_v23, 5  ;;  %v9816_v63 = vmax.bf16 %v4152_v44, %v4098_v52  ;;  %12917 = vst [vmem:[#allocation60_spill] sm:$0xff] %v9875_v57  ;;  %v9885_v52 = vld [vmem:[%s6633_s30 + $0x118] sm:$0xf]  ;;  %v9920_v23 = vld [vmem:[%s6633_s30 + $0x120] sm:$0xf] }
 0x23b   : > { %12902 = vst [vmem:[#allocation21_spill] sm:$0xff] %v9800_v0  ;;  %v9809_v11 = vrot.slane %v896_v1, 4  ;;  %v9824_v17 = vmax.bf16 %v12905_v42, %v9800_v0  ;;  %v12909_v40 = vmax.bf16 %v9609_v58, %v9447_v16  ;;  %v12911_v2 = vmax.bf16 %v9459_v45, %v9603_v8  ;;  %12918 = vst [vmem:[#allocation9_spill] sm:$0xff] %v9885_v52 }
 0x23c   : > { %12903 = vst [vmem:[#allocation48_spill] sm:$0xff] %v9807_v27  ;;  %12904 = vst [vmem:[#allocation3_spill] sm:$0xff] %v9816_v63  ;;  %v12915_v16 = vmax.bf16 %v9469_v59, %v9609_v58  ;;  %v9866_v47 = vrot.slane %v906_v25, 4  ;;  %v916_v45 = vrot.slane %v12171_v24, 4  ;;  %v12168_v30 = vshll.u32 %v9784_v56, 16 }
 0x23d   : > { %12906 = vst [vmem:[#allocation24_spill] sm:$0xff] %v9824_v17  ;;  %v9840_v44 = vmax.bf16 %v12909_v40, %v9807_v27  ;;  %v9848_v5 = vmax.bf16 %v12911_v2, %v9800_v0  ;;  %v12165_v9 = vshll.u32 %v9829_v53, 16  ;;  %v12166_v60 = vshrl.u32 %v9829_v53, 16 }
 0x23e   : > { %v9860_v7 = vmax.bf16 %v12915_v16, %v9807_v27  ;;  %v12167_v59 = vshll.u32 %v9832_v13, 16  ;;  %v12169_v1 = vshrl.u32 %v9832_v13, 16  ;;  %v12170_v61 = vshll.u32 %v9851_v41, 16  ;;  %v10011_v27 = vld [vmem:[%s6633_s30 + $0x13c] sm:$0x3] }
 0x23f   : > { %12910 = vst [vmem:[#allocation57_spill] sm:$0xff] %v9840_v44  ;;  %12912 = vst [vmem:[#allocation50_spill] sm:$0xff] %v9848_v5  ;;  %v12172_v14 = vshrl.u32 %v9854_v54, 16  ;;  %v919_v25 = vrot.slane %v12168_v30, 5  ;;  %v9891_v42 = vrot.slane %v12165_v9, 5  ;;  %v929_v40 = vrot.slane %v12166_v60, 4 }
 0x240   : > { %12916 = vst [vmem:[#allocation40_spill] sm:$0xff] %v9860_v7  ;;  %v9897_v2 = vrot.slane %v12167_v59, 5  ;;  %v939_v16 = vrot.slane %v12169_v1, 4  ;;  %v9903_v29 = vrot.slane %v12170_v61, 5  ;;  %v12174_v39 = vshll.u32 %v9854_v54, 16 }
 0x241   : > { %v950_v48 = vrot.slane %v12172_v14, 4  ;;  %v920_v28 = vor.u32 %v919_v25, %v916_v45  ;;  %v930_v9 = vor.u32 %v929_v40, %v9891_v42  ;;  %v12177_v60 = vshll.u32 %v9875_v57, 16  ;;  %v9912_v30 = vld [vmem:[%s6633_s30 + $0x11c] sm:$0x3]  ;;  %v9965_v7 = vld [vmem:[%s6633_s30 + $0x12c] sm:$0x3] }
 0x242   : > { %v12178_v59 = vshrl.u32 %v9875_v57, 16  ;;  %12919 = vst [vmem:[#allocation8_spill] sm:$0xff] %v9912_v30  ;;  %v940_v1 = vor.u32 %v939_v16, %v9897_v2  ;;  %v953_v61 = vrot.slane %v12174_v39, 5  ;;  %v12175_v24 = vshll.u32 %v9885_v52, 16  ;;  %v9933_v39 = vld [vmem:[%s6633_s30 + $0x124] sm:$0xf] }
 0x243   : > { %v12176_v14 = vshrl.u32 %v9885_v52, 16  ;;  %v9922_v45 = vrot.slane %v920_v28, 4  ;;  %v9924_v25 = vrot.slane %v930_v9, 4  ;;  %v9928_v40 = vrot.slane %v12177_v60, 5  ;;  %12920 = vst [vmem:[#allocation38_spill] sm:$0xff] %v9965_v7 }
 0x244   : > { %v963_v16 = vrot.slane %v12178_v59, 4  ;;  %v9935_v35 = vrot.slane %v940_v1, 4  ;;  %v954_v4 = vor.u32 %v953_v61, %v950_v48  ;;  %v9939_v31 = vrot.slane %v12175_v24, 5  ;;  %v9954_v24 = vld [vmem:[%s6633_s30 + $0x128] sm:$0xf] }
 0x245   : > { %v973_v28 = vrot.slane %v12176_v14, 4  ;;  %v12183_v61 = vshll.u32 %v9912_v30, 16  ;;  %v12186_v9 = vshrl.u32 %v9920_v23, 16  ;;  %v12188_v5 = vshll.u32 %v9920_v23, 16 }
 0x246   : > { %v964_v48 = vor.u32 %v963_v16, %v9928_v40  ;;  %v946_v14 = vsel %vm6694_vm2, %v9935_v35, %v9903_v29  ;;  %v9960_v60 = vrot.slane %v954_v4, 4  ;;  %v12922_v44 = vshll.u32 %v9933_v39, 16 }
 0x247   : > { %v974_v59 = vor.u32 %v973_v28, %v9939_v31  ;;  %v979_v16 = vrot.slane %v12183_v61, 5  ;;  %v984_v35 = vrot.slane %v12186_v9, 4  ;;  %v12191_v28 = vshrl.u32 %v9933_v39, 16 }
 0x248   : > { %v965_v1 = vrot.slane %v964_v48, 4  ;;  %v960_v29 = vsel %vm6694_vm2, %v9960_v60, %v9928_v40  ;;  %v9982_v48 = vld [vmem:[%s6633_s30 + $0x134] sm:$0xf]  ;;  %v987_v43 = vrot.slane %v12188_v5, 5  ;;  %v993_v17 = vrot.slane %v12922_v44, 5 }
 0x249   : > { %v975_v4 = vrot.slane %v974_v59, 4  ;;  %v12196_v60 = vshll.u32 %v9954_v24, 16  ;;  %v997_v40 = vrot.slane %v12191_v28, 4  ;;  %v12199_v9 = vshrl.u32 %v9954_v24, 16 }
 0x24a   : > { %v970_v61 = vsel %vm6694_vm2, %v965_v1, %v9939_v31  ;;  %v12200_v58 = vshll.u32 %v9965_v7, 16  ;;  %v9999_v31 = vld [vmem:[%s6633_s30 + $0x138] sm:$0xf]  ;;  %v988_v1 = vor.u32 %v987_v43, %v984_v35  ;;  %v12205_v44 = vshrl.u32 %v9972_v36, 16 }
 0x24b   : > { %v980_v59 = vsel %vm6694_vm2, %v975_v4, %v979_v16  ;;  %v1003_v5 = vrot.slane %v12196_v60, 5  ;;  %v12206_v8 = vshll.u32 %v9972_v36, 16  ;;  %v998_v63 = vor.u32 %v997_v40, %v993_v17 }
 0x24c   : > { %v1007_v16 = vrot.slane %v12199_v9, 4  ;;  %v1013_v4 = vrot.slane %v12200_v58, 5  ;;  %v12209_v28 = vshll.u32 %v9982_v48, 16  ;;  %v989_v0 = vrot.slane %v988_v1, 4 }
 0x24d   : > { %v1018_v43 = vrot.slane %v12205_v44, 4  ;;  %v1021_v35 = vrot.slane %v12206_v8, 5  ;;  %v12214_v60 = vshrl.u32 %v9982_v48, 16  ;;  %v999_v40 = vrot.slane %v998_v63, 4 }
 0x24e   : > { %v1008_v12 = vor.u32 %v1007_v16, %v1003_v5  ;;  %v1027_v9 = vrot.slane %v12209_v28, 5  ;;  %v12212_v58 = vshll.u32 %v9999_v31, 16  ;;  %v994_v6 = vsel %vm6694_vm2, %v989_v0, %v993_v17 }
 0x24f   : > { %v1022_v15 = vor.u32 %v1021_v35, %v1018_v43  ;;  %v1031_v1 = vrot.slane %v12214_v60, 4  ;;  %v12213_v44 = vshrl.u32 %v9999_v31, 16  ;;  %v1004_v8 = vsel %vm6694_vm2, %v999_v40, %v1003_v5 }
 0x250   : > { %v1009_v33 = vrot.slane %v1008_v12, 4  ;;  %v1037_v63 = vrot.slane %v12212_v58, 5  ;;  %v12211_v16 = vshll.u32 %v10011_v27, 16  ;;  %v12923_v17 = vsel %vm6694_vm2, %v9794_v21, %v9760_v32 }
 0x251   : > { %v1023_v28 = vrot.slane %v1022_v15, 4  ;;  %v1032_v26 = vor.u32 %v1031_v1, %v1027_v9  ;;  %v1041_v0 = vrot.slane %v12213_v44, 4  ;;  %v10039_v43 = vmax.bf16 %v12923_v17, %v9696_v19 }
 0x252   : > { %v1014_v12 = vsel %vm6694_vm2, %v1009_v33, %v1013_v4  ;;  %v1047_v5 = vrot.slane %v12211_v16, 5  ;;  %v12924_v15 = vsel %vm6694_vm2, %v9809_v11, %v9790_v22  ;;  %v12925_v32 = vsel %vm6694_vm2, %v9866_v47, %v9814_v49 }
 0x253   : > { %v10051_v35 = vmax.bf16 %v12924_v15, %v9717_v55  ;;  %v10059_v21 = vmax.bf16 %v12925_v32, %v9729_v51  ;;  %v1028_v33 = vsel %vm6694_vm2, %v1023_v28, %v1027_v9  ;;  %v1033_v4 = vrot.slane %v1032_v26, 4 }
 0x254   : > { %v1042_v40 = vor.u32 %v1041_v0, %v1037_v63  ;;  %v12926_v22 = vsel %vm6694_vm2, %v9922_v45, %v9891_v42  ;;  %v12927_v49 = vsel %vm6694_vm2, %v9924_v25, %v9897_v2  ;;  %v10080_v9 = vmax.bf16 %v946_v14, %v9832_v13 }
 0x255   : > { %v10069_v11 = vmax.bf16 %v12926_v22, %v9784_v56  ;;  %v10077_v47 = vmax.bf16 %v12927_v49, %v9829_v53  ;;  %v10083_v26 = vmax.bf16 %v960_v29, %v9854_v54  ;;  %v10086_v28 = vmax.bf16 %v970_v61, %v9875_v57 }
 0x256   : > { %v1038_v42 = vsel %vm6694_vm2, %v1033_v4, %v1037_v63  ;;  %v1043_v45 = vrot.slane %v1042_v40, 4  ;;  %v10091_v1 = vmax.bf16 %v980_v59, %v9885_v52  ;;  %v10094_v2 = vmax.bf16 %v994_v6, %v9920_v23 }
 0x257   : > { %v10097_v25 = vmax.bf16 %v1004_v8, %v9933_v39  ;;  %v10100_v14 = vmax.bf16 %v1014_v12, %v9954_v24  ;;  %v10103_v29 = vmax.bf16 %v1028_v33, %v9972_v36  ;;  %v10106_v61 = vmax.bf16 %v1038_v42, %v9982_v48 }
 0x258   : > { %v1048_v63 = vsel %vm6694_vm2, %v1043_v45, %v1047_v5  ;;  %v6047_v59 = vrot.slane %v9696_v19, 9  ;;  %v1380_v6 = vrot.slane %v9717_v55, 5  ;;  %v1383_v0 = vrot.slane %v9729_v51, 5 }
 0x259   : > { %12928 = vst [vmem:[#allocation46_spill] sm:$0xff] %v10103_v29  ;;  %12929 = vst [vmem:[#allocation72_spill] sm:$0xff] %v10106_v61  ;;  %v10114_v8 = vmax.bf16 %v1048_v63, %v9999_v31  ;;  %v1386_v17 = vrot.slane %v9777_v37, 5  ;;  %v6048_v12 = vrot.slane %v9784_v56, 9  ;;  %v1390_v15 = vrot.slane %v9829_v53, 5 }
 0x25a   : > { %v10121_v32 = vsel %vm7312_vm5, %v6047_v59, %v1380_v6  ;;  %v1382_v5 = vrot.slane %v1380_v6, 4  ;;  %v1385_v33 = vrot.slane %v1383_v0, 4  ;;  %v1393_v4 = vrot.slane %v9832_v13, 5 }
 0x25b   : > { %12930 = vst [vmem:[#allocation73_spill] sm:$0xff] %v10114_v8  ;;  %v10126_v40 = vsel %vm7312_vm5, %v6048_v12, %v1390_v15  ;;  %v1392_v22 = vrot.slane %v1390_v15, 4  ;;  %v1396_v49 = vrot.slane %v9851_v41, 5  ;;  %v6049_v42 = vrot.slane %v9854_v54, 9 }
 0x25c   : > { %v10132_v45 = vsel %vm7312_vm5, %v1382_v5, %v1383_v0  ;;  %v10136_v63 = vsel %vm7312_vm5, %v1385_v33, %v1386_v17  ;;  %v1395_v59 = vrot.slane %v1393_v4, 4  ;;  %v1400_v6 = vrot.slane %v9875_v57, 5 }
 0x25d   : > { %v10141_v12 = vsel %vm7312_vm5, %v1392_v22, %v1393_v4  ;;  %v1403_v15 = vrot.slane %v9885_v52, 5  ;;  %v1406_v16 = vrot.slane %v9912_v30, 5  ;;  %v6050_v58 = vrot.slane %v9920_v23, 9 }
 0x25e   : > { %v10148_v0 = vsel %vm7312_vm5, %v1395_v59, %v1396_v49  ;;  %v10152_v17 = vsel %vm7312_vm5, %v6049_v42, %v1400_v6  ;;  %v1402_v5 = vrot.slane %v1400_v6, 4  ;;  %v1410_v33 = vrot.slane %v9933_v39, 5  ;;  %v6416_v6 = vld [vmem:[%s11816_s1 + $0x20] sm:$0xff]  }
 0x25f   : > { %v1405_v44 = vrot.slane %v1403_v15, 4  ;;  %v1413_v4 = vrot.slane %v9954_v24, 5  ;;  %v1416_v22 = vrot.slane %v9965_v7, 5  ;;  %v6051_v60 = vrot.slane %v9972_v36, 9  ;;  %6331 = vmatprep.subr.bf16.mxu0 %v6416_v6 }
 0x260   : > { %v10160_v62 = vsel %vm7312_vm5, %v1402_v5, %v1403_v15  ;;  %v10164_v49 = vsel %vm7312_vm5, %v6050_v58, %v1410_v33  ;;  %v1412_v42 = vrot.slane %v1410_v33, 4  ;;  %v1420_v59 = vrot.slane %v9982_v48, 5  ;;  %6332 = vmatpush3.bf16.msra.mxu0 %v6416_v6 }
 0x261   : > { %v10172_v50 = vsel %vm7312_vm5, %v1405_v44, %v1406_v16  ;;  %v1415_v34 = vrot.slane %v1413_v4, 4  ;;  %v1423_v10 = vrot.slane %v9999_v31, 5  ;;  %v1426_v15 = vrot.slane %v10011_v27, 5 }
 0x262   : > { %v10178_v58 = vsel %vm7312_vm5, %v1412_v42, %v1413_v4  ;;  %v10182_v5 = vsel %vm7312_vm5, %v6051_v60, %v1420_v59  ;;  %v1422_v33 = vrot.slane %v1420_v59, 4  ;;  %v12934_v42 = vshll.u32 %v9696_v19, 16 }
 0x263   : > { %v10188_v44 = vsel %vm7312_vm5, %v1415_v34, %v1416_v22  ;;  %v1425_v16 = vrot.slane %v1423_v10, 4  ;;  %v12935_v59 = vshrl.u32 %v9717_v55, 16  ;;  %v12936_v34 = vshll.u32 %v9717_v55, 16 }
 0x264   : > { %v10196_v60 = vsel %vm7312_vm5, %v1422_v33, %v1423_v10  ;;  %v12933_v33 = vshrl.u32 %v9696_v19, 16  ;;  %v1852_v4 = vrot.slane %v12934_v42, 6  ;;  %v1865_v10 = vshrl.u32 %v9777_v37, 16 }
 0x265   : > { %12931 = vst [vmem:[#allocation74_spill] sm:$0xff] %v10196_v60  ;;  %v10206_v22 = vsel %vm7312_vm5, %v1425_v16, %v1426_v15  ;;  %v1855_v18 = vrot.slane %v12935_v59, 5  ;;  %v1856_v20 = vrot.slane %v12936_v34, 6  ;;  %v12937_v15 = vshrl.u32 %v9729_v51, 16 }
 0x266   : > { %12932 = vst [vmem:[#allocation75_spill] sm:$0xff] %v10206_v22  ;;  %v1851_v6 = vrot.slane %v12933_v33, 5  ;;  %v12938_v16 = vshll.u32 %v9729_v51, 16  ;;  %v12939_v33 = vshll.u32 %v9777_v37, 16  ;;  %v12940_v42 = vshrl.u32 %v9784_v56, 16 }
 0x267   : > { %v1860_v46 = vrot.slane %v12937_v15, 5  ;;  %v10243_v19 = vor.u32 %v1856_v20, %v1855_v18  ;;  %v12941_v34 = vshll.u32 %v9784_v56, 16  ;;  %v12942_v15 = vshrl.u32 %v9829_v53, 16 }
 0x268   : > { %v1861_v38 = vrot.slane %v12938_v16, 6  ;;  %v1853_v61 = vor.u32 %v1852_v4, %v1851_v6  ;;  %v1868_v8 = vrot.slane %v12939_v33, 6  ;;  %v1871_v22 = vrot.slane %v12940_v42, 5 }
 0x269   : > { %v1872_v55 = vrot.slane %v12941_v34, 6  ;;  %v1875_v60 = vrot.slane %v12942_v15, 5  ;;  %v1867_v4 = vrot.slane %v1865_v10, 5  ;;  %v12943_v6 = vshll.u32 %v9829_v53, 16  ;;  %v6417_v34 = vld [vmem:[%s11816_s1 + $0x30] sm:$0xff]  }
 0x26a   : > { %v1862_v59 = vor.u32 %v1861_v38, %v1860_v46  ;;  %v10249_v51 = vrot.slane %v1853_v61, 4  ;;  %v12944_v33 = vshrl.u32 %v9832_v13, 16  ;;  %v1859_v42 = vrot.slane %v10243_v19, 4  ;;  %6351 = vmatprep.subr.bf16.mxu1 %v6417_v34 }
 0x26b   : > { %v1876_v16 = vrot.slane %v12943_v6, 6  ;;  %v1873_v20 = vor.u32 %v1872_v55, %v1871_v22  ;;  %v12945_v38 = vshll.u32 %v9832_v13, 16  ;;  %v1869_v10 = vor.u32 %v1868_v8, %v1867_v4  ;;  %6352 = vmatpush3.bf16.msra.mxu1 %v6417_v34 }
 0x26c   : > { %v1880_v37 = vrot.slane %v12944_v33, 5  ;;  %v1864_v18 = vrot.slane %v1862_v59, 4  ;;  %v1885_v6 = vshrl.u32 %v9851_v41, 16  ;;  %v10270_v55 = vsel %vm7539_vm8, %v1859_v42, %v1862_v59 }
 0x26d   : > { %v1881_v46 = vrot.slane %v12945_v38, 6  ;;  %v10265_v15 = vor.u32 %v1876_v16, %v1875_v60  ;;  %v10272_v22 = vrot.slane %v1873_v20, 4  ;;  %v12946_v38 = vshll.u32 %v9851_v41, 16 }
 0x26e   : > { %v10278_v53 = vsel %vm7539_vm8, %v1864_v18, %v1869_v10  ;;  %v1887_v60 = vrot.slane %v1885_v6, 5  ;;  %v12947_v4 = vshrl.u32 %v9854_v54, 16  ;;  %v12948_v42 = vshll.u32 %v9854_v54, 16 }
 0x26f   : > { %v1882_v33 = vor.u32 %v1881_v46, %v1880_v37  ;;  %v1888_v13 = vrot.slane %v12946_v38, 6  ;;  %v1879_v8 = vrot.slane %v10265_v15, 4  ;;  %v1878_v37 = vsel %vm7539_vm8, %v10272_v22, %v10265_v15 }
 0x270   : > { %v1891_v16 = vrot.slane %v12947_v4, 5  ;;  %v1892_v20 = vrot.slane %v12948_v42, 6  ;;  %v12949_v46 = vshrl.u32 %v9875_v57, 16  ;;  %v12950_v38 = vshll.u32 %v9875_v57, 16 }
 0x271   : > { %v1884_v59 = vrot.slane %v1882_v33, 4  ;;  %v1883_v10 = vsel %vm7539_vm8, %v1879_v8, %v1882_v33  ;;  %v1889_v6 = vor.u32 %v1888_v13, %v1887_v60  ;;  %v12951_v34 = vshrl.u32 %v9885_v52, 16 }
 0x272   : > { %v1895_v18 = vrot.slane %v12949_v46, 5  ;;  %v1896_v4 = vrot.slane %v12950_v38, 6  ;;  %v1893_v41 = vor.u32 %v1892_v20, %v1891_v16  ;;  %v12952_v15 = vshll.u32 %v9885_v52, 16 }
 0x273   : > { %v1900_v61 = vrot.slane %v12951_v34, 5  ;;  %v1905_v54 = vshrl.u32 %v9912_v30, 16  ;;  %v12953_v42 = vshll.u32 %v9912_v30, 16  ;;  %v1890_v46 = vsel %vm7539_vm8, %v1884_v59, %v1889_v6 }
 0x274   : > { %v1901_v22 = vrot.slane %v12952_v15, 6  ;;  %v1897_v33 = vor.u32 %v1896_v4, %v1895_v18  ;;  %v12954_v13 = vshrl.u32 %v9920_v23, 16  ;;  %v12955_v60 = vshll.u32 %v9920_v23, 16 }
 0x275   : > { %v1908_v56 = vrot.slane %v12953_v42, 6  ;;  %v1894_v34 = vrot.slane %v1893_v41, 4  ;;  %v1907_v20 = vrot.slane %v1905_v54, 5  ;;  %v12956_v15 = vshrl.u32 %v9933_v39, 16 }
 0x276   : > { %v1911_v8 = vrot.slane %v12954_v13, 5  ;;  %v1912_v38 = vrot.slane %v12955_v60, 6  ;;  %v1902_v16 = vor.u32 %v1901_v22, %v1900_v61  ;;  %v1899_v57 = vrot.slane %v1897_v33, 4 }
 0x277   : > { %v1915_v52 = vrot.slane %v12956_v15, 5  ;;  %v12957_v42 = vshll.u32 %v9933_v39, 16  ;;  %v12958_v59 = vshrl.u32 %v9954_v24, 16  ;;  %v1898_v6 = vsel %vm7539_vm8, %v1894_v34, %v1897_v33 }
 0x278   : > { %v1913_v29 = vor.u32 %v1912_v38, %v1911_v8  ;;  %v1904_v4 = vrot.slane %v1902_v16, 4  ;;  %v1909_v13 = vor.u32 %v1908_v56, %v1907_v20  ;;  %v12959_v41 = vshll.u32 %v9954_v24, 16 }
 0x279   : > { %v1916_v30 = vrot.slane %v12957_v42, 6  ;;  %v1920_v18 = vrot.slane %v12958_v59, 5  ;;  %v1903_v54 = vsel %vm7539_vm8, %v1899_v57, %v1902_v16  ;;  %v1925_v8 = vshrl.u32 %v9965_v7, 16 }
 0x27a   : > { %v1921_v61 = vrot.slane %v12959_v41, 6  ;;  %v1914_v22 = vrot.slane %v1913_v29, 4  ;;  %v1910_v38 = vsel %vm7539_vm8, %v1904_v4, %v1909_v13  ;;  %v12960_v42 = vshll.u32 %v9965_v7, 16 }
 0x27b   : > { %v1917_v60 = vor.u32 %v1916_v30, %v1915_v52  ;;  %v12961_v33 = vshrl.u32 %v9972_v36, 16  ;;  %v1927_v41 = vrot.slane %v1925_v8, 5  ;;  %v12962_v57 = vshll.u32 %v9972_v36, 16 }
 0x27c   : > { %v1922_v15 = vor.u32 %v1921_v61, %v1920_v18  ;;  %v1928_v59 = vrot.slane %v12960_v42, 6  ;;  %v12963_v29 = vshrl.u32 %v9982_v48, 16  ;;  %v12964_v18 = vshll.u32 %v9982_v48, 16 }
 0x27d   : > { %v1931_v56 = vrot.slane %v12961_v33, 5  ;;  %v1918_v34 = vsel %vm7539_vm8, %v1914_v22, %v1917_v60  ;;  %v1919_v20 = vrot.slane %v1917_v60, 4  ;;  %v1932_v30 = vrot.slane %v12962_v57, 6 }
 0x27e   : > { %v1924_v52 = vrot.slane %v1922_v15, 4  ;;  %v1935_v16 = vrot.slane %v12963_v29, 5  ;;  %v1936_v4 = vrot.slane %v12964_v18, 6  ;;  %v12965_v13 = vshrl.u32 %v9999_v31, 16 }
 0x27f   : > { %v1923_v42 = vsel %vm7539_vm8, %v1919_v20, %v1922_v15  ;;  %v1929_v33 = vor.u32 %v1928_v59, %v1927_v41  ;;  %v1933_v22 = vor.u32 %v1932_v30, %v1931_v56  ;;  %v12966_v60 = vshll.u32 %v9999_v31, 16 }
 0x280   : > { %v1940_v61 = vrot.slane %v12965_v13, 5  ;;  %v1937_v36 = vor.u32 %v1936_v4, %v1935_v16  ;;  %v1945_v57 = vshrl.u32 %v10011_v27, 16  ;;  %v12967_v7 = vshll.u32 %v10011_v27, 16 }
 0x281   : > { %v1941_v8 = vrot.slane %v12966_v60, 6  ;;  %v12968_v18 = vmax.bf16 %v10121_v32, %v10039_v43  ;;  %v12969_v13 = vsel %vm7539_vm8, %v10249_v51, %v10243_v19  ;;  %v1930_v59 = vsel %vm7539_vm8, %v1924_v52, %v1929_v33  ;;  %v12991_v33 = vld [vmem:[#allocation19_spill] sm:$0xff]  ;;  %v12992_v60 = vld [vmem:[#allocation20_spill] sm:$0xff] }
 0x282   : > { %v1948_v29 = vrot.slane %v12967_v7, 6  ;;  %v1934_v56 = vrot.slane %v1933_v22, 4  ;;  %v12970_v41 = vmax.bf16 %v10132_v45, %v10051_v35  ;;  %v1939_v30 = vrot.slane %v1937_v36, 4 }
 0x283   : > { %v10352_v15 = vmax.bf16 %v12969_v13, %v12968_v18  ;;  %v1942_v20 = vor.u32 %v1941_v8, %v1940_v61  ;;  %v1947_v43 = vrot.slane %v1945_v57, 5  ;;  %v12971_v32 = vmax.bf16 %v10136_v63, %v10059_v21  ;;  %v12993_v8 = vld [vmem:[#allocation23_spill] sm:$0xff]  ;;  %v12995_v13 = vld [vmem:[#allocation49_spill] sm:$0xff] }
 0x284   : > { %v10360_v7 = vmax.bf16 %v10270_v55, %v12970_v41  ;;  %v12972_v51 = vmax.bf16 %v10126_v40, %v10069_v11  ;;  %v1938_v16 = vsel %vm7539_vm8, %v1934_v56, %v1937_v36  ;;  %v12973_v45 = vmax.bf16 %v10141_v12, %v10077_v47  ;;  %v12996_v56 = vld [vmem:[#allocation31_spill] sm:$0xff]  ;;  %v6295_v41 = vpop.f32.mrf.mxu0 }
 0x285   : > { %v10366_v19 = vmax.bf16 %v10278_v53, %v12971_v32  ;;  %v1944_v35 = vrot.slane %v1942_v20, 4  ;;  %v12974_v4 = vmax.bf16 %v10148_v0, %v10080_v9  ;;  %v1943_v53 = vsel %vm7539_vm8, %v1939_v30, %v1942_v20 }
 0x286   : > { %v10371_v52 = vmax.bf16 %v1878_v37, %v12972_v51  ;;  %v2060_v55 = vmax.bf16 %v1883_v10, %v12973_v45  ;;  %v1949_v63 = vor.u32 %v1948_v29, %v1947_v43  ;;  %v12975_v11 = vmax.bf16 %v10152_v17, %v10083_v26  ;;  %v12994_v29 = vld [vmem:[#allocation56_spill] sm:$0xff]  ;;  %v12998_v51 = vld [vmem:[#allocation65_spill] sm:$0xff] }
 0x287   : > { %v2061_v21 = vmax.bf16 %v1890_v46, %v12974_v4  ;;  %v12976_v36 = vmax.bf16 %v10160_v62, %v10086_v28  ;;  %v12977_v47 = vmax.bf16 %v10172_v50, %v10091_v1  ;;  %v12978_v9 = vmax.bf16 %v10164_v49, %v10094_v2  ;;  %v12981_v28 = vld [vmem:[#allocation46_spill] sm:$0xff] }
 0x288   : > { %v2062_v40 = vmax.bf16 %v1898_v6, %v12975_v11  ;;  %v12979_v10 = vmax.bf16 %v10178_v58, %v10097_v25  ;;  %v12980_v26 = vmax.bf16 %v10188_v44, %v10100_v14  ;;  %v1950_v62 = vsel %vm7539_vm8, %v1944_v35, %v1949_v63  ;;  %v12983_v1 = vld [vmem:[#allocation74_spill] sm:$0xff]  ;;  %v12987_v58 = vld [vmem:[#allocation75_spill] sm:$0xff] }
 0x289   : > { %v2063_v37 = vmax.bf16 %v1903_v54, %v12976_v36  ;;  %v2064_v12 = vmax.bf16 %v1910_v38, %v12977_v47  ;;  %v2065_v0 = vmax.bf16 %v1918_v34, %v12978_v9  ;;  %v12982_v6 = vmax.bf16 %v10182_v5, %v12981_v28  ;;  %v12984_v54 = vld [vmem:[#allocation72_spill] sm:$0xff]  ;;  %v12988_v34 = vld [vmem:[#allocation73_spill] sm:$0xff]  ;;  %v12990_v44 = vld [vmem:[#allocation59_spill] sm:$0xff] }
 0x28a   : > { %v2066_v46 = vmax.bf16 %v1923_v42, %v12979_v10  ;;  %v2067_v17 = vmax.bf16 %v1930_v59, %v12980_v26  ;;  %v12985_v2 = vmax.bf16 %v12983_v1, %v12984_v54  ;;  %v12986_v38 = vld [vmem:[#allocation4_spill] sm:$0xff]  ;;  %v12989_v61 = vmax.bf16 %v12987_v58, %v12988_v34  ;;  %v13000_v47 = vld [vmem:[#allocation9_spill] sm:$0xff]  ;;  %v13002_v34 = vld [vmem:[#allocation38_spill] sm:$0xff] }
 0x28b   : > { %v10406_v50 = vmax.bf16 %v1938_v16, %v12982_v6  ;;  %v6067_v25 = vrot.slane %v12986_v38, 10  ;;  %v2226_v42 = vrot.slane %v12990_v44, 6  ;;  %v2229_v22 = vrot.slane %v12991_v33, 6  ;;  %v13001_v10 = vld [vmem:[#allocation8_spill] sm:$0xff]  ;;  %v13003_v44 = vld [vmem:[#allocation69_spill] sm:$0xff] }
 0x28c   : > { %v10411_v49 = vmax.bf16 %v1943_v53, %v12985_v2  ;;  %v10417_v14 = vmax.bf16 %v1950_v62, %v12989_v61  ;;  %v2232_v5 = vrot.slane %v12992_v60, 6  ;;  %v6068_v57 = vrot.slane %v12993_v8, 10  ;;  %v12999_v53 = vld [vmem:[#allocation60_spill] sm:$0xff] }
 0x28d   : > { %v2236_v18 = vrot.slane %v12994_v29, 6  ;;  %v2239_v59 = vrot.slane %v12995_v13, 6  ;;  %v2242_v20 = vrot.slane %v12996_v56, 6  ;;  %v2227_v30 = vsel %vm7964_vm11, %v6067_v25, %v2226_v42 }
 0x28e   : > { %v2228_v43 = vrot.slane %v2226_v42, 4  ;;  %v2231_v32 = vrot.slane %v2229_v22, 4  ;;  %v6069_v16 = vrot.slane %v12998_v51, 10  ;;  %v2246_v63 = vrot.slane %v12999_v53, 6 }
 0x28f   : > { %v2237_v35 = vsel %vm7964_vm11, %v6068_v57, %v2236_v18  ;;  %v2238_v45 = vrot.slane %v2236_v18, 4  ;;  %v2241_v4 = vrot.slane %v2239_v59, 4  ;;  %v2249_v9 = vrot.slane %v13000_v47, 6  ;;  %v13012_v47 = vld [vmem:[#allocation30_spill] sm:$0xff] }
 0x290   : > { %v2230_v11 = vsel %vm7964_vm11, %v2228_v43, %v2229_v22  ;;  %v2233_v36 = vsel %vm7964_vm11, %v2231_v32, %v2232_v5  ;;  %v2252_v26 = vrot.slane %v13001_v10, 6  ;;  %v2247_v6 = vsel %vm7964_vm11, %v6069_v16, %v2246_v63 }
 0x291   : > { %v2240_v62 = vsel %vm7964_vm11, %v2238_v45, %v2239_v59  ;;  %v2243_v28 = vsel %vm7964_vm11, %v2241_v4, %v2242_v20  ;;  %v2248_v1 = vrot.slane %v2246_v63, 4  ;;  %v2251_v54 = vrot.slane %v2249_v9, 4  ;;  %v13008_v63 = vld [vmem:[#allocation54_spill] sm:$0xff] }
 0x292   : > { %v6070_v2 = vrot.slane %v9920_v23, 10  ;;  %v2256_v38 = vrot.slane %v9933_v39, 6  ;;  %v2259_v25 = vrot.slane %v9954_v24, 6  ;;  %v2262_v61 = vrot.slane %v13002_v34, 6 }
 0x293   : > { %v2250_v58 = vsel %vm7964_vm11, %v2248_v1, %v2249_v9  ;;  %v6071_v42 = vrot.slane %v13003_v44, 10  ;;  %v2266_v33 = vrot.slane %v9982_v48, 6  ;;  %v2253_v22 = vsel %vm7964_vm11, %v2251_v54, %v2252_v26  ;;  %v13013_v26 = vld [vmem:[#allocation47_spill] sm:$0xff] }
 0x294   : > { %v2257_v60 = vsel %vm7964_vm11, %v6070_v2, %v2256_v38  ;;  %v2258_v23 = vrot.slane %v2256_v38, 4  ;;  %v2261_v5 = vrot.slane %v2259_v25, 4  ;;  %v2269_v8 = vrot.slane %v9999_v31, 6 }
 0x295   : > { %v10458_v24 = vsel %vm7964_vm11, %v6071_v42, %v2266_v33  ;;  %v2268_v39 = vrot.slane %v2266_v33, 4  ;;  %v2272_v57 = vrot.slane %v10011_v27, 6  ;;  %v2379_v18 = vmax.bf16 %v2227_v30, %v10352_v15 }
 0x296   : > { %v2260_v48 = vsel %vm7964_vm11, %v2258_v23, %v2259_v25  ;;  %v2263_v29 = vsel %vm7964_vm11, %v2261_v5, %v2262_v61  ;;  %v2380_v13 = vmax.bf16 %v2230_v11, %v10360_v7  ;;  %v2271_v56 = vrot.slane %v2269_v8, 4  ;;  %v13009_v11 = vld [vmem:[#allocation39_spill] sm:$0xff] }
 0x297   : > { %v10470_v59 = vsel %vm7964_vm11, %v2268_v39, %v2269_v8  ;;  %v2381_v20 = vmax.bf16 %v2233_v36, %v10366_v19  ;;  %v2382_v31 = vmax.bf16 %v2237_v35, %v10371_v52  ;;  %v2383_v27 = vmax.bf16 %v2240_v62, %v2060_v55  ;;  %v13004_v52 = vld [vmem:[#allocation53_spill] sm:$0xff]  ;;  %v13005_v55 = vld [vmem:[#allocation35_spill] sm:$0xff] }
 0x298   : > { %v2384_v43 = vmax.bf16 %v2243_v28, %v2061_v21  ;;  %v2385_v32 = vmax.bf16 %v2247_v6, %v2062_v40  ;;  %v2386_v51 = vmax.bf16 %v2250_v58, %v2063_v37  ;;  %v2273_v16 = vsel %vm7964_vm11, %v2271_v56, %v2272_v57  ;;  %v13006_v40 = vld [vmem:[#allocation71_spill] sm:$0xff]  ;;  %v13007_v37 = vld [vmem:[#allocation37_spill] sm:$0xff]  ;;  %v13015_v6 = vld [vmem:[#allocation14_spill] sm:$0xff] }
 0x299   : > { %v2387_v45 = vmax.bf16 %v2253_v22, %v2064_v12  ;;  %v2388_v15 = vmax.bf16 %v2257_v60, %v2065_v0  ;;  %v2389_v30 = vmax.bf16 %v2260_v48, %v2066_v46  ;;  %v2390_v7 = vmax.bf16 %v2263_v29, %v2067_v17  ;;  %v13010_v0 = vld [vmem:[#allocation6_spill] sm:$0xff]  ;;  %v13014_v62 = vld [vmem:[#allocation13_spill] sm:$0xff]  ;;  %v13019_v39 = vld [vmem:[#allocation7_spill] sm:$0xff] }
 0x29a   : > { %v2391_v4 = vmax.bf16 %v10458_v24, %v10406_v50  ;;  %v2392_v53 = vmax.bf16 %v10470_v59, %v10411_v49  ;;  %v2393_v19 = vmax.bf16 %v2273_v16, %v10417_v14  ;;  %v2427_v21 = vmax.bf16 %v13005_v55, %v13004_v52  ;;  %v13011_v17 = vld [vmem:[#allocation58_spill] sm:$0xff]  ;;  %v13020_v57 = vld [vmem:[#allocation25_spill] sm:$0xff] }
 0x29b   : > { %v2428_v35 = vmax.bf16 %v13007_v37, %v13006_v40  ;;  %v2429_v12 = vmax.bf16 %v13009_v11, %v13008_v63  ;;  %v2436_v46 = vmax.bf16 %v2379_v18, %v13010_v0  ;;  %v2437_v36 = vmax.bf16 %v2380_v13, %v13011_v17  ;;  %v13021_v29 = vld [vmem:[#allocation22_spill] sm:$0xff] }
 0x29c   : > { %v2438_v50 = vmax.bf16 %v2381_v20, %v13012_v47  ;;  %v2439_v9 = vmax.bf16 %v2382_v31, %v2379_v18  ;;  %v2440_v10 = vmax.bf16 %v2383_v27, %v2380_v13  ;;  %v2441_v49 = vmax.bf16 %v2384_v43, %v2381_v20 }
 0x29d   : > { %v2475_v14 = vmax.bf16 %v2427_v21, %v13013_v26  ;;  %v2476_v28 = vmax.bf16 %v2428_v35, %v13014_v62  ;;  %v2477_v1 = vmax.bf16 %v2429_v12, %v13015_v6  ;;  %v13016_v54 = vmax.bf16 %v13010_v0, %v13013_v26 }
 0x29e   : > { %v13017_v38 = vmax.bf16 %v13011_v17, %v13014_v62  ;;  %v13018_v58 = vmax.bf16 %v13012_v47, %v13015_v6  ;;  %v2484_v61 = vmax.bf16 %v2436_v46, %v2382_v31  ;;  %v2485_v44 = vmax.bf16 %v2437_v36, %v2383_v27 }
 0x29f   : > { %v2481_v2 = vmax.bf16 %v13016_v54, %v2379_v18  ;;  %v2486_v42 = vmax.bf16 %v2438_v50, %v2384_v43  ;;  %v2487_v33 = vmax.bf16 %v2439_v9, %v2385_v32  ;;  %v2488_v22 = vmax.bf16 %v2440_v10, %v2386_v51 }
 0x2a0   : > { %v2482_v25 = vmax.bf16 %v13017_v38, %v2380_v13  ;;  %v2483_v34 = vmax.bf16 %v13018_v58, %v2381_v20  ;;  %v2489_v60 = vmax.bf16 %v2441_v49, %v2387_v45  ;;  %v2523_v23 = vmax.bf16 %v2475_v14, %v13010_v0 }
 0x2a1   : > { %v2524_v5 = vmax.bf16 %v2476_v28, %v13011_v17  ;;  %v2525_v24 = vmax.bf16 %v2477_v1, %v13012_v47  ;;  %v2526_v8 = vmax.bf16 %v13019_v39, %v2379_v18  ;;  %v2527_v48 = vmax.bf16 %v13020_v57, %v2380_v13 }
 0x2a2   : > { %v2528_v59 = vmax.bf16 %v13021_v29, %v2381_v20  ;;  %v2529_v56 = vmax.bf16 %v2481_v2, %v2382_v31  ;;  %v2530_v16 = vmax.bf16 %v2482_v25, %v2383_v27  ;;  %v2531_v52 = vmax.bf16 %v2483_v34, %v2384_v43 }
 0x2a3   : > { %v2532_v55 = vmax.bf16 %v2484_v61, %v2385_v32  ;;  %v2533_v21 = vmax.bf16 %v2485_v44, %v2386_v51  ;;  %v2534_v40 = vmax.bf16 %v2486_v42, %v2387_v45  ;;  %v2535_v37 = vmax.bf16 %v2487_v33, %v2388_v15 }
 0x2a4   : > { %v2536_v35 = vmax.bf16 %v2488_v22, %v2389_v30  ;;  %v2537_v63 = vmax.bf16 %v2489_v60, %v2390_v7  ;;  %v10508_v11 = vmax.bf16 %v2523_v23, %v2379_v18  ;;  %v10510_v12 = vmax.bf16 %v2524_v5, %v2380_v13 }
 0x2a5   : > { %v10512_v0 = vmax.bf16 %v2525_v24, %v2381_v20  ;;  %v10514_v46 = vmax.bf16 %v2526_v8, %v2382_v31  ;;  %v10516_v17 = vmax.bf16 %v2527_v48, %v2383_v27  ;;  %v10518_v36 = vmax.bf16 %v2528_v59, %v2384_v43 }
 0x2a6   : > { %v10520_v47 = vmax.bf16 %v2529_v56, %v2385_v32  ;;  %v10522_v50 = vmax.bf16 %v2530_v16, %v2386_v51  ;;  %v10524_v9 = vmax.bf16 %v2531_v52, %v2387_v45  ;;  %v10526_v10 = vmax.bf16 %v2532_v55, %v2388_v15 }
 0x2a7   : > { %v10528_v18 = vmax.bf16 %v2533_v21, %v2389_v30  ;;  %v10530_v13 = vmax.bf16 %v2534_v40, %v2390_v7  ;;  %v10532_v20 = vmax.bf16 %v2535_v37, %v2391_v4  ;;  %v10534_v31 = vmax.bf16 %v2536_v35, %v2392_v53 }
 0x2a8   : > { %13022 = vst [vmem:[#allocation46_spill] sm:$0xff] %v10524_v9  ;;  %v10536_v27 = vmax.bf16 %v2537_v63, %v2393_v19  ;;  %v6079_v43 = vrot.slane %v10508_v11, 10  ;;  %v2661_v32 = vrot.slane %v10510_v12, 6  ;;  %v12242_v51 = vrot.slane %v10512_v0, 6 }
 0x2a9   : > { %13023 = vst [vmem:[#allocation74_spill] sm:$0xff] %v10530_v13  ;;  %v3306_v45 = vshrl.u32 %v10508_v11, 16  ;;  %v3309_v15 = vshll.u32 %v10508_v11, 16  ;;  %v3315_v30 = vshll.u32 %v10510_v12, 16  ;;  %v3319_v7 = vshrl.u32 %v10510_v12, 16 }
 0x2aa   : > { %13024 = vst [vmem:[#allocation72_spill] sm:$0xff] %v10536_v27  ;;  %v3325_v4 = vshll.u32 %v10512_v0, 16  ;;  %v3329_v53 = vshrl.u32 %v10512_v0, 16  ;;  %v10549_v19 = vsel %vm7964_vm11, %v6079_v43, %v2661_v32  ;;  %v2663_v49 = vrot.slane %v2661_v32, 4 }
 0x2ab   : > { %v3308_v26 = vrot.slane %v3306_v45, 4  ;;  %v3311_v14 = vrot.slane %v3309_v15, 5  ;;  %v10557_v62 = vrot.slane %v3315_v30, 5  ;;  %v3321_v28 = vrot.slane %v3319_v7, 4 }
 0x2ac   : > { %v10563_v6 = vrot.slane %v3325_v4, 5  ;;  %v3331_v1 = vrot.slane %v3329_v53, 4  ;;  %v10571_v54 = vsel %vm7964_vm11, %v2663_v49, %v12242_v51  ;;  %v3335_v38 = vshrl.u32 %v10514_v46, 16 }
 0x2ad   : > { %13025 = vst [vmem:[#allocation4_spill] sm:$0xff] %v10571_v54  ;;  %v3312_v2 = vor.u32 %v3311_v14, %v3308_v26  ;;  %v3338_v25 = vshll.u32 %v10514_v46, 16  ;;  %v6091_v58 = vcombine.low %v10549_v19, %v10571_v54  ;;  %v3322_v34 = vor.u32 %v3321_v28, %v10557_v62 }
 0x2ae   : > { %v3332_v61 = vor.u32 %v3331_v1, %v10563_v6  ;;  %v12260_v44 = vshll.u32 %v10516_v17, 16  ;;  %v3337_v33 = vrot.slane %v3335_v38, 4  ;;  %v12261_v60 = vshrl.u32 %v10516_v17, 16 }
 0x2af   : > { %v10580_v42 = vrot.slane %v3312_v2, 4  ;;  %v3340_v22 = vrot.slane %v3338_v25, 5  ;;  %6306 = vmatmul.mubr.msk.bf16.gmra.mxu0 %vm2707_vm12, %v6091_v58  ;;  %v10588_v23 = vrot.slane %v3322_v34, 4  ;;  %v12258_v39 = vshll.u32 %v10518_v36, 16 }
 0x2b0   : > { %v10590_v5 = vrot.slane %v3332_v61, 4  ;;  %v10594_v24 = vrot.slane %v12260_v44, 5  ;;  %v3350_v29 = vrot.slane %v12261_v60, 4  ;;  %v12257_v52 = vshrl.u32 %v10520_v47, 16 }
 0x2b1   : > { %v3318_v57 = vsel %vm6694_vm2, %v10580_v42, %v10557_v62  ;;  %v3341_v48 = vor.u32 %v3340_v22, %v3337_v33  ;;  %v3328_v56 = vsel %vm6694_vm2, %v10588_v23, %v10563_v6  ;;  %v10610_v16 = vrot.slane %v12258_v39, 5 }
 0x2b2   : > { %v12256_v55 = vshll.u32 %v10520_v47, 16  ;;  %v3351_v40 = vor.u32 %v3350_v29, %v10594_v24  ;;  %v12254_v37 = vshll.u32 %v10522_v50, 16  ;;  %v12255_v35 = vshrl.u32 %v10522_v50, 16 }
 0x2b3   : > { %13027 = vst [vmem:[#allocation75_spill] sm:$0xff] %v10610_v16  ;;  %v3342_v21 = vrot.slane %v3341_v48, 4  ;;  %v3366_v63 = vrot.slane %v12257_v52, 4  ;;  %v12253_v32 = vshll.u32 %v10524_v9, 16  ;;  %v12252_v2 = vshrl.u32 %v10526_v10, 16 }
 0x2b4   : > { %v3369_v43 = vrot.slane %v12256_v55, 5  ;;  %v3352_v14 = vrot.slane %v3351_v40, 4  ;;  %v3375_v62 = vrot.slane %v12254_v37, 5  ;;  %v3379_v28 = vrot.slane %v12255_v35, 4 }
 0x2b5   : > { %v3347_v26 = vsel %vm6694_vm2, %v3342_v21, %v10594_v24  ;;  %v10632_v1 = vrot.slane %v12253_v32, 5  ;;  %v12246_v58 = vshll.u32 %v10526_v10, 16  ;;  %v12243_v42 = vshll.u32 %v10528_v18, 16 }
 0x2b6   : > { %v3370_v6 = vor.u32 %v3369_v43, %v3366_v63  ;;  %v3357_v34 = vsel %vm6694_vm2, %v3352_v14, %v10610_v16  ;;  %v3380_v61 = vor.u32 %v3379_v28, %v3375_v62  ;;  %v12244_v33 = vshrl.u32 %v10528_v18, 16 }
 0x2b7   : > { %13028 = vst [vmem:[#allocation73_spill] sm:$0xff] %v10632_v1  ;;  %v3395_v23 = vrot.slane %v12252_v2, 4  ;;  %v3398_v24 = vrot.slane %v12246_v58, 5  ;;  %v12245_v48 = vshll.u32 %v10530_v13, 16  ;;  %v3404_v21 = vrot.slane %v12243_v42, 5 }
 0x2b8   : > { %v3371_v22 = vrot.slane %v3370_v6, 4  ;;  %v3381_v29 = vrot.slane %v3380_v61, 4  ;;  %v3408_v40 = vrot.slane %v12244_v33, 4  ;;  %v12247_v6 = vshrl.u32 %v10532_v20, 16 }
 0x2b9   : > { %v3399_v14 = vor.u32 %v3398_v24, %v3395_v23  ;;  %v10655_v28 = vrot.slane %v12245_v48, 5  ;;  %v12248_v42 = vshll.u32 %v10532_v20, 16  ;;  %v12249_v33 = vshll.u32 %v10534_v31, 16 }
 0x2ba   : > { %v3376_v43 = vsel %vm6694_vm2, %v3371_v22, %v3375_v62  ;;  %v3386_v61 = vsel %vm6694_vm2, %v3381_v29, %v10632_v1  ;;  %v3409_v51 = vor.u32 %v3408_v40, %v3404_v21  ;;  %v3424_v62 = vrot.slane %v12247_v6, 4 }
 0x2bb   : > { %13029 = vst [vmem:[#allocation59_spill] sm:$0xff] %v10655_v28  ;;  %v3400_v63 = vrot.slane %v3399_v14, 4  ;;  %v12250_v22 = vshrl.u32 %v10534_v31, 16  ;;  %v12251_v23 = vshll.u32 %v10536_v27, 16  ;;  %v3427_v48 = vrot.slane %v12248_v42, 5 }
 0x2bc   : > { %v3410_v24 = vrot.slane %v3409_v51, 4  ;;  %v3433_v29 = vrot.slane %v12249_v33, 5  ;;  %v10681_v51 = vmax.bf16 %v3318_v57, %v10508_v11  ;;  %v10687_v40 = vmax.bf16 %v3328_v56, %v10510_v12 }
 0x2bd   : > { %v3405_v58 = vsel %vm6694_vm2, %v3400_v63, %v3404_v21  ;;  %v3437_v14 = vrot.slane %v12250_v22, 4  ;;  %v10678_v6 = vrot.slane %v12251_v23, 5  ;;  %v3428_v33 = vor.u32 %v3427_v48, %v3424_v62 }
 0x2be   : > { %v3415_v42 = vsel %vm6694_vm2, %v3410_v24, %v10655_v28  ;;  %v3533_v21 = vmax.bf16 %v10590_v5, %v10512_v0  ;;  %v10692_v22 = vmax.bf16 %v3347_v26, %v10514_v46  ;;  %v10695_v23 = vmax.bf16 %v3357_v34, %v10516_v17 }
 0x2bf   : > { %13030 = vst [vmem:[#allocation19_spill] sm:$0xff] %v10678_v6  ;;  %v3438_v63 = vor.u32 %v3437_v14, %v3433_v29  ;;  %v10698_v57 = vmax.bf16 %v3376_v43, %v10520_v47  ;;  %v3429_v2 = vrot.slane %v3428_v33, 4  ;;  %v10701_v24 = vmax.bf16 %v3386_v61, %v10522_v50 }
 0x2c0   : > { %v10704_v56 = vmax.bf16 %v3405_v58, %v10526_v10  ;;  %v10707_v48 = vmax.bf16 %v3415_v42, %v10528_v18  ;;  %v6131_v26 = vrot.slane %v10508_v11, 9  ;;  %v3660_v62 = vrot.slane %v10510_v12, 5 }
 0x2c1   : > { %v3439_v5 = vrot.slane %v3438_v63, 4  ;;  %v3663_v34 = vrot.slane %v10512_v0, 5  ;;  %v3434_v43 = vsel %vm6694_vm2, %v3429_v2, %v3433_v29  ;;  %v6132_v33 = vrot.slane %v10514_v46, 9 }
 0x2c2   : > { %v3668_v61 = vrot.slane %v10516_v17, 5  ;;  %v12259_v58 = vrot.slane %v10518_v36, 5  ;;  %v10721_v14 = vmax.bf16 %v3434_v43, %v10532_v20  ;;  %v10725_v32 = vsel %vm7312_vm5, %v6131_v26, %v3660_v62 }
 0x2c3   : > { %v3444_v42 = vsel %vm6694_vm2, %v3439_v5, %v10678_v6  ;;  %v3662_v49 = vrot.slane %v3660_v62, 4  ;;  %v3665_v29 = vrot.slane %v3663_v34, 4  ;;  %v6133_v43 = vrot.slane %v10520_v47, 9 }
 0x2c4   : > { %v10728_v2 = vmax.bf16 %v3444_v42, %v10534_v31  ;;  %v10732_v37 = vsel %vm7312_vm5, %v6132_v33, %v3668_v61  ;;  %v3670_v35 = vrot.slane %v3668_v61, 4  ;;  %v3676_v55 = vrot.slane %v10522_v50, 5 }
 0x2c5   : > { %v10736_v5 = vsel %vm7312_vm5, %v3662_v49, %v3663_v34  ;;  %v12262_v26 = vrot.slane %v10524_v9, 5  ;;  %v6134_v33 = vrot.slane %v10526_v10, 9  ;;  %v3684_v61 = vrot.slane %v10528_v18, 5 }
 0x2c6   : > { %v10745_v62 = vsel %vm7312_vm5, %v3670_v35, %v12259_v58  ;;  %v12263_v42 = vrot.slane %v10530_v13, 5  ;;  %v10752_v49 = vsel %vm7312_vm5, %v6133_v43, %v3676_v55  ;;  %v3678_v34 = vrot.slane %v3676_v55, 4 }
 0x2c7   : > { %v6135_v52 = vrot.slane %v10532_v20, 9  ;;  %v3692_v39 = vrot.slane %v10534_v31, 5  ;;  %v10758_v59 = vsel %vm7312_vm5, %v6134_v33, %v3684_v61  ;;  %v3686_v35 = vrot.slane %v3684_v61, 4 }
 0x2c8   : > { %v12264_v58 = vrot.slane %v10536_v27, 5  ;;  %v10767_v43 = vsel %vm7312_vm5, %v3678_v34, %v12262_v26  ;;  %v10781_v44 = vmax.bf16 %v3665_v29, %v3533_v21  ;;  %v3953_v21 = vrot.slane %v3315_v30, 6 }
 0x2c9   : > { %v10771_v55 = vsel %vm7312_vm5, %v6135_v52, %v3692_v39  ;;  %v3694_v60 = vrot.slane %v3692_v39, 4  ;;  %v10779_v61 = vsel %vm7312_vm5, %v3686_v35, %v12263_v42  ;;  %v3952_v35 = vrot.slane %v3319_v7, 5 }
 0x2ca   : > { %v3957_v29 = vrot.slane %v3329_v53, 5  ;;  %v3958_v42 = vrot.slane %v3325_v4, 6  ;;  %v3962_v26 = vrot.slane %v3335_v38, 5  ;;  %v13032_v11 = vshrl.u32 %v10516_v17, 16 }
 0x2cb   : > { %v10791_v39 = vsel %vm7312_vm5, %v3694_v60, %v12264_v58  ;;  %v3948_v60 = vrot.slane %v3306_v45, 5  ;;  %v3949_v58 = vrot.slane %v3309_v15, 6  ;;  %v3963_v45 = vrot.slane %v3338_v25, 6 }
 0x2cc   : > { %v3966_v15 = vrot.slane %v13032_v11, 5  ;;  %v3954_v7 = vor.u32 %v3953_v21, %v3952_v35  ;;  %v13033_v12 = vshll.u32 %v10516_v17, 16  ;;  %v13034_v34 = vshrl.u32 %v10518_v36, 16 }
 0x2cd   : > { %v3950_v52 = vor.u32 %v3949_v58, %v3948_v60  ;;  %v3959_v33 = vor.u32 %v3958_v42, %v3957_v29  ;;  %v3964_v6 = vor.u32 %v3963_v45, %v3962_v26  ;;  %v13035_v4 = vshll.u32 %v10518_v36, 16 }
 0x2ce   : > { %v3967_v30 = vrot.slane %v13033_v12, 6  ;;  %v3971_v53 = vrot.slane %v13034_v34, 5  ;;  %v13036_v38 = vshrl.u32 %v10520_v47, 16  ;;  %v3956_v16 = vrot.slane %v3954_v7, 4 }
 0x2cf   : > { %v3972_v28 = vrot.slane %v13035_v4, 6  ;;  %v3951_v25 = vrot.slane %v3950_v52, 4  ;;  %v13037_v58 = vshll.u32 %v10520_v47, 16  ;;  %v3961_v21 = vrot.slane %v3959_v33, 4 }
 0x2d0   : > { %v3976_v1 = vrot.slane %v13036_v38, 5  ;;  %v3968_v8 = vor.u32 %v3967_v30, %v3966_v15  ;;  %v3965_v60 = vrot.slane %v3964_v6, 4  ;;  %v13039_v34 = vshrl.u32 %v10522_v50, 16 }
 0x2d1   : > { %v3977_v35 = vrot.slane %v13037_v58, 6  ;;  %v10833_v11 = vor.u32 %v3972_v28, %v3971_v53  ;;  %v3955_v26 = vsel %vm7539_vm8, %v3951_v25, %v3954_v7  ;;  %v3960_v29 = vsel %vm7539_vm8, %v3956_v16, %v3959_v33 }
 0x2d2   : > { %v3980_v42 = vrot.slane %v13039_v34, 5  ;;  %v3970_v45 = vrot.slane %v3968_v8, 4  ;;  %v3969_v15 = vsel %vm7539_vm8, %v3965_v60, %v3968_v8  ;;  %v13040_v12 = vshll.u32 %v10522_v50, 16 }
 0x2d3   : > { %13038 = vst [vmem:[#allocation20_spill] sm:$0xff] %v10833_v11  ;;  %v3978_v52 = vor.u32 %v3977_v35, %v3976_v1  ;;  %v13041_v28 = vshrl.u32 %v10524_v9, 16  ;;  %v13042_v53 = vshll.u32 %v10524_v9, 16  ;;  %v13043_v16 = vshrl.u32 %v10526_v10, 16 }
 0x2d4   : > { %v3981_v30 = vrot.slane %v13040_v12, 6  ;;  %v3974_v7 = vsel %vm7539_vm8, %v3970_v45, %v10833_v11  ;;  %v13044_v33 = vshll.u32 %v10526_v10, 16  ;;  %v13046_v35 = vshrl.u32 %v10528_v18, 16 }
 0x2d5   : > { %v3985_v6 = vrot.slane %v13041_v28, 5  ;;  %v3986_v4 = vrot.slane %v13042_v53, 6  ;;  %v3979_v38 = vrot.slane %v3978_v52, 4  ;;  %v3990_v1 = vrot.slane %v13043_v16, 5 }
 0x2d6   : > { %v3991_v8 = vrot.slane %v13044_v33, 6  ;;  %v3982_v25 = vor.u32 %v3981_v30, %v3980_v42  ;;  %v3994_v60 = vrot.slane %v13046_v35, 5  ;;  %v13047_v34 = vshll.u32 %v10528_v18, 16 }
 0x2d7   : > { %v10856_v58 = vor.u32 %v3986_v4, %v3985_v6  ;;  %v13048_v53 = vshrl.u32 %v10530_v13, 16  ;;  %v13049_v52 = vshll.u32 %v10530_v13, 16  ;;  %v13050_v16 = vshrl.u32 %v10532_v20, 16 }
 0x2d8   : > { %v3995_v12 = vrot.slane %v13047_v34, 6  ;;  %v3992_v28 = vor.u32 %v3991_v8, %v3990_v1  ;;  %v3983_v42 = vsel %vm7539_vm8, %v3979_v38, %v3982_v25  ;;  %v3984_v30 = vrot.slane %v3982_v25, 4 }
 0x2d9   : > { %13045 = vst [vmem:[#allocation23_spill] sm:$0xff] %v10856_v58  ;;  %v3999_v45 = vrot.slane %v13048_v53, 5  ;;  %v4000_v11 = vrot.slane %v13049_v52, 6  ;;  %v4004_v63 = vrot.slane %v13050_v16, 5  ;;  %v13051_v4 = vshll.u32 %v10532_v20, 16 }
 0x2da   : > { %v3996_v6 = vor.u32 %v3995_v12, %v3994_v60  ;;  %v3993_v35 = vrot.slane %v3992_v28, 4  ;;  %v13053_v1 = vshrl.u32 %v10534_v31, 16  ;;  %v13054_v53 = vshll.u32 %v10534_v31, 16 }
 0x2db   : > { %v4005_v33 = vrot.slane %v13051_v4, 6  ;;  %v10872_v34 = vor.u32 %v4000_v11, %v3999_v45  ;;  %v3988_v16 = vsel %vm7539_vm8, %v3984_v30, %v10856_v58  ;;  %v13055_v25 = vshrl.u32 %v10536_v27, 16 }
 0x2dc   : > { %v4008_v8 = vrot.slane %v13053_v1, 5  ;;  %v4009_v52 = vrot.slane %v13054_v53, 6  ;;  %v3998_v54 = vrot.slane %v3996_v6, 4  ;;  %v3997_v12 = vsel %vm7539_vm8, %v3993_v35, %v3996_v6 }
 0x2dd   : > { %13052 = vst [vmem:[#allocation56_spill] sm:$0xff] %v10872_v34  ;;  %v4006_v38 = vor.u32 %v4005_v33, %v4004_v63  ;;  %v4013_v60 = vrot.slane %v13055_v25, 5  ;;  %v13056_v28 = vshll.u32 %v10536_v27, 16  ;;  %v13057_v4 = vmax.bf16 %v10725_v32, %v10681_v51 }
 0x2de   : > { %v4010_v11 = vor.u32 %v4009_v52, %v4008_v8  ;;  %v4002_v30 = vsel %vm7539_vm8, %v3998_v54, %v10872_v34  ;;  %v13058_v63 = vmax.bf16 %v10736_v5, %v10687_v40  ;;  %v4101_v25 = vmax.bf16 %v3961_v21, %v10781_v44 }
 0x2df   : > { %v4014_v45 = vrot.slane %v13056_v28, 6  ;;  %v4099_v1 = vmax.bf16 %v3955_v26, %v13057_v4  ;;  %v4007_v53 = vrot.slane %v4006_v38, 4  ;;  %v13060_v8 = vmax.bf16 %v10732_v37, %v10692_v22  ;;  %v13070_v28 = vld [vmem:[#allocation4_spill] sm:$0xff] }
 0x2e0   : > { %v4100_v33 = vmax.bf16 %v3960_v29, %v13058_v63  ;;  %v4012_v6 = vrot.slane %v4010_v11, 4  ;;  %v13061_v32 = vmax.bf16 %v10745_v62, %v10695_v23  ;;  %v13062_v40 = vmax.bf16 %v10752_v49, %v10698_v57 }
 0x2e1   : > { %v10897_v35 = vor.u32 %v4014_v45, %v4013_v60  ;;  %v4102_v52 = vmax.bf16 %v3969_v15, %v13060_v8  ;;  %v4011_v54 = vsel %vm7539_vm8, %v4007_v53, %v4010_v11  ;;  %v13063_v44 = vmax.bf16 %v10767_v43, %v10701_v24 }
 0x2e2   : > { %v4103_v51 = vmax.bf16 %v3974_v7, %v13061_v32  ;;  %v4105_v5 = vmax.bf16 %v3983_v42, %v13062_v40  ;;  %v13064_v26 = vmax.bf16 %v10758_v59, %v10704_v56  ;;  %v13065_v23 = vmax.bf16 %v10779_v61, %v10707_v48  ;;  %v13076_v32 = vld [vmem:[#allocation21_spill] sm:$0xff] }
 0x2e3   : > { %13059 = vst [vmem:[#allocation49_spill] sm:$0xff] %v10897_v35  ;;  %v4106_v21 = vmax.bf16 %v3988_v16, %v13063_v44  ;;  %v4016_v22 = vsel %vm7539_vm8, %v4012_v6, %v10897_v35  ;;  %v13066_v57 = vmax.bf16 %v10771_v55, %v10721_v14  ;;  %v13067_v24 = vrot.slane %v10512_v0, 6  ;;  %v13078_v44 = vld [vmem:[#allocation3_spill] sm:$0xff] }
 0x2e4   : > { %v4108_v37 = vmax.bf16 %v3997_v12, %v13064_v26  ;;  %v4109_v62 = vmax.bf16 %v4002_v30, %v13065_v23  ;;  %v13068_v59 = vmax.bf16 %v10791_v39, %v10728_v2  ;;  %v6140_v29 = vrot.slane %v10514_v46, 10  ;;  %v13079_v26 = vld [vmem:[#allocation15_spill] sm:$0xff]  ;;  %v13082_v23 = vld [vmem:[#allocation16_spill] sm:$0xff] }
 0x2e5   : > { %v10925_v49 = vmax.bf16 %v4011_v54, %v13066_v57  ;;  %v4153_v43 = vrot.slane %v13067_v24, 4  ;;  %v4156_v15 = vrot.slane %v10516_v17, 6  ;;  %v12276_v48 = vrot.slane %v10518_v36, 6  ;;  %v13077_v54 = vld [vmem:[#allocation48_spill] sm:$0xff] }
 0x2e6   : > { %v10932_v56 = vmax.bf16 %v4016_v22, %v13068_v59  ;;  %v6141_v61 = vrot.slane %v10520_v47, 10  ;;  %v4164_v14 = vrot.slane %v10522_v50, 6  ;;  %v12275_v55 = vrot.slane %v10524_v9, 6 }
 0x2e7   : > { %v6142_v0 = vrot.slane %v10526_v10, 10  ;;  %v4157_v7 = vsel %vm7964_vm11, %v6140_v29, %v4156_v15  ;;  %v4158_v2 = vrot.slane %v4156_v15, 4  ;;  %v4172_v39 = vrot.slane %v10528_v18, 6 }
 0x2e8   : > { %v12274_v46 = vrot.slane %v10530_v13, 6  ;;  %v4165_v17 = vsel %vm7964_vm11, %v6141_v61, %v4164_v14  ;;  %v4166_v42 = vrot.slane %v4164_v14, 4  ;;  %v6143_v47 = vrot.slane %v10532_v20, 10 }
 0x2e9   : > { %v4180_v50 = vrot.slane %v10534_v31, 6  ;;  %v4160_v10 = vsel %vm7964_vm11, %v4158_v2, %v12276_v48  ;;  %v4173_v16 = vsel %vm7964_vm11, %v6142_v0, %v4172_v39  ;;  %v4174_v38 = vrot.slane %v4172_v39, 4 }
 0x2ea   : > { %v12273_v18 = vrot.slane %v10536_v27, 6  ;;  %v4168_v60 = vsel %vm7964_vm11, %v4166_v42, %v12275_v55  ;;  %v10963_v12 = vmax.bf16 %v4099_v1, %v10549_v19  ;;  %v10970_v45 = vmax.bf16 %v4100_v33, %v13070_v28  ;;  %v6521_v28 = vld [vmem:[%s6633_s30 + $0xc8] sm:$0xf] }
 0x2eb   : > { %v4181_v20 = vsel %vm7964_vm11, %v6143_v47, %v4180_v50  ;;  %v4182_v31 = vrot.slane %v4180_v50, 4  ;;  %v4176_v11 = vsel %vm7964_vm11, %v4174_v38, %v12274_v46  ;;  %v10972_v4 = vmax.bf16 %v4153_v43, %v4101_v25  ;;  %v13089_v50 = vld [vmem:[#allocation55_spill] sm:$0xff] }
 0x2ec   : > { %13069 = vst [vmem:[#allocation31_spill] sm:$0xff] %v10963_v12  ;;  %13071 = vst [vmem:[#allocation18_spill] sm:$0xff] %v10970_v45  ;;  %v10974_v30 = vmax.bf16 %v4157_v7, %v4102_v52  ;;  %v10980_v63 = vmax.bf16 %v4160_v10, %v4103_v51  ;;  %v10982_v19 = vmax.bf16 %v4165_v17, %v4105_v5  ;;  %v13087_v7 = vld [vmem:[#allocation17_spill] sm:$0xff] }
 0x2ed   : > { %v4184_v53 = vsel %vm7964_vm11, %v4182_v31, %v12273_v18  ;;  %v10984_v1 = vmax.bf16 %v4168_v60, %v4106_v21  ;;  %v4276_v6 = vmax.bf16 %v4173_v16, %v4108_v37  ;;  %v4277_v8 = vmax.bf16 %v4176_v11, %v4109_v62  ;;  %v6519_v60 = vld [vmem:[%s6633_s30 + $0xc0] sm:$0xf]  ;;  %v6520_v31 = vld [vmem:[%s6633_s30 + $0xc4] sm:$0xf] }
 0x2ee   : > { %13072 = vst [vmem:[#allocation65_spill] sm:$0xff] %v10974_v30  ;;  %13073 = vst [vmem:[#allocation60_spill] sm:$0xff] %v10980_v63  ;;  %v4279_v33 = vmax.bf16 %v4181_v20, %v10925_v49  ;;  %v4280_v25 = vmax.bf16 %v4184_v53, %v10932_v56  ;;  %v4312_v52 = vmax.bf16 %v10963_v12, %v13076_v32  ;;  %v6030_v20 = vrot.slane %v6519_v60, 11 }
 0x2ef   : > { %13074 = vst [vmem:[#allocation9_spill] sm:$0xff] %v10982_v19  ;;  %13075 = vst [vmem:[#allocation8_spill] sm:$0xff] %v10984_v1  ;;  %v4313_v40 = vmax.bf16 %v10970_v45, %v13077_v54  ;;  %v4315_v5 = vmax.bf16 %v10974_v30, %v10963_v12  ;;  %v4316_v21 = vmax.bf16 %v10980_v63, %v10970_v45  ;;  %v350_v11 = vrot.slane %v6520_v31, 7 }
 0x2f0   : > { %v13080_v37 = vmax.bf16 %v13076_v32, %v13079_v26  ;;  %v13083_v62 = vmax.bf16 %v13077_v54, %v13082_v23  ;;  %v4348_v43 = vmax.bf16 %v4312_v52, %v10974_v30  ;;  %v13088_v2 = vmax.bf16 %v13087_v7, %v13076_v32  ;;  %v13097_v7 = vld [vmem:[#allocation33_spill] sm:$0xff] }
 0x2f1   : > { %v4349_v59 = vmax.bf16 %v4313_v40, %v10980_v63  ;;  %v4351_v56 = vmax.bf16 %v4315_v5, %v10982_v19  ;;  %v4352_v61 = vmax.bf16 %v4316_v21, %v10984_v1  ;;  %v13090_v10 = vmax.bf16 %v13089_v50, %v13077_v54  ;;  %v6522_v5 = vld [vmem:[%s6633_s30 + $0xd0] sm:$0xf] }
 0x2f2   : > { %v11002_v22 = vmax.bf16 %v13080_v37, %v10963_v12  ;;  %v11008_v57 = vmax.bf16 %v13083_v62, %v10970_v45  ;;  %v11026_v39 = vmax.bf16 %v13088_v2, %v10963_v12  ;;  %v4384_v17 = vmax.bf16 %v4348_v43, %v10982_v19  ;;  %v6523_v62 = vld [vmem:[%s6633_s30 + $0xd4] sm:$0xf]  ;;  %v13098_v2 = vld [vmem:[#allocation41_spill] sm:$0xff] }
 0x2f3   : > { %v4385_v42 = vmax.bf16 %v4349_v59, %v10984_v1  ;;  %v4387_v47 = vmax.bf16 %v4351_v56, %v4276_v6  ;;  %v11034_v16 = vmax.bf16 %v13090_v10, %v10970_v45  ;;  %v4388_v38 = vmax.bf16 %v4352_v61, %v4277_v8  ;;  %v6524_v59 = vld [vmem:[%s6633_s30 + $0xd8] sm:$0xf]  ;;  %v13096_v61 = vld [vmem:[#allocation34_spill] sm:$0xff] }
 0x2f4   : > { %13081 = vst [vmem:[#allocation38_spill] sm:$0xff] %v11002_v22  ;;  %13084 = vst [vmem:[#allocation69_spill] sm:$0xff] %v11008_v57  ;;  %v353_v53 = vrot.slane %v6521_v28, 7  ;;  %v11039_v32 = vmax.bf16 %v4384_v17, %v4276_v6  ;;  %v6031_v21 = vrot.slane %v6522_v5, 11  ;;  %v351_v37 = vsel %vm8821_vm15, %v6030_v20, %v350_v11  ;;  %v13099_v17 = vld [vmem:[#allocation70_spill] sm:$0xff] }
 0x2f5   : > { %v11041_v52 = vmax.bf16 %v4385_v42, %v4277_v8  ;;  %v11043_v40 = vmax.bf16 %v4387_v47, %v4279_v33  ;;  %v11046_v54 = vmax.bf16 %v4388_v38, %v4280_v25  ;;  %v352_v23 = vrot.slane %v350_v11, 4  ;;  %v13100_v38 = vld [vmem:[#allocation68_spill] sm:$0xff] }
 0x2f6   : > { %13091 = vst [vmem:[#allocation53_spill] sm:$0xff] %v11039_v32  ;;  %v357_v43 = vrot.slane %v6523_v62, 7  ;;  %v360_v56 = vrot.slane %v6524_v59, 7  ;;  %v4362_v6 = vmax.bf16 %v13097_v7, %v13096_v61  ;;  %v6144_v8 = vrot.slane %v13098_v2, 9 }
 0x2f7   : > { %13092 = vst [vmem:[#allocation35_spill] sm:$0xff] %v11041_v52  ;;  %13093 = vst [vmem:[#allocation71_spill] sm:$0xff] %v11043_v40  ;;  %v4452_v33 = vrot.slane %v13099_v17, 5  ;;  %v354_v42 = vsel %vm8821_vm15, %v352_v23, %v353_v53  ;;  %v4733_v50 = vshrl.u32 %v13098_v2, 16  ;;  %v4736_v62 = vshll.u32 %v13098_v2, 16 }
 0x2f8   : > { %13094 = vst [vmem:[#allocation37_spill] sm:$0xff] %v11046_v54  ;;  %v358_v25 = vsel %vm8821_vm15, %v6031_v21, %v357_v43  ;;  %v359_v47 = vrot.slane %v357_v43, 4  ;;  %v6108_v10 = vcombine.low %v351_v37, %v354_v42  ;;  %v4398_v60 = vmax.bf16 %v4362_v6, %v13100_v38 }
 0x2f9   : > { %v4453_v31 = vsel %vm7312_vm5, %v6144_v8, %v4452_v33  ;;  %v4454_v11 = vrot.slane %v4452_v33, 4  ;;  %v4735_v5 = vrot.slane %v4733_v50, 4  ;;  %v4742_v53 = vshll.u32 %v13099_v17, 16 }
 0x2fa   : > { %v361_v28 = vsel %vm8821_vm15, %v359_v47, %v360_v56  ;;  %6325 = vmatprep.mubr.msk.bf16.mxu1 %vm2707_vm12, %v6108_v10  ;;  %v4455_v23 = vrot.slane %v4398_v60, 5  ;;  %v4746_v37 = vshrl.u32 %v13099_v17, 16  ;;  %v4752_v43 = vshll.u32 %v4398_v60, 16 }
 0x2fb   : > { %v6109_v21 = vcombine.low %v358_v25, %v361_v28  ;;  %v4738_v59 = vrot.slane %v4736_v62, 5  ;;  %v4744_v7 = vrot.slane %v4742_v53, 5  ;;  %v5138_v6 = vrot.slane %v4733_v50, 5 }
 0x2fc   : > { %v5139_v8 = vrot.slane %v4736_v62, 6  ;;  %v4456_v26 = vsel %vm7312_vm5, %v4454_v11, %v4455_v23  ;;  %v4748_v56 = vrot.slane %v4746_v37, 4  ;;  %v4754_v33 = vrot.slane %v4752_v43, 5 }
 0x2fd   : > { %6326 = vmatmul.mubr.msk.bf16.gmra.mxu1 %vm2707_vm12, %v6109_v21  ;;  %v5142_v42 = vrot.slane %v4746_v37, 5  ;;  %v6156_v47 = vcombine.low %v4453_v31, %v4456_v26  ;;  %v4739_v18 = vor.u32 %v4738_v59, %v4735_v5  ;;  %v5143_v25 = vrot.slane %v4742_v53, 6  ;;  %v13102_v37 = vld [vmem:[#allocation27_spill] sm:$0xff] }
 0x2fe   : > { %v5140_v10 = vor.u32 %v5139_v8, %v5138_v6  ;;  %v4749_v28 = vor.u32 %v4748_v56, %v4744_v7  ;;  %v5147_v51 = vshrl.u32 %v4398_v60, 16  ;;  %v5150_v46 = vrot.slane %v4752_v43, 6 }
 0x2ff   : > { %v6180_v0 = vrot.slane %v13098_v2, 10  ;;  %6333 = vmatprep.mubr.msk.bf16.mxu0 %vm2707_vm12, %v6156_v47  ;;  %v4740_v50 = vrot.slane %v4739_v18, 4  ;;  %v5144_v21 = vor.u32 %v5143_v25, %v5142_v42  ;;  %v5352_v14 = vrot.slane %v13099_v17, 6  ;;  %v13104_v42 = vld [vmem:[#allocation29_spill] sm:$0xff] }
 0x300   : > { %v5141_v62 = vrot.slane %v5140_v10, 4  ;;  %v4750_v11 = vrot.slane %v4749_v28, 4  ;;  %v5149_v23 = vrot.slane %v5147_v51, 5  ;;  %v5355_v55 = vrot.slane %v4398_v60, 6  ;;  %v13105_v10 = vld [vmem:[#allocation32_spill] sm:$0xff] }
 0x301   : > { %v6145_v15 = vrot.slane %v13102_v37, 9  ;;  %v4745_v53 = vsel %vm6694_vm2, %v4740_v50, %v4744_v7  ;;  %v5146_v59 = vrot.slane %v5144_v21, 4  ;;  %v5353_v6 = vsel %vm7964_vm11, %v6180_v0, %v5352_v14 }
 0x302   : > { %v5145_v43 = vsel %vm7539_vm8, %v5141_v62, %v5144_v21  ;;  %v4755_v18 = vsel %vm6694_vm2, %v4750_v11, %v4754_v33  ;;  %v5000_v8 = vmax.bf16 %v4745_v53, %v13098_v2  ;;  %v5151_v56 = vor.u32 %v5150_v46, %v5149_v23  ;;  %v13106_v23 = vld [vmem:[#allocation11_spill] sm:$0xff] }
 0x303   : > { %v5354_v51 = vrot.slane %v5352_v14, 4  ;;  %v5001_v60 = vmax.bf16 %v4755_v18, %v13099_v17  ;;  %v4459_v47 = vrot.slane %v13104_v42, 5  ;;  %v4462_v7 = vrot.slane %v13105_v10, 5 }
 0x304   : > { %v12281_v25 = vshrl.u32 %v13102_v37, 16  ;;  %v5088_v28 = vmax.bf16 %v5000_v8, %v4453_v31  ;;  %v5152_v50 = vsel %vm7539_vm8, %v5146_v59, %v5151_v56  ;;  %v12280_v33 = vshll.u32 %v13102_v37, 16 }
 0x305   : > { %v5356_v0 = vsel %vm7964_vm11, %v5354_v51, %v5355_v55  ;;  %v5089_v2 = vmax.bf16 %v5001_v60, %v4456_v26  ;;  %v11097_v46 = vsel %vm7312_vm5, %v6145_v15, %v4459_v47  ;;  %v4461_v14 = vrot.slane %v4459_v47, 4 }
 0x306   : > { %v4759_v17 = vrot.slane %v12281_v25, 4  ;;  %v5316_v62 = vmax.bf16 %v5145_v43, %v5088_v28  ;;  %v4762_v31 = vrot.slane %v12280_v33, 5  ;;  %v12278_v21 = vshll.u32 %v13104_v42, 16 }
 0x307   : > { %v12279_v11 = vshrl.u32 %v13104_v42, 16  ;;  %v5317_v55 = vmax.bf16 %v5152_v50, %v5089_v2  ;;  %v11107_v26 = vsel %vm7312_vm5, %v4461_v14, %v4462_v7  ;;  %v12277_v15 = vshll.u32 %v13105_v10, 16  ;;  %v13107_v7 = vld [vmem:[#allocation44_spill] sm:$0xff]  ;;  %v13108_v50 = vld [vmem:[#allocation45_spill] sm:$0xff] }
 0x308   : > { %v4296_v53 = vmax.bf16 %v13096_v61, %v13106_v23  ;;  %v11112_v59 = vmax.bf16 %v5353_v6, %v5316_v62  ;;  %v6157_v43 = vcombine.low %v11097_v46, %v11107_v26  ;;  %v4763_v18 = vor.u32 %v4762_v31, %v4759_v17 }
 0x309   : > { %v4768_v8 = vrot.slane %v12278_v21, 5  ;;  %v11118_v56 = vmax.bf16 %v5356_v0, %v5317_v55  ;;  %v4772_v51 = vrot.slane %v12279_v11, 4  ;;  %v4778_v60 = vrot.slane %v12277_v15, 5  ;;  %v13109_v0 = vld [vmem:[#allocation26_spill] sm:$0xff] }
 0x30a   : > { %v4332_v47 = vmax.bf16 %v4296_v53, %v13100_v38  ;;  %6334 = vmatmul.mubr.msk.bf16.vlgmr.msra.gmra.mxu0 %vm2707_vm12, %v6157_v43  ;;  %v4764_v6 = vrot.slane %v4763_v18, 4  ;;  %v6146_v28 = vrot.slane %v13107_v7, 9  ;;  %v4466_v2 = vrot.slane %v13108_v50, 5  ;;  %v13110_v15 = vld [vmem:[#allocation42_spill] sm:$0xff] }
 0x30b   : > { %v4781_v14 = vshrl.u32 %v13107_v7, 16  ;;  %v4773_v17 = vor.u32 %v4772_v51, %v4768_v8  ;;  %v4784_v31 = vshll.u32 %v13107_v7, 16  ;;  %v4790_v55 = vshll.u32 %v13108_v50, 16 }
 0x30c   : > { %v4368_v62 = vmax.bf16 %v4332_v47, %v13109_v0  ;;  %v4769_v23 = vsel %vm6694_vm2, %v4764_v6, %v4768_v8  ;;  %v4467_v53 = vsel %vm7312_vm5, %v6146_v28, %v4466_v2  ;;  %v4468_v43 = vrot.slane %v4466_v2, 4 }
 0x30d   : > { %v4783_v18 = vrot.slane %v4781_v14, 4  ;;  %v4774_v24 = vrot.slane %v4773_v17, 4  ;;  %v11137_v48 = vmax.bf16 %v4769_v23, %v13102_v37  ;;  %v4786_v21 = vrot.slane %v4784_v31, 5 }
 0x30e   : > { %v4404_v51 = vmax.bf16 %v4368_v62, %v13110_v15  ;;  %v4792_v47 = vrot.slane %v4790_v55, 5  ;;  %v4794_v11 = vshrl.u32 %v13108_v50, 16  ;;  %v5168_v33 = vrot.slane %v4781_v14, 5 }
 0x30f   : > { %v5169_v25 = vrot.slane %v4784_v31, 6  ;;  %v4779_v8 = vsel %vm6694_vm2, %v4774_v24, %v4778_v60  ;;  %v4787_v2 = vor.u32 %v4786_v21, %v4783_v18  ;;  %v5173_v31 = vrot.slane %v4790_v55, 6 }
 0x310   : > { %v4469_v28 = vrot.slane %v4404_v51, 5  ;;  %v11146_v17 = vmax.bf16 %v4779_v8, %v13104_v42  ;;  %v4796_v23 = vrot.slane %v4794_v11, 4  ;;  %v4800_v54 = vshll.u32 %v4404_v51, 16 }
 0x311   : > { %v5170_v62 = vor.u32 %v5169_v25, %v5168_v33  ;;  %v4788_v35 = vrot.slane %v4787_v2, 4  ;;  %v5172_v14 = vrot.slane %v4794_v11, 5  ;;  %v5177_v52 = vshrl.u32 %v4404_v51, 16 }
 0x312   : > { %v4470_v40 = vsel %vm7312_vm5, %v4468_v43, %v4469_v28  ;;  %v4797_v27 = vor.u32 %v4796_v23, %v4792_v47  ;;  %v4802_v6 = vrot.slane %v4800_v54, 5  ;;  %v5180_v43 = vrot.slane %v4800_v54, 6 }
 0x313   : > { %v6158_v60 = vcombine.low %v4467_v53, %v4470_v40  ;;  %v4793_v21 = vsel %vm6694_vm2, %v4788_v35, %v4792_v47  ;;  %v5171_v18 = vrot.slane %v5170_v62, 4  ;;  %v5174_v8 = vor.u32 %v5173_v31, %v5172_v14 }
 0x314   : > { %v4798_v25 = vrot.slane %v4797_v27, 4  ;;  %v5004_v33 = vmax.bf16 %v4793_v21, %v13107_v7  ;;  %v6182_v11 = vrot.slane %v13107_v7, 10  ;;  %v5179_v2 = vrot.slane %v5177_v52, 5  ;;  %v13111_v21 = vld [vmem:[#allocation5_spill] sm:$0xff] }
 0x315   : > { %6337 = vmatprep.mubr.msk.bf16.mxu0 %vm2707_vm12, %v6158_v60  ;;  %v5175_v55 = vsel %vm7539_vm8, %v5171_v18, %v5174_v8  ;;  %v5176_v28 = vrot.slane %v5174_v8, 4  ;;  %v5366_v23 = vrot.slane %v13108_v50, 6  ;;  %v5369_v62 = vrot.slane %v4404_v51, 6  ;;  %v13112_v8 = vld [vmem:[#allocation51_spill] sm:$0xff] }
 0x316   : > { %v4803_v35 = vsel %vm6694_vm2, %v4798_v25, %v4802_v6  ;;  %v5092_v47 = vmax.bf16 %v5004_v33, %v4467_v53  ;;  %v4299_v27 = vmax.bf16 %v13100_v38, %v13096_v61  ;;  %v5181_v54 = vor.u32 %v5180_v43, %v5179_v2 }
 0x317   : > { %v5005_v14 = vmax.bf16 %v4803_v35, %v13108_v50  ;;  %v5367_v7 = vsel %vm7964_vm11, %v6182_v11, %v5366_v23  ;;  %v5368_v31 = vrot.slane %v5366_v23, 4  ;;  %v6147_v18 = vrot.slane %v13111_v21, 9 }
 0x318   : > { %v5320_v60 = vmax.bf16 %v5175_v55, %v5092_v47  ;;  %v4335_v52 = vmax.bf16 %v4299_v27, %v13109_v0  ;;  %v4473_v24 = vrot.slane %v13112_v8, 5  ;;  %v5182_v53 = vsel %vm7539_vm8, %v5176_v28, %v5181_v54  ;;  %v13113_v28 = vld [vmem:[#allocation2_spill] sm:$0xff] }
 0x319   : > { %v5093_v6 = vmax.bf16 %v5005_v14, %v4470_v40  ;;  %v5370_v61 = vsel %vm7964_vm11, %v5368_v31, %v5369_v62  ;;  %v4805_v50 = vshrl.u32 %v13111_v21, 16  ;;  %v4808_v40 = vshll.u32 %v13111_v21, 16 }
 0x31a   : > { %v11175_v51 = vmax.bf16 %v5367_v7, %v5320_v60  ;;  %v4371_v25 = vmax.bf16 %v4335_v52, %v13110_v15  ;;  %v4474_v33 = vsel %vm7312_vm5, %v6147_v18, %v4473_v24  ;;  %v4475_v43 = vrot.slane %v4473_v24, 4 }
 0x31b   : > { %v5321_v11 = vmax.bf16 %v5182_v53, %v5093_v6  ;;  %v4807_v55 = vrot.slane %v4805_v50, 4  ;;  %v4814_v2 = vshll.u32 %v13112_v8, 16  ;;  %v4818_v35 = vshrl.u32 %v13112_v8, 16 }
 0x31c   : > { %v4407_v23 = vmax.bf16 %v4371_v25, %v13113_v28  ;;  %v5183_v47 = vrot.slane %v4805_v50, 5  ;;  %v6183_v62 = vrot.slane %v13111_v21, 10  ;;  %v4810_v14 = vrot.slane %v4808_v40, 5 }
 0x31d   : > { %v11185_v27 = vmax.bf16 %v5370_v61, %v5321_v11  ;;  %v4816_v54 = vrot.slane %v4814_v2, 5  ;;  %v5184_v7 = vrot.slane %v4808_v40, 6  ;;  %v4820_v24 = vrot.slane %v4818_v35, 4 }
 0x31e   : > { %v4476_v31 = vrot.slane %v4407_v23, 5  ;;  %v4824_v60 = vshll.u32 %v4407_v23, 16  ;;  %v5187_v52 = vrot.slane %v4818_v35, 5  ;;  %v4811_v18 = vor.u32 %v4810_v14, %v4807_v55  ;;  %v13114_v35 = vld [vmem:[#allocation62_spill] sm:$0xff] }
 0x31f   : > { %v5185_v6 = vor.u32 %v5184_v7, %v5183_v47  ;;  %v5188_v53 = vrot.slane %v4814_v2, 6  ;;  %v5192_v32 = vshrl.u32 %v4407_v23, 16  ;;  %v4821_v34 = vor.u32 %v4820_v24, %v4816_v54  ;;  %v13115_v47 = vld [vmem:[#allocation36_spill] sm:$0xff] }
 0x320   : > { %v4477_v25 = vsel %vm7312_vm5, %v4475_v43, %v4476_v31  ;;  %v4826_v50 = vrot.slane %v4824_v60, 5  ;;  %v5195_v13 = vrot.slane %v4824_v60, 6  ;;  %v4812_v61 = vrot.slane %v4811_v18, 4  ;;  %v13116_v24 = vld [vmem:[#allocation28_spill] sm:$0xff] }
 0x321   : > { %v6159_v57 = vcombine.low %v4474_v33, %v4477_v25  ;;  %v5186_v11 = vrot.slane %v5185_v6, 4  ;;  %v5189_v1 = vor.u32 %v5188_v53, %v5187_v52  ;;  %v4822_v22 = vrot.slane %v4821_v34, 4  ;;  %v13118_v6 = vld [vmem:[#allocation12_spill] sm:$0xff] }
 0x322   : > { %v5194_v40 = vrot.slane %v5192_v32, 5  ;;  %v5373_v19 = vrot.slane %v13112_v8, 6  ;;  %v5376_v58 = vrot.slane %v4407_v23, 6  ;;  %v4817_v55 = vsel %vm6694_vm2, %v4812_v61, %v4816_v54 }
 0x323   : > { %6338 = vmatmul.mubr.msk.bf16.gmra.mxu0 %vm2707_vm12, %v6159_v57  ;;  %v5190_v43 = vsel %vm7539_vm8, %v5186_v11, %v5189_v1  ;;  %v5191_v2 = vrot.slane %v5189_v1, 4  ;;  %v4691_v14 = vor.u32 %v13115_v47, %v13114_v35  ;;  %v4827_v7 = vsel %vm6694_vm2, %v4822_v22, %v4826_v50  ;;  %v13119_v22 = vld [vmem:[#allocation64_spill] sm:$0xff]  ;;  %v13121_v35 = vld [vmem:[#allocation43_spill] sm:$0xff] }
 0x324   : > { %v5006_v34 = vmax.bf16 %v4817_v55, %v13111_v21  ;;  %v5196_v32 = vor.u32 %v5195_v13, %v5194_v40  ;;  %v5374_v23 = vsel %vm7964_vm11, %v6183_v62, %v5373_v19  ;;  %v5007_v57 = vmax.bf16 %v4827_v7, %v13112_v8 }
 0x325   : > { %v5375_v31 = vrot.slane %v5373_v19, 4  ;;  %v4692_v54 = vrot.slane %v4691_v14, 4  ;;  %v13117_v60 = vshll.u32 %v13116_v24, 16  ;;  %v4704_v53 = vshll.u32 %v13118_v6, 16  ;;  %v13120_v19 = vld [vmem:[#allocation63_spill] sm:$0xff] }
 0x326   : > { %v5094_v1 = vmax.bf16 %v5006_v34, %v4474_v33  ;;  %v5197_v18 = vsel %vm7539_vm8, %v5191_v2, %v5196_v32  ;;  %v4709_v50 = vshrl.u32 %v13119_v22, 16  ;;  %v5095_v21 = vmax.bf16 %v5007_v57, %v4477_v25  ;;  %v13123_v32 = vld [vmem:[#allocation61_spill] sm:$0xff] }
 0x327   : > { %v4696_v52 = vrot.slane %v13117_v60, 5  ;;  %v5377_v13 = vsel %vm7964_vm11, %v5375_v31, %v5376_v58  ;;  %v4706_v11 = vrot.slane %v4704_v53, 5  ;;  %v4712_v33 = vshll.u32 %v13119_v22, 16  ;;  %v13122_v58 = vld [vmem:[#allocation67_spill] sm:$0xff] }
 0x328   : > { %v5322_v61 = vmax.bf16 %v5190_v43, %v5094_v1  ;;  %v4711_v40 = vrot.slane %v4709_v50, 4  ;;  %v5323_v55 = vmax.bf16 %v5197_v18, %v5095_v21  ;;  %v4718_v47 = vshll.u32 %v13121_v35, 16 }
 0x329   : > { %v4697_v8 = vsel %vm6694_vm2, %v4692_v54, %v4696_v52  ;;  %v4701_v62 = vor.u32 %v13120_v19, %v4696_v52  ;;  %v4722_v14 = vshrl.u32 %v13121_v35, 16  ;;  %v4714_v7 = vrot.slane %v4712_v33, 5 }
 0x32a   : > { %v11217_v25 = vmax.bf16 %v5374_v23, %v5322_v61  ;;  %v4728_v34 = vshll.u32 %v13122_v58, 16  ;;  %v11221_v57 = vmax.bf16 %v4697_v8, %v13123_v32  ;;  %v11223_v31 = vmax.bf16 %v5377_v13, %v5323_v55 }
 0x32b   : > { %v4702_v2 = vrot.slane %v4701_v62, 4  ;;  %v4720_v54 = vrot.slane %v4718_v47, 5  ;;  %v4724_v60 = vrot.slane %v4722_v14, 4  ;;  %v4715_v52 = vor.u32 %v4714_v7, %v4711_v40 }
 0x32c   : > { %v4730_v1 = vrot.slane %v4728_v34, 5  ;;  %v6174_v23 = vrot.slane %v13123_v32, 9  ;;  %v5034_v19 = vrot.slane %v13116_v24, 5  ;;  %v5037_v62 = vrot.slane %v13118_v6, 5 }
 0x32d   : > { %v4707_v43 = vsel %vm6694_vm2, %v4702_v2, %v4706_v11  ;;  %v4725_v21 = vor.u32 %v4724_v60, %v4720_v54  ;;  %v6175_v8 = vrot.slane %v13119_v22, 9  ;;  %v4716_v13 = vrot.slane %v4715_v52, 4 }
 0x32e   : > { %v4997_v18 = vmax.bf16 %v4707_v43, %v13116_v24  ;;  %v5041_v61 = vrot.slane %v13121_v35, 5  ;;  %v5044_v11 = vrot.slane %v13122_v58, 5  ;;  %v13124_v55 = vshrl.u32 %v13123_v32, 16 }
 0x32f   : > { %v4726_v2 = vrot.slane %v4725_v21, 4  ;;  %v5035_v7 = vsel %vm7312_vm5, %v6174_v23, %v5034_v19  ;;  %v5036_v43 = vrot.slane %v5034_v19, 4  ;;  %v13125_v60 = vshll.u32 %v13123_v32, 16 }
 0x330   : > { %v5108_v40 = vrot.slane %v13124_v55, 5  ;;  %v4721_v45 = vsel %vm6694_vm2, %v4716_v13, %v4720_v54  ;;  %v5042_v52 = vsel %vm7312_vm5, %v6175_v8, %v5041_v61  ;;  %v5043_v29 = vrot.slane %v5041_v61, 4 }
 0x331   : > { %v5109_v9 = vrot.slane %v13125_v60, 6  ;;  %v5084_v63 = vmax.bf16 %v5035_v7, %v11221_v57  ;;  %v4731_v55 = vsel %vm6694_vm2, %v4726_v2, %v4730_v1  ;;  %v4998_v21 = vmax.bf16 %v4721_v45, %v13119_v22 }
 0x332   : > { %v5038_v23 = vsel %vm7312_vm5, %v5036_v43, %v5037_v62  ;;  %v4999_v60 = vmax.bf16 %v4731_v55, %v13121_v35  ;;  %v5045_v54 = vsel %vm7312_vm5, %v5043_v29, %v5044_v11  ;;  %v13126_v8 = vshrl.u32 %v13116_v24, 16 }
 0x333   : > { %v5110_v19 = vor.u32 %v5109_v9, %v5108_v40  ;;  %v5085_v13 = vmax.bf16 %v5038_v23, %v4997_v18  ;;  %v5086_v12 = vmax.bf16 %v5042_v52, %v4998_v21  ;;  %v13127_v7 = vshll.u32 %v13116_v24, 16 }
 0x334   : > { %v5112_v61 = vrot.slane %v13126_v8, 5  ;;  %v5117_v45 = vshrl.u32 %v13118_v6, 16  ;;  %v5087_v2 = vmax.bf16 %v5045_v54, %v4999_v60  ;;  %v5120_v49 = vrot.slane %v4704_v53, 6 }
 0x335   : > { %v5111_v57 = vrot.slane %v5110_v19, 4  ;;  %v5113_v1 = vrot.slane %v13127_v7, 6  ;;  %v5123_v62 = vrot.slane %v4709_v50, 5  ;;  %v5124_v9 = vrot.slane %v4712_v33, 6 }
 0x336   : > { %v5119_v43 = vrot.slane %v5117_v45, 5  ;;  %v5127_v55 = vrot.slane %v4722_v14, 5  ;;  %v5128_v30 = vrot.slane %v4718_v47, 6  ;;  %v5132_v18 = vshrl.u32 %v13122_v58, 16 }
 0x337   : > { %v5114_v40 = vor.u32 %v5113_v1, %v5112_v61  ;;  %v5125_v29 = vor.u32 %v5124_v9, %v5123_v62  ;;  %v5135_v11 = vrot.slane %v4728_v34, 6  ;;  %v13128_v52 = vshrl.u32 %v13102_v37, 16 }
 0x338   : > { %v5121_v8 = vor.u32 %v5120_v49, %v5119_v43  ;;  %v5129_v60 = vor.u32 %v5128_v30, %v5127_v55  ;;  %v5134_v50 = vrot.slane %v5132_v18, 5  ;;  %v13129_v33 = vshll.u32 %v13102_v37, 16 }
 0x339   : > { %v5153_v21 = vrot.slane %v13128_v52, 5  ;;  %v5115_v23 = vsel %vm7539_vm8, %v5111_v57, %v5114_v40  ;;  %v5116_v19 = vrot.slane %v5114_v40, 4  ;;  %v5126_v53 = vrot.slane %v5125_v29, 4 }
 0x33a   : > { %v5154_v54 = vrot.slane %v13129_v33, 6  ;;  %v13130_v47 = vshrl.u32 %v13104_v42, 16  ;;  %v5131_v61 = vrot.slane %v5129_v60, 4  ;;  %v13131_v7 = vshll.u32 %v13104_v42, 16 }
 0x33b   : > { %v5122_v34 = vsel %vm7539_vm8, %v5116_v19, %v5121_v8  ;;  %v5162_v57 = vshrl.u32 %v13105_v10, 16  ;;  %v5130_v30 = vsel %vm7539_vm8, %v5126_v53, %v5129_v60  ;;  %v5136_v49 = vor.u32 %v5135_v11, %v5134_v50 }
 0x33c   : > { %v5157_v14 = vrot.slane %v13130_v47, 5  ;;  %v5158_v1 = vrot.slane %v13131_v7, 6  ;;  %v5155_v45 = vor.u32 %v5154_v54, %v5153_v21  ;;  %v13132_v62 = vshll.u32 %v13105_v10, 16 }
 0x33d   : > { %v5164_v43 = vrot.slane %v5162_v57, 5  ;;  %v5312_v55 = vmax.bf16 %v5115_v23, %v5084_v63  ;;  %v5313_v29 = vmax.bf16 %v5122_v34, %v5085_v13  ;;  %v5137_v18 = vsel %vm7539_vm8, %v5131_v61, %v5136_v49 }
 0x33e   : > { %v5165_v9 = vrot.slane %v13132_v62, 6  ;;  %v5159_v40 = vor.u32 %v5158_v1, %v5157_v14  ;;  %v5156_v52 = vrot.slane %v5155_v45, 4  ;;  %v5314_v19 = vmax.bf16 %v5130_v30, %v5086_v12 }
 0x33f   : > { %v6178_v8 = vrot.slane %v13123_v32, 10  ;;  %v5315_v7 = vmax.bf16 %v5137_v18, %v5087_v2  ;;  %v5338_v11 = vrot.slane %v13116_v24, 6  ;;  %v5341_v60 = vrot.slane %v13118_v6, 6  ;;  %v13136_v18 = vld [vmem:[#allocation40_spill] sm:$0xff] }
 0x340   : > { %v5161_v33 = vrot.slane %v5159_v40, 4  ;;  %v5166_v47 = vor.u32 %v5165_v9, %v5164_v43  ;;  %v5160_v21 = vsel %vm7539_vm8, %v5156_v52, %v5159_v40  ;;  %v6179_v63 = vrot.slane %v13119_v22, 10 }
 0x341   : > { %v5345_v13 = vrot.slane %v13121_v35, 6  ;;  %v13133_v12 = vmax.bf16 %v11137_v48, %v11097_v46  ;;  %v5339_v2 = vsel %vm7964_vm11, %v6178_v8, %v5338_v11  ;;  %v5340_v24 = vrot.slane %v5338_v11, 4 }
 0x342   : > { %v5167_v23 = vsel %vm7539_vm8, %v5161_v33, %v5166_v47  ;;  %v13134_v53 = vmax.bf16 %v11146_v17, %v11107_v26  ;;  %v5348_v35 = vrot.slane %v13122_v58, 6  ;;  %v6181_v48 = vrot.slane %v13102_v37, 10 }
 0x343   : > { %v5318_v32 = vmax.bf16 %v5160_v21, %v13133_v12  ;;  %v5346_v6 = vsel %vm7964_vm11, %v6179_v63, %v5345_v13  ;;  %v5347_v22 = vrot.slane %v5345_v13, 4  ;;  %v5342_v54 = vsel %vm7964_vm11, %v5340_v24, %v5341_v60 }
 0x344   : > { %v5319_v50 = vmax.bf16 %v5167_v23, %v13134_v53  ;;  %v5359_v46 = vrot.slane %v13104_v42, 6  ;;  %v5362_v14 = vrot.slane %v13105_v10, 6  ;;  %v5444_v26 = vmax.bf16 %v5339_v2, %v5312_v55  ;;  %v13135_v10 = vld [vmem:[#allocation50_spill] sm:$0xff] }
 0x345   : > { %v5349_v34 = vsel %vm7964_vm11, %v5347_v22, %v5348_v35  ;;  %v5445_v17 = vmax.bf16 %v5342_v54, %v5313_v29  ;;  %v5446_v61 = vmax.bf16 %v5346_v6, %v5314_v19  ;;  %v4302_v30 = vmax.bf16 %v13109_v0, %v13100_v38 }
 0x346   : > { %v5360_v1 = vsel %vm7964_vm11, %v6181_v48, %v5359_v46  ;;  %v5361_v57 = vrot.slane %v5359_v46, 4  ;;  %v5447_v58 = vmax.bf16 %v5349_v34, %v5315_v7  ;;  %v6148_v45 = vrot.slane %v13135_v10, 9 }
 0x347   : > { %v11309_v49 = vmax.bf16 %v5360_v1, %v5318_v32  ;;  %v5468_v37 = vmax.bf16 %v5446_v61, %v5444_v26  ;;  %v5470_v42 = vmax.bf16 %v11112_v59, %v5446_v61  ;;  %v4338_v43 = vmax.bf16 %v4302_v30, %v13110_v15 }
 0x348   : > { %v5363_v62 = vsel %vm7964_vm11, %v5361_v57, %v5362_v14  ;;  %v5469_v9 = vmax.bf16 %v5447_v58, %v5445_v17  ;;  %v5471_v40 = vmax.bf16 %v11118_v56, %v5447_v58  ;;  %v4480_v52 = vrot.slane %v13136_v18, 5 }
 0x349   : > { %v11317_v55 = vmax.bf16 %v5363_v62, %v5319_v50  ;;  %v5484_v29 = vmax.bf16 %v5468_v37, %v11112_v59  ;;  %v5486_v38 = vmax.bf16 %v5470_v42, %v11309_v49  ;;  %v4374_v8 = vmax.bf16 %v4338_v43, %v13113_v28 }
 0x34a   : > { %v5485_v19 = vmax.bf16 %v5469_v9, %v11118_v56  ;;  %v4829_v33 = vshrl.u32 %v13135_v10, 16  ;;  %v4832_v47 = vshll.u32 %v13135_v10, 16  ;;  %v4481_v60 = vsel %vm7312_vm5, %v6148_v45, %v4480_v52 }
 0x34b   : > { %v5487_v7 = vmax.bf16 %v5471_v40, %v11317_v55  ;;  %v5500_v11 = vmax.bf16 %v5484_v29, %v11309_v49  ;;  %v5502_v21 = vmax.bf16 %v5486_v38, %v11175_v51  ;;  %v4410_v13 = vmax.bf16 %v4374_v8, %v13078_v44 }
 0x34c   : > { %v5501_v63 = vmax.bf16 %v5485_v19, %v11317_v55  ;;  %v4482_v23 = vrot.slane %v4480_v52, 4  ;;  %v4831_v12 = vrot.slane %v4829_v33, 4  ;;  %v4834_v53 = vrot.slane %v4832_v47, 5 }
 0x34d   : > { %v5516_v32 = vmax.bf16 %v5500_v11, %v11175_v51  ;;  %v5503_v2 = vmax.bf16 %v5487_v7, %v11185_v27  ;;  %v5518_v24 = vmax.bf16 %v5502_v21, %v11217_v25  ;;  %v4483_v6 = vrot.slane %v4410_v13, 5 }
 0x34e   : > { %v5517_v50 = vmax.bf16 %v5501_v63, %v11185_v27  ;;  %v4838_v22 = vshll.u32 %v13136_v18, 16  ;;  %v4842_v35 = vshrl.u32 %v13136_v18, 16  ;;  %v4835_v48 = vor.u32 %v4834_v53, %v4831_v12 }
 0x34f   : > { %v5519_v54 = vmax.bf16 %v5503_v2, %v11223_v31  ;;  %v4848_v46 = vshll.u32 %v4410_v13, 16  ;;  %v5198_v14 = vrot.slane %v4829_v33, 5  ;;  %v4484_v26 = vsel %vm7312_vm5, %v4482_v23, %v4483_v6 }
 0x350   : > { %v6194_v34 = vcombine.low %v5516_v32, %v5517_v50  ;;  %v4840_v17 = vrot.slane %v4838_v22, 5  ;;  %v4844_v61 = vrot.slane %v4842_v35, 4  ;;  %v6160_v57 = vcombine.low %v4481_v60, %v4484_v26 }
 0x351   : > { %v6195_v1 = vcombine.low %v5518_v24, %v5519_v54  ;;  %v4836_v58 = vrot.slane %v4835_v48, 4  ;;  %v4850_v30 = vrot.slane %v4848_v46, 5  ;;  %v5199_v42 = vrot.slane %v4832_v47, 6 }
 0x352   : > { %6353 = vmatprep.mubr.msk.bf16.mxu1 %vm2707_vm12, %v6194_v34  ;;  %v4845_v37 = vor.u32 %v4844_v61, %v4840_v17  ;;  %v5202_v45 = vrot.slane %v4842_v35, 5  ;;  %v5203_v62 = vrot.slane %v4838_v22, 6  ;;  %6341 = vmatprep.mubr.msk.bf16.mxu0 %vm2707_vm12, %v6160_v57  ;;  %v5207_v40 = vshrl.u32 %v4410_v13, 16 }
 0x353   : > { %6354 = vmatmul.mubr.msk.bf16.vlgmr.msra.gmra.mxu1 %vm2707_vm12, %v6195_v1  ;;  %v4841_v9 = vsel %vm6694_vm2, %v4836_v58, %v4840_v17  ;;  %v5210_v43 = vrot.slane %v4848_v46, 6  ;;  %v6184_v29 = vrot.slane %v13135_v10, 10  ;;  %v5200_v19 = vor.u32 %v5199_v42, %v5198_v14 }
 0x354   : > { %v4846_v38 = vrot.slane %v4845_v37, 4  ;;  %v5008_v52 = vmax.bf16 %v4841_v9, %v13135_v10  ;;  %v5204_v8 = vor.u32 %v5203_v62, %v5202_v45  ;;  %v5209_v33 = vrot.slane %v5207_v40, 5 }
 0x355   : > { %v5380_v47 = vrot.slane %v13136_v18, 6  ;;  %v5383_v7 = vrot.slane %v4410_v13, 6  ;;  %v4305_v11 = vmax.bf16 %v13110_v15, %v13109_v0  ;;  %v5201_v23 = vrot.slane %v5200_v19, 4 }
 0x356   : > { %v4851_v21 = vsel %vm6694_vm2, %v4846_v38, %v4850_v30  ;;  %v5096_v63 = vmax.bf16 %v5008_v52, %v4481_v60  ;;  %v5206_v12 = vrot.slane %v5204_v8, 4  ;;  %v5211_v2 = vor.u32 %v5210_v43, %v5209_v33 }
 0x357   : > { %v5009_v32 = vmax.bf16 %v4851_v21, %v13136_v18  ;;  %v5381_v10 = vsel %vm7964_vm11, %v6184_v29, %v5380_v47  ;;  %v5382_v24 = vrot.slane %v5380_v47, 4  ;;  %v5205_v53 = vsel %vm7539_vm8, %v5201_v23, %v5204_v8 }
 0x358   : > { %v4341_v13 = vmax.bf16 %v4305_v11, %v13113_v28  ;;  %v6149_v0 = vrot.slane %v11026_v39, 9  ;;  %v4487_v50 = vrot.slane %v11034_v16, 5  ;;  %v5212_v60 = vsel %vm7539_vm8, %v5206_v12, %v5211_v2 }
 0x359   : > { %v5097_v6 = vmax.bf16 %v5009_v32, %v4484_v26  ;;  %v5324_v22 = vmax.bf16 %v5205_v53, %v5096_v63  ;;  %v5384_v18 = vsel %vm7964_vm11, %v5382_v24, %v5383_v7  ;;  %v4853_v46 = vshrl.u32 %v11026_v39, 16 }
 0x35a   : > { %v4377_v35 = vmax.bf16 %v4341_v13, %v13078_v44  ;;  %v4488_v54 = vsel %vm7312_vm5, %v6149_v0, %v4487_v50  ;;  %v4489_v48 = vrot.slane %v4487_v50, 4  ;;  %v4856_v26 = vshll.u32 %v11026_v39, 16 }
 0x35b   : > { %v5325_v14 = vmax.bf16 %v5212_v60, %v5097_v6  ;;  %v11370_v34 = vmax.bf16 %v5381_v10, %v5324_v22  ;;  %v4862_v17 = vshll.u32 %v11034_v16, 16  ;;  %v4855_v1 = vrot.slane %v4853_v46, 4 }
 0x35c   : > { %v4413_v61 = vmax.bf16 %v4377_v35, %v10972_v4  ;;  %v4866_v57 = vshrl.u32 %v11034_v16, 16  ;;  %v5213_v58 = vrot.slane %v4853_v46, 5  ;;  %v4858_v37 = vrot.slane %v4856_v26, 5 }
 0x35d   : > { %v11376_v30 = vmax.bf16 %v5384_v18, %v5325_v14  ;;  %v4864_v42 = vrot.slane %v4862_v17, 5  ;;  %v5214_v45 = vrot.slane %v4856_v26, 6  ;;  %v5218_v52 = vrot.slane %v4862_v17, 6 }
 0x35e   : > { %v4490_v62 = vrot.slane %v4413_v61, 5  ;;  %v4868_v9 = vrot.slane %v4866_v57, 4  ;;  %v4872_v40 = vshll.u32 %v4413_v61, 16  ;;  %v5217_v43 = vrot.slane %v4866_v57, 5 }
 0x35f   : > { %v4859_v29 = vor.u32 %v4858_v37, %v4855_v1  ;;  %v5215_v38 = vor.u32 %v5214_v45, %v5213_v58  ;;  %v5222_v19 = vshrl.u32 %v4413_v61, 16  ;;  %v6185_v2 = vrot.slane %v11026_v39, 10 }
 0x360   : > { %v4491_v8 = vsel %vm7312_vm5, %v4489_v48, %v4490_v62  ;;  %v4869_v33 = vor.u32 %v4868_v9, %v4864_v42  ;;  %v4874_v47 = vrot.slane %v4872_v40, 5  ;;  %v5225_v7 = vrot.slane %v4872_v40, 6 }
 0x361   : > { %v6161_v11 = vcombine.low %v4488_v54, %v4491_v8  ;;  %v4860_v21 = vrot.slane %v4859_v29, 4  ;;  %v5216_v63 = vrot.slane %v5215_v38, 4  ;;  %v5219_v23 = vor.u32 %v5218_v52, %v5217_v43  ;;  %v13139_v29 = vld [vmem:[#allocation75_spill] sm:$0xff] }
 0x362   : > { %v4870_v12 = vrot.slane %v4869_v33, 4  ;;  %v5224_v32 = vrot.slane %v5222_v19, 5  ;;  %v5387_v10 = vrot.slane %v11034_v16, 6  ;;  %v5390_v0 = vrot.slane %v4413_v61, 6  ;;  %v13140_v33 = vld [vmem:[#allocation20_spill] sm:$0xff] }
 0x363   : > { %6342 = vmatmul.mubr.msk.bf16.gmra.mxu0 %vm2707_vm12, %v6161_v11  ;;  %v4865_v24 = vsel %vm6694_vm2, %v4860_v21, %v4864_v42  ;;  %v5220_v53 = vsel %vm7539_vm8, %v5216_v63, %v5219_v23  ;;  %v5221_v13 = vrot.slane %v5219_v23, 4  ;;  %v5472_v48 = vmax.bf16 %v11309_v49, %v11112_v59 }
 0x364   : > { %v4875_v50 = vsel %vm6694_vm2, %v4870_v12, %v4874_v47  ;;  %v5010_v6 = vmax.bf16 %v4865_v24, %v11026_v39  ;;  %v5226_v60 = vor.u32 %v5225_v7, %v5224_v32  ;;  %v5388_v22 = vsel %vm7964_vm11, %v6185_v2, %v5387_v10  ;;  %v13142_v2 = vld [vmem:[#allocation65_spill] sm:$0xff]  ;;  %v13144_v24 = vld [vmem:[#allocation31_spill] sm:$0xff] }
 0x365   : > { %v5011_v18 = vmax.bf16 %v4875_v50, %v11034_v16  ;;  %v5389_v35 = vrot.slane %v5387_v10, 4  ;;  %v5473_v46 = vmax.bf16 %v11317_v55, %v11118_v56  ;;  %v5474_v39 = vmax.bf16 %v11175_v51, %v11309_v49  ;;  %v13143_v10 = vld [vmem:[#allocation24_spill] sm:$0xff]  ;;  %v13147_v50 = vld [vmem:[#allocation57_spill] sm:$0xff] }
 0x366   : > { %v5098_v14 = vmax.bf16 %v5010_v6, %v4488_v54  ;;  %v5227_v26 = vsel %vm7539_vm8, %v5221_v13, %v5226_v60  ;;  %v5475_v17 = vmax.bf16 %v11185_v27, %v11317_v55  ;;  %v5488_v1 = vmax.bf16 %v5472_v48, %v11175_v51  ;;  %v13148_v6 = vld [vmem:[#allocation18_spill] sm:$0xff] }
 0x367   : > { %v5099_v61 = vmax.bf16 %v5011_v18, %v4491_v8  ;;  %v5391_v16 = vsel %vm7964_vm11, %v5389_v35, %v5390_v0  ;;  %v5489_v59 = vmax.bf16 %v5473_v46, %v11185_v27  ;;  %v5490_v56 = vmax.bf16 %v5474_v39, %v11217_v25  ;;  %v13146_v0 = vld [vmem:[#allocation60_spill] sm:$0xff]  ;;  %v13150_v48 = vld [vmem:[#allocation46_spill] sm:$0xff] }
 0x368   : > { %v5326_v57 = vmax.bf16 %v5220_v53, %v5098_v14  ;;  %v5491_v54 = vmax.bf16 %v5475_v17, %v11223_v31  ;;  %v13137_v58 = vshrl.u32 %v10518_v36, 16  ;;  %v5504_v42 = vmax.bf16 %v5488_v1, %v11217_v25 }
 0x369   : > { %v5327_v49 = vmax.bf16 %v5227_v26, %v5099_v61  ;;  %v5505_v55 = vmax.bf16 %v5489_v59, %v11223_v31  ;;  %v13138_v45 = vrot.slane %v10518_v36, 5  ;;  %v5506_v40 = vmax.bf16 %v5490_v56, %v11370_v34 }
 0x36a   : > { %v3360_v37 = vrot.slane %v13137_v58, 4  ;;  %v11415_v9 = vmax.bf16 %v5388_v22, %v5326_v57  ;;  %v5507_v43 = vmax.bf16 %v5491_v54, %v11376_v30  ;;  %v5520_v19 = vmax.bf16 %v5504_v42, %v11370_v34 }
 0x36b   : > { %v3673_v62 = vrot.slane %v13138_v45, 4  ;;  %v11420_v52 = vmax.bf16 %v5391_v16, %v5327_v49  ;;  %v5521_v8 = vmax.bf16 %v5505_v55, %v11376_v30  ;;  %v3975_v47 = vrot.slane %v13140_v33, 4 }
 0x36c   : > { %v3361_v38 = vor.u32 %v3360_v37, %v13139_v29  ;;  %v5522_v7 = vmax.bf16 %v5506_v40, %v11415_v9  ;;  %v13141_v21 = vrot.slane %v10518_v36, 6  ;;  %v4308_v23 = vmax.bf16 %v13113_v28, %v13110_v15 }
 0x36d   : > { %v6196_v12 = vcombine.low %v5520_v19, %v5521_v8  ;;  %v5523_v32 = vmax.bf16 %v5507_v43, %v11420_v52  ;;  %v13145_v53 = vmax.bf16 %v13143_v10, %v13144_v24  ;;  %v13149_v60 = vmax.bf16 %v13147_v50, %v13148_v6 }
 0x36e   : > { %v3362_v11 = vrot.slane %v3361_v38, 4  ;;  %v4161_v63 = vrot.slane %v13141_v21, 4  ;;  %v4344_v35 = vmax.bf16 %v4308_v23, %v13078_v44  ;;  %v13151_v15 = vshrl.u32 %v13150_v48, 16  ;;  %v13153_v23 = vld [vmem:[#allocation73_spill] sm:$0xff] }
 0x36f   : > { %v4414_v13 = vmax.bf16 %v13145_v53, %v13142_v2  ;;  %v11439_v22 = vmax.bf16 %v13149_v60, %v13146_v0  ;;  %v13152_v14 = vrot.slane %v13150_v48, 5  ;;  %6357 = vmatprep.mubr.msk.bf16.mxu1 %vm2707_vm12, %v6196_v12  ;;  %v6197_v39 = vcombine.low %v5522_v7, %v5523_v32 }
 0x370   : > { %v3536_v18 = vmax.bf16 %v3362_v11, %v10518_v36  ;;  %v3389_v46 = vrot.slane %v13151_v15, 4  ;;  %v4380_v59 = vmax.bf16 %v4344_v35, %v10972_v4 }
 0x371   : > { %v3681_v26 = vrot.slane %v13152_v14, 4  ;;  %v6150_v17 = vrot.slane %v4414_v13, 9  ;;  %v4494_v61 = vrot.slane %v11439_v22, 5  ;;  %v4877_v16 = vshrl.u32 %v4414_v13, 16  ;;  %6358 = vmatmul.mubr.msk.bf16.gmra.mxu1 %vm2707_vm12, %v6197_v39 }
 0x372   : > { %v3784_v1 = vmax.bf16 %v3673_v62, %v3536_v18  ;;  %v4880_v57 = vshll.u32 %v4414_v13, 16  ;;  %v4886_v36 = vshll.u32 %v11439_v22, 16  ;;  %v4890_v37 = vshrl.u32 %v11439_v22, 16 }
 0x373   : > { %v4495_v56 = vsel %vm7312_vm5, %v6150_v17, %v4494_v61  ;;  %v4496_v54 = vrot.slane %v4494_v61, 4  ;;  %v4879_v58 = vrot.slane %v4877_v16, 4  ;;  %v5228_v45 = vrot.slane %v4877_v16, 5 }
 0x374   : > { %v4104_v49 = vmax.bf16 %v3975_v47, %v3784_v1  ;;  %v4882_v42 = vrot.slane %v4880_v57, 5  ;;  %v4888_v55 = vrot.slane %v4886_v36, 5  ;;  %v4892_v40 = vrot.slane %v4890_v37, 4 }
 0x375   : > { %v5229_v62 = vrot.slane %v4880_v57, 6  ;;  %v5232_v43 = vrot.slane %v4890_v37, 5  ;;  %v5233_v29 = vrot.slane %v4886_v36, 6  ;;  %v6186_v8 = vrot.slane %v4414_v13, 10 }
 0x376   : > { %v11455_v38 = vmax.bf16 %v4161_v63, %v4104_v49  ;;  %v4883_v19 = vor.u32 %v4882_v42, %v4879_v58  ;;  %v5394_v33 = vrot.slane %v11439_v22, 6  ;;  %v4893_v7 = vor.u32 %v4892_v40, %v4888_v55  ;;  %v13154_v42 = vld [vmem:[#allocation23_spill] sm:$0xff] }
 0x377   : > { %v5230_v11 = vor.u32 %v5229_v62, %v5228_v45  ;;  %v5234_v21 = vor.u32 %v5233_v29, %v5232_v43  ;;  %v3390_v12 = vor.u32 %v3389_v46, %v13153_v23  ;;  %v13155_v45 = vrot.slane %v13150_v48, 6  ;;  %v13156_v43 = vld [vmem:[#allocation9_spill] sm:$0xff]  ;;  %v13157_v29 = vld [vmem:[#allocation38_spill] sm:$0xff] }
 0x378   : > { %v4416_v47 = vmax.bf16 %v4380_v59, %v11455_v38  ;;  %v4884_v32 = vrot.slane %v4883_v19, 4  ;;  %v5395_v10 = vsel %vm7964_vm11, %v6186_v8, %v5394_v33  ;;  %v5396_v24 = vrot.slane %v5394_v33, 4 }
 0x379   : > { %v4894_v53 = vrot.slane %v4893_v7, 4  ;;  %v5231_v50 = vrot.slane %v5230_v11, 4  ;;  %v5236_v63 = vrot.slane %v5234_v21, 4  ;;  %v3391_v6 = vrot.slane %v3390_v12, 4  ;;  %v13159_v7 = vld [vmem:[#allocation8_spill] sm:$0xff] }
 0x37a   : > { %v4497_v60 = vrot.slane %v4416_v47, 5  ;;  %v4889_v18 = vsel %vm6694_vm2, %v4884_v32, %v4888_v55  ;;  %v4896_v35 = vshll.u32 %v4416_v47, 16  ;;  %v5237_v15 = vshrl.u32 %v4416_v47, 16 }
 0x37b   : > { %v5012_v14 = vmax.bf16 %v4889_v18, %v4414_v13  ;;  %v5235_v46 = vsel %vm7539_vm8, %v5231_v50, %v5234_v21  ;;  %v5397_v39 = vrot.slane %v4416_v47, 6  ;;  %v3539_v17 = vmax.bf16 %v3391_v6, %v13150_v48  ;;  %v13160_v48 = vld [vmem:[#allocation69_spill] sm:$0xff] }
 0x37c   : > { %v4498_v61 = vsel %vm7312_vm5, %v4496_v54, %v4497_v60  ;;  %v4898_v16 = vrot.slane %v4896_v35, 5  ;;  %v5239_v1 = vrot.slane %v5237_v15, 5  ;;  %v5240_v59 = vrot.slane %v4896_v35, 6 }
 0x37d   : > { %v6162_v57 = vcombine.low %v4495_v56, %v4498_v61  ;;  %v5100_v36 = vmax.bf16 %v5012_v14, %v4495_v56  ;;  %v5398_v58 = vsel %vm7964_vm11, %v5396_v24, %v5397_v39  ;;  %v3787_v37 = vmax.bf16 %v3681_v26, %v3539_v17 }
 0x37e   : > { %v4899_v13 = vsel %vm6694_vm2, %v4894_v53, %v4898_v16  ;;  %v5241_v49 = vor.u32 %v5240_v59, %v5239_v1  ;;  %v3989_v55 = vrot.slane %v13154_v42, 4  ;;  %v4169_v40 = vrot.slane %v13155_v45, 4 }
 0x37f   : > { %6345 = vmatprep.mubr.msk.bf16.mxu0 %vm2707_vm12, %v6162_v57  ;;  %v5013_v54 = vmax.bf16 %v4899_v13, %v11439_v22  ;;  %v5328_v62 = vmax.bf16 %v5235_v46, %v5100_v36  ;;  %v4311_v56 = vmax.bf16 %v13078_v44, %v13113_v28  ;;  %v13158_v26 = vmax.bf16 %v13157_v29, %v13142_v2 }
 0x380   : > { %v5242_v8 = vsel %vm7539_vm8, %v5236_v63, %v5241_v49  ;;  %v4107_v33 = vmax.bf16 %v3989_v55, %v3787_v37  ;;  %v13161_v11 = vmax.bf16 %v13160_v48, %v13146_v0  ;;  %v5476_v22 = vmax.bf16 %v11217_v25, %v11175_v51 }
 0x381   : > { %v4417_v19 = vmax.bf16 %v13158_v26, %v13156_v43  ;;  %v5101_v23 = vmax.bf16 %v5013_v54, %v4498_v61  ;;  %v11492_v12 = vmax.bf16 %v5395_v10, %v5328_v62  ;;  %v4347_v28 = vmax.bf16 %v4311_v56, %v10972_v4 }
 0x382   : > { %v4418_v21 = vmax.bf16 %v13161_v11, %v13159_v7  ;;  %v11495_v2 = vmax.bf16 %v4169_v40, %v4107_v33 }
 0x383   : > { %v6151_v47 = vrot.slane %v4417_v19, 9  ;;  %v4901_v24 = vshrl.u32 %v4417_v19, 16  ;;  %v4904_v53 = vshll.u32 %v4417_v19, 16  ;;  %v5329_v50 = vmax.bf16 %v5242_v8, %v5101_v23 }
 0x384   : > { %v4501_v32 = vrot.slane %v4418_v21, 5  ;;  %v4383_v63 = vmax.bf16 %v4347_v28, %v11455_v38  ;;  %v4910_v6 = vshll.u32 %v4418_v21, 16  ;;  %v4914_v0 = vshrl.u32 %v4418_v21, 16 }
 0x385   : > { %v4903_v18 = vrot.slane %v4901_v24, 4  ;;  %v4906_v10 = vrot.slane %v4904_v53, 5  ;;  %v11500_v35 = vmax.bf16 %v5398_v58, %v5329_v50  ;;  %v5243_v17 = vrot.slane %v4901_v24, 5 }
 0x386   : > { %v4502_v60 = vsel %vm7312_vm5, %v6151_v47, %v4501_v32  ;;  %v4503_v51 = vrot.slane %v4501_v32, 4  ;;  %v4419_v15 = vmax.bf16 %v4383_v63, %v11495_v2  ;;  %v4912_v14 = vrot.slane %v4910_v6, 5 }
 0x387   : > { %v4916_v46 = vrot.slane %v4914_v0, 4  ;;  %v4907_v39 = vor.u32 %v4906_v10, %v4903_v18  ;;  %v5244_v61 = vrot.slane %v4904_v53, 6  ;;  %v5247_v16 = vrot.slane %v4914_v0, 5 }
 0x388   : > { %v4504_v1 = vrot.slane %v4419_v15, 5  ;;  %v4920_v57 = vshll.u32 %v4419_v15, 16  ;;  %v5248_v36 = vrot.slane %v4910_v6, 6  ;;  %v5252_v49 = vshrl.u32 %v4419_v15, 16 }
 0x389   : > { %v4917_v59 = vor.u32 %v4916_v46, %v4912_v14  ;;  %v4908_v37 = vrot.slane %v4907_v39, 4  ;;  %v5245_v13 = vor.u32 %v5244_v61, %v5243_v17  ;;  %v6187_v42 = vrot.slane %v4417_v19, 10 }
 0x38a   : > { %v4505_v58 = vsel %vm7312_vm5, %v4503_v51, %v4504_v1  ;;  %v4922_v45 = vrot.slane %v4920_v57, 5  ;;  %v5249_v40 = vor.u32 %v5248_v36, %v5247_v16  ;;  %v5254_v43 = vrot.slane %v5252_v49, 5 }
 0x38b   : > { %v4918_v55 = vrot.slane %v4917_v59, 4  ;;  %v6163_v54 = vcombine.low %v4502_v60, %v4505_v58  ;;  %v4913_v62 = vsel %vm6694_vm2, %v4908_v37, %v4912_v14  ;;  %v5246_v56 = vrot.slane %v5245_v13, 4  ;;  %v13162_v14 = vld [vmem:[#allocation74_spill] sm:$0xff]  ;;  %v13166_v37 = vld [vmem:[#allocation56_spill] sm:$0xff] }
 0x38c   : > { %v5014_v26 = vmax.bf16 %v4913_v62, %v4417_v19  ;;  %v5251_v8 = vrot.slane %v5249_v40, 4  ;;  %v5255_v33 = vrot.slane %v4920_v57, 6  ;;  %v5401_v11 = vrot.slane %v4418_v21, 6  ;;  %v13165_v57 = vld [vmem:[#allocation59_spill] sm:$0xff] }
 0x38d   : > { %v4923_v29 = vsel %vm6694_vm2, %v4918_v55, %v4922_v45  ;;  %6346 = vmatmul.mubr.msk.bf16.gmra.mxu0 %vm2707_vm12, %v6163_v54  ;;  %v5250_v48 = vsel %vm7539_vm8, %v5246_v56, %v5249_v40  ;;  %v5404_v23 = vrot.slane %v4419_v15, 6  ;;  %v5477_v32 = vmax.bf16 %v11223_v31, %v11185_v27  ;;  %v13169_v54 = vld [vmem:[#allocation53_spill] sm:$0xff] }
 0x38e   : > { %v5015_v7 = vmax.bf16 %v4923_v29, %v4418_v21  ;;  %v5102_v28 = vmax.bf16 %v5014_v26, %v4502_v60  ;;  %v5256_v47 = vor.u32 %v5255_v33, %v5254_v43  ;;  %v5492_v24 = vmax.bf16 %v5476_v22, %v11370_v34  ;;  %v13170_v26 = vld [vmem:[#allocation35_spill] sm:$0xff] }
 0x38f   : > { %v5402_v19 = vsel %vm7964_vm11, %v6187_v42, %v5401_v11  ;;  %v5403_v50 = vrot.slane %v5401_v11, 4  ;;  %v5478_v63 = vmax.bf16 %v11370_v34, %v11217_v25  ;;  %v5493_v0 = vmax.bf16 %v5477_v32, %v11376_v30 }
 0x390   : > { %v5103_v53 = vmax.bf16 %v5015_v7, %v4505_v58  ;;  %v5257_v6 = vsel %vm7539_vm8, %v5251_v8, %v5256_v47  ;;  %v5330_v21 = vmax.bf16 %v5250_v48, %v5102_v28  ;;  %v5508_v60 = vmax.bf16 %v5492_v24, %v11415_v9 }
 0x391   : > { %v5405_v27 = vsel %vm7964_vm11, %v5403_v50, %v5404_v23  ;;  %v5479_v22 = vmax.bf16 %v11376_v30, %v11223_v31  ;;  %v5494_v18 = vmax.bf16 %v5478_v63, %v11415_v9  ;;  %v5509_v25 = vmax.bf16 %v5493_v0, %v11420_v52 }
 0x392   : > { %v5331_v51 = vmax.bf16 %v5257_v6, %v5103_v53  ;;  %v11528_v10 = vmax.bf16 %v5402_v19, %v5330_v21  ;;  %v5524_v15 = vmax.bf16 %v5508_v60, %v11492_v12  ;;  %v13163_v46 = vshrl.u32 %v13162_v14, 16 }
 0x393   : > { %v5495_v61 = vmax.bf16 %v5479_v22, %v11420_v52  ;;  %v5510_v16 = vmax.bf16 %v5494_v18, %v11492_v12  ;;  %v13164_v1 = vrot.slane %v13162_v14, 5  ;;  %v5525_v59 = vmax.bf16 %v5509_v25, %v11500_v35 }
 0x394   : > { %v3418_v39 = vrot.slane %v13163_v46, 4  ;;  %v11534_v17 = vmax.bf16 %v5405_v27, %v5331_v51  ;;  %v4003_v13 = vrot.slane %v13166_v37, 4  ;;  %v13167_v49 = vrot.slane %v13162_v14, 6 }
 0x395   : > { %v3689_v31 = vrot.slane %v13164_v1, 4  ;;  %v5511_v58 = vmax.bf16 %v5495_v61, %v11500_v35  ;;  %v5526_v55 = vmax.bf16 %v5510_v16, %v11528_v10  ;;  %v13168_v45 = vmax.bf16 %v10972_v4, %v13078_v44 }
 0x396   : > { %v3419_v36 = vor.u32 %v3418_v39, %v13165_v57  ;;  %v4177_v42 = vrot.slane %v13167_v49, 4  ;;  %v4925_v62 = vshrl.u32 %v13169_v54, 16  ;;  %v6198_v56 = vcombine.low %v5524_v15, %v5525_v59 }
 0x397   : > { %v4350_v40 = vmax.bf16 %v13168_v45, %v11455_v38  ;;  %v4928_v29 = vshll.u32 %v13169_v54, 16  ;;  %v4934_v8 = vshll.u32 %v13170_v26, 16  ;;  %v5527_v33 = vmax.bf16 %v5511_v58, %v11534_v17  ;;  %v13171_v45 = vld [vmem:[#allocation72_spill] sm:$0xff] }
 0x398   : > { %v3420_v43 = vrot.slane %v3419_v36, 4  ;;  %v4927_v48 = vrot.slane %v4925_v62, 4  ;;  %v4938_v11 = vshrl.u32 %v13170_v26, 16  ;;  %6361 = vmatprep.mubr.msk.bf16.mxu1 %vm2707_vm12, %v6198_v56  ;;  %v6176_v47 = vrot.slane %v13169_v54, 9  ;;  %v13174_v56 = vld [vmem:[#allocation49_spill] sm:$0xff] }
 0x399   : > { %v4386_v7 = vmax.bf16 %v4350_v40, %v11495_v2  ;;  %v4930_v23 = vrot.slane %v4928_v29, 5  ;;  %v4936_v28 = vrot.slane %v4934_v8, 5  ;;  %v6199_v32 = vcombine.low %v5526_v55, %v5527_v33 }
 0x39a   : > { %v3542_v44 = vmax.bf16 %v3420_v43, %v13162_v14  ;;  %v4940_v24 = vrot.slane %v4938_v11, 4  ;;  %v5048_v53 = vrot.slane %v13170_v26, 5  ;;  %v5258_v19 = vrot.slane %v4925_v62, 5 }
 0x39b   : > { %v4931_v63 = vor.u32 %v4930_v23, %v4927_v48  ;;  %v5259_v6 = vrot.slane %v4928_v29, 6  ;;  %v5262_v21 = vrot.slane %v4938_v11, 5  ;;  %6362 = vmatmul.mubr.msk.bf16.gmra.mxu1 %vm2707_vm12, %v6199_v32  ;;  %v5263_v27 = vrot.slane %v4934_v8, 6  ;;  %v13175_v23 = vld [vmem:[#allocation19_spill] sm:$0xff] }
 0x39c   : > { %v3790_v50 = vmax.bf16 %v3689_v31, %v3542_v44  ;;  %v4941_v0 = vor.u32 %v4940_v24, %v4936_v28  ;;  %v5049_v60 = vsel %vm7312_vm5, %v6176_v47, %v5048_v53  ;;  %v5050_v51 = vrot.slane %v5048_v53, 4 }
 0x39d   : > { %v4932_v18 = vrot.slane %v4931_v63, 4  ;;  %v5260_v25 = vor.u32 %v5259_v6, %v5258_v19  ;;  %v6188_v15 = vrot.slane %v13169_v54, 10  ;;  %v5264_v46 = vor.u32 %v5263_v27, %v5262_v21 }
 0x39e   : > { %v4110_v22 = vmax.bf16 %v4003_v13, %v3790_v50  ;;  %v4942_v14 = vrot.slane %v4941_v0, 4  ;;  %v5408_v39 = vrot.slane %v13170_v26, 6  ;;  %v5480_v61 = vmax.bf16 %v11415_v9, %v11370_v34 }
 0x39f   : > { %v4937_v1 = vsel %vm6694_vm2, %v4932_v18, %v4936_v28  ;;  %v5261_v31 = vrot.slane %v5260_v25, 4  ;;  %v5481_v59 = vmax.bf16 %v11420_v52, %v11376_v30  ;;  %v5266_v36 = vrot.slane %v5264_v46, 4 }
 0x3a0   : > { %v11568_v16 = vmax.bf16 %v4177_v42, %v4110_v22  ;;  %v5016_v57 = vmax.bf16 %v4937_v1, %v13169_v54  ;;  %v5409_v37 = vsel %vm7964_vm11, %v6188_v15, %v5408_v39  ;;  %v5410_v13 = vrot.slane %v5408_v39, 4  ;;  %v13177_v22 = vld [vmem:[#allocation71_spill] sm:$0xff]  ;;  %v13178_v1 = vld [vmem:[#allocation37_spill] sm:$0xff] }
 0x3a1   : > { %v5265_v34 = vsel %vm7539_vm8, %v5261_v31, %v5264_v46  ;;  %v5496_v42 = vmax.bf16 %v5480_v61, %v11492_v12  ;;  %v5497_v58 = vmax.bf16 %v5481_v59, %v11500_v35  ;;  %v13172_v40 = vshrl.u32 %v13171_v45, 16 }
 0x3a2   : > { %v4422_v49 = vmax.bf16 %v4386_v7, %v11568_v16  ;;  %v5104_v55 = vmax.bf16 %v5049_v60, %v5016_v57  ;;  %v13173_v54 = vrot.slane %v13171_v45, 5  ;;  %v4017_v43 = vrot.slane %v13174_v56, 4 }
 0x3a3   : > { %v3447_v30 = vrot.slane %v13172_v40, 4  ;;  %v5512_v11 = vmax.bf16 %v5496_v42, %v11528_v10  ;;  %v5513_v44 = vmax.bf16 %v5497_v58, %v11534_v17  ;;  %v13176_v6 = vrot.slane %v13171_v45, 6 }
 0x3a4   : > { %v3697_v62 = vrot.slane %v13173_v54, 4  ;;  %v4944_v29 = vshll.u32 %v4422_v49, 16  ;;  %v5051_v8 = vrot.slane %v4422_v49, 5  ;;  %v5267_v33 = vshrl.u32 %v4422_v49, 16 }
 0x3a5   : > { %v5411_v7 = vrot.slane %v4422_v49, 6  ;;  %v5332_v48 = vmax.bf16 %v5265_v34, %v5104_v55  ;;  %v3448_v28 = vor.u32 %v3447_v30, %v13175_v23  ;;  %v4185_v21 = vrot.slane %v13176_v6, 4 }
 0x3a6   : > { %v4946_v47 = vrot.slane %v4944_v29, 5  ;;  %v5052_v32 = vsel %vm7312_vm5, %v5050_v51, %v5051_v8  ;;  %v5269_v24 = vrot.slane %v5267_v33, 5  ;;  %v5270_v53 = vrot.slane %v4944_v29, 6 }
 0x3a7   : > { %v5412_v19 = vsel %vm7964_vm11, %v5410_v13, %v5411_v7  ;;  %v11594_v50 = vmax.bf16 %v5409_v37, %v5332_v48  ;;  %v3449_v63 = vrot.slane %v3448_v28, 4  ;;  %v4317_v27 = vmax.bf16 %v11455_v38, %v10972_v4 }
 0x3a8   : > { %v4947_v0 = vsel %vm6694_vm2, %v4942_v14, %v4946_v47  ;;  %v5271_v60 = vor.u32 %v5270_v53, %v5269_v24  ;;  %v4949_v51 = vshrl.u32 %v13177_v22, 16  ;;  %v4952_v46 = vshll.u32 %v13177_v22, 16 }
 0x3a9   : > { %v5017_v18 = vmax.bf16 %v4947_v0, %v13170_v26  ;;  %v5528_v25 = vmax.bf16 %v5512_v11, %v11594_v50  ;;  %v3545_v15 = vmax.bf16 %v3449_v63, %v13171_v45  ;;  %v4353_v61 = vmax.bf16 %v4317_v27, %v11495_v2 }
 0x3aa   : > { %v5272_v39 = vsel %vm7539_vm8, %v5266_v36, %v5271_v60  ;;  %v4951_v14 = vrot.slane %v4949_v51, 4  ;;  %v4958_v31 = vshll.u32 %v13178_v1, 16  ;;  %v4954_v38 = vrot.slane %v4952_v46, 5 }
 0x3ab   : > { %v5105_v59 = vmax.bf16 %v5052_v32, %v5017_v18  ;;  %v3793_v4 = vmax.bf16 %v3697_v62, %v3545_v15  ;;  %v4962_v57 = vshrl.u32 %v13178_v1, 16  ;;  %v4389_v26 = vmax.bf16 %v4353_v61, %v11568_v16 }
 0x3ac   : > { %v4960_v37 = vrot.slane %v4958_v31, 5  ;;  %v6177_v13 = vrot.slane %v13177_v22, 9  ;;  %v5055_v49 = vrot.slane %v13178_v1, 5  ;;  %v4955_v36 = vor.u32 %v4954_v38, %v4951_v14 }
 0x3ad   : > { %v5333_v34 = vmax.bf16 %v5272_v39, %v5105_v59  ;;  %v4113_v42 = vmax.bf16 %v4017_v43, %v3793_v4  ;;  %v4964_v58 = vrot.slane %v4962_v57, 4  ;;  %v5273_v45 = vrot.slane %v4949_v51, 5 }
 0x3ae   : > { %v5056_v2 = vsel %vm7312_vm5, %v6177_v13, %v5055_v49  ;;  %v5057_v55 = vrot.slane %v5055_v49, 4  ;;  %v5274_v40 = vrot.slane %v4952_v46, 6  ;;  %v4956_v62 = vrot.slane %v4955_v36, 4  ;;  %v2766_v13 = vpop.f32.mrf.mxu0 }
 0x3af   : > { %v5465_v30 = vmax.bf16 %v5412_v19, %v5333_v34  ;;  %v4281_v54 = vmax.bf16 %v4185_v21, %v4113_v42  ;;  %v4965_v56 = vor.u32 %v4964_v58, %v4960_v37  ;;  %v5277_v29 = vrot.slane %v4962_v57, 5 }
 0x3b0   : > { %v5275_v16 = vor.u32 %v5274_v40, %v5273_v45  ;;  %v5278_v8 = vrot.slane %v4958_v31, 6  ;;  %v6189_v33 = vrot.slane %v13177_v22, 10  ;;  %v4961_v43 = vsel %vm6694_vm2, %v4956_v62, %v4960_v37  ;;  %v6296_v49 = vpop.f32.mrf.mxu0 }
 0x3b1   : > { %v5529_v7 = vmax.bf16 %v5513_v44, %v5465_v30  ;;  %v4425_v48 = vmax.bf16 %v4389_v26, %v4281_v54  ;;  %v4966_v11 = vrot.slane %v4965_v56, 4  ;;  %v5018_v23 = vmax.bf16 %v4961_v43, %v13177_v22 }
 0x3b2   : > { %v5276_v28 = vrot.slane %v5275_v16, 4  ;;  %v5279_v47 = vor.u32 %v5278_v8, %v5277_v29  ;;  %v5415_v32 = vrot.slane %v13178_v1, 6  ;;  %v5482_v46 = vmax.bf16 %v11492_v12, %v11415_v9  ;;  %v2769_v34 = vpop.f32.mrf.mxu0 }
 0x3b3   : > { %v6200_v24 = vcombine.low %v5528_v25, %v5529_v7  ;;  %v4968_v53 = vshll.u32 %v4425_v48, 16  ;;  %v5058_v19 = vrot.slane %v4425_v48, 5  ;;  %v5282_v63 = vshrl.u32 %v4425_v48, 16 }
 0x3b4   : > { %v5106_v6 = vmax.bf16 %v5056_v2, %v5018_v23  ;;  %v5280_v21 = vsel %vm7539_vm8, %v5276_v28, %v5279_v47  ;;  %v5281_v44 = vrot.slane %v5279_v47, 4  ;;  %v5416_v0 = vsel %vm7964_vm11, %v6189_v33, %v5415_v32  ;;  %v11644_v42 = vpop.f32.mrf.mxu0 }
 0x3b5   : > { %6365 = vmatprep.mubr.msk.bf16.mxu1 %vm2707_vm12, %v6200_v24  ;;  %v4970_v60 = vrot.slane %v4968_v53, 5  ;;  %v5059_v27 = vsel %vm7312_vm5, %v5057_v55, %v5058_v19  ;;  %v5284_v22 = vrot.slane %v5282_v63, 5  ;;  %v5285_v51 = vrot.slane %v4968_v53, 6 }
 0x3b6   : > { %v5334_v18 = vmax.bf16 %v5280_v21, %v5106_v6  ;;  %v5417_v25 = vrot.slane %v5415_v32, 4  ;;  %v5418_v15 = vrot.slane %v4425_v48, 6  ;;  %v5483_v14 = vmax.bf16 %v11500_v35, %v11420_v52  ;;  %v11646_v36 = vpop.f32.mrf.mxu0 }
 0x3b7   : > { %v4971_v39 = vsel %vm6694_vm2, %v4966_v11, %v4970_v60  ;;  %v5286_v61 = vor.u32 %v5285_v51, %v5284_v22  ;;  %v5498_v4 = vmax.bf16 %v5482_v46, %v11528_v10  ;;  %v6315_v10 = vpop.f32.mrf.mxu1  ;;  %v11695_v60 = vld [vmem:[%s11817_s2] ss:$0 sm:$0xff] }
 0x3b8   : > { %v5019_v31 = vmax.bf16 %v4971_v39, %v13178_v1  ;;  %v5419_v20 = vsel %vm7964_vm11, %v5417_v25, %v5418_v15  ;;  %v5466_v59 = vmax.bf16 %v5416_v0, %v5334_v18  ;;  %v5499_v9 = vmax.bf16 %v5483_v14, %v11534_v17  ;;  %v11648_v58 = vpop.f32.mrf.mxu0 }
 0x3b9   : > { %v5287_v38 = vsel %vm7539_vm8, %v5281_v44, %v5286_v61  ;;  %v5514_v5 = vmax.bf16 %v5498_v4, %v11594_v50  ;;  %v2923_v3 = vpop.f32.mrf.mxu1  ;;  %v2932_v19 = vadd.f32 %v6315_v10, %v6295_v41 }
 0x3ba   : > { %v5107_v12 = vmax.bf16 %v5059_v27, %v5019_v31  ;;  %v5515_v57 = vmax.bf16 %v5499_v9, %v5465_v30  ;;  %v11652_v55 = vpop.f32.mrf.mxu0  ;;  %v2924_v21 = vadd.f32 %v2923_v3, %v2766_v13 }
 0x3bb   : > { %v5530_v37 = vmax.bf16 %v5514_v5, %v5466_v59  ;;  %v6316_v17 = vpop.f32.mrf.mxu1 }
 0x3bc   : > { %v5335_v26 = vmax.bf16 %v5287_v38, %v5107_v12  ;;  %v11656_v40 = vpop.f32.mrf.mxu0  ;;  %v2935_v27 = vadd.f32 %v6316_v17, %v6296_v49 }
 0x3bd   : > { %v2926_v50 = vpop.f32.mrf.mxu1 }
 0x3be   : > { %v5467_v52 = vmax.bf16 %v5419_v20, %v5335_v26  ;;  %v11660_v54 = vpop.f32.mrf.mxu0  ;;  %v2927_v15 = vadd.f32 %v2926_v50, %v2769_v34 }
 0x3bf   : > { %v11650_v2 = vpop.f32.mrf.mxu1 }
 0x3c0   : > { %v5531_v35 = vmax.bf16 %v5515_v57, %v5467_v52  ;;  %v11664_v56 = vpop.f32.mrf.mxu0 }
 0x3c1   : > { %v11654_v45 = vpop.f32.mrf.mxu1 }
 0x3c2   : > { %v6201_v1 = vcombine.low %v5530_v37, %v5531_v35  ;;  %v11668_v29 = vpop.f32.mrf.mxu0 }
 0x3c3   : > { %v11658_v30 = vpop.f32.mrf.mxu1 }
 0x3c4   : > { %6366 = vmatmul.mubr.msk.bf16.gmra.mxu1 %vm2707_vm12, %v6201_v1  ;;  %v11672_v33 = vpop.f32.mrf.mxu0 }
 0x3c5   : > { %v11662_v62 = vpop.f32.mrf.mxu1 }
 0x3c6   : > { %v11676_v48 = vpop.f32.mrf.mxu0 }
 0x3c7   : > { %v11666_v16 = vpop.f32.mrf.mxu1 }
 0x3c8   : > { %v11680_v11 = vpop.f32.mrf.mxu0 }
 0x3c9   : > { %v11670_v8 = vpop.f32.mrf.mxu1 }
 0x3ca   : > { %v11684_v28 = vpop.f32.mrf.mxu0 }
 0x3cb   : > { %v11674_v7 = vpop.f32.mrf.mxu1 }
 0x3cc   : > { %v6335_v32 = vpop.f32.mrf.mxu0 }
 0x3cd   : > { %v11678_v43 = vpop.f32.mrf.mxu1  ;;  %v4670_v44 = vadd.f32 %v6335_v32, %v2932_v19  ;;  %v2948_v32 = vadd.f32 %v11650_v2, %v11644_v42 }
 0x3ce   : > { %v4605_v53 = vpop.f32.mrf.mxu0 }
 0x3cf   : > { %v11682_v23 = vpop.f32.mrf.mxu1  ;;  %v4668_v22 = vadd.f32 %v4605_v53, %v2924_v21  ;;  %v2940_v21 = vadd.f32 %v11654_v45, %v11646_v36 }
 0x3d0   : > { %v6336_v6 = vpop.f32.mrf.mxu0 }
 0x3d1   : > { %v11686_v47 = vpop.f32.mrf.mxu1  ;;  %v4671_v46 = vadd.f32 %v6336_v6, %v2935_v27 }
 0x3d2   : > { %v4608_v18 = vpop.f32.mrf.mxu0 }
 0x3d3   : > { %v11688_v24 = vpop.f32.mrf.mxu1  ;;  %v4669_v31 = vadd.f32 %v4608_v18, %v2927_v15 }
 0x3d5   : > { %v11690_v63 = vpop.f32.mrf.mxu1 }
 0x3e3   : > { %v6339_v13 = vpop.f32.mrf.mxu0 }
 0x3e5   : > { %v4621_v3 = vpop.f32.mrf.mxu0 }
 0x3e7   : > { %v6340_v6 = vpop.f32.mrf.mxu0 }
 0x3e9   : > { %v4624_v42 = vpop.f32.mrf.mxu0 }
 0x413   : > { %v6355_v0 = vpop.f32.mrf.mxu1 }
 0x414   : > { %v5712_v51 = vadd.f32 %v6355_v0, %v4670_v44  ;;  %v4674_v44 = vadd.f32 %v6339_v13, %v2948_v32 }
 0x415   : > { %v5647_v25 = vpop.f32.mrf.mxu1 }
 0x416   : > { %v11698_v39 = vadd.f32 %v11695_v60, %v5712_v51  ;;  %v5710_v61 = vadd.f32 %v5647_v25, %v4668_v22  ;;  %v2951_v22 = vadd.f32 %v11658_v30, %v11648_v58  ;;  %v4672_v51 = vadd.f32 %v4621_v3, %v2940_v21 }
 0x417   : > { %v6356_v14 = vpop.f32.mrf.mxu1  ;;  %v2943_v25 = vadd.f32 %v11662_v62, %v11652_v55 }
 0x418   : > { %v5751_v20 = vsub.f32 0.0, %v11698_v39  ;;  %v11702_v59 = vadd.f32 %v11695_v60, %v5710_v61  ;;  %v5713_v4 = vadd.f32 %v6356_v14, %v4671_v46  ;;  %v4675_v15 = vadd.f32 %v6340_v6, %v2951_v22 }
 0x419   : > { %v5650_v38 = vpop.f32.mrf.mxu1  ;;  %v4673_v61 = vadd.f32 %v4624_v42, %v2943_v25  ;;  %v2964_v22 = vadd.f32 %v11666_v16, %v11656_v40 }
 0x41a   : > { %v5769_v9 = vmul.f32 1.442695, %v5751_v20  ;;  %v5749_v12 = vsub.f32 0.0, %v11702_v59  ;;  %v11706_v5 = vadd.f32 %v11695_v60, %v5713_v4  ;;  %v5711_v57 = vadd.f32 %v5650_v38, %v4669_v31 }
 0x41c   : > { %6418 = vpow2.f32 %v5769_v9  ;;  %v5765_v26 = vmul.f32 1.442695, %v5749_v12  ;;  %v5752_v37 = vsub.f32 0.0, %v11706_v5  ;;  %v11710_v52 = vadd.f32 %v11695_v60, %v5711_v57 }
 0x41e   : > { %6420 = vpow2.f32 %v5765_v26  ;;  %v5771_v35 = vmul.f32 1.442695, %v5752_v37  ;;  %v5750_v1 = vsub.f32 0.0, %v11710_v52 }
 0x420   : > { %6422 = vpow2.f32 %v5771_v35  ;;  %v5767_v41 = vmul.f32 1.442695, %v5750_v1 }
 0x422   : > { %6424 = vpow2.f32 %v5767_v41 }
 0x429   : > { %v6419_v49 = vpop.eup %6418 }
 0x42a   : > { %v5799_v10 = vadd.f32 1.0, %v6419_v49 }
 0x42b   : > { %v6421_v34 = vpop.eup %6420 }
 0x42c   : > { %6426 = vrcp.f32 %v5799_v10  ;;  %v5797_v17 = vadd.f32 1.0, %v6421_v34 }
 0x42d   : > { %v6423_v50 = vpop.eup %6422 }
 0x42e   : > { %6428 = vrcp.f32 %v5797_v17  ;;  %v5800_v53 = vadd.f32 1.0, %v6423_v50 }
 0x42f   : > { %v6425_v19 = vpop.eup %6424 }
 0x430   : > { %6430 = vrcp.f32 %v5800_v53  ;;  %v5798_v0 = vadd.f32 1.0, %v6425_v19 }
 0x431   : > { %v6359_v27 = vpop.f32.mrf.mxu1 }
 0x432   : > { %6432 = vrcp.f32 %v5798_v0  ;;  %v5716_v18 = vadd.f32 %v6359_v27, %v4674_v44  ;;  %v6343_v0 = vpop.f32.mrf.mxu0 }
 0x433   : > { %v5663_v2 = vpop.f32.mrf.mxu1  ;;  %v4678_v42 = vadd.f32 %v6343_v0, %v2964_v22  ;;  %v2980_v0 = vadd.f32 %v11682_v23, %v11672_v33 }
 0x434   : > { %v5739_v36 = vadd.f32 %v11695_v60, %v5716_v18  ;;  %v5714_v45 = vadd.f32 %v5663_v2, %v4672_v51  ;;  %v2956_v18 = vadd.f32 %v11670_v8, %v11660_v54 }
 0x435   : > { %v6360_v46 = vpop.f32.mrf.mxu1 }
 0x436   : > { %v5755_v14 = vsub.f32 0.0, %v5739_v36  ;;  %v5737_v31 = vadd.f32 %v11695_v60, %v5714_v45  ;;  %v5717_v58 = vadd.f32 %v6360_v46, %v4675_v15  ;;  %v2967_v46 = vadd.f32 %v11674_v7, %v11664_v56 }
 0x437   : > { %v5666_v30 = vpop.f32.mrf.mxu1 }
 0x438   : > { %v5777_v20 = vmul.f32 1.442695, %v5755_v14  ;;  %v5753_v4 = vsub.f32 0.0, %v5737_v31  ;;  %v11726_v38 = vadd.f32 %v11695_v60, %v5717_v58  ;;  %v5715_v9 = vadd.f32 %v5666_v30, %v4673_v61 }
 0x439   : > { %v6427_v55 = vpop.eup %6426 }
 0x43a   : > { %v5831_v62 = vmul.f32 %v6427_v55, %v11698_v39  ;;  %6434 = vpow2.f32 %v5777_v20  ;;  %v5773_v12 = vmul.f32 1.442695, %v5753_v4  ;;  %v5756_v57 = vsub.f32 0.0, %v11726_v38 }
 0x43b   : > { %v6429_v26 = vpop.eup %6428  ;;  %v11736_v37 = vadd.f32 %v11695_v60, %v5715_v9 }
 0x43c   : > { %v6235_v35 = vpack.c.bf16 %v5831_v62, %v5831_v62  ;;  %v5829_v39 = vmul.f32 %v6429_v26, %v11702_v59  ;;  %6436 = vpow2.f32 %v5773_v12  ;;  %v5779_v1 = vmul.f32 1.442695, %v5756_v57 }
 0x43d   : > { %v6431_v41 = vpop.eup %6430  ;;  %v5754_v13 = vsub.f32 0.0, %v11736_v37 }
 0x43e   : > { %5912 = vst.msk [vmem:[%s11733_s27 + $0x8] sm:$0xf] %vm5909_vm0, %v6235_v35  ;;  %v6233_v49 = vpack.c.bf16 %v5829_v39, %v5829_v39  ;;  %v5832_v10 = vmul.f32 %v6431_v41, %v11706_v5  ;;  %6438 = vpow2.f32 %v5779_v1 }
 0x43f   : > { %v6433_v34 = vpop.eup %6432  ;;  %v5775_v3 = vmul.f32 1.442695, %v5754_v13 }
 0x440   : > { %5910 = vst.msk [vmem:[%s11733_s27] sm:$0xf] %vm5909_vm0, %v6233_v49  ;;  %v6236_v17 = vpack.c.bf16 %v5832_v10, %v5832_v10  ;;  %v5830_v50 = vmul.f32 %v6433_v34, %v11710_v52  ;;  %v4637_v52 = vpop.f32.mrf.mxu0 }
 0x441   : > { %6440 = vpow2.f32 %v5775_v3  ;;  %v4676_v61 = vadd.f32 %v4637_v52, %v2956_v18  ;;  %v2972_v52 = vadd.f32 %v11686_v47, %v11676_v48 }
 0x442   : > { %5913 = vst.msk [vmem:[%s11733_s27 + $0xc] sm:$0xf] %vm5909_vm0, %v6236_v17  ;;  %v6234_v59 = vpack.c.bf16 %v5830_v50, %v5830_v50  ;;  %v6344_v2 = vpop.f32.mrf.mxu0 }
 0x443   : > { %v4679_v16 = vadd.f32 %v6344_v2, %v2967_v46 }
 0x444   : > { %5911 = vst.msk [vmem:[%s11733_s27 + $0x4] sm:$0xf] %vm5909_vm0, %v6234_v59  ;;  %v4640_v4 = vpop.f32.mrf.mxu0 }
 0x447   : > { %v6435_v32 = vpop.eup %6434 }
 0x448   : > { %v5803_v53 = vadd.f32 1.0, %v6435_v32 }
 0x449   : > { %v6437_v19 = vpop.eup %6436 }
 0x44a   : > { %6442 = vrcp.f32 %v5803_v53  ;;  %v5801_v6 = vadd.f32 1.0, %v6437_v19 }
 0x44b   : > { %v6439_v5 = vpop.eup %6438 }
 0x44c   : > { %6444 = vrcp.f32 %v5801_v6  ;;  %v5804_v21 = vadd.f32 1.0, %v6439_v5 }
 0x44d   : > { %v6347_v5 = vpop.f32.mrf.mxu0 }
 0x44e   : > { %v6441_v44 = vpop.eup %6440  ;;  %6446 = vrcp.f32 %v5804_v21  ;;  %v4682_v22 = vadd.f32 %v6347_v5, %v2980_v0 }
 0x44f   : > { %v5802_v27 = vadd.f32 1.0, %v6441_v44  ;;  %v4653_v44 = vpop.f32.mrf.mxu0 }
 0x451   : > { %6448 = vrcp.f32 %v5802_v27 }
 0x457   : > { %v6443_v51 = vpop.eup %6442 }
 0x458   : > { %v5835_v25 = vmul.f32 %v6443_v51, %v5739_v36  ;;  %v2959_v36 = vadd.f32 %v11678_v43, %v11668_v29  ;;  %v6348_v51 = vpop.f32.mrf.mxu0 }
 0x459   : > { %v6445_v45 = vpop.eup %6444 }
 0x45a   : > { %v6239_v58 = vpack.c.bf16 %v5835_v25, %v5835_v25  ;;  %v5833_v30 = vmul.f32 %v6445_v45, %v5737_v31  ;;  %v4677_v57 = vadd.f32 %v4640_v4, %v2959_v36  ;;  %v2983_v25 = vadd.f32 %v11688_v24, %v11680_v11 }
 0x45b   : > { %v6363_v15 = vpop.f32.mrf.mxu1  ;;  %v6447_v40 = vpop.eup %6446 }
 0x45c   : > { %v5720_v14 = vadd.f32 %v6363_v15, %v4678_v42  ;;  %5916 = vst.msk [vmem:[%s11733_s27 + $0x18] sm:$0xf] %vm5909_vm0, %v6239_v58  ;;  %v6237_v9 = vpack.c.bf16 %v5833_v30, %v5833_v30  ;;  %v5836_v56 = vmul.f32 %v6447_v40, %v11726_v38  ;;  %v4680_v15 = vadd.f32 %v4653_v44, %v2972_v52  ;;  %v4656_v58 = vpop.f32.mrf.mxu0 }
 0x45d   : > { %v5679_v20 = vpop.f32.mrf.mxu1  ;;  %v4683_v23 = vadd.f32 %v6348_v51, %v2983_v25  ;;  %v2975_v30 = vadd.f32 %v11690_v63, %v11684_v28 }
 0x45e   : > { %v5743_v54 = vadd.f32 %v11695_v60, %v5720_v14  ;;  %v5718_v8 = vadd.f32 %v5679_v20, %v4676_v61  ;;  %v6449_v12 = vpop.eup %6448  ;;  %5914 = vst.msk [vmem:[%s11733_s27 + $0x10] sm:$0xf] %vm5909_vm0, %v6237_v9  ;;  %v6240_v26 = vpack.c.bf16 %v5836_v56, %v5836_v56 }
 0x45f   : > { %v6364_v7 = vpop.f32.mrf.mxu1  ;;  %v5834_v29 = vmul.f32 %v6449_v12, %v11736_v37 }
 0x460   : > { %v5759_v55 = vsub.f32 0.0, %v5743_v54  ;;  %v5741_v31 = vadd.f32 %v11695_v60, %v5718_v8  ;;  %v5721_v62 = vadd.f32 %v6364_v7, %v4679_v16  ;;  %5917 = vst.msk [vmem:[%s11733_s27 + $0x1c] sm:$0xf] %vm5909_vm0, %v6240_v26  ;;  %v4681_v8 = vadd.f32 %v4656_v58, %v2975_v30 }
 0x461   : > { %v5682_v35 = vpop.f32.mrf.mxu1  ;;  %v6238_v41 = vpack.c.bf16 %v5834_v29, %v5834_v29 }
 0x462   : > { %v5785_v43 = vmul.f32 1.442695, %v5759_v55  ;;  %v5757_v39 = vsub.f32 0.0, %v5741_v31  ;;  %v5744_v1 = vadd.f32 %v11695_v60, %v5721_v62  ;;  %v5719_v38 = vadd.f32 %v5682_v35, %v4677_v57 }
 0x463   : > { %5915 = vst.msk [vmem:[%s11733_s27 + $0x14] sm:$0xf] %vm5909_vm0, %v6238_v41 }
 0x464   : > { %6450 = vpow2.f32 %v5785_v43  ;;  %v5781_v13 = vmul.f32 1.442695, %v5757_v39  ;;  %v5760_v49 = vsub.f32 0.0, %v5744_v1  ;;  %v5742_v10 = vadd.f32 %v11695_v60, %v5719_v38 }
 0x466   : > { %6452 = vpow2.f32 %v5781_v13  ;;  %v5787_v34 = vmul.f32 1.442695, %v5760_v49  ;;  %v5758_v3 = vsub.f32 0.0, %v5742_v10 }
 0x468   : > { %6454 = vpow2.f32 %v5787_v34  ;;  %v5783_v37 = vmul.f32 1.442695, %v5758_v3 }
 0x46a   : > { %6456 = vpow2.f32 %v5783_v37 }
 0x471   : > { %v6451_v17 = vpop.eup %6450 }
 0x472   : > { %v5807_v50 = vadd.f32 1.0, %v6451_v17 }
 0x473   : > { %v6453_v59 = vpop.eup %6452 }
 0x474   : > { %6458 = vrcp.f32 %v5807_v50  ;;  %v5805_v32 = vadd.f32 1.0, %v6453_v59 }
 0x475   : > { %v6455_v53 = vpop.eup %6454 }
 0x476   : > { %6460 = vrcp.f32 %v5805_v32  ;;  %v5808_v19 = vadd.f32 1.0, %v6455_v53 }
 0x477   : > { %v6457_v6 = vpop.eup %6456 }
 0x478   : > { %6462 = vrcp.f32 %v5808_v19  ;;  %v5806_v21 = vadd.f32 1.0, %v6457_v6 }
 0x47a   : > { %6464 = vrcp.f32 %v5806_v21 }
 0x481   : > { %v6459_v27 = vpop.eup %6458 }
 0x482   : > { %v5839_v18 = vmul.f32 %v6459_v27, %v5743_v54 }
 0x483   : > { %v6461_v2 = vpop.eup %6460 }
 0x484   : > { %v6367_v42 = vpop.f32.mrf.mxu1  ;;  %v6243_v46 = vpack.c.bf16 %v5839_v18, %v5839_v18  ;;  %v5837_v61 = vmul.f32 %v6461_v2, %v5741_v31 }
 0x485   : > { %v5724_v45 = vadd.f32 %v6367_v42, %v4682_v22  ;;  %v6463_v33 = vpop.eup %6462 }
 0x486   : > { %v5695_v14 = vpop.f32.mrf.mxu1  ;;  %5920 = vst.msk [vmem:[%s11733_s27 + $0x28] sm:$0xf] %vm5909_vm0, %v6243_v46  ;;  %v6241_v20 = vpack.c.bf16 %v5837_v61, %v5837_v61  ;;  %v5840_v11 = vmul.f32 %v6463_v33, %v5744_v1 }
 0x487   : > { %v5747_v48 = vadd.f32 %v11695_v60, %v5724_v45  ;;  %v5722_v47 = vadd.f32 %v5695_v14, %v4680_v15  ;;  %v6465_v54 = vpop.eup %6464 }
 0x488   : > { %v6368_v24 = vpop.f32.mrf.mxu1  ;;  %5918 = vst.msk [vmem:[%s11733_s27 + $0x20] sm:$0xf] %vm5909_vm0, %v6241_v20  ;;  %v6244_v36 = vpack.c.bf16 %v5840_v11, %v5840_v11  ;;  %v5838_v56 = vmul.f32 %v6465_v54, %v5742_v10 }
 0x489   : > { %v5763_v40 = vsub.f32 0.0, %v5747_v48  ;;  %v5745_v16 = vadd.f32 %v11695_v60, %v5722_v47  ;;  %v5725_v4 = vadd.f32 %v6368_v24, %v4683_v23 }
 0x48a   : > { %v5698_v9 = vpop.f32.mrf.mxu1  ;;  %5921 = vst.msk [vmem:[%s11733_s27 + $0x2c] sm:$0xf] %vm5909_vm0, %v6244_v36  ;;  %v6242_v31 = vpack.c.bf16 %v5838_v56, %v5838_v56 }
 0x48b   : > { %v5793_v7 = vmul.f32 1.442695, %v5763_v40  ;;  %v5761_v28 = vsub.f32 0.0, %v5745_v16  ;;  %v5748_v63 = vadd.f32 %v11695_v60, %v5725_v4  ;;  %v5723_v55 = vadd.f32 %v5698_v9, %v4681_v8 }
 0x48c   : > { %5919 = vst.msk [vmem:[%s11733_s27 + $0x24] sm:$0xf] %vm5909_vm0, %v6242_v31 }
 0x48d   : > { %6466 = vpow2.f32 %v5793_v7  ;;  %v5789_v62 = vmul.f32 1.442695, %v5761_v28  ;;  %v5764_v12 = vsub.f32 0.0, %v5748_v63  ;;  %v5746_v57 = vadd.f32 %v11695_v60, %v5723_v55 }
 0x48f   : > { %6468 = vpow2.f32 %v5789_v62  ;;  %v5795_v26 = vmul.f32 1.442695, %v5764_v12  ;;  %v5762_v35 = vsub.f32 0.0, %v5746_v57 }
 0x491   : > { %6470 = vpow2.f32 %v5795_v26  ;;  %v5791_v29 = vmul.f32 1.442695, %v5762_v35 }
 0x493   : > { %6472 = vpow2.f32 %v5791_v29 }
 0x49a   : > { %v6467_v43 = vpop.eup %6466 }
 0x49b   : > { %v5811_v39 = vadd.f32 1.0, %v6467_v43 }
 0x49c   : > { %v6469_v1 = vpop.eup %6468 }
 0x49d   : > { %6474 = vrcp.f32 %v5811_v39  ;;  %v5809_v38 = vadd.f32 1.0, %v6469_v1 }
 0x49e   : > { %v6471_v41 = vpop.eup %6470 }
 0x49f   : > { %6476 = vrcp.f32 %v5809_v38  ;;  %v5812_v13 = vadd.f32 1.0, %v6471_v41 }
 0x4a0   : > { %v6473_v49 = vpop.eup %6472 }
 0x4a1   : > { %6478 = vrcp.f32 %v5812_v13  ;;  %v5810_v60 = vadd.f32 1.0, %v6473_v49 }
 0x4a3   : > { %6480 = vrcp.f32 %v5810_v60 }
 0x4aa   : > { %v6475_v10 = vpop.eup %6474 }
 0x4ab   : > { %v5843_v34 = vmul.f32 %v6475_v10, %v5747_v48 }
 0x4ac   : > { %v6477_v3 = vpop.eup %6476 }
 0x4ad   : > { %v6247_v37 = vpack.c.bf16 %v5843_v34, %v5843_v34  ;;  %v5841_v17 = vmul.f32 %v6477_v3, %v5745_v16 }
 0x4ae   : > { %v6479_v50 = vpop.eup %6478 }
 0x4af   : > { %5924 = vst.msk [vmem:[%s11733_s27 + $0x38] sm:$0xf] %vm5909_vm0, %v6247_v37  ;;  %v6245_v59 = vpack.c.bf16 %v5841_v17, %v5841_v17  ;;  %v5844_v32 = vmul.f32 %v6479_v50, %v5748_v63 }
 0x4b0   : > { %v6481_v53 = vpop.eup %6480 }
 0x4b1   : > { %5922 = vst.msk [vmem:[%s11733_s27 + $0x30] sm:$0xf] %vm5909_vm0, %v6245_v59  ;;  %v6248_v19 = vpack.c.bf16 %v5844_v32, %v5844_v32  ;;  %v5842_v6 = vmul.f32 %v6481_v53, %v5746_v57 }
 0x4b3   : > { %5925 = vst.msk [vmem:[%s11733_s27 + $0x3c] sm:$0xf] %vm5909_vm0, %v6248_v19  ;;  %v6246_v5 = vpack.c.bf16 %v5842_v6, %v5842_v6 }
 0x4b5   : > { %5923 = vst.msk [vmem:[%s11733_s27 + $0x34] sm:$0xf] %vm5909_vm0, %v6246_v5 }
 0x4b6 PF: > { %s13_s16 = sadd.s32 1, %s6563_s16   ;;  %s13179_s12 = smov %s6555_s14 }
 0x4b7   : > { %p10_p7 = scmp.ge.s32.totalorder %s13_s16, 6   ;;  %s13180_s13 = smov %s6559_s15 }
 0x4b8   : > { %s13181_s14 = smov %s13184_s17  ;;  %s13182_s15 = smov %s13188_s18 }
 0x4b9   :  { %12 = sbr.rel (!%p10_p7) target bundleno = 3 (0x3), region = 66 }

</bundles_post_ra>
